<compile_context>
chip_gen: v5e
topology: v5e:2x2
jax: 0.10.0
libtpu: 0.0.40
codegen_flags: <defaults>
</compile_context>

<pallas_src>
import functools
import numpy as np

import jax
import jax.numpy as jnp
from jax import lax
from jax.experimental import pallas as pl
from jax.experimental.pallas import tpu as pltpu


def _round_up(x, m):
    return (x + m - 1) // m * m


# ----------------------------------------------------------------------------
# B-cos conv hot path:
#   lin = conv(x) ; MaxOut(2) ; out *= (|out| / ||patch|| + 1e-6) ; out /= scale
#   (b = 2) ; optional fused ReLU.
# One bf16 matmul per (i, j, k) tile against the tile-interleaved [w0|w1]
# weight; f32 VMEM accumulator over the K grid axis; epilogue on the last K step.
# ----------------------------------------------------------------------------
def _bcos_kernel(x_ref, w_ref, inv_n_ref, o_ref, acc_ref, *,
                 tn, inv_scale, apply_relu):
    @pl.when(pl.program_id(2) == 0)
    def _():
        acc_ref[...] = jnp.zeros_like(acc_ref)

    acc_ref[...] += jnp.dot(x_ref[...], w_ref[...],
                            preferred_element_type=jnp.float32)

    @pl.when(pl.program_id(2) == pl.num_programs(2) - 1)
    def _():
        res = acc_ref[...]                              # (tm, 2*tn) f32
        out = jnp.maximum(res[:, :tn], res[:, tn:])     # fused MaxOut over pairs
        abs_cos = jnp.abs(out) * inv_n_ref[...] + 1e-6  # |out| / ||patch|| + eps
        out = out * abs_cos * inv_scale                 # b=2 -> out * |cos| / scale
        if apply_relu:
            out = jnp.maximum(out, 0.0)
        o_ref[...] = out.astype(o_ref.dtype)


def bcos_matmul(rows, inv_n, layer, apply_relu, tm=512):
    """rows: (M, K) f32 patch rows.  inv_n: (M, 1) f32 = rsqrt(||patch||^2+eps)."""
    M = rows.shape[0]
    tm = min(tm, _round_up(M, 16))                      # bf16 sublane packing = 16
    Mp = _round_up(M, tm)
    Kp, tk, Np, tn = layer.Kp, layer.tk, layer.Np, layer.tn

    x = jnp.pad(rows, ((0, Mp - M), (0, Kp - layer.K))).astype(jnp.bfloat16)
    inv_n_p = jnp.pad(inv_n, ((0, Mp - M), (0, 0)))

    kernel = functools.partial(_bcos_kernel, tn=tn,
                               inv_scale=layer.inv_scale, apply_relu=apply_relu)
    out = pl.pallas_call(
        kernel,
        out_shape=jax.ShapeDtypeStruct((Mp, Np), jnp.float32),
        grid=(Mp // tm, Np // tn, Kp // tk),
        in_specs=[
            pl.BlockSpec((tm, tk), lambda i, j, k: (i, k)),
            pl.BlockSpec((tk, 2 * tn), lambda i, j, k: (k, j)),
            pl.BlockSpec((tm, 1), lambda i, j, k: (i, 0)),
        ],
        out_specs=pl.BlockSpec((tm, tn), lambda i, j, k: (i, j)),
        scratch_shapes=[pltpu.VMEM((tm, 2 * tn), jnp.float32)],
        compiler_params=pltpu.CompilerParams(
            dimension_semantics=("parallel", "parallel", "arbitrary")),
    )(x, layer.w_cat, inv_n_p)
    return out[:M, :layer.N]


# ----------------------------------------------------------------------------
# Fused classifier: Bcos1x1(relu) -> Bcos1x1(relu) -> Bcos1x1 in one kernel.
# Dropout is eval-mode identity.  Intermediate activations never leave VMEM.
# ----------------------------------------------------------------------------
def _classifier_kernel(x_ref, inv_n_ref, w1_ref, w2_ref, w3_ref, o_ref, *,
                       n1, n2, n3, inv_s1, inv_s2, inv_s3):
    def bcos(inp_bf16, w_ref, inv_n, n, inv_s, relu):
        r = jnp.dot(inp_bf16, w_ref[...], preferred_element_type=jnp.float32)
        out = jnp.maximum(r[:, :n], r[:, n:])
        out = out * (jnp.abs(out) * inv_n + 1e-6) * inv_s
        if relu:
            out = jnp.maximum(out, 0.0)
        return out

    a1 = bcos(x_ref[...], w1_ref, inv_n_ref[...], n1, inv_s1, True)
    # TODO(synk): nn.Dropout modelled in eval mode (identity); training-mode
    # stochastic dropout is not implemented.
    inv_n2 = lax.rsqrt(jnp.sum(a1 * a1, axis=1, keepdims=True) + 1e-6)
    a2 = bcos(a1.astype(jnp.bfloat16), w2_ref, inv_n2, n2, inv_s2, True)
    inv_n3 = lax.rsqrt(jnp.sum(a2 * a2, axis=1, keepdims=True) + 1e-6)
    a3 = bcos(a2.astype(jnp.bfloat16), w3_ref, inv_n3, n3, inv_s3, False)
    o_ref[...] = a3


def classifier_fused(x_flat, c1, c2, c3):
    """x_flat: (B, K1) f32 flattened features -> (B, num_classes) f32."""
    B, K = x_flat.shape
    tm = _round_up(B, 16)
    xp = jnp.pad(x_flat, ((0, tm - B), (0, c1.Kp - K)))
    inv_n = lax.rsqrt(jnp.sum(xp * xp, axis=1, keepdims=True) + 1e-6)
    kernel = functools.partial(
        _classifier_kernel, n1=c1.Np, n2=c2.Np, n3=c3.Np,
        inv_s1=c1.inv_scale, inv_s2=c2.inv_scale, inv_s3=c3.inv_scale)
    out = pl.pallas_call(
        kernel,
        out_shape=jax.ShapeDtypeStruct((tm, c3.Np), jnp.float32),
    )(xp.astype(jnp.bfloat16), inv_n, c1.w_cat, c2.w_cat, c3.w_cat)
    return out[:B, :c3.N]


# ----------------------------------------------------------------------------
# Pooling: reduce k*k shifted views (max -> MaxPool2d, avg -> AdaptiveAvgPool2d
# for integer-multiple downsampling, as in VGG).  Views are flattened/padded to
# a lane-dense (rows, 512) layout so the output store is unmasked.
# ----------------------------------------------------------------------------
def _reduce_kernel(*refs, op, n):
    o_ref = refs[-1]
    acc = refs[0][...]
    for r in refs[1:-1]:
        acc = jnp.maximum(acc, r[...]) if op == "max" else acc + r[...]
    if op == "avg":
        acc = acc / float(n)
    o_ref[...] = acc


def _pool2d(x, k, op):
    """x: (B, H, W, C) NHWC with H % k == W % k == 0; kernel = stride = k."""
    B, H, W, C = x.shape
    Ho, Wo = H // k, W // k
    T = B * Ho * Wo * C
    LW = 512
    rows = pl.cdiv(T, LW)
    tr = min(128, _round_up(rows, 8))
    Rp = _round_up(rows, tr)
    Tp = Rp * LW
    views = [jnp.pad(x[:, i::k, j::k, :].reshape(-1), (0, Tp - T)).reshape(Rp, LW)
             for i in range(k) for j in range(k)]
    kernel = functools.partial(_reduce_kernel, op=op, n=k * k)
    out = pl.pallas_call(
        kernel,
        out_shape=jax.ShapeDtypeStruct((Rp, LW), jnp.float32),
        grid=(Rp // tr,),
        in_specs=[pl.BlockSpec((tr, LW), lambda i: (i, 0)) for _ in views],
        out_specs=pl.BlockSpec((tr, LW), lambda i: (i, 0)),
        compiler_params=pltpu.CompilerParams(dimension_semantics=("parallel",)),
    )(*views)
    return out.reshape(-1)[:T].reshape(B, Ho, Wo, C)


# ----------------------------------------------------------------------------
# Glue: NHWC im2col for 3x3 "same" convs (patch feature order = (kh, kw, c),
# matching the weight flattening below).
# ----------------------------------------------------------------------------
def _im2col_nhwc(x, ks, pad):
    B, H, W, C = x.shape
    xp = jnp.pad(x, ((0, 0), (pad, pad), (pad, pad), (0, 0)))
    cols = [xp[:, i:i + H, j:j + W, :] for i in range(ks) for j in range(ks)]
    patches = jnp.concatenate(cols, axis=-1)            # (B, H, W, ks*ks*C)
    return patches.reshape(B * H * W, ks * ks * C)


class BcosConv2dParams:
    """BcosConv2d(inc, outc, kernel_size, padding, scale_fact) with b=2, max_out=2."""

    def __init__(self, key, inc, outc, ks=1, pad=0, scale_fact=100, max_out=2):
        # kaiming_normal_(mode='fan_out', nonlinearity='relu') on the inner nn.Conv2d
        fan_out = (outc * max_out) * ks * ks
        std = float(np.sqrt(2.0 / fan_out))
        w = jax.random.normal(key, (outc * max_out, inc, ks, ks), jnp.float32) * std
        # Flatten weights in (kh, kw, c) order to match the NHWC im2col rows.
        w = jnp.transpose(w, (0, 2, 3, 1)).reshape(outc * max_out, ks * ks * inc)
        # MaxOut pairing: linear channel j -> (unit j // 2, branch j % 2)
        w0 = w[0::2].T                                   # (K, outc)  branch 0
        w1 = w[1::2].T                                   # (K, outc)  branch 1

        self.ks, self.pad, self.inc, self.N = ks, pad, inc, outc
        self.K = inc * ks * ks
        # K tiling: single K step for small K, 512-wide K tiles otherwise.
        self.tk = _round_up(self.K, 128) if self.K <= 2048 else 512
        self.Kp = _round_up(self.K, self.tk)
        # N tiling: up to 256 lanes per output tile.
        self.tn = min(_round_up(outc, 128), 256)
        self.Np = _round_up(outc, self.tn)

        w0p = jnp.pad(w0, ((0, self.Kp - self.K), (0, self.Np - outc)))
        w1p = jnp.pad(w1, ((0, self.Kp - self.K), (0, self.Np - outc)))
        nj = self.Np // self.tn
        # Tile-interleaved concat: block j of width 2*tn = [w0 tile j | w1 tile j].
        wc = jnp.stack([w0p.reshape(self.Kp, nj, self.tn),
                        w1p.reshape(self.Kp, nj, self.tn)], axis=2)
        self.w_cat = wc.reshape(self.Kp, 2 * self.Np).astype(jnp.bfloat16)

        # out /= sqrt(ks*ks*inc)/scale_fact  ->  out *= inv_scale
        self.inv_scale = float(scale_fact / np.sqrt(ks * ks * inc))

    def __call__(self, x_nhwc, apply_relu=False):
        B, H, W, C = x_nhwc.shape
        if self.ks == 1:
            rows = x_nhwc.reshape(B * H * W, C)
        else:
            rows = _im2col_nhwc(x_nhwc, self.ks, self.pad)
        # Hoisted patch norm (f32, exact), shared by every N/K tile.
        inv_n = lax.rsqrt(jnp.sum(rows * rows, axis=1, keepdims=True) + 1e-6)
        out = bcos_matmul(rows, inv_n, self, apply_relu)
        return out.reshape(B, H, W, self.N)


class VGGPallas:
    """Pallas port of VGG.forward: features -> AdaptiveAvgPool2d((7,7)) ->
    flatten -> x[..., None, None] -> B-cos 1x1 classifier (scale_fact=1000)."""

    def __init__(self, key, in_channels=3, feat_channels=(16, 32),
                 hidden=256, num_classes=10):
        keys = jax.random.split(key, len(feat_channels) + 3)
        # `features` is an injected nn.Module in the reference; here: a small
        # B-cos VGG-style stack (3x3 BcosConv2d, scale_fact=100) + MaxPool2d(2,2).
        self.features = []
        c = in_channels
        for i, v in enumerate(feat_channels):
            self.features.append(
                BcosConv2dParams(keys[i], c, v, ks=3, pad=1, scale_fact=100))
            c = v
        k0 = len(feat_channels)
        self.cls1 = BcosConv2dParams(keys[k0 + 0], c * 7 * 7, hidden, ks=1, scale_fact=1000)
        self.cls2 = BcosConv2dParams(keys[k0 + 1], hidden, hidden, ks=1, scale_fact=1000)
        self.cls3 = BcosConv2dParams(keys[k0 + 2], hidden, num_classes, ks=1, scale_fact=1000)

    def _classifier_fusable(self):
        c1, c2, c3 = self.cls1, self.cls2, self.cls3
        single_tile = (c1.Np == c1.tn and c2.Np == c2.tn and c3.Np == c3.tn)
        chained = (c1.Np == c2.Kp and c2.Np == c3.Kp)
        weight_bytes = 2 * (c1.w_cat.size + c2.w_cat.size + c3.w_cat.size)
        return single_tile and chained and weight_bytes < (12 << 20)

    def __call__(self, x_nchw):
        # NCHW -> NHWC once at the boundary; everything below is channels-last.
        x = jnp.transpose(x_nchw, (0, 2, 3, 1))
        for layer in self.features:
            x = layer(x, apply_relu=False)
        x = _pool2d(x, 2, "max")                        # MaxPool2d(2, 2)
        # AdaptiveAvgPool2d((7, 7))
        B, H, W, C = x.shape
        # TODO(synk): AdaptiveAvgPool2d for non-integer-multiple sizes is not implemented.
        assert H % 7 == 0 and W % 7 == 0, "spatial size must be a multiple of 7"
        if H != 7 or W != 7:
            x = _pool2d(x, H // 7, "avg")
        # torch.flatten(x, 1); x[..., None, None]; classifier (dropout = identity).
        x_flat = x.reshape(B, -1)
        if self._classifier_fusable():
            logits = classifier_fused(x_flat, self.cls1, self.cls2, self.cls3)
        else:
            y = x_flat.reshape(B, 1, 1, -1)
            y = self.cls1(y, apply_relu=True)
            y = self.cls2(y, apply_relu=True)
            y = self.cls3(y, apply_relu=False)
            logits = y.reshape(B, -1)
        return logits[:, :, None, None]                 # (B, num_classes, 1, 1)


if __name__ == "__main__":
    key = jax.random.PRNGKey(0)
    k_x, k_params = jax.random.split(key)
    x = jax.random.normal(k_x, (2, 3, 28, 28), jnp.float32)   # NCHW like PyTorch
    model = VGGPallas(k_params, in_channels=3, feat_channels=(16, 32),
                      hidden=256, num_classes=10)
    fwd = jax.jit(lambda inp: model(inp))               # fuse im2col / norm / layout glue
    out = fwd(x)
    out = jax.block_until_ready(out)
    assert out.shape == (2, 10, 1, 1)
    assert bool(jnp.all(jnp.isfinite(out)))
    print("KERNEL_OK")
</pallas_src>

<mosaic_0001>
module attributes {stable_mosaic.version = 11 : i64} {
  func.func @_bcos_kernel(%arg0: i32, %arg1: i32, %arg2: i32, %arg3: memref<512x128xbf16, #tpu.memory_space<vmem>>, %arg4: memref<128x256xbf16, #tpu.memory_space<vmem>>, %arg5: memref<512x1xf32, #tpu.memory_space<vmem>>, %arg6: memref<512x128xf32, #tpu.memory_space<vmem>>, %arg7: memref<512x256xf32, #tpu.memory_space<vmem>>) attributes {dimension_semantics = [#tpu.dimension_semantics<parallel>, #tpu.dimension_semantics<parallel>, #tpu.dimension_semantics<arbitrary>], iteration_bounds = array<i64: 4, 1, 1>, scalar_prefetch = 0 : i64, scratch_operands = 1 : i64, tpu.core_type = #tpu.core_type<tc>, window_params = [{transform_indices = @transform_0, window_bounds = array<i64: 512, 128>}, {transform_indices = @transform_1, window_bounds = array<i64: 128, 256>}, {transform_indices = @transform_2, window_bounds = array<i64: 512, 1>}, {transform_indices = @transform_3, window_bounds = array<i64: 512, 128>}]} {
    %c0_i32 = arith.constant 0 : i32
    %0 = arith.cmpi eq, %arg2, %c0_i32 : i32
    %1 = arith.extui %0 : i1 to i32
    %c0_i32_0 = arith.constant 0 : i32
    %2 = arith.cmpi ne, %1, %c0_i32_0 : i32
    scf.if %2 {
      %cst_10 = arith.constant 0.000000e+00 : f32
      %12 = vector.broadcast %cst_10 : f32 to vector<512x256xf32>
      %c0_11 = arith.constant 0 : index
      %c0_12 = arith.constant 0 : index
      %13 = vector.load %arg7[%c0_11, %c0_12] : memref<512x256xf32, #tpu.memory_space<vmem>>, vector<512x256xf32>
      tpu.vector_store %arg7[%c0_11, %c0_12], %12 {strides = array<i32>} : memref<512x256xf32, #tpu.memory_space<vmem>>, vector<512x256xf32>,
    } else {
    }
    %c0 = arith.constant 0 : index
    %c0_1 = arith.constant 0 : index
    %3 = vector.load %arg7[%c0, %c0_1] : memref<512x256xf32, #tpu.memory_space<vmem>>, vector<512x256xf32>
    %c0_2 = arith.constant 0 : index
    %c0_3 = arith.constant 0 : index
    %4 = vector.load %arg3[%c0_2, %c0_3] : memref<512x128xbf16, #tpu.memory_space<vmem>>, vector<512x128xbf16>
    %c0_4 = arith.constant 0 : index
    %c0_5 = arith.constant 0 : index
    %5 = vector.load %arg4[%c0_4, %c0_5] : memref<128x256xbf16, #tpu.memory_space<vmem>>, vector<128x256xbf16>
    %cst = arith.constant dense<0.000000e+00> : vector<512x256xf32>
    %6 = tpu.matmul %4, %5, %cst {dimension_numbers = #tpu.dot_dimension_numbers<[1], [0], [0], [1], [0, 0, 1, 1], [], []>} : vector<512x128xbf16>, vector<128x256xbf16>, vector<512x256xf32> -> vector<512x256xf32>
    %7 = arith.addf %3, %6 : vector<512x256xf32>
    %c0_6 = arith.constant 0 : index
    %c0_7 = arith.constant 0 : index
    %8 = vector.load %arg7[%c0_6, %c0_7] : memref<512x256xf32, #tpu.memory_space<vmem>>, vector<512x256xf32>
    tpu.vector_store %arg7[%c0_6, %c0_7], %7 {strides = array<i32>} : memref<512x256xf32, #tpu.memory_space<vmem>>, vector<512x256xf32>,
    %c0_i32_8 = arith.constant 0 : i32
    %9 = arith.cmpi eq, %arg2, %c0_i32_8 : i32
    %10 = arith.extui %9 : i1 to i32
    %c0_i32_9 = arith.constant 0 : i32
    %11 = arith.cmpi ne, %10, %c0_i32_9 : i32
    scf.if %11 {
      %c0_10 = arith.constant 0 : index
      %c0_11 = arith.constant 0 : index
      %12 = vector.load %arg7[%c0_10, %c0_11] : memref<512x256xf32, #tpu.memory_space<vmem>>, vector<512x256xf32>
      %13 = vector.extract_strided_slice %12 {offsets = [0, 0], sizes = [512, 128], strides = [1, 1]} : vector<512x256xf32> to vector<512x128xf32>
      %14 = vector.extract_strided_slice %12 {offsets = [0, 128], sizes = [512, 128], strides = [1, 1]} : vector<512x256xf32> to vector<512x128xf32>
      %15 = arith.maximumf %13, %14 : vector<512x128xf32>
      %16 = math.absf %15 : vector<512x128xf32>
      %c0_12 = arith.constant 0 : index
      %c0_13 = arith.constant 0 : index
      %17 = vector.load %arg5[%c0_12, %c0_13] : memref<512x1xf32, #tpu.memory_space<vmem>>, vector<512x1xf32>
      %18 = vector.broadcast %17 : vector<512x1xf32> to vector<512x128xf32>
      %19 = arith.mulf %16, %18 : vector<512x128xf32>
      %cst_14 = arith.constant 9.99999997E-7 : f32
      %20 = vector.broadcast %cst_14 : f32 to vector<512x128xf32>
      %21 = arith.addf %19, %20 : vector<512x128xf32>
      %22 = arith.mulf %15, %21 : vector<512x128xf32>
      %cst_15 = arith.constant 19.2450085 : f32
      %23 = vector.broadcast %cst_15 : f32 to vector<512x128xf32>
      %24 = arith.mulf %22, %23 : vector<512x128xf32>
      %c0_16 = arith.constant 0 : index
      %c0_17 = arith.constant 0 : index
      %25 = vector.load %arg6[%c0_16, %c0_17] : memref<512x128xf32, #tpu.memory_space<vmem>>, vector<512x128xf32>
      tpu.vector_store %arg6[%c0_16, %c0_17], %24 {strides = array<i32>} : memref<512x128xf32, #tpu.memory_space<vmem>>, vector<512x128xf32>,
    } else {
    }
    return
  }
  func.func @transform_0(%arg0: i32, %arg1: i32, %arg2: i32) -> (i32, i32) {
    %c0_i32 = arith.constant 0 : i32
    return %arg0, %arg2 : i32, i32
  }
  func.func @transform_1(%arg0: i32, %arg1: i32, %arg2: i32) -> (i32, i32) {
    %c0_i32 = arith.constant 0 : i32
    return %arg2, %arg1 : i32, i32
  }
  func.func @transform_2(%arg0: i32, %arg1: i32, %arg2: i32) -> (i32, i32) {
    %c0_i32 = arith.constant 0 : i32
    %c0_i32_0 = arith.constant 0 : i32
    return %arg0, %c0_i32 : i32, i32
  }
  func.func @transform_3(%arg0: i32, %arg1: i32, %arg2: i32) -> (i32, i32) {
    %c0_i32 = arith.constant 0 : i32
    return %arg0, %arg1 : i32, i32
  }
}

module attributes {stable_mosaic.version = 11 : i64} {
  func.func @_bcos_kernel(%arg0: i32, %arg1: i32, %arg2: i32, %arg3: memref<512x256xbf16, #tpu.memory_space<vmem>>, %arg4: memref<256x256xbf16, #tpu.memory_space<vmem>>, %arg5: memref<512x1xf32, #tpu.memory_space<vmem>>, %arg6: memref<512x128xf32, #tpu.memory_space<vmem>>, %arg7: memref<512x256xf32, #tpu.memory_space<vmem>>) attributes {dimension_semantics = [#tpu.dimension_semantics<parallel>, #tpu.dimension_semantics<parallel>, #tpu.dimension_semantics<arbitrary>], iteration_bounds = array<i64: 4, 1, 1>, scalar_prefetch = 0 : i64, scratch_operands = 1 : i64, tpu.core_type = #tpu.core_type<tc>, window_params = [{transform_indices = @transform_0, window_bounds = array<i64: 512, 256>}, {transform_indices = @transform_1, window_bounds = array<i64: 256, 256>}, {transform_indices = @transform_2, window_bounds = array<i64: 512, 1>}, {transform_indices = @transform_3, window_bounds = array<i64: 512, 128>}]} {
    %c0_i32 = arith.constant 0 : i32
    %0 = arith.cmpi eq, %arg2, %c0_i32 : i32
    %1 = arith.extui %0 : i1 to i32
    %c0_i32_0 = arith.constant 0 : i32
    %2 = arith.cmpi ne, %1, %c0_i32_0 : i32
    scf.if %2 {
      %cst_10 = arith.constant 0.000000e+00 : f32
      %12 = vector.broadcast %cst_10 : f32 to vector<512x256xf32>
      %c0_11 = arith.constant 0 : index
      %c0_12 = arith.constant 0 : index
      %13 = vector.load %arg7[%c0_11, %c0_12] : memref<512x256xf32, #tpu.memory_space<vmem>>, vector<512x256xf32>
      tpu.vector_store %arg7[%c0_11, %c0_12], %12 {strides = array<i32>} : memref<512x256xf32, #tpu.memory_space<vmem>>, vector<512x256xf32>,
    } else {
    }
    %c0 = arith.constant 0 : index
    %c0_1 = arith.constant 0 : index
    %3 = vector.load %arg7[%c0, %c0_1] : memref<512x256xf32, #tpu.memory_space<vmem>>, vector<512x256xf32>
    %c0_2 = arith.constant 0 : index
    %c0_3 = arith.constant 0 : index
    %4 = vector.load %arg3[%c0_2, %c0_3] : memref<512x256xbf16, #tpu.memory_space<vmem>>, vector<512x256xbf16>
    %c0_4 = arith.constant 0 : index
    %c0_5 = arith.constant 0 : index
    %5 = vector.load %arg4[%c0_4, %c0_5] : memref<256x256xbf16, #tpu.memory_space<vmem>>, vector<256x256xbf16>
    %cst = arith.constant dense<0.000000e+00> : vector<512x256xf32>
    %6 = tpu.matmul %4, %5, %cst {dimension_numbers = #tpu.dot_dimension_numbers<[1], [0], [0], [1], [0, 0, 1, 1], [], []>} : vector<512x256xbf16>, vector<256x256xbf16>, vector<512x256xf32> -> vector<512x256xf32>
    %7 = arith.addf %3, %6 : vector<512x256xf32>
    %c0_6 = arith.constant 0 : index
    %c0_7 = arith.constant 0 : index
    %8 = vector.load %arg7[%c0_6, %c0_7] : memref<512x256xf32, #tpu.memory_space<vmem>>, vector<512x256xf32>
    tpu.vector_store %arg7[%c0_6, %c0_7], %7 {strides = array<i32>} : memref<512x256xf32, #tpu.memory_space<vmem>>, vector<512x256xf32>,
    %c0_i32_8 = arith.constant 0 : i32
    %9 = arith.cmpi eq, %arg2, %c0_i32_8 : i32
    %10 = arith.extui %9 : i1 to i32
    %c0_i32_9 = arith.constant 0 : i32
    %11 = arith.cmpi ne, %10, %c0_i32_9 : i32
    scf.if %11 {
      %c0_10 = arith.constant 0 : index
      %c0_11 = arith.constant 0 : index
      %12 = vector.load %arg7[%c0_10, %c0_11] : memref<512x256xf32, #tpu.memory_space<vmem>>, vector<512x256xf32>
      %13 = vector.extract_strided_slice %12 {offsets = [0, 0], sizes = [512, 128], strides = [1, 1]} : vector<512x256xf32> to vector<512x128xf32>
      %14 = vector.extract_strided_slice %12 {offsets = [0, 128], sizes = [512, 128], strides = [1, 1]} : vector<512x256xf32> to vector<512x128xf32>
      %15 = arith.maximumf %13, %14 : vector<512x128xf32>
      %16 = math.absf %15 : vector<512x128xf32>
      %c0_12 = arith.constant 0 : index
      %c0_13 = arith.constant 0 : index
      %17 = vector.load %arg5[%c0_12, %c0_13] : memref<512x1xf32, #tpu.memory_space<vmem>>, vector<512x1xf32>
      %18 = vector.broadcast %17 : vector<512x1xf32> to vector<512x128xf32>
      %19 = arith.mulf %16, %18 : vector<512x128xf32>
      %cst_14 = arith.constant 9.99999997E-7 : f32
      %20 = vector.broadcast %cst_14 : f32 to vector<512x128xf32>
      %21 = arith.addf %19, %20 : vector<512x128xf32>
      %22 = arith.mulf %15, %21 : vector<512x128xf32>
      %cst_15 = arith.constant 8.33333301 : f32
      %23 = vector.broadcast %cst_15 : f32 to vector<512x128xf32>
      %24 = arith.mulf %22, %23 : vector<512x128xf32>
      %c0_16 = arith.constant 0 : index
      %c0_17 = arith.constant 0 : index
      %25 = vector.load %arg6[%c0_16, %c0_17] : memref<512x128xf32, #tpu.memory_space<vmem>>, vector<512x128xf32>
      tpu.vector_store %arg6[%c0_16, %c0_17], %24 {strides = array<i32>} : memref<512x128xf32, #tpu.memory_space<vmem>>, vector<512x128xf32>,
    } else {
    }
    return
  }
  func.func @transform_0(%arg0: i32, %arg1: i32, %arg2: i32) -> (i32, i32) {
    %c0_i32 = arith.constant 0 : i32
    return %arg0, %arg2 : i32, i32
  }
  func.func @transform_1(%arg0: i32, %arg1: i32, %arg2: i32) -> (i32, i32) {
    %c0_i32 = arith.constant 0 : i32
    return %arg2, %arg1 : i32, i32
  }
  func.func @transform_2(%arg0: i32, %arg1: i32, %arg2: i32) -> (i32, i32) {
    %c0_i32 = arith.constant 0 : i32
    %c0_i32_0 = arith.constant 0 : i32
    return %arg0, %c0_i32 : i32, i32
  }
  func.func @transform_3(%arg0: i32, %arg1: i32, %arg2: i32) -> (i32, i32) {
    %c0_i32 = arith.constant 0 : i32
    return %arg0, %arg1 : i32, i32
  }
}

module attributes {stable_mosaic.version = 11 : i64} {
  func.func @_reduce_kernel(%arg0: i32, %arg1: memref<32x512xf32, #tpu.memory_space<vmem>>, %arg2: memref<32x512xf32, #tpu.memory_space<vmem>>, %arg3: memref<32x512xf32, #tpu.memory_space<vmem>>, %arg4: memref<32x512xf32, #tpu.memory_space<vmem>>, %arg5: memref<32x512xf32, #tpu.memory_space<vmem>>) attributes {dimension_semantics = [#tpu.dimension_semantics<parallel>], iteration_bounds = array<i64: 1>, scalar_prefetch = 0 : i64, scratch_operands = 0 : i64, tpu.core_type = #tpu.core_type<tc>, window_params = [{transform_indices = @transform_0, window_bounds = array<i64: 32, 512>}, {transform_indices = @transform_1, window_bounds = array<i64: 32, 512>}, {transform_indices = @transform_2, window_bounds = array<i64: 32, 512>}, {transform_indices = @transform_3, window_bounds = array<i64: 32, 512>}, {transform_indices = @transform_4, window_bounds = array<i64: 32, 512>}]} {
    %c0 = arith.constant 0 : index
    %c0_0 = arith.constant 0 : index
    %0 = vector.load %arg1[%c0, %c0_0] : memref<32x512xf32, #tpu.memory_space<vmem>>, vector<32x512xf32>
    %c0_1 = arith.constant 0 : index
    %c0_2 = arith.constant 0 : index
    %1 = vector.load %arg2[%c0_1, %c0_2] : memref<32x512xf32, #tpu.memory_space<vmem>>, vector<32x512xf32>
    %2 = arith.maximumf %0, %1 : vector<32x512xf32>
    %c0_3 = arith.constant 0 : index
    %c0_4 = arith.constant 0 : index
    %3 = vector.load %arg3[%c0_3, %c0_4] : memref<32x512xf32, #tpu.memory_space<vmem>>, vector<32x512xf32>
    %4 = arith.maximumf %2, %3 : vector<32x512xf32>
    %c0_5 = arith.constant 0 : index
    %c0_6 = arith.constant 0 : index
    %5 = vector.load %arg4[%c0_5, %c0_6] : memref<32x512xf32, #tpu.memory_space<vmem>>, vector<32x512xf32>
    %6 = arith.maximumf %4, %5 : vector<32x512xf32>
    %c0_7 = arith.constant 0 : index
    %c0_8 = arith.constant 0 : index
    %7 = vector.load %arg5[%c0_7, %c0_8] : memref<32x512xf32, #tpu.memory_space<vmem>>, vector<32x512xf32>
    tpu.vector_store %arg5[%c0_7, %c0_8], %6 {strides = array<i32>} : memref<32x512xf32, #tpu.memory_space<vmem>>, vector<32x512xf32>,
    return
  }
  func.func @transform_0(%arg0: i32) -> (i32, i32) {
    %c0_i32 = arith.constant 0 : i32
    %c0_i32_0 = arith.constant 0 : i32
    return %arg0, %c0_i32 : i32, i32
  }
  func.func @transform_1(%arg0: i32) -> (i32, i32) {
    %c0_i32 = arith.constant 0 : i32
    %c0_i32_0 = arith.constant 0 : i32
    return %arg0, %c0_i32 : i32, i32
  }
  func.func @transform_2(%arg0: i32) -> (i32, i32) {
    %c0_i32 = arith.constant 0 : i32
    %c0_i32_0 = arith.constant 0 : i32
    return %arg0, %c0_i32 : i32, i32
  }
  func.func @transform_3(%arg0: i32) -> (i32, i32) {
    %c0_i32 = arith.constant 0 : i32
    %c0_i32_0 = arith.constant 0 : i32
    return %arg0, %c0_i32 : i32, i32
  }
  func.func @transform_4(%arg0: i32) -> (i32, i32) {
    %c0_i32 = arith.constant 0 : i32
    %c0_i32_0 = arith.constant 0 : i32
    return %arg0, %c0_i32 : i32, i32
  }
}

module attributes {stable_mosaic.version = 11 : i64} {
  func.func @_reduce_kernel(%arg0: i32, %arg1: memref<8x512xf32, #tpu.memory_space<vmem>>, %arg2: memref<8x512xf32, #tpu.memory_space<vmem>>, %arg3: memref<8x512xf32, #tpu.memory_space<vmem>>, %arg4: memref<8x512xf32, #tpu.memory_space<vmem>>, %arg5: memref<8x512xf32, #tpu.memory_space<vmem>>) attributes {dimension_semantics = [#tpu.dimension_semantics<parallel>], iteration_bounds = array<i64: 1>, scalar_prefetch = 0 : i64, scratch_operands = 0 : i64, tpu.core_type = #tpu.core_type<tc>, window_params = [{transform_indices = @transform_0, window_bounds = array<i64: 8, 512>}, {transform_indices = @transform_1, window_bounds = array<i64: 8, 512>}, {transform_indices = @transform_2, window_bounds = array<i64: 8, 512>}, {transform_indices = @transform_3, window_bounds = array<i64: 8, 512>}, {transform_indices = @transform_4, window_bounds = array<i64: 8, 512>}]} {
    %c0 = arith.constant 0 : index
    %c0_0 = arith.constant 0 : index
    %0 = vector.load %arg1[%c0, %c0_0] : memref<8x512xf32, #tpu.memory_space<vmem>>, vector<8x512xf32>
    %c0_1 = arith.constant 0 : index
    %c0_2 = arith.constant 0 : index
    %1 = vector.load %arg2[%c0_1, %c0_2] : memref<8x512xf32, #tpu.memory_space<vmem>>, vector<8x512xf32>
    %2 = arith.addf %0, %1 : vector<8x512xf32>
    %c0_3 = arith.constant 0 : index
    %c0_4 = arith.constant 0 : index
    %3 = vector.load %arg3[%c0_3, %c0_4] : memref<8x512xf32, #tpu.memory_space<vmem>>, vector<8x512xf32>
    %4 = arith.addf %2, %3 : vector<8x512xf32>
    %c0_5 = arith.constant 0 : index
    %c0_6 = arith.constant 0 : index
    %5 = vector.load %arg4[%c0_5, %c0_6] : memref<8x512xf32, #tpu.memory_space<vmem>>, vector<8x512xf32>
    %6 = arith.addf %4, %5 : vector<8x512xf32>
    %cst = arith.constant 4.000000e+00 : f32
    %7 = vector.broadcast %cst : f32 to vector<8x512xf32>
    %8 = arith.divf %6, %7 : vector<8x512xf32>
    %c0_7 = arith.constant 0 : index
    %c0_8 = arith.constant 0 : index
    %9 = vector.load %arg5[%c0_7, %c0_8] : memref<8x512xf32, #tpu.memory_space<vmem>>, vector<8x512xf32>
    tpu.vector_store %arg5[%c0_7, %c0_8], %8 {strides = array<i32>} : memref<8x512xf32, #tpu.memory_space<vmem>>, vector<8x512xf32>,
    return
  }
  func.func @transform_0(%arg0: i32) -> (i32, i32) {
    %c0_i32 = arith.constant 0 : i32
    %c0_i32_0 = arith.constant 0 : i32
    return %arg0, %c0_i32 : i32, i32
  }
  func.func @transform_1(%arg0: i32) -> (i32, i32) {
    %c0_i32 = arith.constant 0 : i32
    %c0_i32_0 = arith.constant 0 : i32
    return %arg0, %c0_i32 : i32, i32
  }
  func.func @transform_2(%arg0: i32) -> (i32, i32) {
    %c0_i32 = arith.constant 0 : i32
    %c0_i32_0 = arith.constant 0 : i32
    return %arg0, %c0_i32 : i32, i32
  }
  func.func @transform_3(%arg0: i32) -> (i32, i32) {
    %c0_i32 = arith.constant 0 : i32
    %c0_i32_0 = arith.constant 0 : i32
    return %arg0, %c0_i32 : i32, i32
  }
  func.func @transform_4(%arg0: i32) -> (i32, i32) {
    %c0_i32 = arith.constant 0 : i32
    %c0_i32_0 = arith.constant 0 : i32
    return %arg0, %c0_i32 : i32, i32
  }
}

module attributes {stable_mosaic.version = 11 : i64} {
  func.func @_classifier_kernel(%arg0: memref<16x1664xbf16, #tpu.memory_space<vmem>>, %arg1: memref<16x1xf32, #tpu.memory_space<vmem>>, %arg2: memref<1664x512xbf16, #tpu.memory_space<vmem>>, %arg3: memref<256x512xbf16, #tpu.memory_space<vmem>>, %arg4: memref<256x256xbf16, #tpu.memory_space<vmem>>, %arg5: memref<16x128xf32, #tpu.memory_space<vmem>>) attributes {dimension_semantics = [], scalar_prefetch = 0 : i64, scratch_operands = 0 : i64, tpu.core_type = #tpu.core_type<tc>} {
    %c0 = arith.constant 0 : index
    %c0_0 = arith.constant 0 : index
    %0 = vector.load %arg0[%c0, %c0_0] : memref<16x1664xbf16, #tpu.memory_space<vmem>>, vector<16x1664xbf16>
    %c0_1 = arith.constant 0 : index
    %c0_2 = arith.constant 0 : index
    %1 = vector.load %arg1[%c0_1, %c0_2] : memref<16x1xf32, #tpu.memory_space<vmem>>, vector<16x1xf32>
    %c0_3 = arith.constant 0 : index
    %c0_4 = arith.constant 0 : index
    %2 = vector.load %arg2[%c0_3, %c0_4] : memref<1664x512xbf16, #tpu.memory_space<vmem>>, vector<1664x512xbf16>
    %cst = arith.constant dense<0.000000e+00> : vector<16x512xf32>
    %3 = tpu.matmul %0, %2, %cst {dimension_numbers = #tpu.dot_dimension_numbers<[1], [0], [0], [1], [0, 0, 1, 1], [], []>} : vector<16x1664xbf16>, vector<1664x512xbf16>, vector<16x512xf32> -> vector<16x512xf32>
    %4 = vector.extract_strided_slice %3 {offsets = [0, 0], sizes = [16, 256], strides = [1, 1]} : vector<16x512xf32> to vector<16x256xf32>
    %5 = vector.extract_strided_slice %3 {offsets = [0, 256], sizes = [16, 256], strides = [1, 1]} : vector<16x512xf32> to vector<16x256xf32>
    %6 = arith.maximumf %4, %5 : vector<16x256xf32>
    %7 = math.absf %6 : vector<16x256xf32>
    %8 = vector.broadcast %1 : vector<16x1xf32> to vector<16x256xf32>
    %9 = arith.mulf %7, %8 : vector<16x256xf32>
    %cst_5 = arith.constant 9.99999997E-7 : f32
    %10 = vector.broadcast %cst_5 : f32 to vector<16x256xf32>
    %11 = arith.addf %9, %10 : vector<16x256xf32>
    %12 = arith.mulf %6, %11 : vector<16x256xf32>
    %cst_6 = arith.constant 25.2538128 : f32
    %13 = vector.broadcast %cst_6 : f32 to vector<16x256xf32>
    %14 = arith.mulf %12, %13 : vector<16x256xf32>
    %cst_7 = arith.constant 0.000000e+00 : f32
    %15 = vector.broadcast %cst_7 : f32 to vector<16x256xf32>
    %16 = arith.maximumf %14, %15 : vector<16x256xf32>
    %17 = arith.mulf %16, %16 : vector<16x256xf32>
    %cst_8 = arith.constant dense<0.000000e+00> : vector<16xf32>
    %18 = vector.multi_reduction <add>, %17, %cst_8 [1] : vector<16x256xf32> to vector<16xf32>
    %19 = vector.shape_cast %18 : vector<16xf32> to vector<16x1xf32>
    %cst_9 = arith.constant 9.99999997E-7 : f32
    %20 = vector.broadcast %cst_9 : f32 to vector<16x1xf32>
    %21 = arith.addf %19, %20 : vector<16x1xf32>
    %22 = math.rsqrt %21 : vector<16x1xf32>
    %23 = arith.truncf %16 : vector<16x256xf32> to vector<16x256xbf16>
    %c0_10 = arith.constant 0 : index
    %c0_11 = arith.constant 0 : index
    %24 = vector.load %arg3[%c0_10, %c0_11] : memref<256x512xbf16, #tpu.memory_space<vmem>>, vector<256x512xbf16>
    %cst_12 = arith.constant dense<0.000000e+00> : vector<16x512xf32>
    %25 = tpu.matmul %23, %24, %cst_12 {dimension_numbers = #tpu.dot_dimension_numbers<[1], [0], [0], [1], [0, 0, 1, 1], [], []>} : vector<16x256xbf16>, vector<256x512xbf16>, vector<16x512xf32> -> vector<16x512xf32>
    %26 = vector.extract_strided_slice %25 {offsets = [0, 0], sizes = [16, 256], strides = [1, 1]} : vector<16x512xf32> to vector<16x256xf32>
    %27 = vector.extract_strided_slice %25 {offsets = [0, 256], sizes = [16, 256], strides = [1, 1]} : vector<16x512xf32> to vector<16x256xf32>
    %28 = arith.maximumf %26, %27 : vector<16x256xf32>
    %29 = math.absf %28 : vector<16x256xf32>
    %30 = vector.broadcast %22 : vector<16x1xf32> to vector<16x256xf32>
    %31 = arith.mulf %29, %30 : vector<16x256xf32>
    %cst_13 = arith.constant 9.99999997E-7 : f32
    %32 = vector.broadcast %cst_13 : f32 to vector<16x256xf32>
    %33 = arith.addf %31, %32 : vector<16x256xf32>
    %34 = arith.mulf %28, %33 : vector<16x256xf32>
    %cst_14 = arith.constant 6.250000e+01 : f32
    %35 = vector.broadcast %cst_14 : f32 to vector<16x256xf32>
    %36 = arith.mulf %34, %35 : vector<16x256xf32>
    %cst_15 = arith.constant 0.000000e+00 : f32
    %37 = vector.broadcast %cst_15 : f32 to vector<16x256xf32>
    %38 = arith.maximumf %36, %37 : vector<16x256xf32>
    %39 = arith.mulf %38, %38 : vector<16x256xf32>
    %cst_16 = arith.constant dense<0.000000e+00> : vector<16xf32>
    %40 = vector.multi_reduction <add>, %39, %cst_16 [1] : vector<16x256xf32> to vector<16xf32>
    %41 = vector.shape_cast %40 : vector<16xf32> to vector<16x1xf32>
    %cst_17 = arith.constant 9.99999997E-7 : f32
    %42 = vector.broadcast %cst_17 : f32 to vector<16x1xf32>
    %43 = arith.addf %41, %42 : vector<16x1xf32>
    %44 = math.rsqrt %43 : vector<16x1xf32>
    %45 = arith.truncf %38 : vector<16x256xf32> to vector<16x256xbf16>
    %c0_18 = arith.constant 0 : index
    %c0_19 = arith.constant 0 : index
    %46 = vector.load %arg4[%c0_18, %c0_19] : memref<256x256xbf16, #tpu.memory_space<vmem>>, vector<256x256xbf16>
    %cst_20 = arith.constant dense<0.000000e+00> : vector<16x256xf32>
    %47 = tpu.matmul %45, %46, %cst_20 {dimension_numbers = #tpu.dot_dimension_numbers<[1], [0], [0], [1], [0, 0, 1, 1], [], []>} : vector<16x256xbf16>, vector<256x256xbf16>, vector<16x256xf32> -> vector<16x256xf32>
    %48 = vector.extract_strided_slice %47 {offsets = [0, 0], sizes = [16, 128], strides = [1, 1]} : vector<16x256xf32> to vector<16x128xf32>
    %49 = vector.extract_strided_slice %47 {offsets = [0, 128], sizes = [16, 128], strides = [1, 1]} : vector<16x256xf32> to vector<16x128xf32>
    %50 = arith.maximumf %48, %49 : vector<16x128xf32>
    %51 = math.absf %50 : vector<16x128xf32>
    %52 = vector.broadcast %44 : vector<16x1xf32> to vector<16x128xf32>
    %53 = arith.mulf %51, %52 : vector<16x128xf32>
    %cst_21 = arith.constant 9.99999997E-7 : f32
    %54 = vector.broadcast %cst_21 : f32 to vector<16x128xf32>
    %55 = arith.addf %53, %54 : vector<16x128xf32>
    %56 = arith.mulf %50, %55 : vector<16x128xf32>
    %cst_22 = arith.constant 6.250000e+01 : f32
    %57 = vector.broadcast %cst_22 : f32 to vector<16x128xf32>
    %58 = arith.mulf %56, %57 : vector<16x128xf32>
    %c0_23 = arith.constant 0 : index
    %c0_24 = arith.constant 0 : index
    %59 = vector.load %arg5[%c0_23, %c0_24] : memref<16x128xf32, #tpu.memory_space<vmem>>, vector<16x128xf32>
    tpu.vector_store %arg5[%c0_23, %c0_24], %58 {strides = array<i32>} : memref<16x128xf32, #tpu.memory_space<vmem>>, vector<16x128xf32>,
    return
  }
}

</mosaic_0001>

<bundles_post_ra>
// kernel: _lambda_.5
= control target key start
LH: loop header
LB: loop body
LE: loop exit
PB: predicated region body
PF: predicated region fallthrough
CT: control target
= control target key end

     0   :  { %s2901_s12 = smov 0   ;;  %s2903_s13 = smov 0   ;;  %s3312_s0 = inlined_call_operand.vmem [shape: bf16[2048,128], index: 0, kind: input, shape index: {}]   ;;  %s3313_s1 = inlined_call_operand.vmem [shape: bf16[128,256], index: 1, kind: input, shape index: {}]   ;;  %s3314_s2 = inlined_call_operand.vmem [shape: f32[2048,1], index: 2, kind: input, shape index: {}]   ;;  %s3315_s3 = inlined_call_operand.vmem [shape: f32[2048,128], index: 3, kind: output, shape index: {}]  }
   0x1   :  { %s2905_s14 = smov 0  }
   0x2 LB: > { %s32_s15 = sadd.s32 1, %s2874_s13  ;;  %p2563_p0 = scmp.ge.s32.totalorder %s2878_s14, 1  ;;  %s2878_s14 = sphi %s2905_s14, %s13_s14   ;;  %s2874_s13 = sphi %s2903_s13, %s3317_s13   ;;  %s2870_s12 = sphi %s2901_s12, %s3316_s12  }
   0x3   : > { %p34_p1 = scmp.ge.s32.totalorder %s32_s15, 4  ;;  %p194_p2 = scmp.lt.s32.totalorder %s2878_s14, 5 }
   0x5   : > { %s3319_s15 = smov (%p34_p1, %s32_s15), 0  ;;  %p195_p3 = pnand %p2563_p0, %p194_p2 }
   0x6   : > { %s2564_s26 = sshll.u32 (!%p195_p3), %s2870_s12, 6 }
   0x7   : > { %198 = sbr.rel (%p195_p3) target bundleno = 441 (0x1b9), region = 32  ;;  %p240_p4 = scmp.lt.s32.totalorder (!%p195_p3), %s2564_s26, 255 }
   0xc   : > { %v2756_v0 = vld [vmem:[%s3313_s1 + $0x70] sm:$0xf]  ;;  %v2811_v1 = vld [vmem:[%s3313_s1 + $0x74] sm:$0xf0]  ;;  %v2810_v2 = vld [vmem:[%s3313_s1 + $0x74] sm:$0xf] }
   0xd   : > { %v2757_v3 = vor.u32 %v2811_v1, %v2756_v0  ;;  %v2758_v4 = vld [vmem:[%s3313_s1 + $0x78] sm:$0xf0]  ;;  %v2748_v5 = vld [vmem:[%s3313_s1 + $0x60] sm:$0xf]  ;;  %v2880_v7 = vmov 0   ;;  %s3321_s26 = smov (!%p240_p4, %s2564_s26), 255 }
   0xe   : > { %v2761_v6 = vor.u32 %v2810_v2, %v2758_v4  ;;  %2855 = vset.pattern.permute.xlu2 %v2880_v7  ;;  %2854 = vset.pattern.permute.xlu1 %v2880_v7  ;;  %v2809_v8 = vld [vmem:[%s3313_s1 + $0x64] sm:$0xf0]  ;;  %v2808_v9 = vld [vmem:[%s3313_s1 + $0x64] sm:$0xf]  ;;  %v2750_v10 = vld [vmem:[%s3313_s1 + $0x68] sm:$0xf0] }
   0xf   : > { %887 = vmatpush.bf16.msra.mxu0 %v2757_v3  ;;  %2812 = vmatpush.bf16.msra.mxu2 %v2757_v3  ;;  %v2749_v11 = vor.u32 %v2809_v8, %v2748_v5  ;;  %v2753_v12 = vor.u32 %v2808_v9, %v2750_v10  ;;  %v2740_v13 = vld [vmem:[%s3313_s1 + $0x50] sm:$0xf]  ;;  %v2807_v14 = vld [vmem:[%s3313_s1 + $0x54] sm:$0xf0]  ;;  %v2806_v15 = vld [vmem:[%s3313_s1 + $0x54] sm:$0xf] }
  0x10   : > { %1056 = vmatpush.bf16.msra.mxu1 %v2761_v6  ;;  %2820 = vmatpush.bf16.msra.mxu3 %v2761_v6  ;;  %v2742_v16 = vld [vmem:[%s3313_s1 + $0x58] sm:$0xf0]  ;;  %s2567_s17 = sshll.u32 %s3321_s26, 3  ;;  %v2741_v17 = vor.u32 %v2807_v14, %v2740_v13  ;;  %v2732_v18 = vld [vmem:[%s3313_s1 + $0x40] sm:$0xf]  ;;  %s2565_s18 = sshll.u32 %s3321_s26, 2 }
  0x11   : > { %2853 = vset.pattern.permute.xlu0 %v2880_v7  ;;  %s2969_s22 = scalar_lea.vmem %s3314_s2, %s2567_s17  ;;  %v2745_v19 = vor.u32 %v2806_v15, %v2742_v16  ;;  %v2805_v20 = vld [vmem:[%s3313_s1 + $0x44] sm:$0xf0]  ;;  %v2804_v21 = vld [vmem:[%s3313_s1 + $0x44] sm:$0xf]  ;;  %v2734_v22 = vld [vmem:[%s3313_s1 + $0x48] sm:$0xf0]  ;;  %s3041_s21 = scalar_lea.vmem %s3312_s0, %s2565_s18 }
  0x12   : > { %v1744_v23 = vld [vmem:[%s2969_s22 + $0x20] sm:$0xff]  ;;  %v1742_v24 = vld [vmem:[%s2969_s22 + $0x10] sm:$0xff]  ;;  %v2733_v26 = vor.u32 %v2805_v20, %v2732_v18  ;;  %v2737_v27 = vor.u32 %v2804_v21, %v2734_v22  ;;  %v2803_v29 = vld [vmem:[%s3313_s1 + $0x34] sm:$0xf0]  ;;  %s3163_s25 = scalar_lea.vmem %s3315_s3, %s2567_s17 }
  0x13   : > { %888 = vmatpush.bf16.msra.mxu0 %v2749_v11  ;;  %2813 = vmatpush.bf16.msra.mxu2 %v2749_v11  ;;  %v1740_v25 = vld [vmem:[%s2969_s22] sm:$0xff]  ;;  %v2724_v28 = vld [vmem:[%s3313_s1 + $0x30] sm:$0xf]  ;;  %v2802_v30 = vld [vmem:[%s3313_s1 + $0x34] sm:$0xf] }
  0x14   : > { %1057 = vmatpush.bf16.msra.mxu1 %v2753_v12  ;;  %2821 = vmatpush.bf16.msra.mxu3 %v2753_v12  ;;  %v2726_v31 = vld [vmem:[%s3313_s1 + $0x38] sm:$0xf0]  ;;  %v1745_v32 = vld [vmem:[%s2969_s22 + $0x28] sm:$0xff]  ;;  %v2725_v34 = vor.u32 %v2803_v29, %v2724_v28  ;;  %v2716_v37 = vld [vmem:[%s3313_s1 + $0x20] sm:$0xf] }
  0x15   : > { %1826 = vperm.xlu2 %2855, %v1744_v23   ;;  %1816 = vperm.xlu1 %2854, %v1742_v24   ;;  %v1743_v33 = vld [vmem:[%s2969_s22 + $0x18] sm:$0xff]  ;;  %v1741_v35 = vld [vmem:[%s2969_s22 + $0x8] sm:$0xff]  ;;  %v2729_v36 = vor.u32 %v2802_v30, %v2726_v31  ;;  %v2800_v39 = vld [vmem:[%s3313_s1 + $0x24] sm:$0xf] }
  0x16   : > { %1806 = vperm.xlu0 %2853, %v1740_v25   ;;  %v2801_v38 = vld [vmem:[%s3313_s1 + $0x24] sm:$0xf0]  ;;  %v2718_v40 = vld [vmem:[%s3313_s1 + $0x28] sm:$0xf0]  ;;  %v2708_v43 = vld [vmem:[%s3313_s1 + $0x10] sm:$0xf] }
  0x17   : > { %889 = vmatpush.bf16.msra.mxu0 %v2741_v17  ;;  %2814 = vmatpush.bf16.msra.mxu2 %v2741_v17  ;;  %v2717_v41 = vor.u32 %v2801_v38, %v2716_v37  ;;  %v2721_v42 = vor.u32 %v2800_v39, %v2718_v40  ;;  %v2799_v44 = vld [vmem:[%s3313_s1 + $0x14] sm:$0xf0]  ;;  %v2798_v45 = vld [vmem:[%s3313_s1 + $0x14] sm:$0xf]  ;;  %v2710_v46 = vld [vmem:[%s3313_s1 + $0x18] sm:$0xf0] }
  0x18   : > { %1058 = vmatpush.bf16.msra.mxu1 %v2745_v19  ;;  %2822 = vmatpush.bf16.msra.mxu3 %v2745_v19  ;;  %v1748_v47 = vld [vmem:[%s2969_s22 + $0x40] sm:$0xff]  ;;  %v1747_v48 = vld [vmem:[%s2969_s22 + $0x38] sm:$0xff]  ;;  %v2709_v49 = vor.u32 %v2799_v44, %v2708_v43  ;;  %v1746_v50 = vld [vmem:[%s2969_s22 + $0x30] sm:$0xff]  ;;  %v2713_v51 = vor.u32 %v2798_v45, %v2710_v46 }
  0x19   : > { %v2700_v52 = vld [vmem:[%s3313_s1] sm:$0xf]  ;;  %v2797_v53 = vld [vmem:[%s3313_s1 + $0x4] sm:$0xf0]  ;;  %v2796_v54 = vld [vmem:[%s3313_s1 + $0x4] sm:$0xf] }
  0x1a   : > { %v2702_v55 = vld [vmem:[%s3313_s1 + $0x8] sm:$0xf0]  ;;  %v2701_v56 = vor.u32 %v2797_v53, %v2700_v52  ;;  %v1751_v58 = vld [vmem:[%s2969_s22 + $0x58] sm:$0xff]  ;;  %v1750_v59 = vld [vmem:[%s2969_s22 + $0x50] sm:$0xff] }
  0x1b   : > { %890 = vmatpush.bf16.msra.mxu0 %v2733_v26  ;;  %2815 = vmatpush.bf16.msra.mxu2 %v2733_v26  ;;  %v2705_v57 = vor.u32 %v2796_v54, %v2702_v55  ;;  %v2764_v60 = vld [vmem:[%s3041_s21] sm:$0xff]  ;;  %v1749_v61 = vld [vmem:[%s2969_s22 + $0x48] sm:$0xff]  ;;  %v1754_v63 = vld [vmem:[%s2969_s22 + $0x70] sm:$0xff] }
  0x1c   : > { %1059 = vmatpush.bf16.msra.mxu1 %v2737_v27  ;;  %2823 = vmatpush.bf16.msra.mxu3 %v2737_v27  ;;  %v2780_v62 = vld [vmem:[%s3041_s21 + $0x80] sm:$0xff]  ;;  %v1753_v0 = vld [vmem:[%s2969_s22 + $0x68] sm:$0xff]  ;;  %v1755_v5 = vld [vmem:[%s2969_s22 + $0x78] sm:$0xff] }
  0x1d   : > { %1831 = vperm.xlu2 %2855, %v1745_v32   ;;  %1821 = vperm.xlu1 %2854, %v1743_v33   ;;  %v1752_v1 = vld [vmem:[%s2969_s22 + $0x60] sm:$0xff]  ;;  %v1757_v2 = vld [vmem:[%s2969_s22 + $0x88] sm:$0xff]  ;;  %v1759_v8 = vld [vmem:[%s2969_s22 + $0x98] sm:$0xff] }
  0x1e   : > { %1811 = vperm.xlu0 %2853, %v1741_v35   ;;  %v1756_v3 = vld [vmem:[%s2969_s22 + $0x80] sm:$0xff]  ;;  %v2765_v4 = vld [vmem:[%s3041_s21 + $0x8] sm:$0xff]  ;;  %v1758_v9 = vld [vmem:[%s2969_s22 + $0x90] sm:$0xff] }
  0x1f   : > { %891 = vmatpush.bf16.msra.mxu0 %v2725_v34  ;;  %2816 = vmatpush.bf16.msra.mxu2 %v2725_v34  ;;  %v2781_v6 = vld [vmem:[%s3041_s21 + $0x88] sm:$0xff]  ;;  %v1760_v7 = vld [vmem:[%s2969_s22 + $0xa0] sm:$0xff]  ;;  %v1763_v10 = vld [vmem:[%s2969_s22 + $0xb8] sm:$0xff] }
  0x20   : > { %1060 = vmatpush.bf16.msra.mxu1 %v2729_v36  ;;  %2824 = vmatpush.bf16.msra.mxu3 %v2729_v36  ;;  %v1762_v11 = vld [vmem:[%s2969_s22 + $0xb0] sm:$0xff]  ;;  %v1761_v13 = vld [vmem:[%s2969_s22 + $0xa8] sm:$0xff]  ;;  %v1764_v17 = vld [vmem:[%s2969_s22 + $0xc0] sm:$0xff] }
  0x21   : > { %v2766_v12 = vld [vmem:[%s3041_s21 + $0x10] sm:$0xff]  ;;  %v1765_v16 = vld [vmem:[%s2969_s22 + $0xc8] sm:$0xff]  ;;  %v1768_v19 = vld [vmem:[%s2969_s22 + $0xe0] sm:$0xff] }
  0x22   : > { %v2782_v14 = vld [vmem:[%s3041_s21 + $0x90] sm:$0xff]  ;;  %v1769_v18 = vld [vmem:[%s2969_s22 + $0xe8] sm:$0xff]  ;;  %v2767_v20 = vld [vmem:[%s3041_s21 + $0x18] sm:$0xff] }
  0x23   : > { %892 = vmatpush.bf16.msra.mxu0 %v2717_v41  ;;  %2817 = vmatpush.bf16.msra.mxu2 %v2717_v41  ;;  %v1766_v15 = vld [vmem:[%s2969_s22 + $0xd0] sm:$0xff]  ;;  %v1767_v21 = vld [vmem:[%s2969_s22 + $0xd8] sm:$0xff]  ;;  %v1772_v23 = vld [vmem:[%s2969_s22 + $0x100] sm:$0xff] }
  0x24   : > { %1061 = vmatpush.bf16.msra.mxu1 %v2721_v42  ;;  %2825 = vmatpush.bf16.msra.mxu3 %v2721_v42  ;;  %v2783_v22 = vld [vmem:[%s3041_s21 + $0x98] sm:$0xff]  ;;  %v1770_v25 = vld [vmem:[%s2969_s22 + $0xf0] sm:$0xff]  ;;  %v2768_v28 = vld [vmem:[%s3041_s21 + $0x20] sm:$0xff] }
  0x25   : > { %1846 = vperm.xlu2 %2855, %v1748_v47   ;;  %1841 = vperm.xlu1 %2854, %v1747_v48   ;;  %v1771_v24 = vld [vmem:[%s2969_s22 + $0xf8] sm:$0xff]  ;;  %v1774_v27 = vld [vmem:[%s2969_s22 + $0x110] sm:$0xff]  ;;  %v1773_v29 = vld [vmem:[%s2969_s22 + $0x108] sm:$0xff] }
  0x26   : > { %1836 = vperm.xlu0 %2853, %v1746_v50   ;;  %v1775_v26 = vld [vmem:[%s2969_s22 + $0x118] sm:$0xff]  ;;  %v2784_v30 = vld [vmem:[%s3041_s21 + $0xa0] sm:$0xff]  ;;  %v1778_v32 = vld [vmem:[%s2969_s22 + $0x130] sm:$0xff] }
  0x27   : > { %893 = vmatpush.bf16.msra.mxu0 %v2709_v49  ;;  %2818 = vmatpush.bf16.msra.mxu2 %v2709_v49  ;;  %v1777_v33 = vld [vmem:[%s2969_s22 + $0x128] sm:$0xff]  ;;  %v1776_v34 = vld [vmem:[%s2969_s22 + $0x120] sm:$0xff]  ;;  %v1779_v39 = vld [vmem:[%s2969_s22 + $0x138] sm:$0xff] }
  0x28   : > { %1062 = vmatpush.bf16.msra.mxu1 %v2713_v51  ;;  %2826 = vmatpush.bf16.msra.mxu3 %v2713_v51  ;;  %v1781_v36 = vld [vmem:[%s2969_s22 + $0x148] sm:$0xff]  ;;  %v1780_v37 = vld [vmem:[%s2969_s22 + $0x140] sm:$0xff]  ;;  %v1783_v43 = vld [vmem:[%s2969_s22 + $0x158] sm:$0xff] }
  0x29   : > { %v2769_v38 = vld [vmem:[%s3041_s21 + $0x28] sm:$0xff]  ;;  %v1784_v42 = vld [vmem:[%s2969_s22 + $0x160] sm:$0xff]  ;;  %v1782_v44 = vld [vmem:[%s2969_s22 + $0x150] sm:$0xff] }
  0x2a   : > { %v2785_v40 = vld [vmem:[%s3041_s21 + $0xa8] sm:$0xff]  ;;  %v1787_v48 = vld [vmem:[%s2969_s22 + $0x178] sm:$0xff]  ;;  %v1786_v49 = vld [vmem:[%s2969_s22 + $0x170] sm:$0xff] }
  0x2b   : > { %894 = vmatpush.bf16.msra.mxu0 %v2701_v56  ;;  %2819 = vmatpush.bf16.msra.mxu2 %v2701_v56  ;;  %v2770_v50 = vld [vmem:[%s3041_s21 + $0x30] sm:$0xff]  ;;  %v1785_v51 = vld [vmem:[%s2969_s22 + $0x168] sm:$0xff] }
  0x2c   : > { %1063 = vmatpush.bf16.msra.mxu1 %v2705_v57  ;;  %2827 = vmatpush.bf16.msra.mxu3 %v2705_v57  ;;  %v2786_v52 = vld [vmem:[%s3041_s21 + $0xb0] sm:$0xff]  ;;  %v1789_v57 = vld [vmem:[%s2969_s22 + $0x188] sm:$0xff] }
  0x2d   : > { %1861 = vperm.xlu2 %2855, %v1751_v58   ;;  %1856 = vperm.xlu1 %2854, %v1750_v59   ;;  %v1790_v56 = vld [vmem:[%s2969_s22 + $0x190] sm:$0xff]  ;;  %v1788_v58 = vld [vmem:[%s2969_s22 + $0x180] sm:$0xff] }
  0x2e   : > { %1851 = vperm.xlu0 %2853, %v1749_v61   ;;  %895 = vmatmul.bf16.vlgmr.msra.gmra.mxu0 %v2764_v60 }
  0x2f   : > { %975 = vmatmul.bf16.vlgmr.msra.gmra.mxu2 %v2780_v62  ;;  %1064 = vmatmul.bf16.vlgmr.msra.gmra.mxu1 %v2764_v60 }
  0x30   : > { %1144 = vmatmul.bf16.vlgmr.msra.gmra.mxu3 %v2780_v62  ;;  %v1793_v62 = vld [vmem:[%s2969_s22 + $0x1a8] sm:$0xff] }
  0x35   : > { %1876 = vperm.xlu2 %2855, %v1754_v63   ;;  %1871 = vperm.xlu1 %2854, %v1753_v0   ;;  %v1792_v63 = vld [vmem:[%s2969_s22 + $0x1a0] sm:$0xff]  ;;  %v2771_v0 = vld [vmem:[%s3041_s21 + $0x38] sm:$0xff] }
  0x36   : > { %1866 = vperm.xlu0 %2853, %v1752_v1   ;;  %v1791_v1 = vld [vmem:[%s2969_s22 + $0x198] sm:$0xff] }
  0x3d   : > { %1891 = vperm.xlu2 %2855, %v1757_v2   ;;  %1886 = vperm.xlu1 %2854, %v1756_v3   ;;  %v2787_v2 = vld [vmem:[%s3041_s21 + $0xb8] sm:$0xff] }
  0x3e   : > { %1881 = vperm.xlu0 %2853, %v1755_v5   ;;  %900 = vmatmul.bf16.gmra.mxu0 %v2765_v4 }
  0x3f   : > { %980 = vmatmul.bf16.gmra.mxu2 %v2781_v6  ;;  %1069 = vmatmul.bf16.gmra.mxu1 %v2765_v4 }
  0x40   : > { %1149 = vmatmul.bf16.gmra.mxu3 %v2781_v6  ;;  %v1796_v6 = vld [vmem:[%s2969_s22 + $0x1c0] sm:$0xff] }
  0x45   : > { %1906 = vperm.xlu2 %2855, %v1760_v7   ;;  %1901 = vperm.xlu1 %2854, %v1759_v8   ;;  %v1795_v7 = vld [vmem:[%s2969_s22 + $0x1b8] sm:$0xff]  ;;  %v1794_v8 = vld [vmem:[%s2969_s22 + $0x1b0] sm:$0xff] }
  0x46   : > { %1896 = vperm.xlu0 %2853, %v1758_v9  }
  0x4d   : > { %1921 = vperm.xlu2 %2855, %v1763_v10   ;;  %1916 = vperm.xlu1 %2854, %v1762_v11  }
  0x4e   : > { %1911 = vperm.xlu0 %2853, %v1761_v13   ;;  %905 = vmatmul.bf16.gmra.mxu0 %v2766_v12  ;;  %v1798_v13 = vld [vmem:[%s2969_s22 + $0x1d0] sm:$0xff] }
  0x4f   : > { %985 = vmatmul.bf16.gmra.mxu2 %v2782_v14  ;;  %1074 = vmatmul.bf16.gmra.mxu1 %v2766_v12  ;;  %v1799_v12 = vld [vmem:[%s2969_s22 + $0x1d8] sm:$0xff] }
  0x50   : > { %1154 = vmatmul.bf16.gmra.mxu3 %v2782_v14  ;;  %v2772_v14 = vld [vmem:[%s3041_s21 + $0x40] sm:$0xff] }
  0x55   : > { %1936 = vperm.xlu2 %2855, %v1766_v15   ;;  %1931 = vperm.xlu1 %2854, %v1765_v16   ;;  %v1797_v16 = vld [vmem:[%s2969_s22 + $0x1c8] sm:$0xff] }
  0x56   : > { %1926 = vperm.xlu0 %2853, %v1764_v17   ;;  %v2788_v17 = vld [vmem:[%s3041_s21 + $0xc0] sm:$0xff] }
  0x5d   : > { %1951 = vperm.xlu2 %2855, %v1769_v18   ;;  %1946 = vperm.xlu1 %2854, %v1768_v19  }
  0x5e   : > { %1941 = vperm.xlu0 %2853, %v1767_v21   ;;  %910 = vmatmul.bf16.gmra.mxu0 %v2767_v20 }
  0x5f   : > { %990 = vmatmul.bf16.gmra.mxu2 %v2783_v22  ;;  %1079 = vmatmul.bf16.gmra.mxu1 %v2767_v20 }
  0x60   : > { %1159 = vmatmul.bf16.gmra.mxu3 %v2783_v22 }
  0x65   : > { %1966 = vperm.xlu2 %2855, %v1772_v23   ;;  %1961 = vperm.xlu1 %2854, %v1771_v24  }
  0x66   : > { %1956 = vperm.xlu0 %2853, %v1770_v25  }
  0x6d   : > { %1981 = vperm.xlu2 %2855, %v1775_v26   ;;  %1976 = vperm.xlu1 %2854, %v1774_v27   ;;  %v1802_v26 = vld [vmem:[%s2969_s22 + $0x1f0] sm:$0xff]  ;;  %v1801_v27 = vld [vmem:[%s2969_s22 + $0x1e8] sm:$0xff] }
  0x6e   : > { %1971 = vperm.xlu0 %2853, %v1773_v29   ;;  %915 = vmatmul.bf16.gmra.mxu0 %v2768_v28 }
  0x6f   : > { %v3080_v31 = vpop.permute.xlu2 %1826  ;;  %995 = vmatmul.bf16.gmra.mxu2 %v2784_v30  ;;  %1084 = vmatmul.bf16.gmra.mxu1 %v2768_v28 }
  0x70   : > { %1164 = vmatmul.bf16.gmra.mxu3 %v2784_v30 }
  0x75   : > { %1996 = vperm.xlu2 %2855, %v1778_v32   ;;  %1991 = vperm.xlu1 %2854, %v1777_v33   ;;  %v1800_v32 = vld [vmem:[%s2969_s22 + $0x1e0] sm:$0xff] }
  0x76   : > { %1986 = vperm.xlu0 %2853, %v1776_v34  }
  0x77   : > { %v3085_v35 = vpop.permute.xlu2 %1831 }
  0x7d   : > { %2011 = vperm.xlu2 %2855, %v1781_v36   ;;  %2006 = vperm.xlu1 %2854, %v1780_v37  }
  0x7e   : > { %2001 = vperm.xlu0 %2853, %v1779_v39   ;;  %920 = vmatmul.bf16.gmra.mxu0 %v2769_v38 }
  0x7f   : > { %v3092_v41 = vpop.permute.xlu2 %1846  ;;  %1000 = vmatmul.bf16.gmra.mxu2 %v2785_v40  ;;  %1089 = vmatmul.bf16.gmra.mxu1 %v2769_v38 }
  0x80   : > { %1169 = vmatmul.bf16.gmra.mxu3 %v2785_v40 }
  0x85   : > { %2026 = vperm.xlu2 %2855, %v1784_v42   ;;  %2021 = vperm.xlu1 %2854, %v1783_v43  }
  0x86   : > { %2016 = vperm.xlu0 %2853, %v1782_v44  }
  0x87   : > { %v3097_v45 = vpop.permute.xlu2 %1861  ;;  %v3099_v46 = vpop.permute.xlu1 %1816 }
  0x88   : > { %v3101_v47 = vpop.permute.xlu0 %1806 }
  0x8d   : > { %2041 = vperm.xlu2 %2855, %v1787_v48   ;;  %2036 = vperm.xlu1 %2854, %v1786_v49   ;;  %v2773_v48 = vld [vmem:[%s3041_s21 + $0x48] sm:$0xff] }
  0x8e   : > { %2031 = vperm.xlu0 %2853, %v1785_v51   ;;  %925 = vmatmul.bf16.gmra.mxu0 %v2770_v50 }
  0x8f   : > { %v3108_v53 = vpop.permute.xlu2 %1876  ;;  %v3110_v54 = vpop.permute.xlu1 %1821  ;;  %1005 = vmatmul.bf16.gmra.mxu2 %v2786_v52  ;;  %1094 = vmatmul.bf16.gmra.mxu1 %v2770_v50 }
  0x90   : > { %v3112_v55 = vpop.permute.xlu0 %1811  ;;  %1174 = vmatmul.bf16.gmra.mxu3 %v2786_v52  ;;  %v1803_v52 = vld [vmem:[%s2969_s22 + $0x1f8] sm:$0xff] }
  0x95   : > { %2056 = vperm.xlu2 %2855, %v1790_v56   ;;  %2051 = vperm.xlu1 %2854, %v1789_v57   ;;  %v2789_v56 = vld [vmem:[%s3041_s21 + $0xc8] sm:$0xff] }
  0x96   : > { %2046 = vperm.xlu0 %2853, %v1788_v58  }
  0x97   : > { %v3117_v59 = vpop.permute.xlu2 %1891  ;;  %v3119_v60 = vpop.permute.xlu1 %1841 }
  0x98   : > { %v3121_v61 = vpop.permute.xlu0 %1836 }
  0x9d   : > { %2071 = vperm.xlu2 %2855, %v1793_v62   ;;  %2066 = vperm.xlu1 %2854, %v1792_v63  }
  0x9e   : > { %2061 = vperm.xlu0 %2853, %v1791_v1   ;;  %930 = vmatmul.bf16.gmra.mxu0 %v2771_v0 }
  0x9f   : > { %v3128_v3 = vpop.permute.xlu2 %1906  ;;  %v3130_v4 = vpop.permute.xlu1 %1856  ;;  %1010 = vmatmul.bf16.gmra.mxu2 %v2787_v2  ;;  %1099 = vmatmul.bf16.gmra.mxu1 %v2771_v0 }
  0xa0   : > { %v3132_v5 = vpop.permute.xlu0 %1851  ;;  %1179 = vmatmul.bf16.gmra.mxu3 %v2787_v2 }
  0xa5   : > { %2086 = vperm.xlu2 %2855, %v1796_v6   ;;  %2081 = vperm.xlu1 %2854, %v1795_v7  }
  0xa6   : > { %2076 = vperm.xlu0 %2853, %v1794_v8  }
  0xa7   : > { %v3137_v9 = vpop.permute.xlu2 %1921  ;;  %v3139_v10 = vpop.permute.xlu1 %1871 }
  0xa8   : > { %v3141_v11 = vpop.permute.xlu0 %1866 }
  0xab   : > { %v896_v15 = vpop.f32.mrf.mxu0 }
  0xac   : > { %v1065_v18 = vpop.f32.mrf.mxu1 }
  0xad   : > { %v1612_v19 = vmax.f32 %v896_v15, %v1065_v18  ;;  %2101 = vperm.xlu2 %2855, %v1799_v12   ;;  %2096 = vperm.xlu1 %2854, %v1798_v13  }
  0xae   : > { %2091 = vperm.xlu0 %2853, %v1797_v16   ;;  %935 = vmatmul.bf16.gmra.mxu0 %v2772_v14 }
  0xaf   : > { %v1676_v20 = vand.u32 2147483647, %v1612_v19  ;;  %v3148_v21 = vpop.permute.xlu2 %1936  ;;  %v3150_v22 = vpop.permute.xlu1 %1886  ;;  %1015 = vmatmul.bf16.gmra.mxu2 %v2788_v17  ;;  %1104 = vmatmul.bf16.gmra.mxu1 %v2772_v14 }
  0xb0   : > { %v3152_v23 = vpop.permute.xlu0 %1881  ;;  %1184 = vmatmul.bf16.gmra.mxu3 %v2788_v17 }
  0xb1   : > { %v2124_v24 = vmul.f32 %v3101_v47, %v1676_v20 }
  0xb2   : > { %v976_v25 = vpop.f32.mrf.mxu2 }
  0xb3   : > { %v2188_v28 = vadd.f32 1e-06, %v2124_v24  ;;  %v1145_v29 = vpop.f32.mrf.mxu3  ;;  %v898_v30 = vpop.f32.mrf.mxu0 }
  0xb4   : > { %v1067_v33 = vpop.f32.mrf.mxu1  ;;  %v1644_v44 = vmax.f32 %v976_v25, %v1145_v29 }
  0xb5   : > { %v2252_v34 = vmul.f32 %v2188_v28, %v1612_v19  ;;  %v1613_v36 = vmax.f32 %v898_v30, %v1067_v33  ;;  %2116 = vperm.xlu2 %2855, %v1802_v26   ;;  %2111 = vperm.xlu1 %2854, %v1801_v27   ;;  %v2774_v30 = vld [vmem:[%s3041_s21 + $0x50] sm:$0xff] }
  0xb6   : > { %2106 = vperm.xlu0 %2853, %v1800_v32   ;;  %v1708_v63 = vand.u32 2147483647, %v1644_v44 }
  0xb7   : > { %v2316_v37 = vmul.f32 19.245008, %v2252_v34  ;;  %v1677_v38 = vand.u32 2147483647, %v1613_v36  ;;  %v3165_v39 = vpop.permute.xlu2 %1951  ;;  %v3167_v40 = vpop.permute.xlu1 %1901 }
  0xb8   : > { %v3169_v42 = vpop.permute.xlu0 %1896 }
  0xb9   : > { %2380 = vst [vmem:[%s3163_s25] sm:$0xff] %v2316_v37  ;;  %v2125_v43 = vmul.f32 %v3112_v55, %v1677_v38 }
  0xba   : > { %v3173_v47 = vpop.f32.mrf.mxu2 }
  0xbb   : > { %v2189_v49 = vadd.f32 1e-06, %v2125_v43  ;;  %v3176_v50 = vpop.f32.mrf.mxu3  ;;  %v901_v51 = vpop.f32.mrf.mxu0 }
  0xbc   : > { %v1070_v57 = vpop.f32.mrf.mxu1 }
  0xbd   : > { %v2253_v58 = vmul.f32 %v2189_v49, %v1613_v36  ;;  %v1614_v62 = vmax.f32 %v901_v51, %v1070_v57  ;;  %v2790_v36 = vld [vmem:[%s3041_s21 + $0xd0] sm:$0xff] }
  0xbe   : > { %2121 = vperm.xlu0 %2853, %v1803_v52   ;;  %940 = vmatmul.bf16.gmra.mxu0 %v2773_v48 }
  0xbf   : > { %v2317_v0 = vmul.f32 19.245008, %v2253_v58  ;;  %v1678_v1 = vand.u32 2147483647, %v1614_v62  ;;  %v1967_v55 = vpop.permute.xlu2 %1966  ;;  %v3180_v2 = vpop.permute.xlu1 %1916  ;;  %1020 = vmatmul.bf16.gmra.mxu2 %v2789_v56  ;;  %1109 = vmatmul.bf16.gmra.mxu1 %v2773_v48 }
  0xc0   : > { %v2156_v6 = vmul.f32 %v1967_v55, %v1708_v63  ;;  %v3182_v7 = vpop.permute.xlu0 %1911  ;;  %1189 = vmatmul.bf16.gmra.mxu3 %v2789_v56 }
  0xc1   : > { %2381 = vst [vmem:[%s3163_s25 + $0x8] sm:$0xff] %v2317_v0  ;;  %v2126_v8 = vmul.f32 %v3099_v46, %v1678_v1 }
  0xc2   : > { %v2220_v12 = vadd.f32 1e-06, %v2156_v6  ;;  %v981_v13 = vpop.f32.mrf.mxu2 }
  0xc3   : > { %v2190_v14 = vadd.f32 1e-06, %v2126_v8  ;;  %v1150_v15 = vpop.f32.mrf.mxu3  ;;  %v903_v16 = vpop.f32.mrf.mxu0 }
  0xc4   : > { %v2284_v17 = vmul.f32 %v2220_v12, %v1644_v44  ;;  %v1072_v18 = vpop.f32.mrf.mxu1 }
  0xc5   : > { %v2254_v19 = vmul.f32 %v2190_v14, %v1614_v62  ;;  %v1615_v20 = vmax.f32 %v903_v16, %v1072_v18 }
  0xc6   : > { %v2348_v24 = vmul.f32 19.245008, %v2284_v17 }
  0xc7   : > { %v2318_v25 = vmul.f32 19.245008, %v2254_v19  ;;  %v1679_v26 = vand.u32 2147483647, %v1615_v20  ;;  %v3186_v27 = vpop.permute.xlu1 %1931  ;;  %v1982_v51 = vpop.permute.xlu2 %1981 }
  0xc8   : > { %2412 = vst [vmem:[%s3163_s25 + $0x100] sm:$0xff] %v2348_v24  ;;  %v3189_v28 = vpop.permute.xlu0 %1926  ;;  %v1646_v24 = vmax.f32 %v981_v13, %v1150_v15 }
  0xc9   : > { %2382 = vst [vmem:[%s3163_s25 + $0x10] sm:$0xff] %v2318_v25  ;;  %v2127_v46 = vmul.f32 %v3110_v54, %v1679_v26  ;;  %v2775_v26 = vld [vmem:[%s3041_s21 + $0x58] sm:$0xff] }
  0xca   : > { %v983_v29 = vpop.f32.mrf.mxu2 }
  0xcb   : > { %v2191_v32 = vadd.f32 1e-06, %v2127_v46  ;;  %v1152_v33 = vpop.f32.mrf.mxu3  ;;  %v906_v34 = vpop.f32.mrf.mxu0  ;;  %v1645_v46 = vmax.f32 %v3173_v47, %v3176_v50 }
  0xcc   : > { %v1647_v37 = vmax.f32 %v983_v29, %v1152_v33  ;;  %v1075_v38 = vpop.f32.mrf.mxu1  ;;  %v2791_v33 = vld [vmem:[%s3041_s21 + $0xd8] sm:$0xff] }
  0xcd   : > { %v2255_v43 = vmul.f32 %v2191_v32, %v1615_v20  ;;  %v1616_v44 = vmax.f32 %v906_v34, %v1075_v38  ;;  %v1710_v38 = vand.u32 2147483647, %v1646_v24 }
  0xce   : > { %v1711_v48 = vand.u32 2147483647, %v1647_v37  ;;  %945 = vmatmul.bf16.gmra.mxu0 %v2774_v30 }
  0xcf   : > { %v2319_v49 = vmul.f32 19.245008, %v2255_v43  ;;  %v1680_v52 = vand.u32 2147483647, %v1616_v44  ;;  %v3195_v56 = vpop.permute.xlu1 %1946  ;;  %1025 = vmatmul.bf16.gmra.mxu2 %v2790_v36  ;;  %1114 = vmatmul.bf16.gmra.mxu1 %v2774_v30 }
  0xd0   : > { %v2159_v54 = vmul.f32 %v1982_v51, %v1711_v48  ;;  %v3197_v57 = vpop.permute.xlu0 %1941  ;;  %1194 = vmatmul.bf16.gmra.mxu3 %v2790_v36 }
  0xd1   : > { %2383 = vst [vmem:[%s3163_s25 + $0x18] sm:$0xff] %v2319_v49  ;;  %v2128_v58 = vmul.f32 %v3080_v31, %v1680_v52 }
  0xd2   : > { %v2223_v62 = vadd.f32 1e-06, %v2159_v54  ;;  %v986_v63 = vpop.f32.mrf.mxu2 }
  0xd3   : > { %v2192_v0 = vadd.f32 1e-06, %v2128_v58  ;;  %v1155_v1 = vpop.f32.mrf.mxu3  ;;  %v908_v55 = vpop.f32.mrf.mxu0 }
  0xd4   : > { %v2287_v6 = vmul.f32 %v2223_v62, %v1647_v37  ;;  %v1077_v8 = vpop.f32.mrf.mxu1  ;;  %v1648_v47 = vmax.f32 %v986_v63, %v1155_v1 }
  0xd5   : > { %v2256_v12 = vmul.f32 %v2192_v0, %v1616_v44  ;;  %v1617_v14 = vmax.f32 %v908_v55, %v1077_v8 }
  0xd6   : > { %v2351_v16 = vmul.f32 19.245008, %v2287_v6  ;;  %v1712_v63 = vand.u32 2147483647, %v1648_v47 }
  0xd7   : > { %v2320_v17 = vmul.f32 19.245008, %v2256_v12  ;;  %v1681_v18 = vand.u32 2147483647, %v1617_v14  ;;  %v3201_v19 = vpop.permute.xlu1 %1961 }
  0xd8   : > { %2415 = vst [vmem:[%s3163_s25 + $0x118] sm:$0xff] %v2351_v16  ;;  %v3204_v20 = vpop.permute.xlu0 %1956 }
  0xd9   : > { %2384 = vst [vmem:[%s3163_s25 + $0x20] sm:$0xff] %v2320_v17  ;;  %v2129_v31 = vmul.f32 %v3085_v35, %v1681_v18  ;;  %v1709_v35 = vand.u32 2147483647, %v1645_v46 }
  0xda   : > { %v988_v25 = vpop.f32.mrf.mxu2 }
  0xdb   : > { %v2193_v29 = vadd.f32 1e-06, %v2129_v31  ;;  %v1157_v30 = vpop.f32.mrf.mxu3  ;;  %v911_v32 = vpop.f32.mrf.mxu0 }
  0xdc   : > { %v1080_v34 = vpop.f32.mrf.mxu1  ;;  %v1649_v51 = vmax.f32 %v988_v25, %v1157_v30  ;;  %v1997_v31 = vpop.permute.xlu2 %1996 }
  0xdd   : > { %v2257_v36 = vmul.f32 %v2193_v29, %v1617_v14  ;;  %v1618_v37 = vmax.f32 %v911_v32, %v1080_v34 }
  0xde   : > { %950 = vmatmul.bf16.gmra.mxu0 %v2775_v26  ;;  %v1713_v18 = vand.u32 2147483647, %v1649_v51 }
  0xdf   : > { %v2321_v43 = vmul.f32 19.245008, %v2257_v36  ;;  %v1682_v44 = vand.u32 2147483647, %v1618_v37  ;;  %v1977_v48 = vpop.permute.xlu1 %1976  ;;  %1030 = vmatmul.bf16.gmra.mxu2 %v2791_v33  ;;  %1119 = vmatmul.bf16.gmra.mxu1 %v2775_v26 }
  0xe0   : > { %v2158_v13 = vmul.f32 %v1977_v48, %v1710_v38  ;;  %v1972_v15 = vpop.permute.xlu0 %1971  ;;  %1199 = vmatmul.bf16.gmra.mxu3 %v2791_v33 }
  0xe1   : > { %2385 = vst [vmem:[%s3163_s25 + $0x28] sm:$0xff] %v2321_v43  ;;  %v2130_v50 = vmul.f32 %v3121_v61, %v1682_v44  ;;  %v2157_v49 = vmul.f32 %v1972_v15, %v1709_v35  ;;  %v2776_v43 = vld [vmem:[%s3041_s21 + $0x60] sm:$0xff] }
  0xe2   : > { %v2222_v52 = vadd.f32 1e-06, %v2158_v13  ;;  %v991_v54 = vpop.f32.mrf.mxu2  ;;  %v2792_v15 = vld [vmem:[%s3041_s21 + $0xe0] sm:$0xff] }
  0xe3   : > { %v2194_v58 = vadd.f32 1e-06, %v2130_v50  ;;  %v2221_v62 = vadd.f32 1e-06, %v2157_v49  ;;  %v1160_v0 = vpop.f32.mrf.mxu3  ;;  %v913_v55 = vpop.f32.mrf.mxu0 }
  0xe4   : > { %v2286_v6 = vmul.f32 %v2222_v52, %v1646_v24  ;;  %v1650_v8 = vmax.f32 %v991_v54, %v1160_v0  ;;  %v1082_v12 = vpop.f32.mrf.mxu1 }
  0xe5   : > { %v2258_v14 = vmul.f32 %v2194_v58, %v1618_v37  ;;  %v2285_v16 = vmul.f32 %v2221_v62, %v1645_v46  ;;  %v1619_v17 = vmax.f32 %v913_v55, %v1082_v12 }
  0xe6   : > { %v2350_v1 = vmul.f32 19.245008, %v2286_v6  ;;  %v1714_v61 = vand.u32 2147483647, %v1650_v8 }
  0xe7   : > { %v2322_v25 = vmul.f32 19.245008, %v2258_v14  ;;  %v2349_v26 = vmul.f32 19.245008, %v2285_v16  ;;  %v1683_v29 = vand.u32 2147483647, %v1619_v17  ;;  %v1992_v30 = vpop.permute.xlu1 %1991 }
  0xe8   : > { %2414 = vst [vmem:[%s3163_s25 + $0x110] sm:$0xff] %v2350_v1  ;;  %v2162_v24 = vmul.f32 %v1997_v31, %v1714_v61  ;;  %v2161_v32 = vmul.f32 %v1992_v30, %v1713_v18  ;;  %v1987_v33 = vpop.permute.xlu0 %1986 }
  0xe9   : > { %2386 = vst [vmem:[%s3163_s25 + $0x30] sm:$0xff] %v2322_v25  ;;  %v2131_v46 = vmul.f32 %v3119_v60, %v1683_v29  ;;  %v2160_v34 = vmul.f32 %v1987_v33, %v1712_v63 }
  0xea   : > { %2413 = vst [vmem:[%s3163_s25 + $0x108] sm:$0xff] %v2349_v26  ;;  %v2226_v36 = vadd.f32 1e-06, %v2162_v24  ;;  %v2225_v37 = vadd.f32 1e-06, %v2161_v32  ;;  %v993_v38 = vpop.f32.mrf.mxu2 }
  0xeb   : > { %v2195_v44 = vadd.f32 1e-06, %v2131_v46  ;;  %v2224_v48 = vadd.f32 1e-06, %v2160_v34  ;;  %v1162_v35 = vpop.f32.mrf.mxu3  ;;  %v916_v13 = vpop.f32.mrf.mxu0 }
  0xec   : > { %v2290_v50 = vmul.f32 %v2226_v36, %v1650_v8  ;;  %v2289_v49 = vmul.f32 %v2225_v37, %v1649_v51  ;;  %v1651_v52 = vmax.f32 %v993_v38, %v1162_v35  ;;  %v1085_v54 = vpop.f32.mrf.mxu1 }
  0xed   : > { %v2259_v58 = vmul.f32 %v2195_v44, %v1619_v17  ;;  %v2288_v62 = vmul.f32 %v2224_v48, %v1648_v47  ;;  %v1620_v60 = vmax.f32 %v916_v13, %v1085_v54  ;;  %v2793_v13 = vld [vmem:[%s3041_s21 + $0xe8] sm:$0xff] }
  0xee   : > { %v2354_v0 = vmul.f32 19.245008, %v2290_v50  ;;  %v2353_v55 = vmul.f32 19.245008, %v2289_v49  ;;  %v1715_v6 = vand.u32 2147483647, %v1651_v52  ;;  %955 = vmatmul.bf16.gmra.mxu0 %v2776_v43 }
  0xef   : > { %v2323_v12 = vmul.f32 19.245008, %v2259_v58  ;;  %v2352_v14 = vmul.f32 19.245008, %v2288_v62  ;;  %v1684_v16 = vand.u32 2147483647, %v1620_v60  ;;  %1035 = vmatmul.bf16.gmra.mxu2 %v2792_v15  ;;  %1124 = vmatmul.bf16.gmra.mxu1 %v2776_v43 }
  0xf0   : > { %2418 = vst [vmem:[%s3163_s25 + $0x130] sm:$0xff] %v2354_v0  ;;  %v2002_v8 = vpop.permute.xlu0 %2001  ;;  %1204 = vmatmul.bf16.gmra.mxu3 %v2792_v15  ;;  %v2777_v43 = vld [vmem:[%s3041_s21 + $0x68] sm:$0xff] }
  0xf1   : > { %2387 = vst [vmem:[%s3163_s25 + $0x38] sm:$0xff] %v2323_v12  ;;  %v2132_v51 = vmul.f32 %v3092_v41, %v1684_v16  ;;  %v2163_v17 = vmul.f32 %v2002_v8, %v1715_v6  ;;  %v2007_v41 = vpop.permute.xlu1 %2006 }
  0xf2   : > { %2417 = vst [vmem:[%s3163_s25 + $0x128] sm:$0xff] %v2353_v55  ;;  %v996_v47 = vpop.f32.mrf.mxu2 }
  0xf3   : > { %2416 = vst [vmem:[%s3163_s25 + $0x120] sm:$0xff] %v2352_v14  ;;  %v2196_v63 = vadd.f32 1e-06, %v2132_v51  ;;  %v2227_v1 = vadd.f32 1e-06, %v2163_v17  ;;  %v1165_v61 = vpop.f32.mrf.mxu3  ;;  %v918_v18 = vpop.f32.mrf.mxu0 }
  0xf4   : > { %v1652_v31 = vmax.f32 %v996_v47, %v1165_v61  ;;  %v1087_v25 = vpop.f32.mrf.mxu1 }
  0xf5   : > { %v2260_v26 = vmul.f32 %v2196_v63, %v1620_v60  ;;  %v2291_v29 = vmul.f32 %v2227_v1, %v1651_v52  ;;  %v1621_v30 = vmax.f32 %v918_v18, %v1087_v25  ;;  %v2012_v60 = vpop.permute.xlu2 %2011 }
  0xf6   : > { %v1716_v24 = vand.u32 2147483647, %v1652_v31 }
  0xf7   : > { %v2324_v32 = vmul.f32 19.245008, %v2260_v26  ;;  %v2355_v33 = vmul.f32 19.245008, %v2291_v29  ;;  %v1685_v46 = vand.u32 2147483647, %v1621_v30 }
  0xf8   : > { %v2164_v34 = vmul.f32 %v2007_v41, %v1716_v24  ;;  %v2017_v25 = vpop.permute.xlu0 %2016  ;;  %v2778_v41 = vld [vmem:[%s3041_s21 + $0x70] sm:$0xff] }
  0xf9   : > { %2388 = vst [vmem:[%s3163_s25 + $0x40] sm:$0xff] %v2324_v32  ;;  %v2133_v36 = vmul.f32 %v3132_v5, %v1685_v46 }
  0xfa   : > { %2419 = vst [vmem:[%s3163_s25 + $0x138] sm:$0xff] %v2355_v33  ;;  %v2228_v37 = vadd.f32 1e-06, %v2164_v34  ;;  %v998_v38 = vpop.f32.mrf.mxu2 }
  0xfb   : > { %v2197_v44 = vadd.f32 1e-06, %v2133_v36  ;;  %v1167_v48 = vpop.f32.mrf.mxu3  ;;  %v921_v35 = vpop.f32.mrf.mxu0  ;;  %v2794_v36 = vld [vmem:[%s3041_s21 + $0xf0] sm:$0xff] }
  0xfc   : > { %v2292_v15 = vmul.f32 %v2228_v37, %v1652_v31  ;;  %v1653_v50 = vmax.f32 %v998_v38, %v1167_v48  ;;  %v1090_v49 = vpop.f32.mrf.mxu1 }
  0xfd   : > { %v2261_v52 = vmul.f32 %v2197_v44, %v1621_v30  ;;  %v1622_v54 = vmax.f32 %v921_v35, %v1090_v49 }
  0xfe   : > { %v2356_v58 = vmul.f32 19.245008, %v2292_v15  ;;  %v1717_v62 = vand.u32 2147483647, %v1653_v50  ;;  %960 = vmatmul.bf16.gmra.mxu0 %v2777_v43  ;;  %v2022_v15 = vpop.permute.xlu1 %2021 }
  0xff   : > { %v2325_v5 = vmul.f32 19.245008, %v2261_v52  ;;  %v1686_v0 = vand.u32 2147483647, %v1622_v54  ;;  %1040 = vmatmul.bf16.gmra.mxu2 %v2793_v13  ;;  %1129 = vmatmul.bf16.gmra.mxu1 %v2777_v43 }
 0x100   : > { %2420 = vst [vmem:[%s3163_s25 + $0x140] sm:$0xff] %v2356_v58  ;;  %v2165_v55 = vmul.f32 %v2012_v60, %v1717_v62  ;;  %1209 = vmatmul.bf16.gmra.mxu3 %v2793_v13 }
 0x101   : > { %2389 = vst [vmem:[%s3163_s25 + $0x48] sm:$0xff] %v2325_v5  ;;  %v2134_v6 = vmul.f32 %v3130_v4, %v1686_v0 }
 0x102   : > { %v2229_v12 = vadd.f32 1e-06, %v2165_v55  ;;  %v1001_v14 = vpop.f32.mrf.mxu2 }
 0x103   : > { %v2198_v16 = vadd.f32 1e-06, %v2134_v6  ;;  %v1170_v8 = vpop.f32.mrf.mxu3  ;;  %v923_v51 = vpop.f32.mrf.mxu0 }
 0x104   : > { %v2293_v17 = vmul.f32 %v2229_v12, %v1653_v50  ;;  %v1654_v47 = vmax.f32 %v1001_v14, %v1170_v8  ;;  %v1092_v63 = vpop.f32.mrf.mxu1 }
 0x105   : > { %v2262_v1 = vmul.f32 %v2198_v16, %v1622_v54  ;;  %v1623_v61 = vmax.f32 %v923_v51, %v1092_v63  ;;  %v2027_v51 = vpop.permute.xlu2 %2026 }
 0x106   : > { %v2357_v18 = vmul.f32 19.245008, %v2293_v17  ;;  %v1718_v31 = vand.u32 2147483647, %v1654_v47 }
 0x107   : > { %v2326_v26 = vmul.f32 19.245008, %v2262_v1  ;;  %v1687_v29 = vand.u32 2147483647, %v1623_v61 }
 0x108   : > { %2421 = vst [vmem:[%s3163_s25 + $0x148] sm:$0xff] %v2357_v18  ;;  %v2166_v4 = vmul.f32 %v2017_v25, %v1718_v31  ;;  %v2779_v18 = vld [vmem:[%s3041_s21 + $0x78] sm:$0xff] }
 0x109   : > { %2390 = vst [vmem:[%s3163_s25 + $0x50] sm:$0xff] %v2326_v26  ;;  %v2135_v30 = vmul.f32 %v3097_v45, %v1687_v29  ;;  %v2795_v29 = vld [vmem:[%s3041_s21 + $0xf8] sm:$0xff] }
 0x10a   : > { %v2230_v24 = vadd.f32 1e-06, %v2166_v4  ;;  %v1003_v32 = vpop.f32.mrf.mxu2 }
 0x10b   : > { %v2199_v33 = vadd.f32 1e-06, %v2135_v30  ;;  %v1172_v46 = vpop.f32.mrf.mxu3  ;;  %v926_v34 = vpop.f32.mrf.mxu0 }
 0x10c   : > { %v2294_v37 = vmul.f32 %v2230_v24, %v1654_v47  ;;  %v1655_v38 = vmax.f32 %v1003_v32, %v1172_v46  ;;  %v1095_v43 = vpop.f32.mrf.mxu1 }
 0x10d   : > { %v2263_v44 = vmul.f32 %v2199_v33, %v1623_v61  ;;  %v1624_v48 = vmax.f32 %v926_v34, %v1095_v43  ;;  %v2032_v34 = vpop.permute.xlu0 %2031 }
 0x10e   : > { %v2358_v35 = vmul.f32 19.245008, %v2294_v37  ;;  %v1719_v13 = vand.u32 2147483647, %v1655_v38  ;;  %965 = vmatmul.bf16.gmra.mxu0 %v2778_v41 }
 0x10f   : > { %v2327_v50 = vmul.f32 19.245008, %v2263_v44  ;;  %v1688_v45 = vand.u32 2147483647, %v1624_v48  ;;  %1045 = vmatmul.bf16.gmra.mxu2 %v2794_v36  ;;  %1134 = vmatmul.bf16.gmra.mxu1 %v2778_v41 }
 0x110   : > { %2422 = vst [vmem:[%s3163_s25 + $0x150] sm:$0xff] %v2358_v35  ;;  %v2167_v49 = vmul.f32 %v2022_v15, %v1719_v13  ;;  %1214 = vmatmul.bf16.gmra.mxu3 %v2794_v36 }
 0x111   : > { %2391 = vst [vmem:[%s3163_s25 + $0x58] sm:$0xff] %v2327_v50  ;;  %v2136_v52 = vmul.f32 %v3141_v11, %v1688_v45 }
 0x112   : > { %v2231_v54 = vadd.f32 1e-06, %v2167_v49  ;;  %v1006_v58 = vpop.f32.mrf.mxu2 }
 0x113   : > { %v2200_v62 = vadd.f32 1e-06, %v2136_v52  ;;  %v1175_v60 = vpop.f32.mrf.mxu3  ;;  %v928_v5 = vpop.f32.mrf.mxu0 }
 0x114   : > { %v2295_v0 = vmul.f32 %v2231_v54, %v1655_v38  ;;  %v1656_v55 = vmax.f32 %v1006_v58, %v1175_v60  ;;  %v1097_v6 = vpop.f32.mrf.mxu1 }
 0x115   : > { %v2264_v12 = vmul.f32 %v2200_v62, %v1624_v48  ;;  %v1625_v14 = vmax.f32 %v928_v5, %v1097_v6  ;;  %v2037_v62 = vpop.permute.xlu1 %2036 }
 0x116   : > { %v2359_v16 = vmul.f32 19.245008, %v2295_v0  ;;  %v1720_v8 = vand.u32 2147483647, %v1656_v55 }
 0x117   : > { %v2328_v17 = vmul.f32 19.245008, %v2264_v12  ;;  %v1689_v47 = vand.u32 2147483647, %v1625_v14 }
 0x118   : > { %2423 = vst [vmem:[%s3163_s25 + $0x158] sm:$0xff] %v2359_v16  ;;  %v2168_v11 = vmul.f32 %v2027_v51, %v1720_v8 }
 0x119   : > { %2392 = vst [vmem:[%s3163_s25 + $0x60] sm:$0xff] %v2328_v17  ;;  %v2137_v63 = vmul.f32 %v3139_v10, %v1689_v47 }
 0x11a   : > { %v2232_v1 = vadd.f32 1e-06, %v2168_v11  ;;  %v1008_v61 = vpop.f32.mrf.mxu2 }
 0x11b   : > { %v2201_v31 = vadd.f32 1e-06, %v2137_v63  ;;  %v1177_v25 = vpop.f32.mrf.mxu3  ;;  %v931_v26 = vpop.f32.mrf.mxu0 }
 0x11c   : > { %v2296_v4 = vmul.f32 %v2232_v1, %v1656_v55  ;;  %v1657_v30 = vmax.f32 %v1008_v61, %v1177_v25  ;;  %v1100_v24 = vpop.f32.mrf.mxu1  ;;  %v2042_v61 = vpop.permute.xlu2 %2041 }
 0x11d   : > { %v2265_v32 = vmul.f32 %v2201_v31, %v1625_v14  ;;  %v1626_v41 = vmax.f32 %v931_v26, %v1100_v24 }
 0x11e   : > { %v2360_v33 = vmul.f32 19.245008, %v2296_v4  ;;  %v1721_v46 = vand.u32 2147483647, %v1657_v30  ;;  %970 = vmatmul.bf16.gmra.mxu0 %v2779_v18 }
 0x11f   : > { %v2329_v36 = vmul.f32 19.245008, %v2265_v32  ;;  %v1690_v10 = vand.u32 2147483647, %v1626_v41  ;;  %1050 = vmatmul.bf16.gmra.mxu2 %v2795_v29  ;;  %1139 = vmatmul.bf16.gmra.mxu1 %v2779_v18 }
 0x120   : > { %2424 = vst [vmem:[%s3163_s25 + $0x160] sm:$0xff] %v2360_v33  ;;  %v2169_v37 = vmul.f32 %v2032_v34, %v1721_v46  ;;  %1219 = vmatmul.bf16.gmra.mxu3 %v2795_v29 }
 0x121   : > { %2393 = vst [vmem:[%s3163_s25 + $0x68] sm:$0xff] %v2329_v36  ;;  %v2138_v38 = vmul.f32 %v3108_v53, %v1690_v10 }
 0x122   : > { %v2233_v43 = vadd.f32 1e-06, %v2169_v37  ;;  %v1011_v44 = vpop.f32.mrf.mxu2  ;;  %v2047_v37 = vpop.permute.xlu0 %2046 }
 0x123   : > { %v2202_v48 = vadd.f32 1e-06, %v2138_v38  ;;  %v1180_v35 = vpop.f32.mrf.mxu3  ;;  %v933_v13 = vpop.f32.mrf.mxu0 }
 0x124   : > { %v2297_v15 = vmul.f32 %v2233_v43, %v1657_v30  ;;  %v1658_v50 = vmax.f32 %v1011_v44, %v1180_v35  ;;  %v1102_v45 = vpop.f32.mrf.mxu1 }
 0x125   : > { %v2266_v49 = vmul.f32 %v2202_v48, %v1626_v41  ;;  %v1627_v52 = vmax.f32 %v933_v13, %v1102_v45 }
 0x126   : > { %v2361_v54 = vmul.f32 19.245008, %v2297_v15  ;;  %v1722_v58 = vand.u32 2147483647, %v1658_v50 }
 0x127   : > { %v2330_v60 = vmul.f32 19.245008, %v2266_v49  ;;  %v1691_v5 = vand.u32 2147483647, %v1627_v52 }
 0x128   : > { %2425 = vst [vmem:[%s3163_s25 + $0x168] sm:$0xff] %v2361_v54  ;;  %v2170_v0 = vmul.f32 %v2037_v62, %v1722_v58 }
 0x129   : > { %2394 = vst [vmem:[%s3163_s25 + $0x70] sm:$0xff] %v2330_v60  ;;  %v2139_v53 = vmul.f32 %v3152_v23, %v1691_v5  ;;  %v2052_v5 = vpop.permute.xlu1 %2051 }
 0x12a   : > { %v2234_v55 = vadd.f32 1e-06, %v2170_v0  ;;  %v1013_v6 = vpop.f32.mrf.mxu2 }
 0x12b   : > { %v2203_v12 = vadd.f32 1e-06, %v2139_v53  ;;  %v1182_v14 = vpop.f32.mrf.mxu3  ;;  %v936_v16 = vpop.f32.mrf.mxu0 }
 0x12c   : > { %v2298_v8 = vmul.f32 %v2234_v55, %v1658_v50  ;;  %v1659_v51 = vmax.f32 %v1013_v6, %v1182_v14  ;;  %v1105_v17 = vpop.f32.mrf.mxu1 }
 0x12d   : > { %v2267_v47 = vmul.f32 %v2203_v12, %v1627_v52  ;;  %v1628_v11 = vmax.f32 %v936_v16, %v1105_v17 }
 0x12e   : > { %v2362_v63 = vmul.f32 19.245008, %v2298_v8  ;;  %v1723_v1 = vand.u32 2147483647, %v1659_v51 }
 0x12f   : > { %v2331_v18 = vmul.f32 19.245008, %v2267_v47  ;;  %v1692_v31 = vand.u32 2147483647, %v1628_v11 }
 0x130   : > { %2426 = vst [vmem:[%s3163_s25 + $0x170] sm:$0xff] %v2362_v63  ;;  %v2171_v25 = vmul.f32 %v2042_v61, %v1723_v1 }
 0x131   : > { %2395 = vst [vmem:[%s3163_s25 + $0x78] sm:$0xff] %v2331_v18  ;;  %v2140_v23 = vmul.f32 %v3150_v22, %v1692_v31  ;;  %v2057_v18 = vpop.permute.xlu2 %2056 }
 0x132   : > { %v2235_v26 = vadd.f32 1e-06, %v2171_v25  ;;  %v1016_v29 = vpop.f32.mrf.mxu2 }
 0x133   : > { %v2204_v4 = vadd.f32 1e-06, %v2140_v23  ;;  %v1185_v30 = vpop.f32.mrf.mxu3  ;;  %v938_v24 = vpop.f32.mrf.mxu0 }
 0x134   : > { %v2299_v32 = vmul.f32 %v2235_v26, %v1659_v51  ;;  %v1660_v41 = vmax.f32 %v1016_v29, %v1185_v30  ;;  %v1107_v33 = vpop.f32.mrf.mxu1 }
 0x135   : > { %v2268_v46 = vmul.f32 %v2204_v4, %v1628_v11  ;;  %v1629_v34 = vmax.f32 %v938_v24, %v1107_v33 }
 0x136   : > { %v2363_v36 = vmul.f32 19.245008, %v2299_v32  ;;  %v1724_v10 = vand.u32 2147483647, %v1660_v41 }
 0x137   : > { %v2332_v38 = vmul.f32 19.245008, %v2268_v46  ;;  %v1693_v43 = vand.u32 2147483647, %v1629_v34 }
 0x138   : > { %2427 = vst [vmem:[%s3163_s25 + $0x178] sm:$0xff] %v2363_v36  ;;  %v2172_v44 = vmul.f32 %v2047_v37, %v1724_v10  ;;  %v2062_v37 = vpop.permute.xlu0 %2061 }
 0x139   : > { %2396 = vst [vmem:[%s3163_s25 + $0x80] sm:$0xff] %v2332_v38  ;;  %v2141_v22 = vmul.f32 %v3117_v59, %v1693_v43 }
 0x13a   : > { %v2236_v48 = vadd.f32 1e-06, %v2172_v44  ;;  %v1018_v35 = vpop.f32.mrf.mxu2 }
 0x13b   : > { %v2205_v13 = vadd.f32 1e-06, %v2141_v22  ;;  %v1187_v15 = vpop.f32.mrf.mxu3  ;;  %v941_v50 = vpop.f32.mrf.mxu0 }
 0x13c   : > { %v2300_v45 = vmul.f32 %v2236_v48, %v1660_v41  ;;  %v1661_v49 = vmax.f32 %v1018_v35, %v1187_v15  ;;  %v1110_v52 = vpop.f32.mrf.mxu1 }
 0x13d   : > { %v2269_v54 = vmul.f32 %v2205_v13, %v1629_v34  ;;  %v1630_v58 = vmax.f32 %v941_v50, %v1110_v52 }
 0x13e   : > { %v2364_v62 = vmul.f32 19.245008, %v2300_v45  ;;  %v1725_v60 = vand.u32 2147483647, %v1661_v49 }
 0x13f   : > { %v2333_v0 = vmul.f32 19.245008, %v2269_v54  ;;  %v1694_v53 = vand.u32 2147483647, %v1630_v58 }
 0x140   : > { %2428 = vst [vmem:[%s3163_s25 + $0x180] sm:$0xff] %v2364_v62  ;;  %v2173_v55 = vmul.f32 %v2052_v5, %v1725_v60  ;;  %v2067_v60 = vpop.permute.xlu1 %2066 }
 0x141   : > { %2397 = vst [vmem:[%s3163_s25 + $0x88] sm:$0xff] %v2333_v0  ;;  %v2142_v59 = vmul.f32 %v3169_v42, %v1694_v53 }
 0x142   : > { %v2237_v6 = vadd.f32 1e-06, %v2173_v55  ;;  %v1021_v12 = vpop.f32.mrf.mxu2 }
 0x143   : > { %v2206_v14 = vadd.f32 1e-06, %v2142_v59  ;;  %v1190_v16 = vpop.f32.mrf.mxu3  ;;  %v943_v8 = vpop.f32.mrf.mxu0 }
 0x144   : > { %v2301_v51 = vmul.f32 %v2237_v6, %v1661_v49  ;;  %v1662_v17 = vmax.f32 %v1021_v12, %v1190_v16  ;;  %v1112_v47 = vpop.f32.mrf.mxu1 }
 0x145   : > { %v2270_v11 = vmul.f32 %v2206_v14, %v1630_v58  ;;  %v1631_v63 = vmax.f32 %v943_v8, %v1112_v47 }
 0x146   : > { %v2365_v1 = vmul.f32 19.245008, %v2301_v51  ;;  %v1726_v61 = vand.u32 2147483647, %v1662_v17 }
 0x147   : > { %v2334_v31 = vmul.f32 19.245008, %v2270_v11  ;;  %v1695_v25 = vand.u32 2147483647, %v1631_v63 }
 0x148   : > { %2429 = vst [vmem:[%s3163_s25 + $0x188] sm:$0xff] %v2365_v1  ;;  %v2174_v23 = vmul.f32 %v2057_v18, %v1726_v61  ;;  %v2072_v1 = vpop.permute.xlu2 %2071 }
 0x149   : > { %2398 = vst [vmem:[%s3163_s25 + $0x90] sm:$0xff] %v2334_v31  ;;  %v2143_v42 = vmul.f32 %v3167_v40, %v1695_v25 }
 0x14a   : > { %v2238_v26 = vadd.f32 1e-06, %v2174_v23  ;;  %v1023_v29 = vpop.f32.mrf.mxu2 }
 0x14b   : > { %v2207_v4 = vadd.f32 1e-06, %v2143_v42  ;;  %v1192_v30 = vpop.f32.mrf.mxu3  ;;  %v946_v24 = vpop.f32.mrf.mxu0 }
 0x14c   : > { %v2302_v32 = vmul.f32 %v2238_v26, %v1662_v17  ;;  %v1663_v41 = vmax.f32 %v1023_v29, %v1192_v30  ;;  %v1115_v33 = vpop.f32.mrf.mxu1 }
 0x14d   : > { %v2271_v46 = vmul.f32 %v2207_v4, %v1631_v63  ;;  %v1632_v34 = vmax.f32 %v946_v24, %v1115_v33 }
 0x14e   : > { %v2366_v36 = vmul.f32 19.245008, %v2302_v32  ;;  %v1727_v10 = vand.u32 2147483647, %v1663_v41 }
 0x14f   : > { %v2335_v38 = vmul.f32 19.245008, %v2271_v46  ;;  %v1696_v43 = vand.u32 2147483647, %v1632_v34 }
 0x150   : > { %2430 = vst [vmem:[%s3163_s25 + $0x190] sm:$0xff] %v2366_v36  ;;  %v2175_v44 = vmul.f32 %v2062_v37, %v1727_v10 }
 0x151   : > { %2399 = vst [vmem:[%s3163_s25 + $0x98] sm:$0xff] %v2335_v38  ;;  %v2144_v40 = vmul.f32 %v3128_v3, %v1696_v43 }
 0x152   : > { %v2239_v22 = vadd.f32 1e-06, %v2175_v44  ;;  %v1026_v48 = vpop.f32.mrf.mxu2 }
 0x153   : > { %v2208_v35 = vadd.f32 1e-06, %v2144_v40  ;;  %v1195_v13 = vpop.f32.mrf.mxu3  ;;  %v948_v15 = vpop.f32.mrf.mxu0 }
 0x154   : > { %v2303_v50 = vmul.f32 %v2239_v22, %v1663_v41  ;;  %v1664_v45 = vmax.f32 %v1026_v48, %v1195_v13  ;;  %v1117_v49 = vpop.f32.mrf.mxu1 }
 0x155   : > { %v2272_v52 = vmul.f32 %v2208_v35, %v1632_v34  ;;  %v1633_v54 = vmax.f32 %v948_v15, %v1117_v49  ;;  %v2077_v34 = vpop.permute.xlu0 %2076 }
 0x156   : > { %v2367_v58 = vmul.f32 19.245008, %v2303_v50  ;;  %v1728_v62 = vand.u32 2147483647, %v1664_v45 }
 0x157   : > { %v2336_v5 = vmul.f32 19.245008, %v2272_v52  ;;  %v1697_v0 = vand.u32 2147483647, %v1633_v54  ;;  %v2082_v52 = vpop.permute.xlu1 %2081 }
 0x158   : > { %2431 = vst [vmem:[%s3163_s25 + $0x198] sm:$0xff] %v2367_v58  ;;  %v2176_v53 = vmul.f32 %v2067_v60, %v1728_v62 }
 0x159   : > { %2400 = vst [vmem:[%s3163_s25 + $0xa0] sm:$0xff] %v2336_v5  ;;  %v2145_v3 = vmul.f32 %v3182_v7, %v1697_v0 }
 0x15a   : > { %v2240_v55 = vadd.f32 1e-06, %v2176_v53  ;;  %v1028_v59 = vpop.f32.mrf.mxu2 }
 0x15b   : > { %v2209_v6 = vadd.f32 1e-06, %v2145_v3  ;;  %v1197_v12 = vpop.f32.mrf.mxu3  ;;  %v951_v14 = vpop.f32.mrf.mxu0 }
 0x15c   : > { %v2304_v16 = vmul.f32 %v2240_v55, %v1664_v45  ;;  %v1665_v8 = vmax.f32 %v1028_v59, %v1197_v12  ;;  %v1120_v51 = vpop.f32.mrf.mxu1 }
 0x15d   : > { %v2273_v17 = vmul.f32 %v2209_v6, %v1633_v54  ;;  %v1634_v47 = vmax.f32 %v951_v14, %v1120_v51  ;;  %v2087_v51 = vpop.permute.xlu2 %2086 }
 0x15e   : > { %v2368_v11 = vmul.f32 19.245008, %v2304_v16  ;;  %v1729_v63 = vand.u32 2147483647, %v1665_v8 }
 0x15f   : > { %v2337_v61 = vmul.f32 19.245008, %v2273_v17  ;;  %v1698_v18 = vand.u32 2147483647, %v1634_v47 }
 0x160   : > { %2432 = vst [vmem:[%s3163_s25 + $0x1a0] sm:$0xff] %v2368_v11  ;;  %v2177_v31 = vmul.f32 %v2072_v1, %v1729_v63 }
 0x161   : > { %2401 = vst [vmem:[%s3163_s25 + $0xa8] sm:$0xff] %v2337_v61  ;;  %v2146_v7 = vmul.f32 %v3180_v2, %v1698_v18 }
 0x162   : > { %v2241_v25 = vadd.f32 1e-06, %v2177_v31  ;;  %v1031_v23 = vpop.f32.mrf.mxu2 }
 0x163   : > { %v2210_v42 = vadd.f32 1e-06, %v2146_v7  ;;  %v1200_v26 = vpop.f32.mrf.mxu3  ;;  %v953_v29 = vpop.f32.mrf.mxu0 }
 0x164   : > { %v2305_v4 = vmul.f32 %v2241_v25, %v1665_v8  ;;  %v1666_v30 = vmax.f32 %v1031_v23, %v1200_v26  ;;  %v1122_v24 = vpop.f32.mrf.mxu1 }
 0x165   : > { %v2274_v32 = vmul.f32 %v2210_v42, %v1634_v47  ;;  %v1635_v41 = vmax.f32 %v953_v29, %v1122_v24 }
 0x166   : > { %v2369_v33 = vmul.f32 19.245008, %v2305_v4  ;;  %v1730_v46 = vand.u32 2147483647, %v1666_v30 }
 0x167   : > { %v2338_v36 = vmul.f32 19.245008, %v2274_v32  ;;  %v1699_v10 = vand.u32 2147483647, %v1635_v41 }
 0x168   : > { %2433 = vst [vmem:[%s3163_s25 + $0x1a8] sm:$0xff] %v2369_v33  ;;  %v2178_v37 = vmul.f32 %v2077_v34, %v1730_v46 }
 0x169   : > { %2402 = vst [vmem:[%s3163_s25 + $0xb0] sm:$0xff] %v2338_v36  ;;  %v2147_v2 = vmul.f32 %v3137_v9, %v1699_v10 }
 0x16a   : > { %v2242_v38 = vadd.f32 1e-06, %v2178_v37  ;;  %v1033_v43 = vpop.f32.mrf.mxu2 }
 0x16b   : > { %v2211_v44 = vadd.f32 1e-06, %v2147_v2  ;;  %v1202_v40 = vpop.f32.mrf.mxu3  ;;  %v956_v22 = vpop.f32.mrf.mxu0 }
 0x16c   : > { %v2306_v48 = vmul.f32 %v2242_v38, %v1666_v30  ;;  %v1667_v35 = vmax.f32 %v1033_v43, %v1202_v40  ;;  %v1125_v13 = vpop.f32.mrf.mxu1  ;;  %v2092_v30 = vpop.permute.xlu0 %2091 }
 0x16d   : > { %v2275_v15 = vmul.f32 %v2211_v44, %v1635_v41  ;;  %v1636_v50 = vmax.f32 %v956_v22, %v1125_v13 }
 0x16e   : > { %v2370_v45 = vmul.f32 19.245008, %v2306_v48  ;;  %v1731_v49 = vand.u32 2147483647, %v1667_v35  ;;  %v2097_v48 = vpop.permute.xlu1 %2096 }
 0x16f   : > { %v2339_v54 = vmul.f32 19.245008, %v2275_v15  ;;  %v1700_v58 = vand.u32 2147483647, %v1636_v50 }
 0x170   : > { %2434 = vst [vmem:[%s3163_s25 + $0x1b0] sm:$0xff] %v2370_v45  ;;  %v2179_v62 = vmul.f32 %v2082_v52, %v1731_v49 }
 0x171   : > { %2403 = vst [vmem:[%s3163_s25 + $0xb8] sm:$0xff] %v2339_v54  ;;  %v2148_v9 = vmul.f32 %v3189_v28, %v1700_v58 }
 0x172   : > { %v2243_v60 = vadd.f32 1e-06, %v2179_v62  ;;  %v1036_v5 = vpop.f32.mrf.mxu2 }
 0x173   : > { %v2212_v0 = vadd.f32 1e-06, %v2148_v9  ;;  %v1205_v53 = vpop.f32.mrf.mxu3  ;;  %v958_v3 = vpop.f32.mrf.mxu0 }
 0x174   : > { %v2307_v55 = vmul.f32 %v2243_v60, %v1667_v35  ;;  %v1668_v59 = vmax.f32 %v1036_v5, %v1205_v53  ;;  %v1127_v6 = vpop.f32.mrf.mxu1 }
 0x175   : > { %v2276_v12 = vmul.f32 %v2212_v0, %v1636_v50  ;;  %v1637_v14 = vmax.f32 %v958_v3, %v1127_v6  ;;  %v2102_v3 = vpop.permute.xlu2 %2101 }
 0x176   : > { %v2371_v16 = vmul.f32 19.245008, %v2307_v55  ;;  %v1732_v8 = vand.u32 2147483647, %v1668_v59 }
 0x177   : > { %v2340_v17 = vmul.f32 19.245008, %v2276_v12  ;;  %v1701_v47 = vand.u32 2147483647, %v1637_v14 }
 0x178   : > { %2435 = vst [vmem:[%s3163_s25 + $0x1b8] sm:$0xff] %v2371_v16  ;;  %v2180_v11 = vmul.f32 %v2087_v51, %v1732_v8 }
 0x179   : > { %2404 = vst [vmem:[%s3163_s25 + $0xc0] sm:$0xff] %v2340_v17  ;;  %v2149_v28 = vmul.f32 %v3186_v27, %v1701_v47 }
 0x17a   : > { %v2244_v63 = vadd.f32 1e-06, %v2180_v11  ;;  %v1038_v1 = vpop.f32.mrf.mxu2 }
 0x17b   : > { %v2213_v61 = vadd.f32 1e-06, %v2149_v28  ;;  %v1207_v18 = vpop.f32.mrf.mxu3  ;;  %v961_v31 = vpop.f32.mrf.mxu0 }
 0x17c   : > { %v2308_v7 = vmul.f32 %v2244_v63, %v1668_v59  ;;  %v1669_v25 = vmax.f32 %v1038_v1, %v1207_v18  ;;  %v1130_v23 = vpop.f32.mrf.mxu1  ;;  %v2107_v18 = vpop.permute.xlu0 %2106 }
 0x17d   : > { %v2277_v42 = vmul.f32 %v2213_v61, %v1637_v14  ;;  %v1638_v26 = vmax.f32 %v961_v31, %v1130_v23 }
 0x17e   : > { %v2372_v29 = vmul.f32 19.245008, %v2308_v7  ;;  %v1733_v4 = vand.u32 2147483647, %v1669_v25 }
 0x17f   : > { %v2341_v24 = vmul.f32 19.245008, %v2277_v42  ;;  %v1702_v32 = vand.u32 2147483647, %v1638_v26 }
 0x180   : > { %2436 = vst [vmem:[%s3163_s25 + $0x1c0] sm:$0xff] %v2372_v29  ;;  %v2181_v41 = vmul.f32 %v2092_v30, %v1733_v4 }
 0x181   : > { %2405 = vst [vmem:[%s3163_s25 + $0xc8] sm:$0xff] %v2341_v24  ;;  %v2150_v27 = vmul.f32 %v3148_v21, %v1702_v32 }
 0x182   : > { %v2245_v33 = vadd.f32 1e-06, %v2181_v41  ;;  %v1041_v46 = vpop.f32.mrf.mxu2 }
 0x183   : > { %v2214_v34 = vadd.f32 1e-06, %v2150_v27  ;;  %v1210_v36 = vpop.f32.mrf.mxu3  ;;  %v963_v10 = vpop.f32.mrf.mxu0 }
 0x184   : > { %v2309_v37 = vmul.f32 %v2245_v33, %v1669_v25  ;;  %v1670_v2 = vmax.f32 %v1041_v46, %v1210_v36  ;;  %v1132_v38 = vpop.f32.mrf.mxu1 }
 0x185   : > { %v2278_v43 = vmul.f32 %v2214_v34, %v1638_v26  ;;  %v1639_v44 = vmax.f32 %v963_v10, %v1132_v38  ;;  %v2112_v34 = vpop.permute.xlu1 %2111 }
 0x186   : > { %v2373_v40 = vmul.f32 19.245008, %v2309_v37  ;;  %v1734_v22 = vand.u32 2147483647, %v1670_v2 }
 0x187   : > { %v2342_v35 = vmul.f32 19.245008, %v2278_v43  ;;  %v1703_v13 = vand.u32 2147483647, %v1639_v44 }
 0x188   : > { %2437 = vst [vmem:[%s3163_s25 + $0x1c8] sm:$0xff] %v2373_v40  ;;  %v2182_v15 = vmul.f32 %v2097_v48, %v1734_v22 }
 0x189   : > { %2406 = vst [vmem:[%s3163_s25 + $0xd0] sm:$0xff] %v2342_v35  ;;  %v2151_v21 = vmul.f32 %v3197_v57, %v1703_v13 }
 0x18a   : > { %v2246_v50 = vadd.f32 1e-06, %v2182_v15  ;;  %v1043_v45 = vpop.f32.mrf.mxu2 }
 0x18b   : > { %v2215_v49 = vadd.f32 1e-06, %v2151_v21  ;;  %v1212_v52 = vpop.f32.mrf.mxu3  ;;  %v966_v54 = vpop.f32.mrf.mxu0 }
 0x18c   : > { %v2310_v58 = vmul.f32 %v2246_v50, %v1670_v2  ;;  %v1671_v62 = vmax.f32 %v1043_v45, %v1212_v52  ;;  %v1135_v9 = vpop.f32.mrf.mxu1  ;;  %v2117_v45 = vpop.permute.xlu2 %2116 }
 0x18d   : > { %v2279_v60 = vmul.f32 %v2215_v49, %v1639_v44  ;;  %v1640_v5 = vmax.f32 %v966_v54, %v1135_v9 }
 0x18e   : > { %v2374_v0 = vmul.f32 19.245008, %v2310_v58  ;;  %v1735_v53 = vand.u32 2147483647, %v1671_v62 }
 0x18f   : > { %v2343_v55 = vmul.f32 19.245008, %v2279_v60  ;;  %v1704_v59 = vand.u32 2147483647, %v1640_v5 }
 0x190   : > { %2438 = vst [vmem:[%s3163_s25 + $0x1d0] sm:$0xff] %v2374_v0  ;;  %v2183_v6 = vmul.f32 %v2102_v3, %v1735_v53 }
 0x191   : > { %2407 = vst [vmem:[%s3163_s25 + $0xd8] sm:$0xff] %v2343_v55  ;;  %v2152_v57 = vmul.f32 %v3195_v56, %v1704_v59  ;;  %v2122_v59 = vpop.permute.xlu0 %2121 }
 0x192   : > { %v2247_v12 = vadd.f32 1e-06, %v2183_v6  ;;  %v1046_v14 = vpop.f32.mrf.mxu2 }
 0x193   : > { %v2216_v16 = vadd.f32 1e-06, %v2152_v57  ;;  %v1215_v8 = vpop.f32.mrf.mxu3  ;;  %v968_v51 = vpop.f32.mrf.mxu0 }
 0x194   : > { %v2311_v17 = vmul.f32 %v2247_v12, %v1671_v62  ;;  %v1672_v47 = vmax.f32 %v1046_v14, %v1215_v8  ;;  %v1137_v11 = vpop.f32.mrf.mxu1 }
 0x195   : > { %v2280_v28 = vmul.f32 %v2216_v16, %v1640_v5  ;;  %v1641_v63 = vmax.f32 %v968_v51, %v1137_v11 }
 0x196   : > { %v2375_v1 = vmul.f32 19.245008, %v2311_v17  ;;  %v1736_v61 = vand.u32 2147483647, %v1672_v47 }
 0x197   : > { %v2344_v31 = vmul.f32 19.245008, %v2280_v28  ;;  %v1705_v7 = vand.u32 2147483647, %v1641_v63 }
 0x198   : > { %2439 = vst [vmem:[%s3163_s25 + $0x1d8] sm:$0xff] %v2375_v1  ;;  %v2184_v25 = vmul.f32 %v2107_v18, %v1736_v61 }
 0x199   : > { %2408 = vst [vmem:[%s3163_s25 + $0xe0] sm:$0xff] %v2344_v31  ;;  %v2153_v56 = vmul.f32 %v3165_v39, %v1705_v7 }
 0x19a   : > { %v2248_v23 = vadd.f32 1e-06, %v2184_v25  ;;  %v1048_v42 = vpop.f32.mrf.mxu2 }
 0x19b   : > { %v2217_v26 = vadd.f32 1e-06, %v2153_v56  ;;  %v1217_v29 = vpop.f32.mrf.mxu3  ;;  %v971_v4 = vpop.f32.mrf.mxu0 }
 0x19c   : > { %v2312_v30 = vmul.f32 %v2248_v23, %v1672_v47  ;;  %v1673_v24 = vmax.f32 %v1048_v42, %v1217_v29  ;;  %v1140_v32 = vpop.f32.mrf.mxu1 }
 0x19d   : > { %v2281_v41 = vmul.f32 %v2217_v26, %v1641_v63  ;;  %v1642_v27 = vmax.f32 %v971_v4, %v1140_v32 }
 0x19e   : > { %v2376_v33 = vmul.f32 19.245008, %v2312_v30  ;;  %v1737_v46 = vand.u32 2147483647, %v1673_v24 }
 0x19f   : > { %v2345_v36 = vmul.f32 19.245008, %v2281_v41  ;;  %v1706_v10 = vand.u32 2147483647, %v1642_v27 }
 0x1a0   : > { %2440 = vst [vmem:[%s3163_s25 + $0x1e0] sm:$0xff] %v2376_v33  ;;  %v2185_v37 = vmul.f32 %v2112_v34, %v1737_v46 }
 0x1a1   : > { %2409 = vst [vmem:[%s3163_s25 + $0xe8] sm:$0xff] %v2345_v36  ;;  %v2154_v39 = vmul.f32 %v3204_v20, %v1706_v10 }
 0x1a2   : > { %v2249_v2 = vadd.f32 1e-06, %v2185_v37  ;;  %v1051_v38 = vpop.f32.mrf.mxu2 }
 0x1a3   : > { %v2218_v43 = vadd.f32 1e-06, %v2154_v39  ;;  %v1220_v44 = vpop.f32.mrf.mxu3  ;;  %v973_v40 = vpop.f32.mrf.mxu0 }
 0x1a4   : > { %v2313_v22 = vmul.f32 %v2249_v2, %v1673_v24  ;;  %v1674_v48 = vmax.f32 %v1051_v38, %v1220_v44  ;;  %v1142_v35 = vpop.f32.mrf.mxu1 }
 0x1a5   : > { %v2282_v13 = vmul.f32 %v2218_v43, %v1642_v27  ;;  %v1643_v15 = vmax.f32 %v973_v40, %v1142_v35 }
 0x1a6   : > { %v2377_v21 = vmul.f32 19.245008, %v2313_v22  ;;  %v1738_v50 = vand.u32 2147483647, %v1674_v48 }
 0x1a7   : > { %v2346_v49 = vmul.f32 19.245008, %v2282_v13  ;;  %v1707_v52 = vand.u32 2147483647, %v1643_v15 }
 0x1a8   : > { %2441 = vst [vmem:[%s3163_s25 + $0x1e8] sm:$0xff] %v2377_v21  ;;  %v2186_v20 = vmul.f32 %v2117_v45, %v1738_v50 }
 0x1a9   : > { %2410 = vst [vmem:[%s3163_s25 + $0xf0] sm:$0xff] %v2346_v49  ;;  %v2155_v54 = vmul.f32 %v3201_v19, %v1707_v52 }
 0x1aa   : > { %v2250_v58 = vadd.f32 1e-06, %v2186_v20  ;;  %v1053_v62 = vpop.f32.mrf.mxu2 }
 0x1ab   : > { %v2219_v9 = vadd.f32 1e-06, %v2155_v54  ;;  %v1222_v60 = vpop.f32.mrf.mxu3 }
 0x1ac   : > { %v2314_v5 = vmul.f32 %v2250_v58, %v1674_v48  ;;  %v1675_v0 = vmax.f32 %v1053_v62, %v1222_v60 }
 0x1ad   : > { %v2283_v53 = vmul.f32 %v2219_v9, %v1643_v15 }
 0x1ae   : > { %v2378_v3 = vmul.f32 19.245008, %v2314_v5  ;;  %v1739_v55 = vand.u32 2147483647, %v1675_v0 }
 0x1af   : > { %v2347_v6 = vmul.f32 19.245008, %v2283_v53 }
 0x1b0   : > { %2442 = vst [vmem:[%s3163_s25 + $0x1f0] sm:$0xff] %v2378_v3  ;;  %v2187_v57 = vmul.f32 %v2122_v59, %v1739_v55 }
 0x1b1   : > { %2411 = vst [vmem:[%s3163_s25 + $0xf8] sm:$0xff] %v2347_v6 }
 0x1b2   : > { %v2251_v12 = vadd.f32 1e-06, %v2187_v57 }
 0x1b4   : > { %v2315_v14 = vmul.f32 %v2251_v12, %v1675_v0 }
 0x1b6   : > { %v2379_v16 = vmul.f32 19.245008, %v2315_v14 }
 0x1b8   : > { %2443 = vst [vmem:[%s3163_s25 + $0x1f8] sm:$0xff] %v2379_v16 }
 0x1b9 PF: > { %s13_s14 = sadd.s32 1, %s2878_s14   ;;  %s3316_s12 = smov %s2874_s13 }
 0x1ba   : > { %p10_p5 = scmp.ge.s32.totalorder %s13_s14, 6   ;;  %s3317_s13 = smov %s3319_s15 }
 0x1bc   :  { %12 = sbr.rel (!%p10_p5) target bundleno = 2 (0x2), region = 76 }

// kernel: _lambda_.6
= control target key start
LH: loop header
LB: loop body
LE: loop exit
PB: predicated region body
PF: predicated region fallthrough
CT: control target
= control target key end

     0   :  { %s3700_s12 = smov 0   ;;  %s3702_s13 = smov 0   ;;  %s4204_s0 = inlined_call_operand.vmem [shape: bf16[2048,256], index: 0, kind: input, shape index: {}]   ;;  %s4205_s1 = inlined_call_operand.vmem [shape: bf16[256,256], index: 1, kind: input, shape index: {}]   ;;  %s4206_s2 = inlined_call_operand.vmem [shape: f32[2048,1], index: 2, kind: input, shape index: {}]   ;;  %s4207_s3 = inlined_call_operand.vmem [shape: f32[2048,128], index: 3, kind: output, shape index: {}]  }
   0x1   :  { %s3704_s14 = smov 0  }
   0x2 LB: > { %s32_s15 = sadd.s32 1, %s3673_s13  ;;  %p3136_p0 = scmp.ge.s32.totalorder %s3677_s14, 1  ;;  %s3677_s14 = sphi %s3704_s14, %s13_s14   ;;  %s3673_s13 = sphi %s3702_s13, %s4210_s13   ;;  %s3669_s12 = sphi %s3700_s12, %s4209_s12  }
   0x3   : > { %p34_p1 = scmp.ge.s32.totalorder %s32_s15, 4  ;;  %p197_p2 = scmp.lt.s32.totalorder %s3677_s14, 5 }
   0x5   : > { %s4212_s15 = smov (%p34_p1, %s32_s15), 0  ;;  %p198_p3 = pnand %p3136_p0, %p197_p2 }
   0x6   : > { %s3137_s5 = sshll.u32 (!%p198_p3), %s3669_s12, 6 }
   0x7   : > { %201 = sbr.rel (%p198_p3) target bundleno = 699 (0x2bb), region = 32  ;;  %p3889_p4 = scmp.lt.s32.totalorder (!%p198_p3), %s3137_s5, 255 }
   0xc   : > { %v3458_v0 = vld [vmem:[%s4205_s1 + $0x70] sm:$0xf]  ;;  %v3610_v1 = vld [vmem:[%s4205_s1 + $0x74] sm:$0xf0]  ;;  %v3609_v5 = vld [vmem:[%s4205_s1 + $0x74] sm:$0xf] }
   0xd   : > { %v3522_v2 = vld [vmem:[%s4205_s1 + $0xf0] sm:$0xf]  ;;  %v3459_v3 = vor.u32 %v3610_v1, %v3458_v0  ;;  %v3626_v4 = vld [vmem:[%s4205_s1 + $0xf4] sm:$0xf0]  ;;  %v3460_v6 = vld [vmem:[%s4205_s1 + $0x78] sm:$0xf0] }
   0xe   : > { %v3523_v7 = vor.u32 %v3626_v4, %v3522_v2  ;;  %v3463_v8 = vor.u32 %v3609_v5, %v3460_v6  ;;  %v3625_v9 = vld [vmem:[%s4205_s1 + $0xf4] sm:$0xf]  ;;  %v3524_v10 = vld [vmem:[%s4205_s1 + $0xf8] sm:$0xf0]  ;;  %v3450_v11 = vld [vmem:[%s4205_s1 + $0x60] sm:$0xf] }
   0xf   : > { %1119 = vmatpush.bf16.msra.mxu0 %v3459_v3  ;;  %v3527_v12 = vor.u32 %v3625_v9, %v3524_v10  ;;  %v3608_v13 = vld [vmem:[%s4205_s1 + $0x64] sm:$0xf0]  ;;  %v3514_v14 = vld [vmem:[%s4205_s1 + $0xe0] sm:$0xf]  ;;  %v3607_v18 = vld [vmem:[%s4205_s1 + $0x64] sm:$0xf] }
  0x10   : > { %v3624_v15 = vld [vmem:[%s4205_s1 + $0xe4] sm:$0xf0]  ;;  %1288 = vmatpush.bf16.msra.mxu1 %v3523_v7  ;;  %1457 = vmatpush.bf16.msra.mxu2 %v3463_v8  ;;  %v3451_v16 = vor.u32 %v3608_v13, %v3450_v11  ;;  %v3452_v19 = vld [vmem:[%s4205_s1 + $0x68] sm:$0xf0]  ;;  %v3623_v20 = vld [vmem:[%s4205_s1 + $0xe4] sm:$0xf] }
  0x11   : > { %v3515_v17 = vor.u32 %v3624_v15, %v3514_v14  ;;  %1626 = vmatpush.bf16.msra.mxu3 %v3527_v12  ;;  %v3455_v21 = vor.u32 %v3607_v18, %v3452_v19  ;;  %v3516_v22 = vld [vmem:[%s4205_s1 + $0xe8] sm:$0xf0]  ;;  %v3442_v23 = vld [vmem:[%s4205_s1 + $0x50] sm:$0xf]  ;;  %v3606_v24 = vld [vmem:[%s4205_s1 + $0x54] sm:$0xf0] }
  0x12   : > { %v3519_v25 = vor.u32 %v3623_v20, %v3516_v22  ;;  %v3506_v26 = vld [vmem:[%s4205_s1 + $0xd0] sm:$0xf]  ;;  %v3622_v27 = vld [vmem:[%s4205_s1 + $0xd4] sm:$0xf0]  ;;  %v3605_v28 = vld [vmem:[%s4205_s1 + $0x54] sm:$0xf]  ;;  %v3443_v29 = vor.u32 %v3606_v24, %v3442_v23 }
  0x13   : > { %1120 = vmatpush.bf16.msra.mxu0 %v3451_v16  ;;  %v3444_v30 = vld [vmem:[%s4205_s1 + $0x58] sm:$0xf0]  ;;  %v3621_v31 = vld [vmem:[%s4205_s1 + $0xd4] sm:$0xf]  ;;  %v3507_v33 = vor.u32 %v3622_v27, %v3506_v26  ;;  %v3434_v35 = vld [vmem:[%s4205_s1 + $0x40] sm:$0xf] }
  0x14   : > { %v3508_v32 = vld [vmem:[%s4205_s1 + $0xd8] sm:$0xf0]  ;;  %1289 = vmatpush.bf16.msra.mxu1 %v3515_v17  ;;  %1458 = vmatpush.bf16.msra.mxu2 %v3455_v21  ;;  %v3447_v34 = vor.u32 %v3605_v28, %v3444_v30  ;;  %v3604_v36 = vld [vmem:[%s4205_s1 + $0x44] sm:$0xf0]  ;;  %v3498_v37 = vld [vmem:[%s4205_s1 + $0xc0] sm:$0xf] }
  0x15   : > { %1627 = vmatpush.bf16.msra.mxu3 %v3519_v25  ;;  %v3511_v38 = vor.u32 %v3621_v31, %v3508_v32  ;;  %v3620_v39 = vld [vmem:[%s4205_s1 + $0xc4] sm:$0xf0]  ;;  %v3603_v40 = vld [vmem:[%s4205_s1 + $0x44] sm:$0xf]  ;;  %v3436_v41 = vld [vmem:[%s4205_s1 + $0x48] sm:$0xf0]  ;;  %v3435_v44 = vor.u32 %v3604_v36, %v3434_v35 }
  0x16   : > { %v3619_v42 = vld [vmem:[%s4205_s1 + $0xc4] sm:$0xf]  ;;  %v3500_v43 = vld [vmem:[%s4205_s1 + $0xc8] sm:$0xf0]  ;;  %v3499_v45 = vor.u32 %v3620_v39, %v3498_v37  ;;  %v3439_v46 = vor.u32 %v3603_v40, %v3436_v41  ;;  %v3426_v47 = vld [vmem:[%s4205_s1 + $0x30] sm:$0xf] }
  0x17   : > { %1121 = vmatpush.bf16.msra.mxu0 %v3443_v29  ;;  %v3602_v48 = vld [vmem:[%s4205_s1 + $0x34] sm:$0xf0]  ;;  %v3490_v49 = vld [vmem:[%s4205_s1 + $0xb0] sm:$0xf]  ;;  %v3503_v50 = vor.u32 %v3619_v42, %v3500_v43  ;;  %v3601_v52 = vld [vmem:[%s4205_s1 + $0x34] sm:$0xf] }
  0x18   : > { %1290 = vmatpush.bf16.msra.mxu1 %v3507_v33  ;;  %1459 = vmatpush.bf16.msra.mxu2 %v3447_v34  ;;  %v3618_v51 = vld [vmem:[%s4205_s1 + $0xb4] sm:$0xf0]  ;;  %v3428_v53 = vld [vmem:[%s4205_s1 + $0x38] sm:$0xf0]  ;;  %v3617_v54 = vld [vmem:[%s4205_s1 + $0xb4] sm:$0xf]  ;;  %v3427_v56 = vor.u32 %v3602_v48, %v3426_v47 }
  0x19   : > { %1628 = vmatpush.bf16.msra.mxu3 %v3511_v38  ;;  %v3492_v55 = vld [vmem:[%s4205_s1 + $0xb8] sm:$0xf0]  ;;  %v3491_v57 = vor.u32 %v3618_v51, %v3490_v49  ;;  %v3431_v58 = vor.u32 %v3601_v52, %v3428_v53  ;;  %v3418_v59 = vld [vmem:[%s4205_s1 + $0x20] sm:$0xf]  ;;  %v3600_v60 = vld [vmem:[%s4205_s1 + $0x24] sm:$0xf0] }
  0x1a   : > { %v3482_v61 = vld [vmem:[%s4205_s1 + $0xa0] sm:$0xf]  ;;  %v3495_v62 = vor.u32 %v3617_v54, %v3492_v55  ;;  %v3616_v63 = vld [vmem:[%s4205_s1 + $0xa4] sm:$0xf0]  ;;  %v3599_v0 = vld [vmem:[%s4205_s1 + $0x24] sm:$0xf]  ;;  %v3419_v4 = vor.u32 %v3600_v60, %v3418_v59 }
  0x1b   : > { %1122 = vmatpush.bf16.msra.mxu0 %v3435_v44  ;;  %v3420_v1 = vld [vmem:[%s4205_s1 + $0x28] sm:$0xf0]  ;;  %v3615_v2 = vld [vmem:[%s4205_s1 + $0xa4] sm:$0xf]  ;;  %v3410_v5 = vld [vmem:[%s4205_s1 + $0x10] sm:$0xf]  ;;  %v3483_v6 = vor.u32 %v3616_v63, %v3482_v61 }
  0x1c   : > { %1291 = vmatpush.bf16.msra.mxu1 %v3499_v45  ;;  %1460 = vmatpush.bf16.msra.mxu2 %v3439_v46  ;;  %v3484_v3 = vld [vmem:[%s4205_s1 + $0xa8] sm:$0xf0]  ;;  %v3423_v7 = vor.u32 %v3599_v0, %v3420_v1  ;;  %v3598_v8 = vld [vmem:[%s4205_s1 + $0x14] sm:$0xf0]  ;;  %v3474_v9 = vld [vmem:[%s4205_s1 + $0x90] sm:$0xf] }
  0x1d   : > { %1629 = vmatpush.bf16.msra.mxu3 %v3503_v50  ;;  %v3614_v10 = vld [vmem:[%s4205_s1 + $0x94] sm:$0xf0]  ;;  %v3487_v11 = vor.u32 %v3615_v2, %v3484_v3  ;;  %v3597_v12 = vld [vmem:[%s4205_s1 + $0x14] sm:$0xf]  ;;  %v3412_v13 = vld [vmem:[%s4205_s1 + $0x18] sm:$0xf0]  ;;  %v3411_v17 = vor.u32 %v3598_v8, %v3410_v5 }
  0x1e   : > { %v3613_v14 = vld [vmem:[%s4205_s1 + $0x94] sm:$0xf]  ;;  %v3476_v15 = vld [vmem:[%s4205_s1 + $0x98] sm:$0xf0]  ;;  %v3679_v16 = vmov 0   ;;  %v3475_v19 = vor.u32 %v3614_v10, %v3474_v9  ;;  %v3415_v20 = vor.u32 %v3597_v12, %v3412_v13  ;;  %s4214_s5 = smov (!%p3889_p4, %s3137_s5), 255 }
  0x1f   : > { %1123 = vmatpush.bf16.msra.mxu0 %v3427_v56  ;;  %3652 = vset.pattern.permute.xlu0 %v3679_v16  ;;  %v3402_v18 = vld [vmem:[%s4205_s1] sm:$0xf]  ;;  %v3596_v21 = vld [vmem:[%s4205_s1 + $0x4] sm:$0xf0]  ;;  %v3479_v23 = vor.u32 %v3613_v14, %v3476_v15  ;;  %v3595_v25 = vld [vmem:[%s4205_s1 + $0x4] sm:$0xf] }
  0x20   : > { %1292 = vmatpush.bf16.msra.mxu1 %v3491_v57  ;;  %1461 = vmatpush.bf16.msra.mxu2 %v3431_v58  ;;  %v3466_v22 = vld [vmem:[%s4205_s1 + $0x80] sm:$0xf]  ;;  %v3612_v24 = vld [vmem:[%s4205_s1 + $0x84] sm:$0xf0]  ;;  %v3404_v26 = vld [vmem:[%s4205_s1 + $0x8] sm:$0xf0]  ;;  %v3403_v29 = vor.u32 %v3596_v21, %v3402_v18 }
  0x21   : > { %1630 = vmatpush.bf16.msra.mxu3 %v3495_v62  ;;  %3653 = vset.pattern.permute.xlu1 %v3679_v16  ;;  %v3611_v27 = vld [vmem:[%s4205_s1 + $0x84] sm:$0xf]  ;;  %v3468_v28 = vld [vmem:[%s4205_s1 + $0x88] sm:$0xf0]  ;;  %s3919_s30 = sshll.u32 %s4214_s5, 3  ;;  %v3467_v30 = vor.u32 %v3612_v24, %v3466_v22  ;;  %v3407_v31 = vor.u32 %v3595_v25, %v3404_v26 }
  0x22   : > { %3654 = vset.pattern.permute.xlu2 %v3679_v16  ;;  %s3925_s7 = scalar_lea.vmem %s4204_s0, %s3919_s30  ;;  %s3931_s10 = scalar_lea.vmem %s4206_s2, %s3919_s30  ;;  %v3471_v35 = vor.u32 %v3611_v27, %v3468_v28 }
  0x23   : > { %1124 = vmatpush.bf16.msra.mxu0 %v3419_v4  ;;  %v3146_v32 = vld [vmem:[%s3925_s7] sm:$0xf]  ;;  %v3532_v33 = vld [vmem:[%s3925_s7 + $0x4] sm:$0xf0]  ;;  %v3531_v34 = vld [vmem:[%s3925_s7 + $0x4] sm:$0xf]  ;;  %s3996_s12 = scalar_lea.vmem %s4207_s3, %s3919_s30 }
  0x24   : > { %1293 = vmatpush.bf16.msra.mxu1 %v3483_v6  ;;  %1462 = vmatpush.bf16.msra.mxu2 %v3423_v7  ;;  %v3148_v36 = vld [vmem:[%s3925_s7 + $0x8] sm:$0xf0]  ;;  %v3147_v37 = vor.u32 %v3532_v33, %v3146_v32  ;;  %v2310_v38 = vld [vmem:[%s3931_s10] sm:$0xff]  ;;  %v2312_v41 = vld [vmem:[%s3931_s10 + $0x10] sm:$0xff] }
  0x25   : > { %1631 = vmatpush.bf16.msra.mxu3 %v3487_v11  ;;  %v3151_v39 = vor.u32 %v3531_v34, %v3148_v36  ;;  %2376 = vperm.xlu0 %3652, %v2310_v38   ;;  %v2311_v40 = vld [vmem:[%s3931_s10 + $0x8] sm:$0xff]  ;;  %v2313_v42 = vld [vmem:[%s3931_s10 + $0x18] sm:$0xff]  ;;  %v3154_v43 = vld [vmem:[%s3925_s7 + $0x10] sm:$0xf] }
  0x26   : > { %2386 = vperm.xlu1 %3653, %v2312_v41   ;;  %v3534_v44 = vld [vmem:[%s3925_s7 + $0x14] sm:$0xf0]  ;;  %v3533_v45 = vld [vmem:[%s3925_s7 + $0x14] sm:$0xf]  ;;  %v3156_v46 = vld [vmem:[%s3925_s7 + $0x18] sm:$0xf0] }
  0x27   : > { %1125 = vmatpush.bf16.msra.mxu0 %v3411_v17  ;;  %v3155_v47 = vor.u32 %v3534_v44, %v3154_v43  ;;  %v3159_v48 = vor.u32 %v3533_v45, %v3156_v46  ;;  %v3162_v49 = vld [vmem:[%s3925_s7 + $0x20] sm:$0xf]  ;;  %v3536_v50 = vld [vmem:[%s3925_s7 + $0x24] sm:$0xf0]  ;;  %v3535_v51 = vld [vmem:[%s3925_s7 + $0x24] sm:$0xf] }
  0x28   : > { %1294 = vmatpush.bf16.msra.mxu1 %v3475_v19  ;;  %1463 = vmatpush.bf16.msra.mxu2 %v3415_v20  ;;  %v3164_v52 = vld [vmem:[%s3925_s7 + $0x28] sm:$0xf0]  ;;  %v3163_v53 = vor.u32 %v3536_v50, %v3162_v49  ;;  %v2316_v55 = vld [vmem:[%s3931_s10 + $0x30] sm:$0xff]  ;;  %v2314_v56 = vld [vmem:[%s3931_s10 + $0x20] sm:$0xff] }
  0x29   : > { %1632 = vmatpush.bf16.msra.mxu3 %v3479_v23  ;;  %v3167_v54 = vor.u32 %v3535_v51, %v3164_v52  ;;  %v2317_v57 = vld [vmem:[%s3931_s10 + $0x38] sm:$0xff]  ;;  %2396 = vperm.xlu2 %3654, %v2314_v56   ;;  %v3170_v58 = vld [vmem:[%s3925_s7 + $0x30] sm:$0xf]  ;;  %v3537_v60 = vld [vmem:[%s3925_s7 + $0x34] sm:$0xf] }
  0x2a   : > { %v3538_v59 = vld [vmem:[%s3925_s7 + $0x34] sm:$0xf0]  ;;  %v3172_v61 = vld [vmem:[%s3925_s7 + $0x38] sm:$0xf0]  ;;  %v2315_v0 = vld [vmem:[%s3931_s10 + $0x28] sm:$0xff] }
  0x2b   : > { %1126 = vmatpush.bf16.msra.mxu0 %v3403_v29  ;;  %v3171_v62 = vor.u32 %v3538_v59, %v3170_v58  ;;  %v3175_v63 = vor.u32 %v3537_v60, %v3172_v61  ;;  %v2319_v1 = vld [vmem:[%s3931_s10 + $0x48] sm:$0xff]  ;;  %v3178_v2 = vld [vmem:[%s3925_s7 + $0x40] sm:$0xf]  ;;  %v3539_v4 = vld [vmem:[%s3925_s7 + $0x44] sm:$0xf] }
  0x2c   : > { %1295 = vmatpush.bf16.msra.mxu1 %v3467_v30  ;;  %1464 = vmatpush.bf16.msra.mxu2 %v3407_v31  ;;  %v3540_v3 = vld [vmem:[%s3925_s7 + $0x44] sm:$0xf0]  ;;  %v3180_v5 = vld [vmem:[%s3925_s7 + $0x48] sm:$0xf0]  ;;  %v2320_v8 = vld [vmem:[%s3931_s10 + $0x50] sm:$0xff] }
  0x2d   : > { %1633 = vmatpush.bf16.msra.mxu3 %v3471_v35  ;;  %2381 = vperm.xlu0 %3652, %v2311_v40   ;;  %v3179_v6 = vor.u32 %v3540_v3, %v3178_v2  ;;  %v3183_v7 = vor.u32 %v3539_v4, %v3180_v5  ;;  %v2318_v9 = vld [vmem:[%s3931_s10 + $0x40] sm:$0xff]  ;;  %v3186_v10 = vld [vmem:[%s3925_s7 + $0x50] sm:$0xf]  ;;  %v3542_v11 = vld [vmem:[%s3925_s7 + $0x54] sm:$0xf0] }
  0x2e   : > { %1127 = vmatmul.bf16.vlgmr.msra.gmra.mxu0 %v3147_v37  ;;  %2391 = vperm.xlu1 %3653, %v2313_v42   ;;  %v3541_v12 = vld [vmem:[%s3925_s7 + $0x54] sm:$0xf]  ;;  %v3188_v13 = vld [vmem:[%s3925_s7 + $0x58] sm:$0xf0]  ;;  %v3187_v14 = vor.u32 %v3542_v11, %v3186_v10  ;;  %v2322_v16 = vld [vmem:[%s3931_s10 + $0x60] sm:$0xff] }
  0x2f   : > { %1296 = vmatmul.bf16.vlgmr.msra.gmra.mxu1 %v3151_v39  ;;  %1465 = vmatmul.bf16.vlgmr.msra.gmra.mxu2 %v3147_v37  ;;  %v3191_v15 = vor.u32 %v3541_v12, %v3188_v13  ;;  %v3194_v17 = vld [vmem:[%s3925_s7 + $0x60] sm:$0xf]  ;;  %v3544_v18 = vld [vmem:[%s3925_s7 + $0x64] sm:$0xf0]  ;;  %v3543_v19 = vld [vmem:[%s3925_s7 + $0x64] sm:$0xf] }
  0x30   : > { %1634 = vmatmul.bf16.vlgmr.msra.gmra.mxu3 %v3151_v39  ;;  %v3196_v20 = vld [vmem:[%s3925_s7 + $0x68] sm:$0xf0]  ;;  %v3195_v21 = vor.u32 %v3544_v18, %v3194_v17  ;;  %v2321_v24 = vld [vmem:[%s3931_s10 + $0x58] sm:$0xff]  ;;  %v3202_v25 = vld [vmem:[%s3925_s7 + $0x70] sm:$0xf] }
  0x31   : > { %2401 = vperm.xlu2 %3654, %v2315_v0   ;;  %v3199_v22 = vor.u32 %v3543_v19, %v3196_v20  ;;  %v2323_v23 = vld [vmem:[%s3931_s10 + $0x68] sm:$0xff]  ;;  %v3546_v26 = vld [vmem:[%s3925_s7 + $0x74] sm:$0xf0]  ;;  %v3545_v27 = vld [vmem:[%s3925_s7 + $0x74] sm:$0xf] }
  0x32   : > { %v3204_v28 = vld [vmem:[%s3925_s7 + $0x78] sm:$0xf0]  ;;  %v3203_v29 = vor.u32 %v3546_v26, %v3202_v25  ;;  %v2326_v32 = vld [vmem:[%s3931_s10 + $0x80] sm:$0xff]  ;;  %v3548_v34 = vld [vmem:[%s3925_s7 + $0x84] sm:$0xf0] }
  0x33   : > { %v3207_v30 = vor.u32 %v3545_v27, %v3204_v28  ;;  %v2325_v31 = vld [vmem:[%s3931_s10 + $0x78] sm:$0xff]  ;;  %v3210_v33 = vld [vmem:[%s3925_s7 + $0x80] sm:$0xf]  ;;  %v3547_v35 = vld [vmem:[%s3925_s7 + $0x84] sm:$0xf] }
  0x34   : > { %v3212_v36 = vld [vmem:[%s3925_s7 + $0x88] sm:$0xf0]  ;;  %v3211_v37 = vor.u32 %v3548_v34, %v3210_v33  ;;  %v2324_v41 = vld [vmem:[%s3931_s10 + $0x70] sm:$0xff]  ;;  %v3550_v52 = vld [vmem:[%s3925_s7 + $0x94] sm:$0xf0] }
  0x35   : > { %2406 = vperm.xlu0 %3652, %v2316_v55   ;;  %v3215_v39 = vor.u32 %v3547_v35, %v3212_v36  ;;  %v2328_v50 = vld [vmem:[%s3931_s10 + $0x90] sm:$0xff]  ;;  %v3220_v55 = vld [vmem:[%s3925_s7 + $0x98] sm:$0xf0]  ;;  %v2327_v19 = vld [vmem:[%s3931_s10 + $0x88] sm:$0xff] }
  0x36   : > { %2411 = vperm.xlu1 %3653, %v2317_v57   ;;  %v3218_v51 = vld [vmem:[%s3925_s7 + $0x90] sm:$0xf]  ;;  %v2329_v4 = vld [vmem:[%s3931_s10 + $0x98] sm:$0xff]  ;;  %v3226_v20 = vld [vmem:[%s3925_s7 + $0xa0] sm:$0xf] }
  0x37   : > { %v3219_v58 = vor.u32 %v3550_v52, %v3218_v51  ;;  %v3228_v25 = vld [vmem:[%s3925_s7 + $0xa8] sm:$0xf0] }
  0x39   : > { %2416 = vperm.xlu2 %3654, %v2318_v9  }
  0x3d   : > { %2421 = vperm.xlu0 %3652, %v2319_v1  }
  0x3e   : > { %1132 = vmatmul.bf16.gmra.mxu0 %v3155_v47  ;;  %2426 = vperm.xlu1 %3653, %v2320_v8  }
  0x3f   : > { %1301 = vmatmul.bf16.gmra.mxu1 %v3159_v48  ;;  %1470 = vmatmul.bf16.gmra.mxu2 %v3155_v47 }
  0x40   : > { %1639 = vmatmul.bf16.gmra.mxu3 %v3159_v48 }
  0x41   : > { %2431 = vperm.xlu2 %3654, %v2321_v24  }
  0x45   : > { %2436 = vperm.xlu0 %3652, %v2322_v16  }
  0x46   : > { %2441 = vperm.xlu1 %3653, %v2323_v23  }
  0x49   : > { %2446 = vperm.xlu2 %3654, %v2324_v41  }
  0x4d   : > { %2451 = vperm.xlu0 %3652, %v2325_v31  }
  0x4e   : > { %1137 = vmatmul.bf16.gmra.mxu0 %v3163_v53  ;;  %2456 = vperm.xlu1 %3653, %v2326_v32  }
  0x4f   : > { %1306 = vmatmul.bf16.gmra.mxu1 %v3167_v54  ;;  %1475 = vmatmul.bf16.gmra.mxu2 %v3163_v53 }
  0x50   : > { %1644 = vmatmul.bf16.gmra.mxu3 %v3167_v54  ;;  %v3549_v54 = vld [vmem:[%s3925_s7 + $0x94] sm:$0xf] }
  0x51   : > { %v3223_v61 = vor.u32 %v3549_v54, %v3220_v55  ;;  %2461 = vperm.xlu2 %3654, %v2327_v19   ;;  %v3234_v54 = vld [vmem:[%s3925_s7 + $0xb0] sm:$0xf]  ;;  %v3554_v55 = vld [vmem:[%s3925_s7 + $0xb4] sm:$0xf0] }
  0x55   : > { %2466 = vperm.xlu0 %3652, %v2328_v50  }
  0x56   : > { %2471 = vperm.xlu1 %3653, %v2329_v4  }
  0x5e   : > { %1142 = vmatmul.bf16.gmra.mxu0 %v3171_v62 }
  0x5f   : > { %1311 = vmatmul.bf16.gmra.mxu1 %v3175_v63  ;;  %1480 = vmatmul.bf16.gmra.mxu2 %v3171_v62 }
  0x60   : > { %1649 = vmatmul.bf16.gmra.mxu3 %v3175_v63 }
  0x6e   : > { %1147 = vmatmul.bf16.gmra.mxu0 %v3179_v6 }
  0x6f   : > { %1316 = vmatmul.bf16.gmra.mxu1 %v3183_v7  ;;  %1485 = vmatmul.bf16.gmra.mxu2 %v3179_v6 }
  0x70   : > { %1654 = vmatmul.bf16.gmra.mxu3 %v3183_v7 }
  0x7e   : > { %1152 = vmatmul.bf16.gmra.mxu0 %v3187_v14 }
  0x7f   : > { %1321 = vmatmul.bf16.gmra.mxu1 %v3191_v15  ;;  %1490 = vmatmul.bf16.gmra.mxu2 %v3187_v14 }
  0x80   : > { %1659 = vmatmul.bf16.gmra.mxu3 %v3191_v15 }
  0x83   : > { %v2397_v50 = vpop.permute.xlu2 %2396 }
  0x8e   : > { %1157 = vmatmul.bf16.gmra.mxu0 %v3195_v21 }
  0x8f   : > { %1326 = vmatmul.bf16.gmra.mxu1 %v3199_v22  ;;  %1495 = vmatmul.bf16.gmra.mxu2 %v3195_v21  ;;  %v3552_v21 = vld [vmem:[%s3925_s7 + $0xa4] sm:$0xf0] }
  0x90   : > { %1664 = vmatmul.bf16.gmra.mxu3 %v3199_v22  ;;  %v3551_v22 = vld [vmem:[%s3925_s7 + $0xa4] sm:$0xf]  ;;  %v3227_v28 = vor.u32 %v3552_v21, %v3226_v20 }
  0x91   : > { %v3231_v31 = vor.u32 %v3551_v22, %v3228_v25  ;;  %v2334_v22 = vld [vmem:[%s3931_s10 + $0xc0] sm:$0xff]  ;;  %v3556_v25 = vld [vmem:[%s3925_s7 + $0xc4] sm:$0xf0] }
  0x97   : > { %v2377_v48 = vpop.permute.xlu0 %2376 }
  0x98   : > { %v2387_v16 = vpop.permute.xlu1 %2386 }
  0x9e   : > { %1162 = vmatmul.bf16.gmra.mxu0 %v3203_v29 }
  0x9f   : > { %1331 = vmatmul.bf16.gmra.mxu1 %v3207_v30  ;;  %1500 = vmatmul.bf16.gmra.mxu2 %v3203_v29  ;;  %v2382_v5 = vpop.permute.xlu0 %2381 }
  0xa0   : > { %1669 = vmatmul.bf16.gmra.mxu3 %v3207_v30 }
  0xab   : > { %v1128_v38 = vpop.f32.mrf.mxu0 }
  0xac   : > { %v1297_v40 = vpop.f32.mrf.mxu1 }
  0xad   : > { %v1298_v42 = vadd.f32 %v1297_v40, %v1128_v38  ;;  %v2331_v38 = vld [vmem:[%s3931_s10 + $0xa8] sm:$0xff] }
  0xae   : > { %1167 = vmatmul.bf16.gmra.mxu0 %v3211_v37  ;;  %2481 = vperm.xlu0 %3652, %v2331_v38  }
  0xaf   : > { %1336 = vmatmul.bf16.gmra.mxu1 %v3215_v39  ;;  %1505 = vmatmul.bf16.gmra.mxu2 %v3211_v37 }
  0xb0   : > { %1674 = vmatmul.bf16.gmra.mxu3 %v3215_v39  ;;  %v2392_v39 = vpop.permute.xlu1 %2391 }
  0xb2   : > { %v1466_v43 = vpop.f32.mrf.mxu2 }
  0xb3   : > { %v1635_v44 = vpop.f32.mrf.mxu3  ;;  %v1130_v45 = vpop.f32.mrf.mxu0 }
  0xb4   : > { %v1636_v46 = vadd.f32 %v1635_v44, %v1466_v43  ;;  %v1299_v47 = vpop.f32.mrf.mxu1 }
  0xb5   : > { %v1300_v62 = vadd.f32 %v1299_v47, %v1130_v45 }
  0xb6   : > { %v2182_v49 = vmax.f32 %v1298_v42, %v1636_v46  ;;  %2496 = vperm.xlu0 %3652, %v2334_v22  }
  0xb8   : > { %v2246_v53 = vand.u32 2147483647, %v2182_v49 }
  0xba   : > { %v2694_v56 = vmul.f32 %v2377_v48, %v2246_v53  ;;  %v1468_v57 = vpop.f32.mrf.mxu2  ;;  %v2332_v53 = vld [vmem:[%s3931_s10 + $0xb0] sm:$0xff] }
  0xbb   : > { %v1637_v59 = vpop.f32.mrf.mxu3  ;;  %v1133_v60 = vpop.f32.mrf.mxu0  ;;  %2486 = vperm.xlu1 %3653, %v2332_v53  }
  0xbc   : > { %v2758_v63 = vadd.f32 1e-06, %v2694_v56  ;;  %v1638_v0 = vadd.f32 %v1637_v59, %v1468_v57  ;;  %v1302_v1 = vpop.f32.mrf.mxu1  ;;  %v3553_v56 = vld [vmem:[%s3925_s7 + $0xb4] sm:$0xf]  ;;  %v3236_v59 = vld [vmem:[%s3925_s7 + $0xb8] sm:$0xf0] }
  0xbd   : > { %v1303_v8 = vadd.f32 %v1302_v1, %v1133_v60  ;;  %v3239_v1 = vor.u32 %v3553_v56, %v3236_v59  ;;  %v2333_v56 = vld [vmem:[%s3931_s10 + $0xb8] sm:$0xff] }
  0xbe   : > { %v2822_v2 = vmul.f32 %v2758_v63, %v2182_v49  ;;  %v2183_v3 = vmax.f32 %v1300_v62, %v1638_v0  ;;  %1172 = vmatmul.bf16.gmra.mxu0 %v3219_v58  ;;  %v3235_v62 = vor.u32 %v3554_v55, %v3234_v54  ;;  %v3558_v59 = vld [vmem:[%s3925_s7 + $0xd4] sm:$0xf0] }
  0xbf   : > { %1341 = vmatmul.bf16.gmra.mxu1 %v3223_v61  ;;  %1510 = vmatmul.bf16.gmra.mxu2 %v3219_v58 }
  0xc0   : > { %v2886_v6 = vmul.f32 8.333333, %v2822_v2  ;;  %1679 = vmatmul.bf16.gmra.mxu3 %v3223_v61  ;;  %v2247_v7 = vand.u32 2147483647, %v2183_v3 }
  0xc2   : > { %2950 = vst [vmem:[%s3996_s12] sm:$0xff] %v2886_v6  ;;  %v2695_v9 = vmul.f32 %v2382_v5, %v2247_v7  ;;  %v1471_v10 = vpop.f32.mrf.mxu2 }
  0xc3   : > { %v1640_v11 = vpop.f32.mrf.mxu3  ;;  %v1135_v12 = vpop.f32.mrf.mxu0 }
  0xc4   : > { %v2759_v13 = vadd.f32 1e-06, %v2695_v9  ;;  %v1641_v14 = vadd.f32 %v1640_v11, %v1471_v10  ;;  %v1304_v15 = vpop.f32.mrf.mxu1  ;;  %v2402_v9 = vpop.permute.xlu2 %2401 }
  0xc5   : > { %v1305_v32 = vadd.f32 %v1304_v15, %v1135_v12 }
  0xc6   : > { %v2823_v17 = vmul.f32 %v2759_v13, %v2183_v3  ;;  %v2184_v18 = vmax.f32 %v1303_v8, %v1641_v14  ;;  %v2330_v8 = vld [vmem:[%s3931_s10 + $0xa0] sm:$0xff] }
  0xc7   : > { %2476 = vperm.xlu2 %3654, %v2330_v8  }
  0xc8   : > { %v2887_v23 = vmul.f32 8.333333, %v2823_v17  ;;  %v2248_v24 = vand.u32 2147483647, %v2184_v18 }
  0xca   : > { %2951 = vst [vmem:[%s3996_s12 + $0x8] sm:$0xff] %v2887_v23  ;;  %v2696_v26 = vmul.f32 %v2387_v16, %v2248_v24  ;;  %v1473_v27 = vpop.f32.mrf.mxu2  ;;  %v2407_v23 = vpop.permute.xlu0 %2406  ;;  %v3242_v24 = vld [vmem:[%s3925_s7 + $0xc0] sm:$0xf] }
  0xcb   : > { %v1642_v29 = vpop.f32.mrf.mxu3  ;;  %v1138_v30 = vpop.f32.mrf.mxu0 }
  0xcc   : > { %v2760_v33 = vadd.f32 1e-06, %v2696_v26  ;;  %v1643_v34 = vadd.f32 %v1642_v29, %v1473_v27  ;;  %v1307_v35 = vpop.f32.mrf.mxu1  ;;  %v3555_v26 = vld [vmem:[%s3925_s7 + $0xc4] sm:$0xf]  ;;  %v3244_v29 = vld [vmem:[%s3925_s7 + $0xc8] sm:$0xf0] }
  0xcd   : > { %v1308_v42 = vadd.f32 %v1307_v35, %v1138_v30  ;;  %v3247_v35 = vor.u32 %v3555_v26, %v3244_v29  ;;  %v2338_v26 = vld [vmem:[%s3931_s10 + $0xe0] sm:$0xff]  ;;  %v3560_v29 = vld [vmem:[%s3925_s7 + $0xe4] sm:$0xf0] }
  0xce   : > { %v2824_v36 = vmul.f32 %v2760_v33, %v2184_v18  ;;  %v2185_v37 = vmax.f32 %v1305_v32, %v1643_v34  ;;  %1177 = vmatmul.bf16.gmra.mxu0 %v3227_v28  ;;  %v3243_v32 = vor.u32 %v3556_v25, %v3242_v24 }
  0xcf   : > { %1346 = vmatmul.bf16.gmra.mxu1 %v3231_v31  ;;  %1515 = vmatmul.bf16.gmra.mxu2 %v3227_v28 }
  0xd0   : > { %v2888_v40 = vmul.f32 8.333333, %v2824_v36  ;;  %1684 = vmatmul.bf16.gmra.mxu3 %v3231_v31  ;;  %v2249_v41 = vand.u32 2147483647, %v2185_v37  ;;  %2491 = vperm.xlu2 %3654, %v2333_v56  }
  0xd2   : > { %2952 = vst [vmem:[%s3996_s12 + $0x10] sm:$0xff] %v2888_v40  ;;  %v2697_v43 = vmul.f32 %v2392_v39, %v2249_v41  ;;  %v1476_v44 = vpop.f32.mrf.mxu2 }
  0xd3   : > { %v1645_v45 = vpop.f32.mrf.mxu3  ;;  %v1140_v46 = vpop.f32.mrf.mxu0 }
  0xd4   : > { %v2761_v47 = vadd.f32 1e-06, %v2697_v43  ;;  %v1646_v48 = vadd.f32 %v1645_v45, %v1476_v44  ;;  %v1309_v49 = vpop.f32.mrf.mxu1  ;;  %v2412_v43 = vpop.permute.xlu1 %2411 }
  0xd5   : > { %v1310_v2 = vadd.f32 %v1309_v49, %v1140_v46 }
  0xd6   : > { %v2825_v51 = vmul.f32 %v2761_v47, %v2185_v37  ;;  %v2186_v52 = vmax.f32 %v1308_v42, %v1646_v48  ;;  %v2335_v42 = vld [vmem:[%s3931_s10 + $0xc8] sm:$0xff] }
  0xd7   : > { %2501 = vperm.xlu1 %3653, %v2335_v42  }
  0xd8   : > { %v2889_v57 = vmul.f32 8.333333, %v2825_v51  ;;  %v2250_v58 = vand.u32 2147483647, %v2186_v52 }
  0xda   : > { %2953 = vst [vmem:[%s3996_s12 + $0x18] sm:$0xff] %v2889_v57  ;;  %v2698_v60 = vmul.f32 %v2397_v50, %v2250_v58  ;;  %v1478_v61 = vpop.f32.mrf.mxu2  ;;  %v2417_v57 = vpop.permute.xlu2 %2416  ;;  %v3250_v58 = vld [vmem:[%s3925_s7 + $0xd0] sm:$0xf] }
  0xdb   : > { %v1647_v63 = vpop.f32.mrf.mxu3  ;;  %v1143_v0 = vpop.f32.mrf.mxu0 }
  0xdc   : > { %v2762_v3 = vadd.f32 1e-06, %v2698_v60  ;;  %v1648_v4 = vadd.f32 %v1647_v63, %v1478_v61  ;;  %v1312_v5 = vpop.f32.mrf.mxu1  ;;  %v3557_v60 = vld [vmem:[%s3925_s7 + $0xd4] sm:$0xf]  ;;  %v3252_v63 = vld [vmem:[%s3925_s7 + $0xd8] sm:$0xf0] }
  0xdd   : > { %v1313_v12 = vadd.f32 %v1312_v5, %v1143_v0  ;;  %v3255_v5 = vor.u32 %v3557_v60, %v3252_v63  ;;  %v2340_v60 = vld [vmem:[%s3931_s10 + $0xf0] sm:$0xff]  ;;  %v3562_v63 = vld [vmem:[%s3925_s7 + $0xf4] sm:$0xf0] }
  0xde   : > { %v2826_v6 = vmul.f32 %v2762_v3, %v2186_v52  ;;  %v2187_v7 = vmax.f32 %v1310_v2, %v1648_v4  ;;  %1182 = vmatmul.bf16.gmra.mxu0 %v3235_v62  ;;  %v3251_v2 = vor.u32 %v3558_v59, %v3250_v58 }
  0xdf   : > { %1351 = vmatmul.bf16.gmra.mxu1 %v3239_v1  ;;  %1520 = vmatmul.bf16.gmra.mxu2 %v3235_v62 }
  0xe0   : > { %v2890_v10 = vmul.f32 8.333333, %v2826_v6  ;;  %1689 = vmatmul.bf16.gmra.mxu3 %v3239_v1  ;;  %v2251_v11 = vand.u32 2147483647, %v2187_v7  ;;  %2516 = vperm.xlu1 %3653, %v2338_v26  }
  0xe2   : > { %2954 = vst [vmem:[%s3996_s12 + $0x20] sm:$0xff] %v2890_v10  ;;  %v2699_v13 = vmul.f32 %v2402_v9, %v2251_v11  ;;  %v1481_v14 = vpop.f32.mrf.mxu2 }
  0xe3   : > { %v1650_v15 = vpop.f32.mrf.mxu3  ;;  %v1145_v16 = vpop.f32.mrf.mxu0 }
  0xe4   : > { %v2763_v17 = vadd.f32 1e-06, %v2699_v13  ;;  %v1651_v18 = vadd.f32 %v1650_v15, %v1481_v14  ;;  %v1314_v19 = vpop.f32.mrf.mxu1  ;;  %v2422_v13 = vpop.permute.xlu0 %2421 }
  0xe5   : > { %v1315_v36 = vadd.f32 %v1314_v19, %v1145_v16 }
  0xe6   : > { %v2827_v20 = vmul.f32 %v2763_v17, %v2187_v7  ;;  %v2188_v21 = vmax.f32 %v1313_v12, %v1651_v18  ;;  %v2337_v12 = vld [vmem:[%s3931_s10 + $0xd8] sm:$0xff] }
  0xe7   : > { %2511 = vperm.xlu0 %3652, %v2337_v12  }
  0xe8   : > { %v2891_v27 = vmul.f32 8.333333, %v2827_v20  ;;  %v2252_v28 = vand.u32 2147483647, %v2188_v21 }
  0xea   : > { %2955 = vst [vmem:[%s3996_s12 + $0x28] sm:$0xff] %v2891_v27  ;;  %v2700_v30 = vmul.f32 %v2407_v23, %v2252_v28  ;;  %v1483_v31 = vpop.f32.mrf.mxu2  ;;  %v2427_v27 = vpop.permute.xlu1 %2426  ;;  %v3258_v28 = vld [vmem:[%s3925_s7 + $0xe0] sm:$0xf] }
  0xeb   : > { %v1652_v33 = vpop.f32.mrf.mxu3  ;;  %v1148_v34 = vpop.f32.mrf.mxu0 }
  0xec   : > { %v2764_v37 = vadd.f32 1e-06, %v2700_v30  ;;  %v1653_v38 = vadd.f32 %v1652_v33, %v1483_v31  ;;  %v1317_v39 = vpop.f32.mrf.mxu1  ;;  %v3559_v30 = vld [vmem:[%s3925_s7 + $0xe4] sm:$0xf]  ;;  %v3260_v33 = vld [vmem:[%s3925_s7 + $0xe8] sm:$0xf0] }
  0xed   : > { %v1318_v46 = vadd.f32 %v1317_v39, %v1148_v34  ;;  %v3263_v39 = vor.u32 %v3559_v30, %v3260_v33  ;;  %v2339_v30 = vld [vmem:[%s3931_s10 + $0xe8] sm:$0xff]  ;;  %v3274_v33 = vld [vmem:[%s3925_s7 + $0x100] sm:$0xf] }
  0xee   : > { %v2828_v40 = vmul.f32 %v2764_v37, %v2188_v21  ;;  %v2189_v41 = vmax.f32 %v1315_v36, %v1653_v38  ;;  %1187 = vmatmul.bf16.gmra.mxu0 %v3243_v32  ;;  %v3259_v36 = vor.u32 %v3560_v29, %v3258_v28 }
  0xef   : > { %1356 = vmatmul.bf16.gmra.mxu1 %v3247_v35  ;;  %1525 = vmatmul.bf16.gmra.mxu2 %v3243_v32 }
  0xf0   : > { %v2892_v44 = vmul.f32 8.333333, %v2828_v40  ;;  %1694 = vmatmul.bf16.gmra.mxu3 %v3247_v35  ;;  %v2253_v45 = vand.u32 2147483647, %v2189_v41  ;;  %2526 = vperm.xlu0 %3652, %v2340_v60  }
  0xf2   : > { %2956 = vst [vmem:[%s3996_s12 + $0x30] sm:$0xff] %v2892_v44  ;;  %v2701_v47 = vmul.f32 %v2412_v43, %v2253_v45  ;;  %v1486_v48 = vpop.f32.mrf.mxu2 }
  0xf3   : > { %v1655_v49 = vpop.f32.mrf.mxu3  ;;  %v1150_v50 = vpop.f32.mrf.mxu0 }
  0xf4   : > { %v2765_v51 = vadd.f32 1e-06, %v2701_v47  ;;  %v1656_v52 = vadd.f32 %v1655_v49, %v1486_v48  ;;  %v1319_v53 = vpop.f32.mrf.mxu1  ;;  %v2432_v47 = vpop.permute.xlu2 %2431 }
  0xf5   : > { %v1320_v6 = vadd.f32 %v1319_v53, %v1150_v50 }
  0xf6   : > { %v2829_v54 = vmul.f32 %v2765_v51, %v2189_v41  ;;  %v2190_v55 = vmax.f32 %v1318_v46, %v1656_v52  ;;  %v2336_v46 = vld [vmem:[%s3931_s10 + $0xd0] sm:$0xff] }
  0xf7   : > { %2506 = vperm.xlu2 %3654, %v2336_v46  }
  0xf8   : > { %v2893_v61 = vmul.f32 8.333333, %v2829_v54  ;;  %v2254_v62 = vand.u32 2147483647, %v2190_v55 }
  0xfa   : > { %2957 = vst [vmem:[%s3996_s12 + $0x38] sm:$0xff] %v2893_v61  ;;  %v2702_v0 = vmul.f32 %v2417_v57, %v2254_v62  ;;  %v1488_v1 = vpop.f32.mrf.mxu2  ;;  %v2437_v61 = vpop.permute.xlu0 %2436  ;;  %v3266_v62 = vld [vmem:[%s3925_s7 + $0xf0] sm:$0xf] }
  0xfb   : > { %v1657_v3 = vpop.f32.mrf.mxu3  ;;  %v1153_v4 = vpop.f32.mrf.mxu0 }
  0xfc   : > { %v2766_v7 = vadd.f32 1e-06, %v2702_v0  ;;  %v1658_v8 = vadd.f32 %v1657_v3, %v1488_v1  ;;  %v1322_v9 = vpop.f32.mrf.mxu1  ;;  %v3561_v0 = vld [vmem:[%s3925_s7 + $0xf4] sm:$0xf]  ;;  %v3268_v3 = vld [vmem:[%s3925_s7 + $0xf8] sm:$0xf0] }
  0xfd   : > { %v1323_v16 = vadd.f32 %v1322_v9, %v1153_v4  ;;  %v3271_v9 = vor.u32 %v3561_v0, %v3268_v3 }
  0xfe   : > { %v2830_v10 = vmul.f32 %v2766_v7, %v2190_v55  ;;  %v2191_v11 = vmax.f32 %v1320_v6, %v1658_v8  ;;  %1192 = vmatmul.bf16.gmra.mxu0 %v3251_v2  ;;  %v3267_v6 = vor.u32 %v3562_v63, %v3266_v62 }
  0xff   : > { %1361 = vmatmul.bf16.gmra.mxu1 %v3255_v5  ;;  %1530 = vmatmul.bf16.gmra.mxu2 %v3251_v2 }
 0x100   : > { %v2894_v14 = vmul.f32 8.333333, %v2830_v10  ;;  %1699 = vmatmul.bf16.gmra.mxu3 %v3255_v5  ;;  %v2255_v15 = vand.u32 2147483647, %v2191_v11  ;;  %2521 = vperm.xlu2 %3654, %v2339_v30  }
 0x102   : > { %2958 = vst [vmem:[%s3996_s12 + $0x40] sm:$0xff] %v2894_v14  ;;  %v2703_v17 = vmul.f32 %v2422_v13, %v2255_v15  ;;  %v1491_v18 = vpop.f32.mrf.mxu2 }
 0x103   : > { %v1660_v19 = vpop.f32.mrf.mxu3  ;;  %v1155_v20 = vpop.f32.mrf.mxu0 }
 0x104   : > { %v2767_v21 = vadd.f32 1e-06, %v2703_v17  ;;  %v1661_v22 = vadd.f32 %v1660_v19, %v1491_v18  ;;  %v1324_v23 = vpop.f32.mrf.mxu1  ;;  %v2442_v17 = vpop.permute.xlu1 %2441 }
 0x105   : > { %v1325_v40 = vadd.f32 %v1324_v23, %v1155_v20 }
 0x106   : > { %v2831_v24 = vmul.f32 %v2767_v21, %v2191_v11  ;;  %v2192_v25 = vmax.f32 %v1323_v16, %v1661_v22  ;;  %v2341_v16 = vld [vmem:[%s3931_s10 + $0xf8] sm:$0xff] }
 0x107   : > { %2531 = vperm.xlu1 %3653, %v2341_v16  }
 0x108   : > { %v2895_v31 = vmul.f32 8.333333, %v2831_v24  ;;  %v2256_v32 = vand.u32 2147483647, %v2192_v25 }
 0x10a   : > { %2959 = vst [vmem:[%s3996_s12 + $0x48] sm:$0xff] %v2895_v31  ;;  %v2704_v34 = vmul.f32 %v2427_v27, %v2256_v32  ;;  %v1493_v35 = vpop.f32.mrf.mxu2  ;;  %v2343_v31 = vld [vmem:[%s3931_s10 + $0x108] sm:$0xff]  ;;  %v2447_v32 = vpop.permute.xlu2 %2446 }
 0x10b   : > { %v1662_v37 = vpop.f32.mrf.mxu3  ;;  %v1158_v38 = vpop.f32.mrf.mxu0  ;;  %2541 = vperm.xlu0 %3652, %v2343_v31  }
 0x10c   : > { %v2768_v41 = vadd.f32 1e-06, %v2704_v34  ;;  %v1663_v42 = vadd.f32 %v1662_v37, %v1493_v35  ;;  %v1327_v43 = vpop.f32.mrf.mxu1  ;;  %v3564_v34 = vld [vmem:[%s3925_s7 + $0x104] sm:$0xf0]  ;;  %v3563_v35 = vld [vmem:[%s3925_s7 + $0x104] sm:$0xf]  ;;  %v2457_v3 = vpop.permute.xlu1 %2456 }
 0x10d   : > { %v1328_v50 = vadd.f32 %v1327_v43, %v1158_v38  ;;  %v3276_v38 = vld [vmem:[%s3925_s7 + $0x108] sm:$0xf0] }
 0x10e   : > { %v2832_v44 = vmul.f32 %v2768_v41, %v2192_v25  ;;  %v2193_v45 = vmax.f32 %v1325_v40, %v1663_v42  ;;  %1197 = vmatmul.bf16.gmra.mxu0 %v3259_v36  ;;  %v3275_v41 = vor.u32 %v3564_v34, %v3274_v33 }
 0x10f   : > { %1366 = vmatmul.bf16.gmra.mxu1 %v3263_v39  ;;  %1535 = vmatmul.bf16.gmra.mxu2 %v3259_v36 }
 0x110   : > { %v2896_v48 = vmul.f32 8.333333, %v2832_v44  ;;  %1704 = vmatmul.bf16.gmra.mxu3 %v3263_v39  ;;  %v2257_v49 = vand.u32 2147483647, %v2193_v45  ;;  %v3279_v44 = vor.u32 %v3563_v35, %v3276_v38  ;;  %v2350_v38 = vld [vmem:[%s3931_s10 + $0x140] sm:$0xff] }
 0x112   : > { %2960 = vst [vmem:[%s3996_s12 + $0x50] sm:$0xff] %v2896_v48  ;;  %v2705_v51 = vmul.f32 %v2432_v47, %v2257_v49  ;;  %v1496_v52 = vpop.f32.mrf.mxu2 }
 0x113   : > { %v1665_v53 = vpop.f32.mrf.mxu3  ;;  %v1160_v54 = vpop.f32.mrf.mxu0 }
 0x114   : > { %v2769_v55 = vadd.f32 1e-06, %v2705_v51  ;;  %v1666_v56 = vadd.f32 %v1665_v53, %v1496_v52  ;;  %v1329_v57 = vpop.f32.mrf.mxu1  ;;  %v2346_v51 = vld [vmem:[%s3931_s10 + $0x120] sm:$0xff]  ;;  %v2452_v52 = vpop.permute.xlu0 %2451 }
 0x115   : > { %v1330_v10 = vadd.f32 %v1329_v57, %v1160_v54  ;;  %2556 = vperm.xlu0 %3652, %v2346_v51  }
 0x116   : > { %v2833_v58 = vmul.f32 %v2769_v55, %v2193_v45  ;;  %v2194_v59 = vmax.f32 %v1328_v50, %v1666_v56 }
 0x118   : > { %v2897_v1 = vmul.f32 8.333333, %v2833_v58  ;;  %v2258_v2 = vand.u32 2147483647, %v2194_v59 }
 0x11a   : > { %2961 = vst [vmem:[%s3996_s12 + $0x58] sm:$0xff] %v2897_v1  ;;  %v2706_v4 = vmul.f32 %v2437_v61, %v2258_v2  ;;  %v1498_v5 = vpop.f32.mrf.mxu2  ;;  %v2344_v1 = vld [vmem:[%s3931_s10 + $0x110] sm:$0xff]  ;;  %v2349_v2 = vld [vmem:[%s3931_s10 + $0x138] sm:$0xff] }
 0x11b   : > { %v1667_v7 = vpop.f32.mrf.mxu3  ;;  %v1163_v8 = vpop.f32.mrf.mxu0  ;;  %2546 = vperm.xlu1 %3653, %v2344_v1  }
 0x11c   : > { %v2770_v11 = vadd.f32 1e-06, %v2706_v4  ;;  %v1668_v12 = vadd.f32 %v1667_v7, %v1498_v5  ;;  %v1332_v13 = vpop.f32.mrf.mxu1  ;;  %v3282_v4 = vld [vmem:[%s3925_s7 + $0x110] sm:$0xf]  ;;  %v3566_v5 = vld [vmem:[%s3925_s7 + $0x114] sm:$0xf0] }
 0x11d   : > { %v1333_v20 = vadd.f32 %v1332_v13, %v1163_v8  ;;  %2571 = vperm.xlu0 %3652, %v2349_v2  }
 0x11e   : > { %v2834_v14 = vmul.f32 %v2770_v11, %v2194_v59  ;;  %v2195_v15 = vmax.f32 %v1330_v10, %v1668_v12  ;;  %1202 = vmatmul.bf16.gmra.mxu0 %v3267_v6  ;;  %v3283_v12 = vor.u32 %v3566_v5, %v3282_v4 }
 0x11f   : > { %1371 = vmatmul.bf16.gmra.mxu1 %v3271_v9  ;;  %1540 = vmatmul.bf16.gmra.mxu2 %v3267_v6  ;;  %v3565_v6 = vld [vmem:[%s3925_s7 + $0x114] sm:$0xf] }
 0x120   : > { %v2898_v18 = vmul.f32 8.333333, %v2834_v14  ;;  %1709 = vmatmul.bf16.gmra.mxu3 %v3271_v9  ;;  %v2259_v19 = vand.u32 2147483647, %v2195_v15  ;;  %v3284_v9 = vld [vmem:[%s3925_s7 + $0x118] sm:$0xf0] }
 0x122   : > { %2962 = vst [vmem:[%s3996_s12 + $0x60] sm:$0xff] %v2898_v18  ;;  %v2707_v21 = vmul.f32 %v2442_v17, %v2259_v19  ;;  %v1501_v22 = vpop.f32.mrf.mxu2 }
 0x123   : > { %v1670_v23 = vpop.f32.mrf.mxu3  ;;  %v1165_v24 = vpop.f32.mrf.mxu0 }
 0x124   : > { %v2771_v25 = vadd.f32 1e-06, %v2707_v21  ;;  %v1671_v26 = vadd.f32 %v1670_v23, %v1501_v22  ;;  %v1334_v27 = vpop.f32.mrf.mxu1  ;;  %v2342_v22 = vld [vmem:[%s3931_s10 + $0x100] sm:$0xff]  ;;  %v2347_v23 = vld [vmem:[%s3931_s10 + $0x128] sm:$0xff] }
 0x125   : > { %v1335_v45 = vadd.f32 %v1334_v27, %v1165_v24  ;;  %v2352_v24 = vld [vmem:[%s3931_s10 + $0x150] sm:$0xff]  ;;  %2536 = vperm.xlu2 %3654, %v2342_v22   ;;  %2561 = vperm.xlu1 %3653, %v2347_v23  }
 0x126   : > { %v2835_v28 = vmul.f32 %v2771_v25, %v2195_v15  ;;  %v2196_v29 = vmax.f32 %v1333_v20, %v1671_v26  ;;  %v3287_v15 = vor.u32 %v3565_v6, %v3284_v9  ;;  %v2462_v25 = vpop.permute.xlu2 %2461  ;;  %2586 = vperm.xlu0 %3652, %v2352_v24  }
 0x128   : > { %v2899_v36 = vmul.f32 8.333333, %v2835_v28  ;;  %v2260_v37 = vand.u32 2147483647, %v2196_v29 }
 0x12a   : > { %2963 = vst [vmem:[%s3996_s12 + $0x68] sm:$0xff] %v2899_v36  ;;  %v2708_v39 = vmul.f32 %v2447_v32, %v2260_v37  ;;  %v1503_v40 = vpop.f32.mrf.mxu2 }
 0x12b   : > { %v1672_v42 = vpop.f32.mrf.mxu3  ;;  %v1168_v43 = vpop.f32.mrf.mxu0 }
 0x12c   : > { %v2772_v46 = vadd.f32 1e-06, %v2708_v39  ;;  %v1673_v47 = vadd.f32 %v1672_v42, %v1503_v40  ;;  %v1337_v48 = vpop.f32.mrf.mxu1  ;;  %v2355_v39 = vld [vmem:[%s3931_s10 + $0x168] sm:$0xff]  ;;  %v2467_v40 = vpop.permute.xlu0 %2466 }
 0x12d   : > { %v1338_v55 = vadd.f32 %v1337_v48, %v1168_v43  ;;  %v3568_v42 = vld [vmem:[%s3925_s7 + $0x124] sm:$0xf0]  ;;  %v3567_v43 = vld [vmem:[%s3925_s7 + $0x124] sm:$0xf]  ;;  %2576 = vperm.xlu1 %3653, %v2350_v38  }
 0x12e   : > { %v2836_v49 = vmul.f32 %v2772_v46, %v2196_v29  ;;  %v2197_v50 = vmax.f32 %v1335_v45, %v1673_v47  ;;  %1207 = vmatmul.bf16.gmra.mxu0 %v3275_v41  ;;  %v3292_v46 = vld [vmem:[%s3925_s7 + $0x128] sm:$0xf0]  ;;  %2601 = vperm.xlu0 %3652, %v2355_v39  }
 0x12f   : > { %1376 = vmatmul.bf16.gmra.mxu1 %v3279_v44  ;;  %1545 = vmatmul.bf16.gmra.mxu2 %v3275_v41  ;;  %v3290_v41 = vld [vmem:[%s3925_s7 + $0x120] sm:$0xf] }
 0x130   : > { %v2900_v53 = vmul.f32 8.333333, %v2836_v49  ;;  %1714 = vmatmul.bf16.gmra.mxu3 %v3279_v44  ;;  %v2261_v54 = vand.u32 2147483647, %v2197_v50  ;;  %v3291_v49 = vor.u32 %v3568_v42, %v3290_v41 }
 0x132   : > { %2964 = vst [vmem:[%s3996_s12 + $0x70] sm:$0xff] %v2900_v53  ;;  %v2709_v56 = vmul.f32 %v2452_v52, %v2261_v54  ;;  %v1506_v57 = vpop.f32.mrf.mxu2  ;;  %v3295_v52 = vor.u32 %v3567_v43, %v3292_v46 }
 0x133   : > { %v1675_v58 = vpop.f32.mrf.mxu3  ;;  %v1170_v59 = vpop.f32.mrf.mxu0 }
 0x134   : > { %v2773_v60 = vadd.f32 1e-06, %v2709_v56  ;;  %v1676_v61 = vadd.f32 %v1675_v58, %v1506_v57  ;;  %v1339_v62 = vpop.f32.mrf.mxu1 }
 0x135   : > { %v1340_v16 = vadd.f32 %v1339_v62, %v1170_v59  ;;  %v2345_v59 = vld [vmem:[%s3931_s10 + $0x118] sm:$0xff]  ;;  %v2472_v62 = vpop.permute.xlu1 %2471 }
 0x136   : > { %v2837_v63 = vmul.f32 %v2773_v60, %v2197_v50  ;;  %v2198_v0 = vmax.f32 %v1338_v55, %v1676_v61  ;;  %v2353_v60 = vld [vmem:[%s3931_s10 + $0x158] sm:$0xff]  ;;  %v2358_v61 = vld [vmem:[%s3931_s10 + $0x180] sm:$0xff]  ;;  %2551 = vperm.xlu2 %3654, %v2345_v59  }
 0x137   : > { %2591 = vperm.xlu1 %3653, %v2353_v60   ;;  %2616 = vperm.xlu0 %3652, %v2358_v61  }
 0x138   : > { %v2901_v7 = vmul.f32 8.333333, %v2837_v63  ;;  %v2262_v8 = vand.u32 2147483647, %v2198_v0 }
 0x13a   : > { %2965 = vst [vmem:[%s3996_s12 + $0x78] sm:$0xff] %v2901_v7  ;;  %v2710_v10 = vmul.f32 %v2457_v3, %v2262_v8  ;;  %v1508_v11 = vpop.f32.mrf.mxu2 }
 0x13b   : > { %v1677_v13 = vpop.f32.mrf.mxu3  ;;  %v1173_v14 = vpop.f32.mrf.mxu0 }
 0x13c   : > { %v2774_v17 = vadd.f32 1e-06, %v2710_v10  ;;  %v1678_v18 = vadd.f32 %v1677_v13, %v1508_v11  ;;  %v1342_v19 = vpop.f32.mrf.mxu1  ;;  %v2348_v11 = vld [vmem:[%s3931_s10 + $0x130] sm:$0xff]  ;;  %v2361_v13 = vld [vmem:[%s3931_s10 + $0x198] sm:$0xff] }
 0x13d   : > { %v1343_v28 = vadd.f32 %v1342_v19, %v1173_v14  ;;  %v2477_v14 = vpop.permute.xlu2 %2476 }
 0x13e   : > { %v2838_v20 = vmul.f32 %v2774_v17, %v2198_v0  ;;  %v2199_v21 = vmax.f32 %v1340_v16, %v1678_v18  ;;  %1212 = vmatmul.bf16.gmra.mxu0 %v3283_v12  ;;  %v3570_v16 = vld [vmem:[%s3925_s7 + $0x134] sm:$0xf0]  ;;  %v3569_v17 = vld [vmem:[%s3925_s7 + $0x134] sm:$0xf]  ;;  %2566 = vperm.xlu2 %3654, %v2348_v11  }
 0x13f   : > { %1381 = vmatmul.bf16.gmra.mxu1 %v3287_v15  ;;  %1550 = vmatmul.bf16.gmra.mxu2 %v3283_v12  ;;  %v2356_v12 = vld [vmem:[%s3931_s10 + $0x170] sm:$0xff] }
 0x140   : > { %v2902_v26 = vmul.f32 8.333333, %v2838_v20  ;;  %1719 = vmatmul.bf16.gmra.mxu3 %v3287_v15  ;;  %v2263_v27 = vand.u32 2147483647, %v2199_v21  ;;  %v3298_v15 = vld [vmem:[%s3925_s7 + $0x130] sm:$0xf]  ;;  %2606 = vperm.xlu1 %3653, %v2356_v12  }
 0x141   : > { %v3300_v20 = vld [vmem:[%s3925_s7 + $0x138] sm:$0xf0]  ;;  %2631 = vperm.xlu0 %3652, %v2361_v13   ;;  %v3299_v23 = vor.u32 %v3570_v16, %v3298_v15 }
 0x142   : > { %2966 = vst [vmem:[%s3996_s12 + $0x80] sm:$0xff] %v2902_v26  ;;  %v2711_v29 = vmul.f32 %v2462_v25, %v2263_v27  ;;  %v1511_v30 = vpop.f32.mrf.mxu2  ;;  %v3303_v26 = vor.u32 %v3569_v17, %v3300_v20 }
 0x143   : > { %v1680_v31 = vpop.f32.mrf.mxu3  ;;  %v1175_v32 = vpop.f32.mrf.mxu0 }
 0x144   : > { %v2775_v33 = vadd.f32 1e-06, %v2711_v29  ;;  %v1681_v34 = vadd.f32 %v1680_v31, %v1511_v30  ;;  %v1344_v35 = vpop.f32.mrf.mxu1 }
 0x145   : > { %v1345_v53 = vadd.f32 %v1344_v35, %v1175_v32  ;;  %v2364_v35 = vld [vmem:[%s3931_s10 + $0x1b0] sm:$0xff] }
 0x146   : > { %v2839_v36 = vmul.f32 %v2775_v33, %v2199_v21  ;;  %v2200_v37 = vmax.f32 %v1343_v28, %v1681_v34  ;;  %v2351_v33 = vld [vmem:[%s3931_s10 + $0x148] sm:$0xff] }
 0x147   : > { %v2359_v34 = vld [vmem:[%s3931_s10 + $0x188] sm:$0xff]  ;;  %2581 = vperm.xlu2 %3654, %v2351_v33  }
 0x148   : > { %v2903_v44 = vmul.f32 8.333333, %v2839_v36  ;;  %v2264_v45 = vand.u32 2147483647, %v2200_v37  ;;  %v2482_v36 = vpop.permute.xlu0 %2481  ;;  %2621 = vperm.xlu1 %3653, %v2359_v34  }
 0x149   : > { %2646 = vperm.xlu0 %3652, %v2364_v35  }
 0x14a   : > { %2967 = vst [vmem:[%s3996_s12 + $0x88] sm:$0xff] %v2903_v44  ;;  %v2712_v47 = vmul.f32 %v2467_v40, %v2264_v45  ;;  %v1513_v48 = vpop.f32.mrf.mxu2 }
 0x14b   : > { %v1682_v50 = vpop.f32.mrf.mxu3  ;;  %v1178_v51 = vpop.f32.mrf.mxu0 }
 0x14c   : > { %v2776_v54 = vadd.f32 1e-06, %v2712_v47  ;;  %v1683_v55 = vadd.f32 %v1682_v50, %v1513_v48  ;;  %v1347_v56 = vpop.f32.mrf.mxu1  ;;  %v2362_v50 = vld [vmem:[%s3931_s10 + $0x1a0] sm:$0xff] }
 0x14d   : > { %v1348_v1 = vadd.f32 %v1347_v56, %v1178_v51  ;;  %v2367_v51 = vld [vmem:[%s3931_s10 + $0x1c8] sm:$0xff] }
 0x14e   : > { %v2840_v57 = vmul.f32 %v2776_v54, %v2200_v37  ;;  %v2201_v58 = vmax.f32 %v1345_v53, %v1683_v55  ;;  %1217 = vmatmul.bf16.gmra.mxu0 %v3291_v49  ;;  %v3306_v53 = vld [vmem:[%s3925_s7 + $0x140] sm:$0xf]  ;;  %v3572_v54 = vld [vmem:[%s3925_s7 + $0x144] sm:$0xf0]  ;;  %v3571_v55 = vld [vmem:[%s3925_s7 + $0x144] sm:$0xf] }
 0x14f   : > { %1386 = vmatmul.bf16.gmra.mxu1 %v3295_v52  ;;  %1555 = vmatmul.bf16.gmra.mxu2 %v3291_v49  ;;  %v2354_v49 = vld [vmem:[%s3931_s10 + $0x160] sm:$0xff]  ;;  %v3307_v61 = vor.u32 %v3572_v54, %v3306_v53 }
 0x150   : > { %v2904_v63 = vmul.f32 8.333333, %v2840_v57  ;;  %1724 = vmatmul.bf16.gmra.mxu3 %v3295_v52  ;;  %v2265_v0 = vand.u32 2147483647, %v2201_v58  ;;  %v2487_v52 = vpop.permute.xlu1 %2486  ;;  %2596 = vperm.xlu2 %3654, %v2354_v49  }
 0x151   : > { %2636 = vperm.xlu1 %3653, %v2362_v50   ;;  %2661 = vperm.xlu0 %3652, %v2367_v51  }
 0x152   : > { %2968 = vst [vmem:[%s3996_s12 + $0x90] sm:$0xff] %v2904_v63  ;;  %v2713_v2 = vmul.f32 %v2472_v62, %v2265_v0  ;;  %v1516_v3 = vpop.f32.mrf.mxu2 }
 0x153   : > { %v1685_v4 = vpop.f32.mrf.mxu3  ;;  %v1180_v5 = vpop.f32.mrf.mxu0 }
 0x154   : > { %v2777_v6 = vadd.f32 1e-06, %v2713_v2  ;;  %v1686_v7 = vadd.f32 %v1685_v4, %v1516_v3  ;;  %v1349_v8 = vpop.f32.mrf.mxu1 }
 0x155   : > { %v1350_v27 = vadd.f32 %v1349_v8, %v1180_v5  ;;  %v2365_v8 = vld [vmem:[%s3931_s10 + $0x1b8] sm:$0xff] }
 0x156   : > { %v2841_v9 = vmul.f32 %v2777_v6, %v2201_v58  ;;  %v2202_v10 = vmax.f32 %v1348_v1, %v1686_v7  ;;  %v3308_v58 = vld [vmem:[%s3925_s7 + $0x148] sm:$0xf0]  ;;  %v2357_v7 = vld [vmem:[%s3931_s10 + $0x178] sm:$0xff] }
 0x157   : > { %v3311_v0 = vor.u32 %v3571_v55, %v3308_v58 }
 0x158   : > { %v2905_v18 = vmul.f32 8.333333, %v2841_v9  ;;  %v2266_v19 = vand.u32 2147483647, %v2202_v10  ;;  %v2370_v9 = vld [vmem:[%s3931_s10 + $0x1e0] sm:$0xff]  ;;  %2611 = vperm.xlu2 %3654, %v2357_v7  }
 0x159   : > { %2651 = vperm.xlu1 %3653, %v2365_v8   ;;  %2676 = vperm.xlu0 %3652, %v2370_v9  }
 0x15a   : > { %2969 = vst [vmem:[%s3996_s12 + $0x98] sm:$0xff] %v2905_v18  ;;  %v2714_v21 = vmul.f32 %v2477_v14, %v2266_v19  ;;  %v1518_v22 = vpop.f32.mrf.mxu2 }
 0x15b   : > { %v1687_v24 = vpop.f32.mrf.mxu3  ;;  %v1183_v25 = vpop.f32.mrf.mxu0 }
 0x15c   : > { %v2778_v28 = vadd.f32 1e-06, %v2714_v21  ;;  %v1688_v29 = vadd.f32 %v1687_v24, %v1518_v22  ;;  %v1352_v30 = vpop.f32.mrf.mxu1  ;;  %v2368_v24 = vld [vmem:[%s3931_s10 + $0x1d0] sm:$0xff] }
 0x15d   : > { %v1353_v39 = vadd.f32 %v1352_v30, %v1183_v25  ;;  %v2373_v25 = vld [vmem:[%s3931_s10 + $0x1f8] sm:$0xff] }
 0x15e   : > { %v2842_v31 = vmul.f32 %v2778_v28, %v2202_v10  ;;  %v2203_v32 = vmax.f32 %v1350_v27, %v1688_v29  ;;  %1222 = vmatmul.bf16.gmra.mxu0 %v3299_v23  ;;  %v2492_v10 = vpop.permute.xlu2 %2491  ;;  %v3314_v27 = vld [vmem:[%s3925_s7 + $0x150] sm:$0xf]  ;;  %v3574_v28 = vld [vmem:[%s3925_s7 + $0x154] sm:$0xf0]  ;;  %v3573_v29 = vld [vmem:[%s3925_s7 + $0x154] sm:$0xf] }
 0x15f   : > { %1391 = vmatmul.bf16.gmra.mxu1 %v3303_v26  ;;  %1560 = vmatmul.bf16.gmra.mxu2 %v3299_v23  ;;  %v2360_v23 = vld [vmem:[%s3931_s10 + $0x190] sm:$0xff]  ;;  %v3315_v35 = vor.u32 %v3574_v28, %v3314_v27 }
 0x160   : > { %v2906_v37 = vmul.f32 8.333333, %v2842_v31  ;;  %1729 = vmatmul.bf16.gmra.mxu3 %v3303_v26  ;;  %v2267_v38 = vand.u32 2147483647, %v2203_v32  ;;  %v2497_v26 = vpop.permute.xlu0 %2496  ;;  %2626 = vperm.xlu2 %3654, %v2360_v23  }
 0x161   : > { %2666 = vperm.xlu1 %3653, %v2368_v24   ;;  %2691 = vperm.xlu0 %3652, %v2373_v25  }
 0x162   : > { %2970 = vst [vmem:[%s3996_s12 + $0xa0] sm:$0xff] %v2906_v37  ;;  %v2715_v40 = vmul.f32 %v2482_v36, %v2267_v38  ;;  %v1521_v41 = vpop.f32.mrf.mxu2 }
 0x163   : > { %v1690_v42 = vpop.f32.mrf.mxu3  ;;  %v1185_v43 = vpop.f32.mrf.mxu0 }
 0x164   : > { %v2779_v44 = vadd.f32 1e-06, %v2715_v40  ;;  %v1691_v45 = vadd.f32 %v1690_v42, %v1521_v41  ;;  %v1354_v46 = vpop.f32.mrf.mxu1 }
 0x165   : > { %v1355_v1 = vadd.f32 %v1354_v46, %v1185_v43  ;;  %v2371_v46 = vld [vmem:[%s3931_s10 + $0x1e8] sm:$0xff] }
 0x166   : > { %v2843_v47 = vmul.f32 %v2779_v44, %v2203_v32  ;;  %v2204_v48 = vmax.f32 %v1353_v39, %v1691_v45  ;;  %v3316_v32 = vld [vmem:[%s3925_s7 + $0x158] sm:$0xf0]  ;;  %v2363_v45 = vld [vmem:[%s3931_s10 + $0x1a8] sm:$0xff] }
 0x167   : > { %v3319_v38 = vor.u32 %v3573_v29, %v3316_v32  ;;  %v3330_v32 = vld [vmem:[%s3925_s7 + $0x170] sm:$0xf] }
 0x168   : > { %v2907_v56 = vmul.f32 8.333333, %v2843_v47  ;;  %v2268_v57 = vand.u32 2147483647, %v2204_v48  ;;  %v2502_v47 = vpop.permute.xlu1 %2501  ;;  %2641 = vperm.xlu2 %3654, %v2363_v45  }
 0x169   : > { %2681 = vperm.xlu1 %3653, %v2371_v46  }
 0x16a   : > { %2971 = vst [vmem:[%s3996_s12 + $0xa8] sm:$0xff] %v2907_v56  ;;  %v2716_v59 = vmul.f32 %v2487_v52, %v2268_v57  ;;  %v1523_v60 = vpop.f32.mrf.mxu2 }
 0x16b   : > { %v1692_v62 = vpop.f32.mrf.mxu3  ;;  %v1188_v63 = vpop.f32.mrf.mxu0 }
 0x16c   : > { %v2780_v2 = vadd.f32 1e-06, %v2716_v59  ;;  %v1693_v3 = vadd.f32 %v1692_v62, %v1523_v60  ;;  %v1357_v4 = vpop.f32.mrf.mxu1  ;;  %v2366_v60 = vld [vmem:[%s3931_s10 + $0x1c0] sm:$0xff] }
 0x16d   : > { %v1358_v13 = vadd.f32 %v1357_v4, %v1188_v63  ;;  %v3322_v62 = vld [vmem:[%s3925_s7 + $0x160] sm:$0xf]  ;;  %v3576_v63 = vld [vmem:[%s3925_s7 + $0x164] sm:$0xf0] }
 0x16e   : > { %v2844_v5 = vmul.f32 %v2780_v2, %v2204_v48  ;;  %v2205_v6 = vmax.f32 %v1355_v1, %v1693_v3  ;;  %1227 = vmatmul.bf16.gmra.mxu0 %v3307_v61  ;;  %v3324_v3 = vld [vmem:[%s3925_s7 + $0x168] sm:$0xf0] }
 0x16f   : > { %1396 = vmatmul.bf16.gmra.mxu1 %v3311_v0  ;;  %1565 = vmatmul.bf16.gmra.mxu2 %v3307_v61  ;;  %v2507_v61 = vpop.permute.xlu2 %2506 }
 0x170   : > { %v2908_v11 = vmul.f32 8.333333, %v2844_v5  ;;  %1734 = vmatmul.bf16.gmra.mxu3 %v3311_v0  ;;  %v2269_v12 = vand.u32 2147483647, %v2205_v6  ;;  %v3575_v0 = vld [vmem:[%s3925_s7 + $0x164] sm:$0xf]  ;;  %2656 = vperm.xlu2 %3654, %v2366_v60  }
 0x171   : > { %v3327_v9 = vor.u32 %v3575_v0, %v3324_v3  ;;  %v3338_v0 = vld [vmem:[%s3925_s7 + $0x180] sm:$0xf] }
 0x172   : > { %2972 = vst [vmem:[%s3996_s12 + $0xb0] sm:$0xff] %v2908_v11  ;;  %v2717_v14 = vmul.f32 %v2492_v10, %v2269_v12  ;;  %v1526_v15 = vpop.f32.mrf.mxu2 }
 0x173   : > { %v1695_v16 = vpop.f32.mrf.mxu3  ;;  %v1190_v17 = vpop.f32.mrf.mxu0 }
 0x174   : > { %v2781_v18 = vadd.f32 1e-06, %v2717_v14  ;;  %v1696_v19 = vadd.f32 %v1695_v16, %v1526_v15  ;;  %v1359_v20 = vpop.f32.mrf.mxu1  ;;  %v2369_v16 = vld [vmem:[%s3931_s10 + $0x1d8] sm:$0xff] }
 0x175   : > { %v1360_v39 = vadd.f32 %v1359_v20, %v1190_v17  ;;  %v2512_v17 = vpop.permute.xlu0 %2511 }
 0x176   : > { %v2845_v21 = vmul.f32 %v2781_v18, %v2205_v6  ;;  %v2206_v22 = vmax.f32 %v1358_v13, %v1696_v19  ;;  %v3323_v6 = vor.u32 %v3576_v63, %v3322_v62 }
 0x178   : > { %v2909_v30 = vmul.f32 8.333333, %v2845_v21  ;;  %v2270_v31 = vand.u32 2147483647, %v2206_v22  ;;  %2671 = vperm.xlu2 %3654, %v2369_v16  }
 0x17a   : > { %2973 = vst [vmem:[%s3996_s12 + $0xb8] sm:$0xff] %v2909_v30  ;;  %v2718_v33 = vmul.f32 %v2497_v26, %v2270_v31  ;;  %v1528_v34 = vpop.f32.mrf.mxu2  ;;  %v2372_v30 = vld [vmem:[%s3931_s10 + $0x1f0] sm:$0xff]  ;;  %v2517_v31 = vpop.permute.xlu1 %2516 }
 0x17b   : > { %v1697_v36 = vpop.f32.mrf.mxu3  ;;  %v1193_v37 = vpop.f32.mrf.mxu0 }
 0x17c   : > { %v2782_v40 = vadd.f32 1e-06, %v2718_v33  ;;  %v1698_v41 = vadd.f32 %v1697_v36, %v1528_v34  ;;  %v1362_v42 = vpop.f32.mrf.mxu1  ;;  %v3578_v33 = vld [vmem:[%s3925_s7 + $0x174] sm:$0xf0]  ;;  %v3577_v34 = vld [vmem:[%s3925_s7 + $0x174] sm:$0xf] }
 0x17d   : > { %v1363_v50 = vadd.f32 %v1362_v42, %v1193_v37  ;;  %v3332_v37 = vld [vmem:[%s3925_s7 + $0x178] sm:$0xf0]  ;;  %v2527_v63 = vpop.permute.xlu0 %2526 }
 0x17e   : > { %v2846_v43 = vmul.f32 %v2782_v40, %v2206_v22  ;;  %v2207_v44 = vmax.f32 %v1360_v39, %v1698_v41  ;;  %1232 = vmatmul.bf16.gmra.mxu0 %v3315_v35  ;;  %v3331_v40 = vor.u32 %v3578_v33, %v3330_v32  ;;  %v3346_v32 = vld [vmem:[%s3925_s7 + $0x190] sm:$0xf]  ;;  %v3582_v33 = vld [vmem:[%s3925_s7 + $0x194] sm:$0xf0] }
 0x17f   : > { %1401 = vmatmul.bf16.gmra.mxu1 %v3319_v38  ;;  %1570 = vmatmul.bf16.gmra.mxu2 %v3315_v35 }
 0x180   : > { %v2910_v48 = vmul.f32 8.333333, %v2846_v43  ;;  %1739 = vmatmul.bf16.gmra.mxu3 %v3319_v38  ;;  %v2271_v49 = vand.u32 2147483647, %v2207_v44  ;;  %2686 = vperm.xlu2 %3654, %v2372_v30   ;;  %v3335_v43 = vor.u32 %v3577_v34, %v3332_v37  ;;  %v3581_v34 = vld [vmem:[%s3925_s7 + $0x194] sm:$0xf] }
 0x181   : > { %v3348_v37 = vld [vmem:[%s3925_s7 + $0x198] sm:$0xf0] }
 0x182   : > { %2974 = vst [vmem:[%s3996_s12 + $0xc0] sm:$0xff] %v2910_v48  ;;  %v2719_v51 = vmul.f32 %v2502_v47, %v2271_v49  ;;  %v1531_v52 = vpop.f32.mrf.mxu2 }
 0x183   : > { %v1700_v53 = vpop.f32.mrf.mxu3  ;;  %v1195_v54 = vpop.f32.mrf.mxu0 }
 0x184   : > { %v2783_v55 = vadd.f32 1e-06, %v2719_v51  ;;  %v1701_v56 = vadd.f32 %v1700_v53, %v1531_v52  ;;  %v1364_v57 = vpop.f32.mrf.mxu1 }
 0x185   : > { %v1365_v10 = vadd.f32 %v1364_v57, %v1195_v54 }
 0x186   : > { %v2847_v58 = vmul.f32 %v2783_v55, %v2207_v44  ;;  %v2208_v59 = vmax.f32 %v1363_v50, %v1701_v56  ;;  %v2522_v50 = vpop.permute.xlu2 %2521 }
 0x188   : > { %v2911_v1 = vmul.f32 8.333333, %v2847_v58  ;;  %v2272_v2 = vand.u32 2147483647, %v2208_v59 }
 0x18a   : > { %2975 = vst [vmem:[%s3996_s12 + $0xc8] sm:$0xff] %v2911_v1  ;;  %v2720_v4 = vmul.f32 %v2507_v61, %v2272_v2  ;;  %v1533_v5 = vpop.f32.mrf.mxu2  ;;  %v3580_v1 = vld [vmem:[%s3925_s7 + $0x184] sm:$0xf0]  ;;  %v3579_v2 = vld [vmem:[%s3925_s7 + $0x184] sm:$0xf] }
 0x18b   : > { %v1702_v7 = vpop.f32.mrf.mxu3  ;;  %v1198_v8 = vpop.f32.mrf.mxu0 }
 0x18c   : > { %v2784_v11 = vadd.f32 1e-06, %v2720_v4  ;;  %v1703_v12 = vadd.f32 %v1702_v7, %v1533_v5  ;;  %v1367_v13 = vpop.f32.mrf.mxu1  ;;  %v3340_v5 = vld [vmem:[%s3925_s7 + $0x188] sm:$0xf0] }
 0x18d   : > { %v1368_v20 = vadd.f32 %v1367_v13, %v1198_v8  ;;  %v3339_v8 = vor.u32 %v3580_v1, %v3338_v0  ;;  %v3354_v0 = vld [vmem:[%s3925_s7 + $0x1a0] sm:$0xf]  ;;  %v3584_v1 = vld [vmem:[%s3925_s7 + $0x1a4] sm:$0xf0] }
 0x18e   : > { %v2848_v14 = vmul.f32 %v2784_v11, %v2208_v59  ;;  %v2209_v15 = vmax.f32 %v1365_v10, %v1703_v12  ;;  %1237 = vmatmul.bf16.gmra.mxu0 %v3323_v6  ;;  %v3343_v11 = vor.u32 %v3579_v2, %v3340_v5  ;;  %v3583_v2 = vld [vmem:[%s3925_s7 + $0x1a4] sm:$0xf]  ;;  %v3356_v5 = vld [vmem:[%s3925_s7 + $0x1a8] sm:$0xf0] }
 0x18f   : > { %1406 = vmatmul.bf16.gmra.mxu1 %v3327_v9  ;;  %1575 = vmatmul.bf16.gmra.mxu2 %v3323_v6 }
 0x190   : > { %v2912_v18 = vmul.f32 8.333333, %v2848_v14  ;;  %1744 = vmatmul.bf16.gmra.mxu3 %v3327_v9  ;;  %v2273_v19 = vand.u32 2147483647, %v2209_v15 }
 0x192   : > { %2976 = vst [vmem:[%s3996_s12 + $0xd0] sm:$0xff] %v2912_v18  ;;  %v2721_v21 = vmul.f32 %v2512_v17, %v2273_v19  ;;  %v1536_v22 = vpop.f32.mrf.mxu2  ;;  %v2532_v18 = vpop.permute.xlu1 %2531 }
 0x193   : > { %v1705_v23 = vpop.f32.mrf.mxu3  ;;  %v1200_v24 = vpop.f32.mrf.mxu0 }
 0x194   : > { %v2785_v25 = vadd.f32 1e-06, %v2721_v21  ;;  %v1706_v26 = vadd.f32 %v1705_v23, %v1536_v22  ;;  %v1369_v27 = vpop.f32.mrf.mxu1 }
 0x195   : > { %v1370_v44 = vadd.f32 %v1369_v27, %v1200_v24 }
 0x196   : > { %v2849_v28 = vmul.f32 %v2785_v25, %v2209_v15  ;;  %v2210_v29 = vmax.f32 %v1368_v20, %v1706_v26 }
 0x198   : > { %v2913_v35 = vmul.f32 8.333333, %v2849_v28  ;;  %v2274_v36 = vand.u32 2147483647, %v2210_v29 }
 0x19a   : > { %2977 = vst [vmem:[%s3996_s12 + $0xd8] sm:$0xff] %v2913_v35  ;;  %v2722_v38 = vmul.f32 %v2517_v31, %v2274_v36  ;;  %v1538_v39 = vpop.f32.mrf.mxu2  ;;  %v2537_v31 = vpop.permute.xlu2 %2536 }
 0x19b   : > { %v1707_v41 = vpop.f32.mrf.mxu3  ;;  %v1203_v42 = vpop.f32.mrf.mxu0 }
 0x19c   : > { %v2786_v45 = vadd.f32 1e-06, %v2722_v38  ;;  %v1708_v46 = vadd.f32 %v1707_v41, %v1538_v39  ;;  %v1372_v47 = vpop.f32.mrf.mxu1 }
 0x19d   : > { %v1373_v53 = vadd.f32 %v1372_v47, %v1203_v42 }
 0x19e   : > { %v2850_v48 = vmul.f32 %v2786_v45, %v2210_v29  ;;  %v2211_v49 = vmax.f32 %v1370_v44, %v1708_v46  ;;  %1242 = vmatmul.bf16.gmra.mxu0 %v3331_v40 }
 0x19f   : > { %1411 = vmatmul.bf16.gmra.mxu1 %v3335_v43  ;;  %1580 = vmatmul.bf16.gmra.mxu2 %v3331_v40  ;;  %v3347_v40 = vor.u32 %v3582_v33, %v3346_v32  ;;  %v3586_v32 = vld [vmem:[%s3925_s7 + $0x1b4] sm:$0xf0]  ;;  %v3585_v33 = vld [vmem:[%s3925_s7 + $0x1b4] sm:$0xf] }
 0x1a0   : > { %v2914_v51 = vmul.f32 8.333333, %v2850_v48  ;;  %1749 = vmatmul.bf16.gmra.mxu3 %v3335_v43  ;;  %v2275_v52 = vand.u32 2147483647, %v2211_v49  ;;  %v3351_v43 = vor.u32 %v3581_v34, %v3348_v37 }
 0x1a2   : > { %2978 = vst [vmem:[%s3996_s12 + $0xe0] sm:$0xff] %v2914_v51  ;;  %v2723_v54 = vmul.f32 %v2522_v50, %v2275_v52  ;;  %v1541_v55 = vpop.f32.mrf.mxu2  ;;  %v2542_v52 = vpop.permute.xlu0 %2541 }
 0x1a3   : > { %v1710_v56 = vpop.f32.mrf.mxu3  ;;  %v1205_v57 = vpop.f32.mrf.mxu0 }
 0x1a4   : > { %v2787_v58 = vadd.f32 1e-06, %v2723_v54  ;;  %v1711_v59 = vadd.f32 %v1710_v56, %v1541_v55  ;;  %v1374_v60 = vpop.f32.mrf.mxu1 }
 0x1a5   : > { %v1375_v12 = vadd.f32 %v1374_v60, %v1205_v57 }
 0x1a6   : > { %v2851_v61 = vmul.f32 %v2787_v58, %v2211_v49  ;;  %v2212_v62 = vmax.f32 %v1373_v53, %v1711_v59 }
 0x1a8   : > { %v2915_v3 = vmul.f32 8.333333, %v2851_v61  ;;  %v2276_v4 = vand.u32 2147483647, %v2212_v62 }
 0x1aa   : > { %2979 = vst [vmem:[%s3996_s12 + $0xe8] sm:$0xff] %v2915_v3  ;;  %v2724_v6 = vmul.f32 %v2527_v63, %v2276_v4  ;;  %v1543_v7 = vpop.f32.mrf.mxu2  ;;  %v2547_v63 = vpop.permute.xlu1 %2546 }
 0x1ab   : > { %v1712_v9 = vpop.f32.mrf.mxu3  ;;  %v1208_v10 = vpop.f32.mrf.mxu0 }
 0x1ac   : > { %v2788_v13 = vadd.f32 1e-06, %v2724_v6  ;;  %v1713_v14 = vadd.f32 %v1712_v9, %v1543_v7  ;;  %v1377_v15 = vpop.f32.mrf.mxu1  ;;  %v2557_v37 = vpop.permute.xlu0 %2556 }
 0x1ad   : > { %v1378_v21 = vadd.f32 %v1377_v15, %v1208_v10 }
 0x1ae   : > { %v2852_v16 = vmul.f32 %v2788_v13, %v2212_v62  ;;  %v2213_v17 = vmax.f32 %v1375_v12, %v1713_v14  ;;  %1247 = vmatmul.bf16.gmra.mxu0 %v3339_v8 }
 0x1af   : > { %1416 = vmatmul.bf16.gmra.mxu1 %v3343_v11  ;;  %1585 = vmatmul.bf16.gmra.mxu2 %v3339_v8  ;;  %v3355_v8 = vor.u32 %v3584_v1, %v3354_v0  ;;  %v3588_v0 = vld [vmem:[%s3925_s7 + $0x1c4] sm:$0xf0]  ;;  %v3587_v1 = vld [vmem:[%s3925_s7 + $0x1c4] sm:$0xf] }
 0x1b0   : > { %v2916_v19 = vmul.f32 8.333333, %v2852_v16  ;;  %1754 = vmatmul.bf16.gmra.mxu3 %v3343_v11  ;;  %v2277_v20 = vand.u32 2147483647, %v2213_v17  ;;  %v3359_v11 = vor.u32 %v3583_v2, %v3356_v5 }
 0x1b2   : > { %2980 = vst [vmem:[%s3996_s12 + $0xf0] sm:$0xff] %v2916_v19  ;;  %v2725_v22 = vmul.f32 %v2532_v18, %v2277_v20  ;;  %v1546_v23 = vpop.f32.mrf.mxu2  ;;  %v2552_v20 = vpop.permute.xlu2 %2551 }
 0x1b3   : > { %v1715_v24 = vpop.f32.mrf.mxu3  ;;  %v1210_v25 = vpop.f32.mrf.mxu0 }
 0x1b4   : > { %v2789_v26 = vadd.f32 1e-06, %v2725_v22  ;;  %v1716_v27 = vadd.f32 %v1715_v24, %v1546_v23  ;;  %v1379_v28 = vpop.f32.mrf.mxu1 }
 0x1b5   : > { %v1380_v44 = vadd.f32 %v1379_v28, %v1210_v25 }
 0x1b6   : > { %v2853_v29 = vmul.f32 %v2789_v26, %v2213_v17  ;;  %v2214_v30 = vmax.f32 %v1378_v21, %v1716_v27 }
 0x1b8   : > { %v2917_v35 = vmul.f32 8.333333, %v2853_v29  ;;  %v2278_v36 = vand.u32 2147483647, %v2214_v30 }
 0x1ba   : > { %2981 = vst [vmem:[%s3996_s12 + $0xf8] sm:$0xff] %v2917_v35  ;;  %v2726_v38 = vmul.f32 %v2537_v31, %v2278_v36  ;;  %v1548_v39 = vpop.f32.mrf.mxu2  ;;  %v3362_v31 = vld [vmem:[%s3925_s7 + $0x1b0] sm:$0xf]  ;;  %v3364_v36 = vld [vmem:[%s3925_s7 + $0x1b8] sm:$0xf0]  ;;  %v2567_v5 = vpop.permute.xlu2 %2566 }
 0x1bb   : > { %v1717_v41 = vpop.f32.mrf.mxu3  ;;  %v1213_v42 = vpop.f32.mrf.mxu0 }
 0x1bc   : > { %v2790_v45 = vadd.f32 1e-06, %v2726_v38  ;;  %v1718_v46 = vadd.f32 %v1717_v41, %v1548_v39  ;;  %v1382_v47 = vpop.f32.mrf.mxu1 }
 0x1bd   : > { %v1383_v54 = vadd.f32 %v1382_v47, %v1213_v42 }
 0x1be   : > { %v2854_v48 = vmul.f32 %v2790_v45, %v2214_v30  ;;  %v2215_v49 = vmax.f32 %v1380_v44, %v1718_v46  ;;  %1252 = vmatmul.bf16.gmra.mxu0 %v3347_v40 }
 0x1bf   : > { %1421 = vmatmul.bf16.gmra.mxu1 %v3351_v43  ;;  %1590 = vmatmul.bf16.gmra.mxu2 %v3347_v40  ;;  %v3363_v40 = vor.u32 %v3586_v32, %v3362_v31  ;;  %v3378_v31 = vld [vmem:[%s3925_s7 + $0x1d0] sm:$0xf]  ;;  %v3590_v32 = vld [vmem:[%s3925_s7 + $0x1d4] sm:$0xf0] }
 0x1c0   : > { %v2918_v50 = vmul.f32 8.333333, %v2854_v48  ;;  %v2279_v51 = vand.u32 2147483647, %v2215_v49  ;;  %1759 = vmatmul.bf16.gmra.mxu3 %v3351_v43  ;;  %v3367_v43 = vor.u32 %v3585_v33, %v3364_v36  ;;  %v3589_v33 = vld [vmem:[%s3925_s7 + $0x1d4] sm:$0xf] }
 0x1c1   : > { %v3380_v36 = vld [vmem:[%s3925_s7 + $0x1d8] sm:$0xf0] }
 0x1c2   : > { %2982 = vst [vmem:[%s3996_s12 + $0x100] sm:$0xff] %v2918_v50  ;;  %v2727_v53 = vmul.f32 %v2542_v52, %v2279_v51  ;;  %v1551_v55 = vpop.f32.mrf.mxu2  ;;  %v2562_v52 = vpop.permute.xlu1 %2561 }
 0x1c3   : > { %v1720_v56 = vpop.f32.mrf.mxu3  ;;  %v1215_v57 = vpop.f32.mrf.mxu0 }
 0x1c4   : > { %v2791_v58 = vadd.f32 1e-06, %v2727_v53  ;;  %v1721_v59 = vadd.f32 %v1720_v56, %v1551_v55  ;;  %v1384_v60 = vpop.f32.mrf.mxu1 }
 0x1c5   : > { %v1385_v12 = vadd.f32 %v1384_v60, %v1215_v57 }
 0x1c6   : > { %v2855_v61 = vmul.f32 %v2791_v58, %v2215_v49  ;;  %v2216_v62 = vmax.f32 %v1383_v54, %v1721_v59 }
 0x1c8   : > { %v2919_v3 = vmul.f32 8.333333, %v2855_v61  ;;  %v2280_v4 = vand.u32 2147483647, %v2216_v62 }
 0x1ca   : > { %2983 = vst [vmem:[%s3996_s12 + $0x108] sm:$0xff] %v2919_v3  ;;  %v2728_v6 = vmul.f32 %v2547_v63, %v2280_v4  ;;  %v1553_v7 = vpop.f32.mrf.mxu2  ;;  %v3370_v63 = vld [vmem:[%s3925_s7 + $0x1c0] sm:$0xf]  ;;  %v3372_v4 = vld [vmem:[%s3925_s7 + $0x1c8] sm:$0xf0] }
 0x1cb   : > { %v1722_v9 = vpop.f32.mrf.mxu3  ;;  %v1218_v10 = vpop.f32.mrf.mxu0 }
 0x1cc   : > { %v2792_v13 = vadd.f32 1e-06, %v2728_v6  ;;  %v1723_v14 = vadd.f32 %v1722_v9, %v1553_v7  ;;  %v1387_v15 = vpop.f32.mrf.mxu1 }
 0x1cd   : > { %v1388_v22 = vadd.f32 %v1387_v15, %v1218_v10 }
 0x1ce   : > { %v2856_v16 = vmul.f32 %v2792_v13, %v2216_v62  ;;  %v2217_v17 = vmax.f32 %v1385_v12, %v1723_v14  ;;  %1257 = vmatmul.bf16.gmra.mxu0 %v3355_v8 }
 0x1cf   : > { %1426 = vmatmul.bf16.gmra.mxu1 %v3359_v11  ;;  %1595 = vmatmul.bf16.gmra.mxu2 %v3355_v8  ;;  %v3371_v8 = vor.u32 %v3588_v0, %v3370_v63  ;;  %v3386_v63 = vld [vmem:[%s3925_s7 + $0x1e0] sm:$0xf]  ;;  %v3592_v0 = vld [vmem:[%s3925_s7 + $0x1e4] sm:$0xf0] }
 0x1d0   : > { %v2920_v18 = vmul.f32 8.333333, %v2856_v16  ;;  %v2281_v19 = vand.u32 2147483647, %v2217_v17  ;;  %1764 = vmatmul.bf16.gmra.mxu3 %v3359_v11  ;;  %v3375_v11 = vor.u32 %v3587_v1, %v3372_v4  ;;  %v3591_v1 = vld [vmem:[%s3925_s7 + $0x1e4] sm:$0xf] }
 0x1d1   : > { %v3388_v4 = vld [vmem:[%s3925_s7 + $0x1e8] sm:$0xf0] }
 0x1d2   : > { %2984 = vst [vmem:[%s3996_s12 + $0x110] sm:$0xff] %v2920_v18  ;;  %v2729_v21 = vmul.f32 %v2552_v20, %v2281_v19  ;;  %v1556_v23 = vpop.f32.mrf.mxu2  ;;  %v2572_v20 = vpop.permute.xlu0 %2571 }
 0x1d3   : > { %v1725_v24 = vpop.f32.mrf.mxu3  ;;  %v1220_v25 = vpop.f32.mrf.mxu0 }
 0x1d4   : > { %v2793_v26 = vadd.f32 1e-06, %v2729_v21  ;;  %v1726_v27 = vadd.f32 %v1725_v24, %v1556_v23  ;;  %v1389_v28 = vpop.f32.mrf.mxu1 }
 0x1d5   : > { %v1390_v45 = vadd.f32 %v1389_v28, %v1220_v25 }
 0x1d6   : > { %v2857_v29 = vmul.f32 %v2793_v26, %v2217_v17  ;;  %v2218_v30 = vmax.f32 %v1388_v22, %v1726_v27 }
 0x1d8   : > { %v2921_v34 = vmul.f32 8.333333, %v2857_v29  ;;  %v2282_v35 = vand.u32 2147483647, %v2218_v30 }
 0x1da   : > { %2985 = vst [vmem:[%s3996_s12 + $0x118] sm:$0xff] %v2921_v34  ;;  %v2730_v38 = vmul.f32 %v2557_v37, %v2282_v35  ;;  %v1558_v39 = vpop.f32.mrf.mxu2  ;;  %v2577_v37 = vpop.permute.xlu1 %2576 }
 0x1db   : > { %v1727_v41 = vpop.f32.mrf.mxu3  ;;  %v1223_v42 = vpop.f32.mrf.mxu0 }
 0x1dc   : > { %v2794_v44 = vadd.f32 1e-06, %v2730_v38  ;;  %v1728_v46 = vadd.f32 %v1727_v41, %v1558_v39  ;;  %v1392_v47 = vpop.f32.mrf.mxu1 }
 0x1dd   : > { %v1393_v54 = vadd.f32 %v1392_v47, %v1223_v42 }
 0x1de   : > { %v2858_v48 = vmul.f32 %v2794_v44, %v2218_v30  ;;  %v2219_v49 = vmax.f32 %v1390_v45, %v1728_v46  ;;  %1262 = vmatmul.bf16.gmra.mxu0 %v3363_v40 }
 0x1df   : > { %1431 = vmatmul.bf16.gmra.mxu1 %v3367_v43  ;;  %1600 = vmatmul.bf16.gmra.mxu2 %v3363_v40  ;;  %v3379_v40 = vor.u32 %v3590_v32, %v3378_v31  ;;  %v3394_v31 = vld [vmem:[%s3925_s7 + $0x1f0] sm:$0xf]  ;;  %v3594_v32 = vld [vmem:[%s3925_s7 + $0x1f4] sm:$0xf0] }
 0x1e0   : > { %v2922_v50 = vmul.f32 8.333333, %v2858_v48  ;;  %v2283_v51 = vand.u32 2147483647, %v2219_v49  ;;  %1769 = vmatmul.bf16.gmra.mxu3 %v3367_v43  ;;  %v3383_v43 = vor.u32 %v3589_v33, %v3380_v36  ;;  %v3593_v33 = vld [vmem:[%s3925_s7 + $0x1f4] sm:$0xf] }
 0x1e1   : > { %v3396_v36 = vld [vmem:[%s3925_s7 + $0x1f8] sm:$0xf0] }
 0x1e2   : > { %2986 = vst [vmem:[%s3996_s12 + $0x120] sm:$0xff] %v2922_v50  ;;  %v2731_v53 = vmul.f32 %v2562_v52, %v2283_v51  ;;  %v1561_v55 = vpop.f32.mrf.mxu2  ;;  %v2582_v52 = vpop.permute.xlu2 %2581 }
 0x1e3   : > { %v1730_v56 = vpop.f32.mrf.mxu3  ;;  %v1225_v57 = vpop.f32.mrf.mxu0 }
 0x1e4   : > { %v2795_v58 = vadd.f32 1e-06, %v2731_v53  ;;  %v1731_v59 = vadd.f32 %v1730_v56, %v1561_v55  ;;  %v1394_v60 = vpop.f32.mrf.mxu1 }
 0x1e5   : > { %v1395_v13 = vadd.f32 %v1394_v60, %v1225_v57 }
 0x1e6   : > { %v2859_v61 = vmul.f32 %v2795_v58, %v2219_v49  ;;  %v2220_v62 = vmax.f32 %v1393_v54, %v1731_v59 }
 0x1e8   : > { %v2923_v2 = vmul.f32 8.333333, %v2859_v61  ;;  %v2284_v3 = vand.u32 2147483647, %v2220_v62 }
 0x1ea   : > { %2987 = vst [vmem:[%s3996_s12 + $0x128] sm:$0xff] %v2923_v2  ;;  %v2732_v6 = vmul.f32 %v2567_v5, %v2284_v3  ;;  %v1563_v7 = vpop.f32.mrf.mxu2  ;;  %v2587_v5 = vpop.permute.xlu0 %2586 }
 0x1eb   : > { %v1732_v9 = vpop.f32.mrf.mxu3  ;;  %v1228_v10 = vpop.f32.mrf.mxu0 }
 0x1ec   : > { %v2796_v12 = vadd.f32 1e-06, %v2732_v6  ;;  %v1733_v14 = vadd.f32 %v1732_v9, %v1563_v7  ;;  %v1397_v15 = vpop.f32.mrf.mxu1 }
 0x1ed   : > { %v1398_v22 = vadd.f32 %v1397_v15, %v1228_v10 }
 0x1ee   : > { %v2860_v16 = vmul.f32 %v2796_v12, %v2220_v62  ;;  %v2221_v17 = vmax.f32 %v1395_v13, %v1733_v14  ;;  %1267 = vmatmul.bf16.gmra.mxu0 %v3371_v8 }
 0x1ef   : > { %1436 = vmatmul.bf16.gmra.mxu1 %v3375_v11  ;;  %1605 = vmatmul.bf16.gmra.mxu2 %v3371_v8  ;;  %v3387_v8 = vor.u32 %v3592_v0, %v3386_v63 }
 0x1f0   : > { %v2924_v18 = vmul.f32 8.333333, %v2860_v16  ;;  %v2285_v19 = vand.u32 2147483647, %v2221_v17  ;;  %1774 = vmatmul.bf16.gmra.mxu3 %v3375_v11  ;;  %v3391_v11 = vor.u32 %v3591_v1, %v3388_v4 }
 0x1f2   : > { %2988 = vst [vmem:[%s3996_s12 + $0x130] sm:$0xff] %v2924_v18  ;;  %v2733_v21 = vmul.f32 %v2572_v20, %v2285_v19  ;;  %v1566_v23 = vpop.f32.mrf.mxu2  ;;  %v2592_v20 = vpop.permute.xlu1 %2591 }
 0x1f3   : > { %v1735_v24 = vpop.f32.mrf.mxu3  ;;  %v1230_v25 = vpop.f32.mrf.mxu0 }
 0x1f4   : > { %v2797_v26 = vadd.f32 1e-06, %v2733_v21  ;;  %v1736_v27 = vadd.f32 %v1735_v24, %v1566_v23  ;;  %v1399_v28 = vpop.f32.mrf.mxu1 }
 0x1f5   : > { %v1400_v45 = vadd.f32 %v1399_v28, %v1230_v25 }
 0x1f6   : > { %v2861_v29 = vmul.f32 %v2797_v26, %v2221_v17  ;;  %v2222_v30 = vmax.f32 %v1398_v22, %v1736_v27 }
 0x1f8   : > { %v2925_v34 = vmul.f32 8.333333, %v2861_v29  ;;  %v2286_v35 = vand.u32 2147483647, %v2222_v30 }
 0x1fa   : > { %2989 = vst [vmem:[%s3996_s12 + $0x138] sm:$0xff] %v2925_v34  ;;  %v2734_v38 = vmul.f32 %v2577_v37, %v2286_v35  ;;  %v1568_v39 = vpop.f32.mrf.mxu2  ;;  %v2597_v37 = vpop.permute.xlu2 %2596 }
 0x1fb   : > { %v1737_v41 = vpop.f32.mrf.mxu3  ;;  %v1233_v42 = vpop.f32.mrf.mxu0 }
 0x1fc   : > { %v2798_v44 = vadd.f32 1e-06, %v2734_v38  ;;  %v1738_v46 = vadd.f32 %v1737_v41, %v1568_v39  ;;  %v1402_v47 = vpop.f32.mrf.mxu1  ;;  %v2607_v1 = vpop.permute.xlu1 %2606 }
 0x1fd   : > { %v1403_v54 = vadd.f32 %v1402_v47, %v1233_v42 }
 0x1fe   : > { %v2862_v48 = vmul.f32 %v2798_v44, %v2222_v30  ;;  %v2223_v49 = vmax.f32 %v1400_v45, %v1738_v46  ;;  %1272 = vmatmul.bf16.gmra.mxu0 %v3379_v40 }
 0x1ff   : > { %1441 = vmatmul.bf16.gmra.mxu1 %v3383_v43  ;;  %1610 = vmatmul.bf16.gmra.mxu2 %v3379_v40  ;;  %v3395_v40 = vor.u32 %v3594_v32, %v3394_v31 }
 0x200   : > { %v2926_v50 = vmul.f32 8.333333, %v2862_v48  ;;  %v2287_v51 = vand.u32 2147483647, %v2223_v49  ;;  %1779 = vmatmul.bf16.gmra.mxu3 %v3383_v43  ;;  %v3399_v43 = vor.u32 %v3593_v33, %v3396_v36 }
 0x202   : > { %2990 = vst [vmem:[%s3996_s12 + $0x140] sm:$0xff] %v2926_v50  ;;  %v2735_v53 = vmul.f32 %v2582_v52, %v2287_v51  ;;  %v1571_v55 = vpop.f32.mrf.mxu2  ;;  %v2602_v52 = vpop.permute.xlu0 %2601 }
 0x203   : > { %v1740_v56 = vpop.f32.mrf.mxu3  ;;  %v1235_v57 = vpop.f32.mrf.mxu0 }
 0x204   : > { %v2799_v58 = vadd.f32 1e-06, %v2735_v53  ;;  %v1741_v59 = vadd.f32 %v1740_v56, %v1571_v55  ;;  %v1404_v60 = vpop.f32.mrf.mxu1 }
 0x205   : > { %v1405_v13 = vadd.f32 %v1404_v60, %v1235_v57 }
 0x206   : > { %v2863_v61 = vmul.f32 %v2799_v58, %v2223_v49  ;;  %v2224_v62 = vmax.f32 %v1403_v54, %v1741_v59 }
 0x208   : > { %v2927_v2 = vmul.f32 8.333333, %v2863_v61  ;;  %v2288_v3 = vand.u32 2147483647, %v2224_v62 }
 0x20a   : > { %2991 = vst [vmem:[%s3996_s12 + $0x148] sm:$0xff] %v2927_v2  ;;  %v2736_v6 = vmul.f32 %v2587_v5, %v2288_v3  ;;  %v1573_v7 = vpop.f32.mrf.mxu2 }
 0x20b   : > { %v1742_v9 = vpop.f32.mrf.mxu3  ;;  %v1238_v10 = vpop.f32.mrf.mxu0 }
 0x20c   : > { %v2800_v12 = vadd.f32 1e-06, %v2736_v6  ;;  %v1743_v14 = vadd.f32 %v1742_v9, %v1573_v7  ;;  %v1407_v15 = vpop.f32.mrf.mxu1 }
 0x20d   : > { %v1408_v22 = vadd.f32 %v1407_v15, %v1238_v10 }
 0x20e   : > { %v2864_v16 = vmul.f32 %v2800_v12, %v2224_v62  ;;  %v2225_v17 = vmax.f32 %v1405_v13, %v1743_v14  ;;  %1277 = vmatmul.bf16.gmra.mxu0 %v3387_v8  ;;  %v2612_v14 = vpop.permute.xlu2 %2611 }
 0x20f   : > { %1446 = vmatmul.bf16.gmra.mxu1 %v3391_v11  ;;  %1615 = vmatmul.bf16.gmra.mxu2 %v3387_v8 }
 0x210   : > { %v2928_v18 = vmul.f32 8.333333, %v2864_v16  ;;  %v2289_v19 = vand.u32 2147483647, %v2225_v17  ;;  %1784 = vmatmul.bf16.gmra.mxu3 %v3391_v11 }
 0x212   : > { %2992 = vst [vmem:[%s3996_s12 + $0x150] sm:$0xff] %v2928_v18  ;;  %v2737_v21 = vmul.f32 %v2592_v20, %v2289_v19  ;;  %v1576_v23 = vpop.f32.mrf.mxu2 }
 0x213   : > { %v1745_v24 = vpop.f32.mrf.mxu3  ;;  %v1240_v25 = vpop.f32.mrf.mxu0 }
 0x214   : > { %v2801_v26 = vadd.f32 1e-06, %v2737_v21  ;;  %v1746_v27 = vadd.f32 %v1745_v24, %v1576_v23  ;;  %v1409_v28 = vpop.f32.mrf.mxu1 }
 0x215   : > { %v1410_v45 = vadd.f32 %v1409_v28, %v1240_v25 }
 0x216   : > { %v2865_v29 = vmul.f32 %v2801_v26, %v2225_v17  ;;  %v2226_v30 = vmax.f32 %v1408_v22, %v1746_v27  ;;  %v2617_v27 = vpop.permute.xlu0 %2616 }
 0x218   : > { %v2929_v34 = vmul.f32 8.333333, %v2865_v29  ;;  %v2290_v35 = vand.u32 2147483647, %v2226_v30 }
 0x21a   : > { %2993 = vst [vmem:[%s3996_s12 + $0x158] sm:$0xff] %v2929_v34  ;;  %v2738_v38 = vmul.f32 %v2597_v37, %v2290_v35  ;;  %v1578_v39 = vpop.f32.mrf.mxu2 }
 0x21b   : > { %v1747_v41 = vpop.f32.mrf.mxu3  ;;  %v1243_v42 = vpop.f32.mrf.mxu0 }
 0x21c   : > { %v2802_v44 = vadd.f32 1e-06, %v2738_v38  ;;  %v1748_v46 = vadd.f32 %v1747_v41, %v1578_v39  ;;  %v1412_v47 = vpop.f32.mrf.mxu1 }
 0x21d   : > { %v1413_v54 = vadd.f32 %v1412_v47, %v1243_v42 }
 0x21e   : > { %v2866_v48 = vmul.f32 %v2802_v44, %v2226_v30  ;;  %v2227_v49 = vmax.f32 %v1410_v45, %v1748_v46  ;;  %1282 = vmatmul.bf16.gmra.mxu0 %v3395_v40 }
 0x21f   : > { %1451 = vmatmul.bf16.gmra.mxu1 %v3399_v43  ;;  %1620 = vmatmul.bf16.gmra.mxu2 %v3395_v40  ;;  %v2622_v40 = vpop.permute.xlu1 %2621 }
 0x220   : > { %v2930_v50 = vmul.f32 8.333333, %v2866_v48  ;;  %v2291_v51 = vand.u32 2147483647, %v2227_v49  ;;  %1789 = vmatmul.bf16.gmra.mxu3 %v3399_v43 }
 0x222   : > { %2994 = vst [vmem:[%s3996_s12 + $0x160] sm:$0xff] %v2930_v50  ;;  %v2739_v53 = vmul.f32 %v2602_v52, %v2291_v51  ;;  %v1581_v55 = vpop.f32.mrf.mxu2 }
 0x223   : > { %v1750_v56 = vpop.f32.mrf.mxu3  ;;  %v1245_v57 = vpop.f32.mrf.mxu0 }
 0x224   : > { %v2803_v58 = vadd.f32 1e-06, %v2739_v53  ;;  %v1751_v59 = vadd.f32 %v1750_v56, %v1581_v55  ;;  %v1414_v60 = vpop.f32.mrf.mxu1  ;;  %v2627_v53 = vpop.permute.xlu2 %2626 }
 0x225   : > { %v1415_v7 = vadd.f32 %v1414_v60, %v1245_v57 }
 0x226   : > { %v2867_v61 = vmul.f32 %v2803_v58, %v2227_v49  ;;  %v2228_v62 = vmax.f32 %v1413_v54, %v1751_v59 }
 0x228   : > { %v2931_v63 = vmul.f32 8.333333, %v2867_v61  ;;  %v2292_v0 = vand.u32 2147483647, %v2228_v62 }
 0x22a   : > { %2995 = vst [vmem:[%s3996_s12 + $0x168] sm:$0xff] %v2931_v63  ;;  %v2740_v2 = vmul.f32 %v2607_v1, %v2292_v0  ;;  %v1583_v3 = vpop.f32.mrf.mxu2 }
 0x22b   : > { %v1752_v4 = vpop.f32.mrf.mxu3  ;;  %v1248_v5 = vpop.f32.mrf.mxu0 }
 0x22c   : > { %v2804_v6 = vadd.f32 1e-06, %v2740_v2  ;;  %v1753_v8 = vadd.f32 %v1752_v4, %v1583_v3  ;;  %v1417_v9 = vpop.f32.mrf.mxu1  ;;  %v2632_v2 = vpop.permute.xlu0 %2631 }
 0x22d   : > { %v1418_v16 = vadd.f32 %v1417_v9, %v1248_v5 }
 0x22e   : > { %v2868_v10 = vmul.f32 %v2804_v6, %v2228_v62  ;;  %v2229_v11 = vmax.f32 %v1415_v7, %v1753_v8 }
 0x230   : > { %v2932_v12 = vmul.f32 8.333333, %v2868_v10  ;;  %v2293_v13 = vand.u32 2147483647, %v2229_v11 }
 0x232   : > { %2996 = vst [vmem:[%s3996_s12 + $0x170] sm:$0xff] %v2932_v12  ;;  %v2741_v15 = vmul.f32 %v2612_v14, %v2293_v13  ;;  %v1586_v17 = vpop.f32.mrf.mxu2 }
 0x233   : > { %v1755_v18 = vpop.f32.mrf.mxu3  ;;  %v1250_v19 = vpop.f32.mrf.mxu0 }
 0x234   : > { %v2805_v20 = vadd.f32 1e-06, %v2741_v15  ;;  %v1756_v21 = vadd.f32 %v1755_v18, %v1586_v17  ;;  %v1419_v22 = vpop.f32.mrf.mxu1  ;;  %v2637_v15 = vpop.permute.xlu1 %2636 }
 0x235   : > { %v1420_v33 = vadd.f32 %v1419_v22, %v1250_v19 }
 0x236   : > { %v2869_v23 = vmul.f32 %v2805_v20, %v2229_v11  ;;  %v2230_v24 = vmax.f32 %v1418_v16, %v1756_v21 }
 0x238   : > { %v2933_v25 = vmul.f32 8.333333, %v2869_v23  ;;  %v2294_v26 = vand.u32 2147483647, %v2230_v24 }
 0x23a   : > { %2997 = vst [vmem:[%s3996_s12 + $0x178] sm:$0xff] %v2933_v25  ;;  %v2742_v28 = vmul.f32 %v2617_v27, %v2294_v26  ;;  %v1588_v29 = vpop.f32.mrf.mxu2 }
 0x23b   : > { %v1757_v30 = vpop.f32.mrf.mxu3  ;;  %v1253_v31 = vpop.f32.mrf.mxu0 }
 0x23c   : > { %v2806_v32 = vadd.f32 1e-06, %v2742_v28  ;;  %v1758_v34 = vadd.f32 %v1757_v30, %v1588_v29  ;;  %v1422_v35 = vpop.f32.mrf.mxu1  ;;  %v2642_v28 = vpop.permute.xlu2 %2641 }
 0x23d   : > { %v1423_v42 = vadd.f32 %v1422_v35, %v1253_v31 }
 0x23e   : > { %v2870_v36 = vmul.f32 %v2806_v32, %v2230_v24  ;;  %v2231_v37 = vmax.f32 %v1420_v33, %v1758_v34 }
 0x240   : > { %v2934_v38 = vmul.f32 8.333333, %v2870_v36  ;;  %v2295_v39 = vand.u32 2147483647, %v2231_v37 }
 0x242   : > { %2998 = vst [vmem:[%s3996_s12 + $0x180] sm:$0xff] %v2934_v38  ;;  %v2743_v41 = vmul.f32 %v2622_v40, %v2295_v39  ;;  %v1591_v43 = vpop.f32.mrf.mxu2 }
 0x243   : > { %v1760_v44 = vpop.f32.mrf.mxu3  ;;  %v1255_v45 = vpop.f32.mrf.mxu0 }
 0x244   : > { %v2807_v46 = vadd.f32 1e-06, %v2743_v41  ;;  %v1761_v47 = vadd.f32 %v1760_v44, %v1591_v43  ;;  %v1424_v48 = vpop.f32.mrf.mxu1  ;;  %v2647_v41 = vpop.permute.xlu0 %2646 }
 0x245   : > { %v1425_v59 = vadd.f32 %v1424_v48, %v1255_v45 }
 0x246   : > { %v2871_v49 = vmul.f32 %v2807_v46, %v2231_v37  ;;  %v2232_v50 = vmax.f32 %v1423_v42, %v1761_v47 }
 0x248   : > { %v2935_v51 = vmul.f32 8.333333, %v2871_v49  ;;  %v2296_v52 = vand.u32 2147483647, %v2232_v50 }
 0x24a   : > { %2999 = vst [vmem:[%s3996_s12 + $0x188] sm:$0xff] %v2935_v51  ;;  %v2744_v54 = vmul.f32 %v2627_v53, %v2296_v52  ;;  %v1593_v55 = vpop.f32.mrf.mxu2 }
 0x24b   : > { %v1762_v56 = vpop.f32.mrf.mxu3  ;;  %v1258_v57 = vpop.f32.mrf.mxu0 }
 0x24c   : > { %v2808_v58 = vadd.f32 1e-06, %v2744_v54  ;;  %v1763_v60 = vadd.f32 %v1762_v56, %v1593_v55  ;;  %v1427_v61 = vpop.f32.mrf.mxu1  ;;  %v2652_v54 = vpop.permute.xlu1 %2651 }
 0x24d   : > { %v1428_v4 = vadd.f32 %v1427_v61, %v1258_v57 }
 0x24e   : > { %v2872_v62 = vmul.f32 %v2808_v58, %v2232_v50  ;;  %v2233_v63 = vmax.f32 %v1425_v59, %v1763_v60 }
 0x250   : > { %v2936_v0 = vmul.f32 8.333333, %v2872_v62  ;;  %v2297_v1 = vand.u32 2147483647, %v2233_v63 }
 0x252   : > { %3000 = vst [vmem:[%s3996_s12 + $0x190] sm:$0xff] %v2936_v0  ;;  %v2745_v3 = vmul.f32 %v2632_v2, %v2297_v1  ;;  %v1596_v5 = vpop.f32.mrf.mxu2 }
 0x253   : > { %v1765_v6 = vpop.f32.mrf.mxu3  ;;  %v1260_v7 = vpop.f32.mrf.mxu0 }
 0x254   : > { %v2809_v8 = vadd.f32 1e-06, %v2745_v3  ;;  %v1766_v9 = vadd.f32 %v1765_v6, %v1596_v5  ;;  %v1429_v10 = vpop.f32.mrf.mxu1  ;;  %v2657_v3 = vpop.permute.xlu2 %2656 }
 0x255   : > { %v1430_v21 = vadd.f32 %v1429_v10, %v1260_v7 }
 0x256   : > { %v2873_v11 = vmul.f32 %v2809_v8, %v2233_v63  ;;  %v2234_v12 = vmax.f32 %v1428_v4, %v1766_v9 }
 0x258   : > { %v2937_v13 = vmul.f32 8.333333, %v2873_v11  ;;  %v2298_v14 = vand.u32 2147483647, %v2234_v12 }
 0x25a   : > { %3001 = vst [vmem:[%s3996_s12 + $0x198] sm:$0xff] %v2937_v13  ;;  %v2746_v16 = vmul.f32 %v2637_v15, %v2298_v14  ;;  %v1598_v17 = vpop.f32.mrf.mxu2 }
 0x25b   : > { %v1767_v18 = vpop.f32.mrf.mxu3  ;;  %v1263_v19 = vpop.f32.mrf.mxu0 }
 0x25c   : > { %v2810_v20 = vadd.f32 1e-06, %v2746_v16  ;;  %v1768_v22 = vadd.f32 %v1767_v18, %v1598_v17  ;;  %v1432_v23 = vpop.f32.mrf.mxu1  ;;  %v2662_v16 = vpop.permute.xlu0 %2661 }
 0x25d   : > { %v1433_v30 = vadd.f32 %v1432_v23, %v1263_v19 }
 0x25e   : > { %v2874_v24 = vmul.f32 %v2810_v20, %v2234_v12  ;;  %v2235_v25 = vmax.f32 %v1430_v21, %v1768_v22 }
 0x260   : > { %v2938_v26 = vmul.f32 8.333333, %v2874_v24  ;;  %v2299_v27 = vand.u32 2147483647, %v2235_v25 }
 0x262   : > { %3002 = vst [vmem:[%s3996_s12 + $0x1a0] sm:$0xff] %v2938_v26  ;;  %v2747_v29 = vmul.f32 %v2642_v28, %v2299_v27  ;;  %v1601_v31 = vpop.f32.mrf.mxu2 }
 0x263   : > { %v1770_v32 = vpop.f32.mrf.mxu3  ;;  %v1265_v33 = vpop.f32.mrf.mxu0 }
 0x264   : > { %v2811_v34 = vadd.f32 1e-06, %v2747_v29  ;;  %v1771_v35 = vadd.f32 %v1770_v32, %v1601_v31  ;;  %v1434_v36 = vpop.f32.mrf.mxu1  ;;  %v2667_v29 = vpop.permute.xlu1 %2666 }
 0x265   : > { %v1435_v47 = vadd.f32 %v1434_v36, %v1265_v33 }
 0x266   : > { %v2875_v37 = vmul.f32 %v2811_v34, %v2235_v25  ;;  %v2236_v38 = vmax.f32 %v1433_v30, %v1771_v35 }
 0x268   : > { %v2939_v39 = vmul.f32 8.333333, %v2875_v37  ;;  %v2300_v40 = vand.u32 2147483647, %v2236_v38 }
 0x26a   : > { %3003 = vst [vmem:[%s3996_s12 + $0x1a8] sm:$0xff] %v2939_v39  ;;  %v2748_v42 = vmul.f32 %v2647_v41, %v2300_v40  ;;  %v1603_v43 = vpop.f32.mrf.mxu2 }
 0x26b   : > { %v1772_v44 = vpop.f32.mrf.mxu3  ;;  %v1268_v45 = vpop.f32.mrf.mxu0 }
 0x26c   : > { %v2812_v46 = vadd.f32 1e-06, %v2748_v42  ;;  %v1773_v48 = vadd.f32 %v1772_v44, %v1603_v43  ;;  %v1437_v49 = vpop.f32.mrf.mxu1  ;;  %v2672_v42 = vpop.permute.xlu2 %2671 }
 0x26d   : > { %v1438_v56 = vadd.f32 %v1437_v49, %v1268_v45 }
 0x26e   : > { %v2876_v50 = vmul.f32 %v2812_v46, %v2236_v38  ;;  %v2237_v51 = vmax.f32 %v1435_v47, %v1773_v48 }
 0x270   : > { %v2940_v52 = vmul.f32 8.333333, %v2876_v50  ;;  %v2301_v53 = vand.u32 2147483647, %v2237_v51 }
 0x272   : > { %3004 = vst [vmem:[%s3996_s12 + $0x1b0] sm:$0xff] %v2940_v52  ;;  %v2749_v55 = vmul.f32 %v2652_v54, %v2301_v53  ;;  %v1606_v57 = vpop.f32.mrf.mxu2 }
 0x273   : > { %v1775_v58 = vpop.f32.mrf.mxu3  ;;  %v1270_v59 = vpop.f32.mrf.mxu0 }
 0x274   : > { %v2813_v60 = vadd.f32 1e-06, %v2749_v55  ;;  %v1776_v61 = vadd.f32 %v1775_v58, %v1606_v57  ;;  %v1439_v62 = vpop.f32.mrf.mxu1  ;;  %v2677_v55 = vpop.permute.xlu0 %2676 }
 0x275   : > { %v1440_v9 = vadd.f32 %v1439_v62, %v1270_v59 }
 0x276   : > { %v2877_v63 = vmul.f32 %v2813_v60, %v2237_v51  ;;  %v2238_v0 = vmax.f32 %v1438_v56, %v1776_v61 }
 0x278   : > { %v2941_v1 = vmul.f32 8.333333, %v2877_v63  ;;  %v2302_v2 = vand.u32 2147483647, %v2238_v0 }
 0x27a   : > { %3005 = vst [vmem:[%s3996_s12 + $0x1b8] sm:$0xff] %v2941_v1  ;;  %v2750_v4 = vmul.f32 %v2657_v3, %v2302_v2  ;;  %v1608_v5 = vpop.f32.mrf.mxu2 }
 0x27b   : > { %v1777_v6 = vpop.f32.mrf.mxu3  ;;  %v1273_v7 = vpop.f32.mrf.mxu0 }
 0x27c   : > { %v2814_v8 = vadd.f32 1e-06, %v2750_v4  ;;  %v1778_v10 = vadd.f32 %v1777_v6, %v1608_v5  ;;  %v1442_v11 = vpop.f32.mrf.mxu1  ;;  %v2682_v4 = vpop.permute.xlu1 %2681 }
 0x27d   : > { %v1443_v18 = vadd.f32 %v1442_v11, %v1273_v7 }
 0x27e   : > { %v2878_v12 = vmul.f32 %v2814_v8, %v2238_v0  ;;  %v2239_v13 = vmax.f32 %v1440_v9, %v1778_v10 }
 0x280   : > { %v2942_v14 = vmul.f32 8.333333, %v2878_v12  ;;  %v2303_v15 = vand.u32 2147483647, %v2239_v13 }
 0x282   : > { %3006 = vst [vmem:[%s3996_s12 + $0x1c0] sm:$0xff] %v2942_v14  ;;  %v2751_v17 = vmul.f32 %v2662_v16, %v2303_v15  ;;  %v1611_v19 = vpop.f32.mrf.mxu2 }
 0x283   : > { %v1780_v20 = vpop.f32.mrf.mxu3  ;;  %v1275_v21 = vpop.f32.mrf.mxu0 }
 0x284   : > { %v2815_v22 = vadd.f32 1e-06, %v2751_v17  ;;  %v1781_v23 = vadd.f32 %v1780_v20, %v1611_v19  ;;  %v1444_v24 = vpop.f32.mrf.mxu1 }
 0x285   : > { %v1445_v35 = vadd.f32 %v1444_v24, %v1275_v21 }
 0x286   : > { %v2879_v25 = vmul.f32 %v2815_v22, %v2239_v13  ;;  %v2240_v26 = vmax.f32 %v1443_v18, %v1781_v23  ;;  %v2687_v13 = vpop.permute.xlu2 %2686 }
 0x288   : > { %v2943_v27 = vmul.f32 8.333333, %v2879_v25  ;;  %v2304_v28 = vand.u32 2147483647, %v2240_v26 }
 0x28a   : > { %3007 = vst [vmem:[%s3996_s12 + $0x1c8] sm:$0xff] %v2943_v27  ;;  %v2752_v30 = vmul.f32 %v2667_v29, %v2304_v28  ;;  %v1613_v31 = vpop.f32.mrf.mxu2  ;;  %v2692_v28 = vpop.permute.xlu0 %2691 }
 0x28b   : > { %v1782_v32 = vpop.f32.mrf.mxu3  ;;  %v1278_v33 = vpop.f32.mrf.mxu0 }
 0x28c   : > { %v2816_v34 = vadd.f32 1e-06, %v2752_v30  ;;  %v1783_v36 = vadd.f32 %v1782_v32, %v1613_v31  ;;  %v1447_v37 = vpop.f32.mrf.mxu1 }
 0x28d   : > { %v1448_v44 = vadd.f32 %v1447_v37, %v1278_v33 }
 0x28e   : > { %v2880_v38 = vmul.f32 %v2816_v34, %v2240_v26  ;;  %v2241_v39 = vmax.f32 %v1445_v35, %v1783_v36 }
 0x290   : > { %v2944_v40 = vmul.f32 8.333333, %v2880_v38  ;;  %v2305_v41 = vand.u32 2147483647, %v2241_v39 }
 0x292   : > { %3008 = vst [vmem:[%s3996_s12 + $0x1d0] sm:$0xff] %v2944_v40  ;;  %v2753_v43 = vmul.f32 %v2672_v42, %v2305_v41  ;;  %v1616_v45 = vpop.f32.mrf.mxu2 }
 0x293   : > { %v1785_v46 = vpop.f32.mrf.mxu3  ;;  %v1280_v49 = vpop.f32.mrf.mxu0 }
 0x294   : > { %v2817_v47 = vadd.f32 1e-06, %v2753_v43  ;;  %v1786_v48 = vadd.f32 %v1785_v46, %v1616_v45  ;;  %v1449_v50 = vpop.f32.mrf.mxu1 }
 0x295   : > { %v1450_v60 = vadd.f32 %v1449_v50, %v1280_v49 }
 0x296   : > { %v2881_v51 = vmul.f32 %v2817_v47, %v2241_v39  ;;  %v2242_v52 = vmax.f32 %v1448_v44, %v1786_v48 }
 0x298   : > { %v2945_v53 = vmul.f32 8.333333, %v2881_v51  ;;  %v2306_v54 = vand.u32 2147483647, %v2242_v52 }
 0x29a   : > { %3009 = vst [vmem:[%s3996_s12 + $0x1d8] sm:$0xff] %v2945_v53  ;;  %v2754_v56 = vmul.f32 %v2677_v55, %v2306_v54  ;;  %v1618_v57 = vpop.f32.mrf.mxu2 }
 0x29b   : > { %v1787_v58 = vpop.f32.mrf.mxu3  ;;  %v1283_v0 = vpop.f32.mrf.mxu0 }
 0x29c   : > { %v2818_v59 = vadd.f32 1e-06, %v2754_v56  ;;  %v1788_v61 = vadd.f32 %v1787_v58, %v1618_v57  ;;  %v1452_v1 = vpop.f32.mrf.mxu1 }
 0x29d   : > { %v1453_v6 = vadd.f32 %v1452_v1, %v1283_v0 }
 0x29e   : > { %v2882_v62 = vmul.f32 %v2818_v59, %v2242_v52  ;;  %v2243_v63 = vmax.f32 %v1450_v60, %v1788_v61 }
 0x2a0   : > { %v2946_v2 = vmul.f32 8.333333, %v2882_v62  ;;  %v2307_v3 = vand.u32 2147483647, %v2243_v63 }
 0x2a2   : > { %3010 = vst [vmem:[%s3996_s12 + $0x1e0] sm:$0xff] %v2946_v2  ;;  %v2755_v5 = vmul.f32 %v2682_v4, %v2307_v3  ;;  %v1621_v7 = vpop.f32.mrf.mxu2 }
 0x2a3   : > { %v1790_v8 = vpop.f32.mrf.mxu3  ;;  %v1285_v16 = vpop.f32.mrf.mxu0 }
 0x2a4   : > { %v2819_v9 = vadd.f32 1e-06, %v2755_v5  ;;  %v1791_v10 = vadd.f32 %v1790_v8, %v1621_v7  ;;  %v1454_v17 = vpop.f32.mrf.mxu1 }
 0x2a5   : > { %v1455_v22 = vadd.f32 %v1454_v17, %v1285_v16 }
 0x2a6   : > { %v2883_v11 = vmul.f32 %v2819_v9, %v2243_v63  ;;  %v2244_v12 = vmax.f32 %v1453_v6, %v1791_v10 }
 0x2a8   : > { %v2947_v14 = vmul.f32 8.333333, %v2883_v11  ;;  %v2308_v15 = vand.u32 2147483647, %v2244_v12 }
 0x2aa   : > { %3011 = vst [vmem:[%s3996_s12 + $0x1e8] sm:$0xff] %v2947_v14  ;;  %v2756_v18 = vmul.f32 %v2687_v13, %v2308_v15  ;;  %v1623_v19 = vpop.f32.mrf.mxu2 }
 0x2ab   : > { %v1792_v20 = vpop.f32.mrf.mxu3 }
 0x2ac   : > { %v2820_v21 = vadd.f32 1e-06, %v2756_v18  ;;  %v1793_v23 = vadd.f32 %v1792_v20, %v1623_v19 }
 0x2ae   : > { %v2884_v24 = vmul.f32 %v2820_v21, %v2244_v12  ;;  %v2245_v25 = vmax.f32 %v1455_v22, %v1793_v23 }
 0x2b0   : > { %v2948_v26 = vmul.f32 8.333333, %v2884_v24  ;;  %v2309_v27 = vand.u32 2147483647, %v2245_v25 }
 0x2b2   : > { %3012 = vst [vmem:[%s3996_s12 + $0x1f0] sm:$0xff] %v2948_v26  ;;  %v2757_v29 = vmul.f32 %v2692_v28, %v2309_v27 }
 0x2b4   : > { %v2821_v30 = vadd.f32 1e-06, %v2757_v29 }
 0x2b6   : > { %v2885_v31 = vmul.f32 %v2821_v30, %v2245_v25 }
 0x2b8   : > { %v2949_v32 = vmul.f32 8.333333, %v2885_v31 }
 0x2ba   : > { %3013 = vst [vmem:[%s3996_s12 + $0x1f8] sm:$0xff] %v2949_v32 }
 0x2bb PF: > { %s13_s14 = sadd.s32 1, %s3677_s14   ;;  %s4209_s12 = smov %s3673_s13 }
 0x2bc   : > { %p10_p5 = scmp.ge.s32.totalorder %s13_s14, 6   ;;  %s4210_s13 = smov %s4212_s15 }
 0x2be   :  { %12 = sbr.rel (!%p10_p5) target bundleno = 2 (0x2), region = 76 }

// kernel: _lambda_.7
= control target key start
LH: loop header
LB: loop body
LE: loop exit
PB: predicated region body
PF: predicated region fallthrough
CT: control target
= control target key end

     0   :  { %s414_s0 = inlined_call_operand.vmem [shape: f32[32,512], index: 0, kind: input, shape index: {}]   ;;  %s415_s1 = inlined_call_operand.vmem [shape: f32[32,512], index: 1, kind: input, shape index: {}]   ;;  %s416_s2 = inlined_call_operand.vmem [shape: f32[32,512], index: 2, kind: input, shape index: {}]   ;;  %s417_s3 = inlined_call_operand.vmem [shape: f32[32,512], index: 3, kind: input, shape index: {}]   ;;  %s418_s4 = inlined_call_operand.vmem [shape: f32[32,512], index: 4, kind: output, shape index: {}]  }
   0x1   :  { %v17_v0 = vld [vmem:[%s414_s0] sm:$0xff]  ;;  %v18_v4 = vld [vmem:[%s414_s0 + $0x8] sm:$0xff]  ;;  %v19_v9 = vld [vmem:[%s414_s0 + $0x10] sm:$0xff] }
   0x2   :  { %v33_v1 = vld [vmem:[%s415_s1] sm:$0xff]  ;;  %v34_v5 = vld [vmem:[%s415_s1 + $0x8] sm:$0xff]  ;;  %v35_v12 = vld [vmem:[%s415_s1 + $0x10] sm:$0xff] }
   0x3   :  { %v65_v2 = vld [vmem:[%s416_s2] sm:$0xff]  ;;  %v49_v3 = vmax.f32 %v17_v0, %v33_v1  ;;  %v50_v7 = vmax.f32 %v18_v4, %v34_v5  ;;  %v66_v8 = vld [vmem:[%s416_s2 + $0x8] sm:$0xff]  ;;  %v67_v13 = vld [vmem:[%s416_s2 + $0x10] sm:$0xff]  ;;  %v51_v15 = vmax.f32 %v19_v9, %v35_v12 }
   0x4   :  { %v97_v6 = vld [vmem:[%s417_s3] sm:$0xff]  ;;  %v98_v11 = vld [vmem:[%s417_s3 + $0x8] sm:$0xff]  ;;  %v20_v16 = vld [vmem:[%s414_s0 + $0x18] sm:$0xff] }
   0x5   :  { %v81_v10 = vmax.f32 %v49_v3, %v65_v2  ;;  %v82_v14 = vmax.f32 %v50_v7, %v66_v8  ;;  %v36_v17 = vld [vmem:[%s415_s1 + $0x18] sm:$0xff]  ;;  %v99_v20 = vld [vmem:[%s417_s3 + $0x10] sm:$0xff]  ;;  %v21_v22 = vld [vmem:[%s414_s0 + $0x20] sm:$0xff]  ;;  %v83_v25 = vmax.f32 %v51_v15, %v67_v13 }
   0x6   :  { %v68_v18 = vld [vmem:[%s416_s2 + $0x18] sm:$0xff]  ;;  %v52_v21 = vmax.f32 %v20_v16, %v36_v17  ;;  %v37_v23 = vld [vmem:[%s415_s1 + $0x20] sm:$0xff]  ;;  %v22_v29 = vld [vmem:[%s414_s0 + $0x28] sm:$0xff] }
   0x7   :  { %v113_v19 = vmax.f32 %v81_v10, %v97_v6  ;;  %v114_v24 = vmax.f32 %v82_v14, %v98_v11  ;;  %v100_v26 = vld [vmem:[%s417_s3 + $0x18] sm:$0xff]  ;;  %v53_v27 = vmax.f32 %v21_v22, %v37_v23  ;;  %v69_v28 = vld [vmem:[%s416_s2 + $0x20] sm:$0xff]  ;;  %v38_v32 = vld [vmem:[%s415_s1 + $0x28] sm:$0xff]  ;;  %v115_v34 = vmax.f32 %v83_v25, %v99_v20 }
   0x8   :  { %v84_v30 = vmax.f32 %v52_v21, %v68_v18  ;;  %v101_v31 = vld [vmem:[%s417_s3 + $0x20] sm:$0xff]  ;;  %v70_v33 = vld [vmem:[%s416_s2 + $0x28] sm:$0xff]  ;;  %v54_v36 = vmax.f32 %v22_v29, %v38_v32  ;;  %v23_v37 = vld [vmem:[%s414_s0 + $0x30] sm:$0xff] }
   0x9   :  { %129 = vst [vmem:[%s418_s4] sm:$0xff] %v113_v19  ;;  %v85_v35 = vmax.f32 %v53_v27, %v69_v28  ;;  %v39_v38 = vld [vmem:[%s415_s1 + $0x30] sm:$0xff]  ;;  %v102_v41 = vld [vmem:[%s417_s3 + $0x28] sm:$0xff]  ;;  %v24_v43 = vld [vmem:[%s414_s0 + $0x38] sm:$0xff] }
   0xa   :  { %130 = vst [vmem:[%s418_s4 + $0x8] sm:$0xff] %v114_v24  ;;  %v71_v39 = vld [vmem:[%s416_s2 + $0x30] sm:$0xff]  ;;  %v116_v40 = vmax.f32 %v84_v30, %v100_v26  ;;  %v55_v42 = vmax.f32 %v23_v37, %v39_v38  ;;  %v40_v44 = vld [vmem:[%s415_s1 + $0x38] sm:$0xff]  ;;  %v86_v46 = vmax.f32 %v54_v36, %v70_v33  ;;  %v25_v50 = vld [vmem:[%s414_s0 + $0x40] sm:$0xff] }
   0xb   :  { %131 = vst [vmem:[%s418_s4 + $0x10] sm:$0xff] %v115_v34  ;;  %v117_v45 = vmax.f32 %v85_v35, %v101_v31  ;;  %v103_v47 = vld [vmem:[%s417_s3 + $0x30] sm:$0xff]  ;;  %v56_v48 = vmax.f32 %v24_v43, %v40_v44  ;;  %v72_v49 = vld [vmem:[%s416_s2 + $0x38] sm:$0xff]  ;;  %v41_v53 = vld [vmem:[%s415_s1 + $0x40] sm:$0xff] }
   0xc   :  { %132 = vst [vmem:[%s418_s4 + $0x18] sm:$0xff] %v116_v40  ;;  %v87_v51 = vmax.f32 %v55_v42, %v71_v39  ;;  %v104_v52 = vld [vmem:[%s417_s3 + $0x38] sm:$0xff]  ;;  %v73_v54 = vld [vmem:[%s416_s2 + $0x40] sm:$0xff]  ;;  %v118_v55 = vmax.f32 %v86_v46, %v102_v41  ;;  %v57_v57 = vmax.f32 %v25_v50, %v41_v53  ;;  %v26_v58 = vld [vmem:[%s414_s0 + $0x48] sm:$0xff] }
   0xd   :  { %133 = vst [vmem:[%s418_s4 + $0x20] sm:$0xff] %v117_v45  ;;  %v88_v56 = vmax.f32 %v56_v48, %v72_v49  ;;  %v42_v59 = vld [vmem:[%s415_s1 + $0x48] sm:$0xff]  ;;  %v105_v62 = vld [vmem:[%s417_s3 + $0x40] sm:$0xff]  ;;  %v27_v0 = vld [vmem:[%s414_s0 + $0x50] sm:$0xff] }
   0xe   :  { %v74_v60 = vld [vmem:[%s416_s2 + $0x48] sm:$0xff]  ;;  %v119_v61 = vmax.f32 %v87_v51, %v103_v47  ;;  %v58_v63 = vmax.f32 %v26_v58, %v42_v59  ;;  %v43_v1 = vld [vmem:[%s415_s1 + $0x50] sm:$0xff]  ;;  %134 = vst [vmem:[%s418_s4 + $0x28] sm:$0xff] %v118_v55  ;;  %v89_v3 = vmax.f32 %v57_v57, %v73_v54  ;;  %v28_v7 = vld [vmem:[%s414_s0 + $0x58] sm:$0xff] }
   0xf   :  { %v120_v2 = vmax.f32 %v88_v56, %v104_v52  ;;  %v106_v4 = vld [vmem:[%s417_s3 + $0x48] sm:$0xff]  ;;  %v59_v5 = vmax.f32 %v27_v0, %v43_v1  ;;  %v75_v6 = vld [vmem:[%s416_s2 + $0x50] sm:$0xff]  ;;  %v44_v10 = vld [vmem:[%s415_s1 + $0x58] sm:$0xff] }
  0x10   :  { %135 = vst [vmem:[%s418_s4 + $0x30] sm:$0xff] %v119_v61  ;;  %v90_v8 = vmax.f32 %v58_v63, %v74_v60  ;;  %v107_v9 = vld [vmem:[%s417_s3 + $0x50] sm:$0xff]  ;;  %v76_v11 = vld [vmem:[%s416_s2 + $0x58] sm:$0xff]  ;;  %v121_v12 = vmax.f32 %v89_v3, %v105_v62  ;;  %v60_v14 = vmax.f32 %v28_v7, %v44_v10  ;;  %v29_v15 = vld [vmem:[%s414_s0 + $0x60] sm:$0xff] }
  0x11   :  { %136 = vst [vmem:[%s418_s4 + $0x38] sm:$0xff] %v120_v2  ;;  %v91_v13 = vmax.f32 %v59_v5, %v75_v6  ;;  %v45_v16 = vld [vmem:[%s415_s1 + $0x60] sm:$0xff]  ;;  %v108_v19 = vld [vmem:[%s417_s3 + $0x58] sm:$0xff]  ;;  %v30_v21 = vld [vmem:[%s414_s0 + $0x68] sm:$0xff] }
  0x12   :  { %v77_v17 = vld [vmem:[%s416_s2 + $0x60] sm:$0xff]  ;;  %v122_v18 = vmax.f32 %v90_v8, %v106_v4  ;;  %v61_v20 = vmax.f32 %v29_v15, %v45_v16  ;;  %v46_v22 = vld [vmem:[%s415_s1 + $0x68] sm:$0xff]  ;;  %137 = vst [vmem:[%s418_s4 + $0x40] sm:$0xff] %v121_v12  ;;  %v92_v24 = vmax.f32 %v60_v14, %v76_v11  ;;  %v31_v28 = vld [vmem:[%s414_s0 + $0x70] sm:$0xff] }
  0x13   :  { %v123_v23 = vmax.f32 %v91_v13, %v107_v9  ;;  %v109_v25 = vld [vmem:[%s417_s3 + $0x60] sm:$0xff]  ;;  %v62_v26 = vmax.f32 %v30_v21, %v46_v22  ;;  %v78_v27 = vld [vmem:[%s416_s2 + $0x68] sm:$0xff]  ;;  %v47_v31 = vld [vmem:[%s415_s1 + $0x70] sm:$0xff] }
  0x14   :  { %138 = vst [vmem:[%s418_s4 + $0x48] sm:$0xff] %v122_v18  ;;  %v93_v29 = vmax.f32 %v61_v20, %v77_v17  ;;  %v110_v30 = vld [vmem:[%s417_s3 + $0x68] sm:$0xff]  ;;  %v79_v32 = vld [vmem:[%s416_s2 + $0x70] sm:$0xff]  ;;  %v124_v33 = vmax.f32 %v92_v24, %v108_v19  ;;  %v63_v35 = vmax.f32 %v31_v28, %v47_v31  ;;  %v32_v36 = vld [vmem:[%s414_s0 + $0x78] sm:$0xff] }
  0x15   :  { %139 = vst [vmem:[%s418_s4 + $0x50] sm:$0xff] %v123_v23  ;;  %v94_v34 = vmax.f32 %v62_v26, %v78_v27  ;;  %v48_v37 = vld [vmem:[%s415_s1 + $0x78] sm:$0xff]  ;;  %v111_v40 = vld [vmem:[%s417_s3 + $0x70] sm:$0xff] }
  0x16   :  { %v80_v38 = vld [vmem:[%s416_s2 + $0x78] sm:$0xff]  ;;  %v125_v39 = vmax.f32 %v93_v29, %v109_v25  ;;  %v64_v41 = vmax.f32 %v32_v36, %v48_v37  ;;  %140 = vst [vmem:[%s418_s4 + $0x58] sm:$0xff] %v124_v33  ;;  %v95_v43 = vmax.f32 %v63_v35, %v79_v32 }
  0x17   :  { %v126_v42 = vmax.f32 %v94_v34, %v110_v30  ;;  %v112_v44 = vld [vmem:[%s417_s3 + $0x78] sm:$0xff] }
  0x18   :  { %141 = vst [vmem:[%s418_s4 + $0x60] sm:$0xff] %v125_v39  ;;  %v96_v45 = vmax.f32 %v64_v41, %v80_v38  ;;  %v127_v46 = vmax.f32 %v95_v43, %v111_v40 }
  0x19   :  { %142 = vst [vmem:[%s418_s4 + $0x68] sm:$0xff] %v126_v42 }
  0x1a   :  { %v128_v47 = vmax.f32 %v96_v45, %v112_v44  ;;  %143 = vst [vmem:[%s418_s4 + $0x70] sm:$0xff] %v127_v46 }
  0x1c   :  { %144 = vst [vmem:[%s418_s4 + $0x78] sm:$0xff] %v128_v47 }

// kernel: _lambda_.8
= control target key start
LH: loop header
LB: loop body
LE: loop exit
PB: predicated region body
PF: predicated region fallthrough
CT: control target
= control target key end

     0   :  { %v67_v1 = vmov 4.0   ;;  %s153_s0 = inlined_call_operand.vmem [shape: f32[8,512], index: 0, kind: input, shape index: {}]   ;;  %s154_s1 = inlined_call_operand.vmem [shape: f32[8,512], index: 1, kind: input, shape index: {}]   ;;  %s155_s2 = inlined_call_operand.vmem [shape: f32[8,512], index: 2, kind: input, shape index: {}]   ;;  %s156_s3 = inlined_call_operand.vmem [shape: f32[8,512], index: 3, kind: input, shape index: {}]   ;;  %s157_s4 = inlined_call_operand.vmem [shape: f32[8,512], index: 4, kind: output, shape index: {}]  }
   0x1   :  { %v17_v0 = vld [vmem:[%s153_s0] sm:$0xff]  ;;  %65 = vrcp.f32 %v67_v1  ;;  %v18_v3 = vld [vmem:[%s153_s0 + $0x8] sm:$0xff]  ;;  %v19_v5 = vld [vmem:[%s153_s0 + $0x10] sm:$0xff] }
   0x2   :  { %v21_v2 = vld [vmem:[%s154_s1] sm:$0xff]  ;;  %v22_v4 = vld [vmem:[%s154_s1 + $0x8] sm:$0xff]  ;;  %v23_v6 = vld [vmem:[%s154_s1 + $0x10] sm:$0xff] }
   0x3   :  { %v25_v7 = vadd.f32 %v21_v2, %v17_v0  ;;  %v26_v8 = vadd.f32 %v22_v4, %v18_v3  ;;  %v27_v9 = vadd.f32 %v23_v6, %v19_v5  ;;  %v20_v10 = vld [vmem:[%s153_s0 + $0x18] sm:$0xff]  ;;  %v29_v12 = vld [vmem:[%s155_s2] sm:$0xff]  ;;  %v30_v13 = vld [vmem:[%s155_s2 + $0x8] sm:$0xff] }
   0x4   :  { %v24_v11 = vld [vmem:[%s154_s1 + $0x18] sm:$0xff]  ;;  %v31_v14 = vld [vmem:[%s155_s2 + $0x10] sm:$0xff]  ;;  %v37_v22 = vld [vmem:[%s156_s3] sm:$0xff] }
   0x5   :  { %v28_v15 = vadd.f32 %v24_v11, %v20_v10  ;;  %v32_v17 = vld [vmem:[%s155_s2 + $0x18] sm:$0xff]  ;;  %v33_v19 = vadd.f32 %v29_v12, %v25_v7  ;;  %v34_v20 = vadd.f32 %v30_v13, %v26_v8  ;;  %v35_v21 = vadd.f32 %v31_v14, %v27_v9  ;;  %v38_v24 = vld [vmem:[%s156_s3 + $0x8] sm:$0xff]  ;;  %v39_v25 = vld [vmem:[%s156_s3 + $0x10] sm:$0xff] }
   0x6   :  { %v40_v27 = vld [vmem:[%s156_s3 + $0x18] sm:$0xff] }
   0x7   :  { %v66_v16 = vpop.eup %65  ;;  %v36_v26 = vadd.f32 %v32_v17, %v28_v15  ;;  %v41_v29 = vadd.f32 %v37_v22, %v33_v19  ;;  %v42_v30 = vadd.f32 %v38_v24, %v34_v20  ;;  %v43_v31 = vadd.f32 %v39_v25, %v35_v21 }
   0x8   :  { %v46_v18 = vmul.f32 4.0, %v66_v16  ;;  %vm50_vm0 = vweird.f32 %v66_v16 }
   0x9   :  { %v44_v33 = vadd.f32 %v40_v27, %v36_v26 }
   0xa   :  { %v47_v23 = vsub.f32 1.0, %v46_v18 }
   0xc   :  { %v48_v28 = vmul.f32 %v66_v16, %v47_v23 }
   0xe   :  { %v49_v32 = vadd.f32 %v66_v16, %v48_v28 }
  0x10   :  { %v51_v34 = vsel %vm50_vm0, %v66_v16, %v49_v32 }
  0x11   :  { %v52_v35 = vmul.f32 %v51_v34, %v41_v29  ;;  %v53_v36 = vmul.f32 %v51_v34, %v42_v30  ;;  %v54_v37 = vmul.f32 %v51_v34, %v43_v31  ;;  %v55_v38 = vmul.f32 %v51_v34, %v44_v33 }
  0x13   :  { %56 = vst [vmem:[%s157_s4] sm:$0xff] %v52_v35 }
  0x14   :  { %57 = vst [vmem:[%s157_s4 + $0x8] sm:$0xff] %v53_v36 }
  0x15   :  { %58 = vst [vmem:[%s157_s4 + $0x10] sm:$0xff] %v54_v37 }
  0x16   :  { %59 = vst [vmem:[%s157_s4 + $0x18] sm:$0xff] %v55_v38 }

// kernel: _lambda_.9
= control target key start
LH: loop header
LB: loop body
LE: loop exit
PB: predicated region body
PF: predicated region fallthrough
CT: control target
= control target key end

     0   :  { %s10260_s2 = inlined_call_operand.vmem [shape: bf16[1664,512], index: 2, kind: input, shape index: {}]   ;;  %s10261_s0 = inlined_call_operand.vmem [shape: bf16[16,1664], index: 0, kind: input, shape index: {}]   ;;  %s10262_s1 = inlined_call_operand.vmem [shape: f32[16,1], index: 1, kind: input, shape index: {}]   ;;  %s10263_s3 = inlined_call_operand.vmem [shape: bf16[256,512], index: 3, kind: input, shape index: {}]   ;;  %s10264_s4 = inlined_call_operand.vmem [shape: bf16[256,256], index: 4, kind: input, shape index: {}]   ;;  %s10265_s5 = inlined_call_operand.vmem [shape: f32[16,128], index: 5, kind: output, shape index: {}]  }
   0x1   :  { %v4388_v0 = vld [vmem:[%s10260_s2 + $0xe0] sm:$0xf]  ;;  %v6365_v1 = vld [vmem:[%s10260_s2 + $0xec] sm:$0xf0] }
   0x2   :  { %v4516_v2 = vld [vmem:[%s10260_s2 + $0x1e0] sm:$0xf]  ;;  %v4389_v3 = vor.u32 %v6365_v1, %v4388_v0  ;;  %v6397_v4 = vld [vmem:[%s10260_s2 + $0x1ec] sm:$0xf0] }
   0x3   :  { %v4644_v5 = vld [vmem:[%s10260_s2 + $0x2e0] sm:$0xf]  ;;  %v6429_v6 = vld [vmem:[%s10260_s2 + $0x2ec] sm:$0xf0]  ;;  %v4517_v7 = vor.u32 %v6397_v4, %v4516_v2 }
   0x4   :  { %v4645_v8 = vor.u32 %v6429_v6, %v4644_v5  ;;  %v4772_v9 = vld [vmem:[%s10260_s2 + $0x3e0] sm:$0xf]  ;;  %v6461_v10 = vld [vmem:[%s10260_s2 + $0x3ec] sm:$0xf0]  ;;  %2598 = vmatpush.bf16.msra.mxu0 %v4389_v3 }
   0x5   :  { %v4372_v11 = vld [vmem:[%s10260_s2 + $0xc0] sm:$0xf]  ;;  %v4773_v12 = vor.u32 %v6461_v10, %v4772_v9  ;;  %v6361_v13 = vld [vmem:[%s10260_s2 + $0xcc] sm:$0xf0]  ;;  %2612 = vmatpush.bf16.msra.mxu1 %v4517_v7 }
   0x6   :  { %v4500_v14 = vld [vmem:[%s10260_s2 + $0x1c0] sm:$0xf]  ;;  %v6393_v15 = vld [vmem:[%s10260_s2 + $0x1cc] sm:$0xf0]  ;;  %2626 = vmatpush.bf16.msra.mxu2 %v4645_v8  ;;  %v4373_v16 = vor.u32 %v6361_v13, %v4372_v11 }
   0x7   :  { %v4501_v17 = vor.u32 %v6393_v15, %v4500_v14  ;;  %v4628_v18 = vld [vmem:[%s10260_s2 + $0x2c0] sm:$0xf]  ;;  %v6425_v19 = vld [vmem:[%s10260_s2 + $0x2cc] sm:$0xf0]  ;;  %2640 = vmatpush.bf16.msra.mxu3 %v4773_v12 }
   0x8   :  { %v4756_v20 = vld [vmem:[%s10260_s2 + $0x3c0] sm:$0xf]  ;;  %v4629_v21 = vor.u32 %v6425_v19, %v4628_v18  ;;  %v6457_v22 = vld [vmem:[%s10260_s2 + $0x3cc] sm:$0xf0]  ;;  %2599 = vmatpush.bf16.msra.mxu0 %v4373_v16 }
   0x9   :  { %v4356_v23 = vld [vmem:[%s10260_s2 + $0xa0] sm:$0xf]  ;;  %v6357_v24 = vld [vmem:[%s10260_s2 + $0xac] sm:$0xf0]  ;;  %v4757_v25 = vor.u32 %v6457_v22, %v4756_v20  ;;  %2613 = vmatpush.bf16.msra.mxu1 %v4501_v17 }
   0xa   :  { %v4484_v26 = vld [vmem:[%s10260_s2 + $0x1a0] sm:$0xf]  ;;  %v6389_v27 = vld [vmem:[%s10260_s2 + $0x1ac] sm:$0xf0]  ;;  %v4357_v29 = vor.u32 %v6357_v24, %v4356_v23  ;;  %2627 = vmatpush.bf16.msra.mxu2 %v4629_v21 }
   0xb   :  { %v4612_v28 = vld [vmem:[%s10260_s2 + $0x2a0] sm:$0xf]  ;;  %v6421_v30 = vld [vmem:[%s10260_s2 + $0x2ac] sm:$0xf0]  ;;  %v4485_v33 = vor.u32 %v6389_v27, %v4484_v26  ;;  %2641 = vmatpush.bf16.msra.mxu3 %v4757_v25 }
   0xc   :  { %v4740_v31 = vld [vmem:[%s10260_s2 + $0x3a0] sm:$0xf]  ;;  %v6453_v32 = vld [vmem:[%s10260_s2 + $0x3ac] sm:$0xf0]  ;;  %v4613_v34 = vor.u32 %v6421_v30, %v4612_v28  ;;  %2600 = vmatpush.bf16.msra.mxu0 %v4357_v29 }
   0xd   :  { %v4340_v35 = vld [vmem:[%s10260_s2 + $0x80] sm:$0xf]  ;;  %v6353_v36 = vld [vmem:[%s10260_s2 + $0x8c] sm:$0xf0]  ;;  %v4741_v38 = vor.u32 %v6453_v32, %v4740_v31  ;;  %2614 = vmatpush.bf16.msra.mxu1 %v4485_v33 }
   0xe   :  { %v4468_v37 = vld [vmem:[%s10260_s2 + $0x180] sm:$0xf]  ;;  %v6385_v39 = vld [vmem:[%s10260_s2 + $0x18c] sm:$0xf0]  ;;  %v4341_v44 = vor.u32 %v6353_v36, %v4340_v35  ;;  %2628 = vmatpush.bf16.msra.mxu2 %v4613_v34 }
   0xf   :  { %v4596_v40 = vld [vmem:[%s10260_s2 + $0x280] sm:$0xf]  ;;  %v6417_v41 = vld [vmem:[%s10260_s2 + $0x28c] sm:$0xf0]  ;;  %v4469_v45 = vor.u32 %v6385_v39, %v4468_v37  ;;  %2642 = vmatpush.bf16.msra.mxu3 %v4741_v38 }
  0x10   :  { %v4724_v42 = vld [vmem:[%s10260_s2 + $0x380] sm:$0xf]  ;;  %v6449_v43 = vld [vmem:[%s10260_s2 + $0x38c] sm:$0xf0]  ;;  %v4597_v46 = vor.u32 %v6417_v41, %v4596_v40  ;;  %2601 = vmatpush.bf16.msra.mxu0 %v4341_v44 }
  0x11   :  { %v4324_v47 = vld [vmem:[%s10260_s2 + $0x60] sm:$0xf]  ;;  %v6349_v48 = vld [vmem:[%s10260_s2 + $0x6c] sm:$0xf0]  ;;  %v4725_v50 = vor.u32 %v6449_v43, %v4724_v42  ;;  %2615 = vmatpush.bf16.msra.mxu1 %v4469_v45 }
  0x12   :  { %v4452_v49 = vld [vmem:[%s10260_s2 + $0x160] sm:$0xf]  ;;  %v6381_v51 = vld [vmem:[%s10260_s2 + $0x16c] sm:$0xf0]  ;;  %v4325_v56 = vor.u32 %v6349_v48, %v4324_v47  ;;  %2629 = vmatpush.bf16.msra.mxu2 %v4597_v46 }
  0x13   :  { %v4580_v52 = vld [vmem:[%s10260_s2 + $0x260] sm:$0xf]  ;;  %v6413_v53 = vld [vmem:[%s10260_s2 + $0x26c] sm:$0xf0]  ;;  %v4453_v57 = vor.u32 %v6381_v51, %v4452_v49  ;;  %2643 = vmatpush.bf16.msra.mxu3 %v4725_v50 }
  0x14   :  { %v4708_v54 = vld [vmem:[%s10260_s2 + $0x360] sm:$0xf]  ;;  %v6445_v55 = vld [vmem:[%s10260_s2 + $0x36c] sm:$0xf0]  ;;  %v4581_v58 = vor.u32 %v6413_v53, %v4580_v52  ;;  %2602 = vmatpush.bf16.msra.mxu0 %v4325_v56  ;;  %v6328_v53 = vld [vmem:[%s10261_s0 + $0x30] sm:$0xf0] }
  0x15   :  { %v4308_v59 = vld [vmem:[%s10260_s2 + $0x40] sm:$0xf]  ;;  %v6345_v60 = vld [vmem:[%s10260_s2 + $0x4c] sm:$0xf0]  ;;  %v4709_v62 = vor.u32 %v6445_v55, %v4708_v54  ;;  %2616 = vmatpush.bf16.msra.mxu1 %v4453_v57  ;;  %v4232_v54 = vld [vmem:[%s10261_s0 + $0x8] sm:$0xf] }
  0x16   :  { %v4436_v61 = vld [vmem:[%s10260_s2 + $0x140] sm:$0xf]  ;;  %v6377_v63 = vld [vmem:[%s10260_s2 + $0x14c] sm:$0xf0]  ;;  %v4309_v4 = vor.u32 %v6345_v60, %v4308_v59  ;;  %2630 = vmatpush.bf16.msra.mxu2 %v4581_v58  ;;  %v6329_v59 = vld [vmem:[%s10261_s0 + $0x38] sm:$0xf0] }
  0x17   :  { %v4564_v0 = vld [vmem:[%s10260_s2 + $0x240] sm:$0xf]  ;;  %v6409_v1 = vld [vmem:[%s10260_s2 + $0x24c] sm:$0xf0]  ;;  %v4437_v5 = vor.u32 %v6377_v63, %v4436_v61  ;;  %2644 = vmatpush.bf16.msra.mxu3 %v4709_v62 }
  0x18   :  { %v4692_v2 = vld [vmem:[%s10260_s2 + $0x340] sm:$0xf]  ;;  %v6441_v3 = vld [vmem:[%s10260_s2 + $0x34c] sm:$0xf0]  ;;  %v4565_v6 = vor.u32 %v6409_v1, %v4564_v0  ;;  %2603 = vmatpush.bf16.msra.mxu0 %v4309_v4  ;;  %v7157_v1 = vor.u32 %v6329_v59, %v4232_v54 }
  0x19   :  { %v4292_v7 = vld [vmem:[%s10260_s2 + $0x20] sm:$0xf]  ;;  %v6341_v8 = vld [vmem:[%s10260_s2 + $0x2c] sm:$0xf0]  ;;  %v4693_v10 = vor.u32 %v6441_v3, %v4692_v2  ;;  %2617 = vmatpush.bf16.msra.mxu1 %v4437_v5 }
  0x1a   :  { %v4420_v9 = vld [vmem:[%s10260_s2 + $0x120] sm:$0xf]  ;;  %v6373_v11 = vld [vmem:[%s10260_s2 + $0x12c] sm:$0xf0]  ;;  %v4293_v16 = vor.u32 %v6341_v8, %v4292_v7  ;;  %2631 = vmatpush.bf16.msra.mxu2 %v4565_v6  ;;  %v6322_v6 = vld [vmem:[%s10261_s0 + $0x4] sm:$0xf] }
  0x1b   :  { %v4548_v12 = vld [vmem:[%s10260_s2 + $0x220] sm:$0xf]  ;;  %v6405_v13 = vld [vmem:[%s10260_s2 + $0x22c] sm:$0xf0]  ;;  %v4421_v19 = vor.u32 %v6373_v11, %v4420_v9  ;;  %2645 = vmatpush.bf16.msra.mxu3 %v4693_v10  ;;  %v4226_v7 = vld [vmem:[%s10261_s0 + $0x34] sm:$0xf0] }
  0x1c   :  { %v4676_v14 = vld [vmem:[%s10260_s2 + $0x320] sm:$0xf]  ;;  %v6437_v15 = vld [vmem:[%s10260_s2 + $0x32c] sm:$0xf0]  ;;  %v4549_v20 = vor.u32 %v6405_v13, %v4548_v12  ;;  %2604 = vmatpush.bf16.msra.mxu0 %v4293_v16  ;;  %v6323_v8 = vld [vmem:[%s10261_s0 + $0xc] sm:$0xf]  ;;  %v7179_v10 = vor.u32 %v6322_v6, %v4226_v7 }
  0x1d   :  { %v4276_v17 = vld [vmem:[%s10260_s2] sm:$0xf]  ;;  %v6337_v18 = vld [vmem:[%s10260_s2 + $0xc] sm:$0xf0]  ;;  %v4677_v24 = vor.u32 %v6437_v15, %v4676_v14  ;;  %2618 = vmatpush.bf16.msra.mxu1 %v4421_v19 }
  0x1e   :  { %v4404_v21 = vld [vmem:[%s10260_s2 + $0x100] sm:$0xf]  ;;  %v6369_v22 = vld [vmem:[%s10260_s2 + $0x10c] sm:$0xf0]  ;;  %v4277_v31 = vor.u32 %v6337_v18, %v4276_v17  ;;  %2632 = vmatpush.bf16.msra.mxu2 %v4549_v20 }
  0x1f   :  { %v4532_v23 = vld [vmem:[%s10260_s2 + $0x200] sm:$0xf]  ;;  %v6401_v25 = vld [vmem:[%s10260_s2 + $0x20c] sm:$0xf0]  ;;  %v4405_v35 = vor.u32 %v6369_v22, %v4404_v21  ;;  %2646 = vmatpush.bf16.msra.mxu3 %v4677_v24 }
  0x20   :  { %v4660_v26 = vld [vmem:[%s10260_s2 + $0x300] sm:$0xf]  ;;  %v6433_v27 = vld [vmem:[%s10260_s2 + $0x30c] sm:$0xf0]  ;;  %v4533_v36 = vor.u32 %v6401_v25, %v4532_v23  ;;  %2605 = vmatpush.bf16.msra.mxu0 %v4277_v31 }
  0x21   :  { %v4900_v28 = vld [vmem:[%s10260_s2 + $0x4e0] sm:$0xf]  ;;  %v6493_v29 = vld [vmem:[%s10260_s2 + $0x4ec] sm:$0xf0]  ;;  %v4661_v39 = vor.u32 %v6433_v27, %v4660_v26  ;;  %2619 = vmatpush.bf16.msra.mxu1 %v4405_v35 }
  0x22   :  { %v5028_v30 = vld [vmem:[%s10260_s2 + $0x5e0] sm:$0xf]  ;;  %v6525_v32 = vld [vmem:[%s10260_s2 + $0x5ec] sm:$0xf0]  ;;  %v4901_v40 = vor.u32 %v6493_v29, %v4900_v28  ;;  %2633 = vmatpush.bf16.msra.mxu2 %v4533_v36 }
  0x23   :  { %v5156_v33 = vld [vmem:[%s10260_s2 + $0x6e0] sm:$0xf]  ;;  %v6557_v34 = vld [vmem:[%s10260_s2 + $0x6ec] sm:$0xf0]  ;;  %v5029_v43 = vor.u32 %v6525_v32, %v5028_v30  ;;  %2647 = vmatpush.bf16.msra.mxu3 %v4661_v39 }
  0x24   :  { %v5284_v37 = vld [vmem:[%s10260_s2 + $0x7e0] sm:$0xf]  ;;  %v6589_v38 = vld [vmem:[%s10260_s2 + $0x7ec] sm:$0xf0]  ;;  %v5157_v44 = vor.u32 %v6557_v34, %v5156_v33  ;;  %2654 = vmatpush.bf16.msrb.mxu0 %v4901_v40  ;;  %2620 = vmatmul.bf16.vlgmr.msra.gmra.mxu1 %v7179_v10 }
  0x25   :  { %v4884_v41 = vld [vmem:[%s10260_s2 + $0x4c0] sm:$0xf]  ;;  %v6489_v42 = vld [vmem:[%s10260_s2 + $0x4cc] sm:$0xf0]  ;;  %v5285_v48 = vor.u32 %v6589_v38, %v5284_v37  ;;  %2668 = vmatpush.bf16.msrb.mxu1 %v5029_v43  ;;  %2634 = vmatmul.bf16.vlgmr.msra.gmra.mxu2 %v7157_v1 }
  0x26   :  { %v5012_v45 = vld [vmem:[%s10260_s2 + $0x5c0] sm:$0xf]  ;;  %v6521_v46 = vld [vmem:[%s10260_s2 + $0x5cc] sm:$0xf0]  ;;  %v4885_v55 = vor.u32 %v6489_v42, %v4884_v41  ;;  %2682 = vmatpush.bf16.msrb.mxu2 %v5157_v44 }
  0x27   :  { %v5140_v47 = vld [vmem:[%s10260_s2 + $0x6c0] sm:$0xf]  ;;  %v6553_v49 = vld [vmem:[%s10260_s2 + $0x6cc] sm:$0xf0]  ;;  %v5013_v60 = vor.u32 %v6521_v46, %v5012_v45  ;;  %2696 = vmatpush.bf16.msrb.mxu3 %v5285_v48 }
  0x28   :  { %v5268_v50 = vld [vmem:[%s10260_s2 + $0x7c0] sm:$0xf]  ;;  %v6585_v51 = vld [vmem:[%s10260_s2 + $0x7cc] sm:$0xf0]  ;;  %v5141_v61 = vor.u32 %v6553_v49, %v5140_v47  ;;  %2655 = vmatpush.bf16.msrb.mxu0 %v4885_v55 }
  0x29   :  { %v4224_v52 = vld [vmem:[%s10261_s0] sm:$0xf]  ;;  %v6485_v57 = vld [vmem:[%s10260_s2 + $0x4ac] sm:$0xf0]  ;;  %v5269_v2 = vor.u32 %v6585_v51, %v5268_v50  ;;  %2669 = vmatpush.bf16.msrb.mxu1 %v5013_v60 }
  0x2a   :  { %v4868_v56 = vld [vmem:[%s10260_s2 + $0x4a0] sm:$0xf]  ;;  %v7143_v58 = vor.u32 %v6328_v53, %v4224_v52  ;;  %v6517_v63 = vld [vmem:[%s10260_s2 + $0x5ac] sm:$0xf0]  ;;  %2683 = vmatpush.bf16.msrb.mxu2 %v5141_v61 }
  0x2b   :  { %v4996_v62 = vld [vmem:[%s10260_s2 + $0x5a0] sm:$0xf]  ;;  %v6549_v3 = vld [vmem:[%s10260_s2 + $0x6ac] sm:$0xf0]  ;;  %v4869_v9 = vor.u32 %v6485_v57, %v4868_v56  ;;  %2697 = vmatpush.bf16.msrb.mxu3 %v5269_v2 }
  0x2c   :  { %v5124_v0 = vld [vmem:[%s10260_s2 + $0x6a0] sm:$0xf]  ;;  %v6581_v5 = vld [vmem:[%s10260_s2 + $0x7ac] sm:$0xf0]  ;;  %2606 = vmatmul.bf16.vlgmr.msra.gmra.mxu0 %v7143_v58  ;;  %v4997_v12 = vor.u32 %v6517_v63, %v4996_v62 }
  0x2d   :  { %v5252_v4 = vld [vmem:[%s10260_s2 + $0x7a0] sm:$0xf]  ;;  %v5125_v13 = vor.u32 %v6549_v3, %v5124_v0  ;;  %v6481_v15 = vld [vmem:[%s10260_s2 + $0x48c] sm:$0xf0]  ;;  %2656 = vmatpush.bf16.msrb.mxu0 %v4869_v9 }
  0x2e   :  { %v4234_v11 = vld [vmem:[%s10261_s0 + $0x3c] sm:$0xf0]  ;;  %v5253_v18 = vor.u32 %v6581_v5, %v5252_v4  ;;  %v6513_v19 = vld [vmem:[%s10260_s2 + $0x58c] sm:$0xf0]  ;;  %2670 = vmatpush.bf16.msrb.mxu1 %v4997_v12 }
  0x2f   :  { %v4852_v14 = vld [vmem:[%s10260_s2 + $0x480] sm:$0xf]  ;;  %v7193_v17 = vor.u32 %v6323_v8, %v4234_v11  ;;  %v6545_v21 = vld [vmem:[%s10260_s2 + $0x68c] sm:$0xf0]  ;;  %2684 = vmatpush.bf16.msrb.mxu2 %v5125_v13 }
  0x30   :  { %v4980_v16 = vld [vmem:[%s10260_s2 + $0x580] sm:$0xf]  ;;  %v6577_v23 = vld [vmem:[%s10260_s2 + $0x78c] sm:$0xf0]  ;;  %v4853_v24 = vor.u32 %v6481_v15, %v4852_v14  ;;  %2698 = vmatpush.bf16.msrb.mxu3 %v5253_v18 }
  0x31   :  { %v5108_v20 = vld [vmem:[%s10260_s2 + $0x680] sm:$0xf]  ;;  %2648 = vmatmul.bf16.vlgmr.msra.gmra.mxu3 %v7193_v17  ;;  %v4981_v25 = vor.u32 %v6513_v19, %v4980_v16  ;;  %v6477_v28 = vld [vmem:[%s10260_s2 + $0x46c] sm:$0xf0] }
  0x32   :  { %v5236_v22 = vld [vmem:[%s10260_s2 + $0x780] sm:$0xf]  ;;  %v5109_v26 = vor.u32 %v6545_v21, %v5108_v20  ;;  %v6509_v31 = vld [vmem:[%s10260_s2 + $0x56c] sm:$0xf0]  ;;  %2657 = vmatpush.bf16.msrb.mxu0 %v4853_v24 }
  0x33   :  { %v4836_v27 = vld [vmem:[%s10260_s2 + $0x460] sm:$0xf]  ;;  %v5237_v30 = vor.u32 %v6577_v23, %v5236_v22  ;;  %v6541_v33 = vld [vmem:[%s10260_s2 + $0x66c] sm:$0xf0]  ;;  %2671 = vmatpush.bf16.msrb.mxu1 %v4981_v25  ;;  %v6330_v22 = vld [vmem:[%s10261_s0 + $0x40] sm:$0xf0] }
  0x34   :  { %v4964_v29 = vld [vmem:[%s10260_s2 + $0x560] sm:$0xf]  ;;  %v6573_v35 = vld [vmem:[%s10260_s2 + $0x76c] sm:$0xf0]  ;;  %v4837_v36 = vor.u32 %v6477_v28, %v4836_v27  ;;  %2685 = vmatpush.bf16.msrb.mxu2 %v5109_v26  ;;  %v4248_v25 = vld [vmem:[%s10261_s0 + $0x18] sm:$0xf] }
  0x35   :  { %v5092_v32 = vld [vmem:[%s10260_s2 + $0x660] sm:$0xf]  ;;  %v4965_v37 = vor.u32 %v6509_v31, %v4964_v29  ;;  %v6473_v40 = vld [vmem:[%s10260_s2 + $0x44c] sm:$0xf0]  ;;  %2699 = vmatpush.bf16.msrb.mxu3 %v5237_v30  ;;  %v6331_v26 = vld [vmem:[%s10261_s0 + $0x48] sm:$0xf0] }
  0x36   :  { %v5220_v34 = vld [vmem:[%s10260_s2 + $0x760] sm:$0xf]  ;;  %v5093_v38 = vor.u32 %v6541_v33, %v5092_v32  ;;  %v6505_v43 = vld [vmem:[%s10260_s2 + $0x54c] sm:$0xf0]  ;;  %2658 = vmatpush.bf16.msrb.mxu0 %v4837_v36  ;;  %v6324_v27 = vld [vmem:[%s10261_s0 + $0x14] sm:$0xf] }
  0x37   :  { %v4820_v39 = vld [vmem:[%s10260_s2 + $0x440] sm:$0xf]  ;;  %v5221_v42 = vor.u32 %v6573_v35, %v5220_v34  ;;  %v6537_v45 = vld [vmem:[%s10260_s2 + $0x64c] sm:$0xf0]  ;;  %2672 = vmatpush.bf16.msrb.mxu1 %v4965_v37  ;;  %v4242_v30 = vld [vmem:[%s10261_s0 + $0x44] sm:$0xf0] }
  0x38   :  { %v4948_v41 = vld [vmem:[%s10260_s2 + $0x540] sm:$0xf]  ;;  %v6569_v47 = vld [vmem:[%s10260_s2 + $0x74c] sm:$0xf0]  ;;  %v4821_v48 = vor.u32 %v6473_v40, %v4820_v39  ;;  %2686 = vmatpush.bf16.msrb.mxu2 %v5093_v38  ;;  %v6325_v31 = vld [vmem:[%s10261_s0 + $0x1c] sm:$0xf] }
  0x39   :  { %v5076_v44 = vld [vmem:[%s10260_s2 + $0x640] sm:$0xf]  ;;  %v4949_v50 = vor.u32 %v6505_v43, %v4948_v41  ;;  %v6469_v52 = vld [vmem:[%s10260_s2 + $0x42c] sm:$0xf0]  ;;  %2700 = vmatpush.bf16.msrb.mxu3 %v5221_v42  ;;  %v7376_v43 = vor.u32 %v6331_v26, %v4248_v25 }
  0x3a   :  { %v5204_v46 = vld [vmem:[%s10260_s2 + $0x740] sm:$0xf]  ;;  %v5077_v51 = vor.u32 %v6537_v45, %v5076_v44  ;;  %v6501_v54 = vld [vmem:[%s10260_s2 + $0x52c] sm:$0xf0]  ;;  %2659 = vmatpush.bf16.msrb.mxu0 %v4821_v48  ;;  %v7378_v44 = vor.u32 %v6324_v27, %v4242_v30 }
  0x3b   :  { %v4804_v49 = vld [vmem:[%s10260_s2 + $0x420] sm:$0xf]  ;;  %v5205_v55 = vor.u32 %v6569_v47, %v5204_v46  ;;  %v6533_v57 = vld [vmem:[%s10260_s2 + $0x62c] sm:$0xf0]  ;;  %2673 = vmatpush.bf16.msrb.mxu1 %v4949_v50 }
  0x3c   :  { %v4932_v53 = vld [vmem:[%s10260_s2 + $0x520] sm:$0xf]  ;;  %v6565_v60 = vld [vmem:[%s10260_s2 + $0x72c] sm:$0xf0]  ;;  %v4805_v63 = vor.u32 %v6469_v52, %v4804_v49  ;;  %2687 = vmatpush.bf16.msrb.mxu2 %v5077_v51 }
  0x3d   :  { %v5060_v56 = vld [vmem:[%s10260_s2 + $0x620] sm:$0xf]  ;;  %v6465_v62 = vld [vmem:[%s10260_s2 + $0x40c] sm:$0xf0]  ;;  %v4933_v5 = vor.u32 %v6501_v54, %v4932_v53  ;;  %2701 = vmatpush.bf16.msrb.mxu3 %v5205_v55 }
  0x3e   :  { %v5188_v59 = vld [vmem:[%s10260_s2 + $0x720] sm:$0xf]  ;;  %v6497_v2 = vld [vmem:[%s10260_s2 + $0x50c] sm:$0xf0]  ;;  %v5061_v6 = vor.u32 %v6533_v57, %v5060_v56  ;;  %2660 = vmatpush.bf16.msrb.mxu0 %v4805_v63 }
  0x3f   :  { %v4788_v61 = vld [vmem:[%s10260_s2 + $0x400] sm:$0xf]  ;;  %v6529_v4 = vld [vmem:[%s10260_s2 + $0x60c] sm:$0xf0]  ;;  %v5189_v11 = vor.u32 %v6565_v60, %v5188_v59  ;;  %2674 = vmatpush.bf16.msrb.mxu1 %v4933_v5 }
  0x40   :  { %v4916_v0 = vld [vmem:[%s10260_s2 + $0x500] sm:$0xf]  ;;  %v6561_v8 = vld [vmem:[%s10260_s2 + $0x70c] sm:$0xf0]  ;;  %v4789_v19 = vor.u32 %v6465_v62, %v4788_v61  ;;  %2688 = vmatpush.bf16.msrb.mxu2 %v5061_v6 }
  0x41   :  { %v5044_v3 = vld [vmem:[%s10260_s2 + $0x600] sm:$0xf]  ;;  %v6621_v12 = vld [vmem:[%s10260_s2 + $0x8ec] sm:$0xf0]  ;;  %v4917_v23 = vor.u32 %v6497_v2, %v4916_v0  ;;  %2702 = vmatpush.bf16.msrb.mxu3 %v5189_v11 }
  0x42   :  { %v5172_v7 = vld [vmem:[%s10260_s2 + $0x700] sm:$0xf]  ;;  %v6653_v14 = vld [vmem:[%s10260_s2 + $0x9ec] sm:$0xf0]  ;;  %v5045_v24 = vor.u32 %v6529_v4, %v5044_v3  ;;  %2661 = vmatpush.bf16.msrb.mxu0 %v4789_v19 }
  0x43   :  { %v5412_v9 = vld [vmem:[%s10260_s2 + $0x8e0] sm:$0xf]  ;;  %v6685_v16 = vld [vmem:[%s10260_s2 + $0xaec] sm:$0xf0]  ;;  %v5173_v28 = vor.u32 %v6561_v8, %v5172_v7  ;;  %2675 = vmatpush.bf16.msrb.mxu1 %v4917_v23 }
  0x44   :  { %v5540_v13 = vld [vmem:[%s10260_s2 + $0x9e0] sm:$0xf]  ;;  %v6717_v20 = vld [vmem:[%s10260_s2 + $0xbec] sm:$0xf0]  ;;  %v5413_v29 = vor.u32 %v6621_v12, %v5412_v9  ;;  %2689 = vmatpush.bf16.msrb.mxu2 %v5045_v24 }
  0x45   :  { %v5668_v15 = vld [vmem:[%s10260_s2 + $0xae0] sm:$0xf]  ;;  %v4240_v21 = vld [vmem:[%s10261_s0 + $0x10] sm:$0xf]  ;;  %v5541_v33 = vor.u32 %v6653_v14, %v5540_v13  ;;  %2703 = vmatpush.bf16.msrb.mxu3 %v5173_v28 }
  0x46   :  { %v5796_v18 = vld [vmem:[%s10260_s2 + $0xbe0] sm:$0xf]  ;;  %v4250_v32 = vld [vmem:[%s10261_s0 + $0x4c] sm:$0xf0]  ;;  %v5669_v34 = vor.u32 %v6685_v16, %v5668_v15  ;;  %v7365_v39 = vor.u32 %v6330_v22, %v4240_v21  ;;  %2710 = vmatpush.bf16.msra.mxu0 %v5413_v29  ;;  %2676 = vmatmul.bf16.vlgmr.msrb.gmra.mxu1 %v7378_v44 }
  0x47   :  { %v5396_v35 = vld [vmem:[%s10260_s2 + $0x8c0] sm:$0xf]  ;;  %v6617_v36 = vld [vmem:[%s10260_s2 + $0x8cc] sm:$0xf0]  ;;  %v5797_v38 = vor.u32 %v6717_v20, %v5796_v18  ;;  %v7386_v47 = vor.u32 %v6325_v31, %v4250_v32  ;;  %2724 = vmatpush.bf16.msra.mxu1 %v5541_v33  ;;  %2690 = vmatmul.bf16.vlgmr.msrb.gmra.mxu2 %v7376_v43 }
  0x48   :  { %v5524_v37 = vld [vmem:[%s10260_s2 + $0x9c0] sm:$0xf]  ;;  %v6649_v40 = vld [vmem:[%s10260_s2 + $0x9cc] sm:$0xf0]  ;;  %v5397_v48 = vor.u32 %v6617_v36, %v5396_v35  ;;  %2738 = vmatpush.bf16.msra.mxu2 %v5669_v34  ;;  %2662 = vmatmul.bf16.vlgmr.msrb.gmra.mxu0 %v7365_v39 }
  0x49   :  { %v5652_v41 = vld [vmem:[%s10260_s2 + $0xac0] sm:$0xf]  ;;  %v6681_v42 = vld [vmem:[%s10260_s2 + $0xacc] sm:$0xf0]  ;;  %v5525_v49 = vor.u32 %v6649_v40, %v5524_v37  ;;  %2752 = vmatpush.bf16.msra.mxu3 %v5797_v38 }
  0x4a   :  { %v5780_v45 = vld [vmem:[%s10260_s2 + $0xbc0] sm:$0xf]  ;;  %v6713_v46 = vld [vmem:[%s10260_s2 + $0xbcc] sm:$0xf0]  ;;  %v5653_v50 = vor.u32 %v6681_v42, %v5652_v41  ;;  %2704 = vmatmul.bf16.vlgmr.msrb.gmra.mxu3 %v7386_v47  ;;  %2711 = vmatpush.bf16.msra.mxu0 %v5397_v48 }
  0x4b   :  { %v5380_v51 = vld [vmem:[%s10260_s2 + $0x8a0] sm:$0xf]  ;;  %v6613_v52 = vld [vmem:[%s10260_s2 + $0x8ac] sm:$0xf0]  ;;  %v5781_v54 = vor.u32 %v6713_v46, %v5780_v45  ;;  %2725 = vmatpush.bf16.msra.mxu1 %v5525_v49 }
  0x4c   :  { %v5508_v53 = vld [vmem:[%s10260_s2 + $0x9a0] sm:$0xf]  ;;  %v6645_v55 = vld [vmem:[%s10260_s2 + $0x9ac] sm:$0xf0]  ;;  %v5381_v61 = vor.u32 %v6613_v52, %v5380_v51  ;;  %2739 = vmatpush.bf16.msra.mxu2 %v5653_v50 }
  0x4d   :  { %v5636_v56 = vld [vmem:[%s10260_s2 + $0xaa0] sm:$0xf]  ;;  %v6677_v57 = vld [vmem:[%s10260_s2 + $0xaac] sm:$0xf0]  ;;  %v5509_v62 = vor.u32 %v6645_v55, %v5508_v53  ;;  %2753 = vmatpush.bf16.msra.mxu3 %v5781_v54 }
  0x4e   :  { %v5764_v59 = vld [vmem:[%s10260_s2 + $0xba0] sm:$0xf]  ;;  %v6709_v60 = vld [vmem:[%s10260_s2 + $0xbac] sm:$0xf0]  ;;  %v5637_v63 = vor.u32 %v6677_v57, %v5636_v56  ;;  %2712 = vmatpush.bf16.msra.mxu0 %v5381_v61 }
  0x4f   :  { %v5364_v0 = vld [vmem:[%s10260_s2 + $0x880] sm:$0xf]  ;;  %v6609_v2 = vld [vmem:[%s10260_s2 + $0x88c] sm:$0xf0]  ;;  %v5765_v4 = vor.u32 %v6709_v60, %v5764_v59  ;;  %2726 = vmatpush.bf16.msra.mxu1 %v5509_v62 }
  0x50   :  { %v5492_v3 = vld [vmem:[%s10260_s2 + $0x980] sm:$0xf]  ;;  %v6641_v5 = vld [vmem:[%s10260_s2 + $0x98c] sm:$0xf0]  ;;  %v5365_v11 = vor.u32 %v6609_v2, %v5364_v0  ;;  %2740 = vmatpush.bf16.msra.mxu2 %v5637_v63 }
  0x51   :  { %v5620_v6 = vld [vmem:[%s10260_s2 + $0xa80] sm:$0xf]  ;;  %v6673_v7 = vld [vmem:[%s10260_s2 + $0xa8c] sm:$0xf0]  ;;  %v5493_v12 = vor.u32 %v6641_v5, %v5492_v3  ;;  %2754 = vmatpush.bf16.msra.mxu3 %v5765_v4  ;;  %v6363_v4 = vld [vmem:[%s10260_s2 + $0xe4] sm:$0xf] }
  0x52   :  { %v5748_v8 = vld [vmem:[%s10260_s2 + $0xb80] sm:$0xf]  ;;  %v6705_v9 = vld [vmem:[%s10260_s2 + $0xb8c] sm:$0xf0]  ;;  %v5621_v13 = vor.u32 %v6673_v7, %v5620_v6  ;;  %2713 = vmatpush.bf16.msra.mxu0 %v5365_v11  ;;  %v4390_v5 = vld [vmem:[%s10260_s2 + $0xf0] sm:$0xf0] }
  0x53   :  { %v5348_v14 = vld [vmem:[%s10260_s2 + $0x860] sm:$0xf]  ;;  %v6605_v15 = vld [vmem:[%s10260_s2 + $0x86c] sm:$0xf0]  ;;  %v5749_v18 = vor.u32 %v6705_v9, %v5748_v8  ;;  %2727 = vmatpush.bf16.msra.mxu1 %v5493_v12  ;;  %v6395_v6 = vld [vmem:[%s10260_s2 + $0x1e4] sm:$0xf] }
  0x54   :  { %v5476_v16 = vld [vmem:[%s10260_s2 + $0x960] sm:$0xf]  ;;  %v6637_v19 = vld [vmem:[%s10260_s2 + $0x96c] sm:$0xf0]  ;;  %v5349_v24 = vor.u32 %v6605_v15, %v5348_v14  ;;  %2741 = vmatpush.bf16.msra.mxu2 %v5621_v13  ;;  %v4518_v7 = vld [vmem:[%s10260_s2 + $0x1f0] sm:$0xf0] }
  0x55   :  { %v5604_v20 = vld [vmem:[%s10260_s2 + $0xa60] sm:$0xf]  ;;  %v6669_v21 = vld [vmem:[%s10260_s2 + $0xa6c] sm:$0xf0]  ;;  %v5477_v25 = vor.u32 %v6637_v19, %v5476_v16  ;;  %2755 = vmatpush.bf16.msra.mxu3 %v5749_v18  ;;  %v6427_v8 = vld [vmem:[%s10260_s2 + $0x2e4] sm:$0xf] }
  0x56   :  { %v5732_v22 = vld [vmem:[%s10260_s2 + $0xb60] sm:$0xf]  ;;  %v6701_v23 = vld [vmem:[%s10260_s2 + $0xb6c] sm:$0xf0]  ;;  %v5605_v26 = vor.u32 %v6669_v21, %v5604_v20  ;;  %2714 = vmatpush.bf16.msra.mxu0 %v5349_v24  ;;  %v4646_v11 = vld [vmem:[%s10260_s2 + $0x2f0] sm:$0xf0] }
  0x57   :  { %v5332_v27 = vld [vmem:[%s10260_s2 + $0x840] sm:$0xf]  ;;  %v6601_v28 = vld [vmem:[%s10260_s2 + $0x84c] sm:$0xf0]  ;;  %v5733_v30 = vor.u32 %v6701_v23, %v5732_v22  ;;  %2728 = vmatpush.bf16.msra.mxu1 %v5477_v25  ;;  %v6332_v13 = vld [vmem:[%s10261_s0 + $0x50] sm:$0xf0]  ;;  %v4393_v25 = vor.u32 %v6363_v4, %v4390_v5 }
  0x58   :  { %v5460_v29 = vld [vmem:[%s10260_s2 + $0x940] sm:$0xf]  ;;  %v6633_v31 = vld [vmem:[%s10260_s2 + $0x94c] sm:$0xf0]  ;;  %v5333_v36 = vor.u32 %v6601_v28, %v5332_v27  ;;  %2742 = vmatpush.bf16.msra.mxu2 %v5605_v26  ;;  %v4264_v16 = vld [vmem:[%s10261_s0 + $0x28] sm:$0xf]  ;;  %v4521_v26 = vor.u32 %v6395_v6, %v4518_v7 }
  0x59   :  { %v5588_v32 = vld [vmem:[%s10260_s2 + $0xa40] sm:$0xf]  ;;  %v6665_v33 = vld [vmem:[%s10260_s2 + $0xa4c] sm:$0xf0]  ;;  %v5461_v38 = vor.u32 %v6633_v31, %v5460_v29  ;;  %2756 = vmatpush.bf16.msra.mxu3 %v5733_v30  ;;  %v6333_v18 = vld [vmem:[%s10261_s0 + $0x58] sm:$0xf0]  ;;  %v4649_v30 = vor.u32 %v6427_v8, %v4646_v11 }
  0x5a   :  { %v5716_v34 = vld [vmem:[%s10260_s2 + $0xb40] sm:$0xf]  ;;  %v6697_v35 = vld [vmem:[%s10260_s2 + $0xb4c] sm:$0xf0]  ;;  %v5589_v40 = vor.u32 %v6665_v33, %v5588_v32  ;;  %2715 = vmatpush.bf16.msra.mxu0 %v5333_v36  ;;  %v6326_v19 = vld [vmem:[%s10261_s0 + $0x24] sm:$0xf] }
  0x5b   :  { %v5316_v37 = vld [vmem:[%s10260_s2 + $0x820] sm:$0xf]  ;;  %v6597_v41 = vld [vmem:[%s10260_s2 + $0x82c] sm:$0xf0]  ;;  %v5717_v46 = vor.u32 %v6697_v35, %v5716_v34  ;;  %2729 = vmatpush.bf16.msra.mxu1 %v5461_v38  ;;  %v4258_v22 = vld [vmem:[%s10261_s0 + $0x54] sm:$0xf0]  ;;  %v7604_v35 = vor.u32 %v6333_v18, %v4264_v16 }
  0x5c   :  { %v5444_v42 = vld [vmem:[%s10260_s2 + $0x920] sm:$0xf]  ;;  %v6629_v45 = vld [vmem:[%s10260_s2 + $0x92c] sm:$0xf0]  ;;  %v5317_v54 = vor.u32 %v6597_v41, %v5316_v37  ;;  %2743 = vmatpush.bf16.msra.mxu2 %v5589_v40  ;;  %v6327_v23 = vld [vmem:[%s10261_s0 + $0x2c] sm:$0xf]  ;;  %v7606_v36 = vor.u32 %v6326_v19, %v4258_v22 }
  0x5d   :  { %v5572_v48 = vld [vmem:[%s10260_s2 + $0xa20] sm:$0xf]  ;;  %v6661_v49 = vld [vmem:[%s10260_s2 + $0xa2c] sm:$0xf0]  ;;  %v5445_v60 = vor.u32 %v6629_v45, %v5444_v42  ;;  %2757 = vmatpush.bf16.msra.mxu3 %v5717_v46  ;;  %v6359_v29 = vld [vmem:[%s10260_s2 + $0xc4] sm:$0xf] }
  0x5e   :  { %v5700_v50 = vld [vmem:[%s10260_s2 + $0xb20] sm:$0xf]  ;;  %v6693_v51 = vld [vmem:[%s10260_s2 + $0xb2c] sm:$0xf0]  ;;  %v5573_v61 = vor.u32 %v6661_v49, %v5572_v48  ;;  %2716 = vmatpush.bf16.msra.mxu0 %v5317_v54  ;;  %v4374_v32 = vld [vmem:[%s10260_s2 + $0xd0] sm:$0xf0] }
  0x5f   :  { %v5300_v52 = vld [vmem:[%s10260_s2 + $0x800] sm:$0xf]  ;;  %v6593_v53 = vld [vmem:[%s10260_s2 + $0x80c] sm:$0xf0]  ;;  %v5701_v2 = vor.u32 %v6693_v51, %v5700_v50  ;;  %2730 = vmatpush.bf16.msra.mxu1 %v5445_v60  ;;  %v6391_v33 = vld [vmem:[%s10260_s2 + $0x1c4] sm:$0xf]  ;;  %v4377_v42 = vor.u32 %v6359_v29, %v4374_v32 }
  0x60   :  { %v5428_v55 = vld [vmem:[%s10260_s2 + $0x900] sm:$0xf]  ;;  %v6625_v56 = vld [vmem:[%s10260_s2 + $0x90c] sm:$0xf0]  ;;  %v5301_v9 = vor.u32 %v6593_v53, %v5300_v52  ;;  %2744 = vmatpush.bf16.msra.mxu2 %v5573_v61  ;;  %v4502_v34 = vld [vmem:[%s10260_s2 + $0x1d0] sm:$0xf0] }
  0x61   :  { %v5556_v57 = vld [vmem:[%s10260_s2 + $0xa00] sm:$0xf]  ;;  %v6657_v59 = vld [vmem:[%s10260_s2 + $0xa0c] sm:$0xf0]  ;;  %v5429_v14 = vor.u32 %v6625_v56, %v5428_v55  ;;  %2758 = vmatpush.bf16.msra.mxu3 %v5701_v2  ;;  %v6423_v37 = vld [vmem:[%s10260_s2 + $0x2c4] sm:$0xf]  ;;  %v4505_v45 = vor.u32 %v6391_v33, %v4502_v34 }
  0x62   :  { %v5684_v62 = vld [vmem:[%s10260_s2 + $0xb00] sm:$0xf]  ;;  %v6689_v63 = vld [vmem:[%s10260_s2 + $0xb0c] sm:$0xf0]  ;;  %v5557_v15 = vor.u32 %v6657_v59, %v5556_v57  ;;  %2717 = vmatpush.bf16.msra.mxu0 %v5301_v9  ;;  %v4630_v38 = vld [vmem:[%s10260_s2 + $0x2d0] sm:$0xf0] }
  0x63   :  { %v5924_v0 = vld [vmem:[%s10260_s2 + $0xce0] sm:$0xf]  ;;  %v6749_v3 = vld [vmem:[%s10260_s2 + $0xcec] sm:$0xf0]  ;;  %v5685_v20 = vor.u32 %v6689_v63, %v5684_v62  ;;  %2731 = vmatpush.bf16.msra.mxu1 %v5429_v14  ;;  %v6355_v49 = vld [vmem:[%s10260_s2 + $0xa4] sm:$0xf]  ;;  %v4633_v50 = vor.u32 %v6423_v37, %v4630_v38 }
  0x64   :  { %v4256_v12 = vld [vmem:[%s10261_s0 + $0x20] sm:$0xf]  ;;  %v5925_v21 = vor.u32 %v6749_v3, %v5924_v0  ;;  %v6745_v28 = vld [vmem:[%s10260_s2 + $0xccc] sm:$0xf0]  ;;  %2745 = vmatpush.bf16.msra.mxu2 %v5557_v15  ;;  %v4358_v51 = vld [vmem:[%s10260_s2 + $0xb0] sm:$0xf0] }
  0x65   :  { %v4266_v24 = vld [vmem:[%s10261_s0 + $0x5c] sm:$0xf0]  ;;  %v7593_v31 = vor.u32 %v6332_v13, %v4256_v12  ;;  %2759 = vmatpush.bf16.msra.mxu3 %v5685_v20  ;;  %v6741_v48 = vld [vmem:[%s10260_s2 + $0xcac] sm:$0xf0]  ;;  %v6387_v52 = vld [vmem:[%s10260_s2 + $0x1a4] sm:$0xf]  ;;  %v4361_v57 = vor.u32 %v6355_v49, %v4358_v51 }
  0x66   :  { %v5908_v27 = vld [vmem:[%s10260_s2 + $0xcc0] sm:$0xf]  ;;  %2766 = vmatpush.bf16.msrb.mxu0 %v5925_v21  ;;  %v7614_v40 = vor.u32 %v6327_v23, %v4266_v24  ;;  %v4486_v53 = vld [vmem:[%s10260_s2 + $0x1b0] sm:$0xf0]  ;;  %2732 = vmatmul.bf16.vlgmr.msra.gmra.mxu1 %v7606_v36  ;;  %v6419_v54 = vld [vmem:[%s10260_s2 + $0x2a4] sm:$0xf] }
  0x67   :  { %v5909_v41 = vor.u32 %v6745_v28, %v5908_v27  ;;  %2780 = vmatpush.bf16.msrb.mxu1 %v4393_v25  ;;  %v5892_v46 = vld [vmem:[%s10260_s2 + $0xca0] sm:$0xf]  ;;  %2718 = vmatmul.bf16.vlgmr.msra.gmra.mxu0 %v7593_v31  ;;  %v4614_v55 = vld [vmem:[%s10260_s2 + $0x2b0] sm:$0xf0]  ;;  %v4489_v59 = vor.u32 %v6387_v52, %v4486_v53  ;;  %v6737_v61 = vld [vmem:[%s10260_s2 + $0xc8c] sm:$0xf0] }
  0x68   :  { %2794 = vmatpush.bf16.msrb.mxu2 %v4521_v26  ;;  %2760 = vmatmul.bf16.vlgmr.msra.gmra.mxu3 %v7614_v40  ;;  %v5893_v56 = vor.u32 %v6741_v48, %v5892_v46  ;;  %v5876_v60 = vld [vmem:[%s10260_s2 + $0xc80] sm:$0xf]  ;;  %v6351_v62 = vld [vmem:[%s10260_s2 + $0x84] sm:$0xf]  ;;  %v4617_v63 = vor.u32 %v6419_v54, %v4614_v55  ;;  %v4342_v0 = vld [vmem:[%s10260_s2 + $0x90] sm:$0xf0] }
  0x69   :  { %2808 = vmatpush.bf16.msrb.mxu3 %v4649_v30  ;;  %2746 = vmatmul.bf16.vlgmr.msra.gmra.mxu2 %v7604_v35  ;;  %v6383_v2 = vld [vmem:[%s10260_s2 + $0x184] sm:$0xf]  ;;  %v4470_v3 = vld [vmem:[%s10260_s2 + $0x190] sm:$0xf0]  ;;  %v5877_v6 = vor.u32 %v6737_v61, %v5876_v60  ;;  %v4345_v7 = vor.u32 %v6351_v62, %v4342_v0  ;;  %v5860_v9 = vld [vmem:[%s10260_s2 + $0xc60] sm:$0xf] }
  0x6a   :  { %2767 = vmatpush.bf16.msrb.mxu0 %v5909_v41  ;;  %v6415_v4 = vld [vmem:[%s10260_s2 + $0x284] sm:$0xf]  ;;  %v4598_v5 = vld [vmem:[%s10260_s2 + $0x290] sm:$0xf0]  ;;  %v4473_v8 = vor.u32 %v6383_v2, %v4470_v3  ;;  %v6733_v11 = vld [vmem:[%s10260_s2 + $0xc6c] sm:$0xf0] }
  0x6b   :  { %2781 = vmatpush.bf16.msrb.mxu1 %v4377_v42  ;;  %v6347_v12 = vld [vmem:[%s10260_s2 + $0x64] sm:$0xf]  ;;  %v4601_v13 = vor.u32 %v6415_v4, %v4598_v5  ;;  %v4326_v14 = vld [vmem:[%s10260_s2 + $0x70] sm:$0xf0]  ;;  %v5861_v20 = vor.u32 %v6733_v11, %v5860_v9  ;;  %v5844_v23 = vld [vmem:[%s10260_s2 + $0xc40] sm:$0xf] }
  0x6c   :  { %2795 = vmatpush.bf16.msrb.mxu2 %v4505_v45  ;;  %v6379_v15 = vld [vmem:[%s10260_s2 + $0x164] sm:$0xf]  ;;  %v4454_v16 = vld [vmem:[%s10260_s2 + $0x170] sm:$0xf0]  ;;  %v4329_v21 = vor.u32 %v6347_v12, %v4326_v14  ;;  %v6729_v24 = vld [vmem:[%s10260_s2 + $0xc4c] sm:$0xf0] }
  0x6d   :  { %2809 = vmatpush.bf16.msrb.mxu3 %v4633_v50  ;;  %v6411_v18 = vld [vmem:[%s10260_s2 + $0x264] sm:$0xf]  ;;  %v4582_v19 = vld [vmem:[%s10260_s2 + $0x270] sm:$0xf0]  ;;  %v4457_v22 = vor.u32 %v6379_v15, %v4454_v16  ;;  %v5845_v33 = vor.u32 %v6729_v24, %v5844_v23  ;;  %v5828_v38 = vld [vmem:[%s10260_s2 + $0xc20] sm:$0xf] }
  0x6e   :  { %2768 = vmatpush.bf16.msrb.mxu0 %v5893_v56  ;;  %v6343_v25 = vld [vmem:[%s10260_s2 + $0x44] sm:$0xf]  ;;  %v4585_v26 = vor.u32 %v6411_v18, %v4582_v19  ;;  %v4310_v27 = vld [vmem:[%s10260_s2 + $0x50] sm:$0xf0]  ;;  %v6725_v41 = vld [vmem:[%s10260_s2 + $0xc2c] sm:$0xf0] }
  0x6f   :  { %2782 = vmatpush.bf16.msrb.mxu1 %v4361_v57  ;;  %v6375_v28 = vld [vmem:[%s10260_s2 + $0x144] sm:$0xf]  ;;  %v4438_v29 = vld [vmem:[%s10260_s2 + $0x150] sm:$0xf0]  ;;  %v4313_v34 = vor.u32 %v6343_v25, %v4310_v27  ;;  %v5829_v52 = vor.u32 %v6725_v41, %v5828_v38  ;;  %v5812_v53 = vld [vmem:[%s10260_s2 + $0xc00] sm:$0xf] }
  0x70   :  { %2796 = vmatpush.bf16.msrb.mxu2 %v4489_v59  ;;  %v6407_v30 = vld [vmem:[%s10260_s2 + $0x244] sm:$0xf]  ;;  %v4566_v32 = vld [vmem:[%s10260_s2 + $0x250] sm:$0xf0]  ;;  %v4441_v37 = vor.u32 %v6375_v28, %v4438_v29  ;;  %v6721_v54 = vld [vmem:[%s10260_s2 + $0xc0c] sm:$0xf0] }
  0x71   :  { %2810 = vmatpush.bf16.msrb.mxu3 %v4617_v63  ;;  %v6339_v42 = vld [vmem:[%s10260_s2 + $0x24] sm:$0xf]  ;;  %v4569_v45 = vor.u32 %v6407_v30, %v4566_v32  ;;  %v4294_v46 = vld [vmem:[%s10260_s2 + $0x30] sm:$0xf0]  ;;  %v4272_v14 = vld [vmem:[%s10261_s0 + $0x30] sm:$0xf] }
  0x72   :  { %2769 = vmatpush.bf16.msrb.mxu0 %v5877_v6  ;;  %v6371_v48 = vld [vmem:[%s10260_s2 + $0x124] sm:$0xf]  ;;  %v4422_v49 = vld [vmem:[%s10260_s2 + $0x130] sm:$0xf0]  ;;  %v4297_v56 = vor.u32 %v6339_v42, %v4294_v46  ;;  %v5813_v6 = vor.u32 %v6721_v54, %v5812_v53 }
  0x73   :  { %2783 = vmatpush.bf16.msrb.mxu1 %v4345_v7  ;;  %v6403_v50 = vld [vmem:[%s10260_s2 + $0x224] sm:$0xf]  ;;  %v4550_v51 = vld [vmem:[%s10260_s2 + $0x230] sm:$0xf0]  ;;  %v4425_v57 = vor.u32 %v6371_v48, %v4422_v49 }
  0x74   :  { %2797 = vmatpush.bf16.msrb.mxu2 %v4473_v8  ;;  %v6335_v55 = vld [vmem:[%s10260_s2 + $0x4] sm:$0xf]  ;;  %v4278_v59 = vld [vmem:[%s10260_s2 + $0x10] sm:$0xf0]  ;;  %v4553_v62 = vor.u32 %v6403_v50, %v4550_v51 }
  0x75   :  { %2811 = vmatpush.bf16.msrb.mxu3 %v4601_v13  ;;  %v6367_v60 = vld [vmem:[%s10260_s2 + $0x104] sm:$0xf]  ;;  %v4406_v61 = vld [vmem:[%s10260_s2 + $0x110] sm:$0xf0]  ;;  %v4281_v11 = vor.u32 %v6335_v55, %v4278_v59 }
  0x76   :  { %2770 = vmatpush.bf16.msrb.mxu0 %v5861_v20  ;;  %v6399_v63 = vld [vmem:[%s10260_s2 + $0x204] sm:$0xf]  ;;  %v4534_v0 = vld [vmem:[%s10260_s2 + $0x210] sm:$0xf0]  ;;  %v4409_v12 = vor.u32 %v6367_v60, %v4406_v61 }
  0x77   :  { %2784 = vmatpush.bf16.msrb.mxu1 %v4329_v21  ;;  %v6459_v2 = vld [vmem:[%s10260_s2 + $0x3e4] sm:$0xf]  ;;  %v4774_v3 = vld [vmem:[%s10260_s2 + $0x3f0] sm:$0xf0]  ;;  %v4537_v16 = vor.u32 %v6399_v63, %v4534_v0 }
  0x78   :  { %2798 = vmatpush.bf16.msrb.mxu2 %v4457_v22  ;;  %v6491_v4 = vld [vmem:[%s10260_s2 + $0x4e4] sm:$0xf]  ;;  %v4902_v5 = vld [vmem:[%s10260_s2 + $0x4f0] sm:$0xf0]  ;;  %v4777_v18 = vor.u32 %v6459_v2, %v4774_v3 }
  0x79   :  { %2812 = vmatpush.bf16.msrb.mxu3 %v4585_v26  ;;  %v6523_v7 = vld [vmem:[%s10260_s2 + $0x5e4] sm:$0xf]  ;;  %v5030_v8 = vld [vmem:[%s10260_s2 + $0x5f0] sm:$0xf0]  ;;  %v4905_v19 = vor.u32 %v6491_v4, %v4902_v5 }
  0x7a   :  { %2771 = vmatpush.bf16.msrb.mxu0 %v5845_v33  ;;  %v6555_v9 = vld [vmem:[%s10260_s2 + $0x6e4] sm:$0xf]  ;;  %v5158_v13 = vld [vmem:[%s10260_s2 + $0x6f0] sm:$0xf0]  ;;  %v5033_v20 = vor.u32 %v6523_v7, %v5030_v8 }
  0x7b   :  { %2785 = vmatpush.bf16.msrb.mxu1 %v4313_v34  ;;  %v6334_v15 = vld [vmem:[%s10261_s0 + $0x60] sm:$0xf0]  ;;  %v4758_v22 = vld [vmem:[%s10260_s2 + $0x3d0] sm:$0xf0]  ;;  %v5161_v24 = vor.u32 %v6555_v9, %v5158_v13 }
  0x7c   :  { %2799 = vmatpush.bf16.msrb.mxu2 %v4441_v37  ;;  %v6455_v21 = vld [vmem:[%s10260_s2 + $0x3c4] sm:$0xf]  ;;  %v7803_v25 = vor.u32 %v6334_v15, %v4272_v14  ;;  %v4886_v26 = vld [vmem:[%s10260_s2 + $0x4d0] sm:$0xf0] }
  0x7d   :  { %2813 = vmatpush.bf16.msrb.mxu3 %v4569_v45  ;;  %v6487_v23 = vld [vmem:[%s10260_s2 + $0x4c4] sm:$0xf]  ;;  %v5014_v28 = vld [vmem:[%s10260_s2 + $0x5d0] sm:$0xf0]  ;;  %v4761_v32 = vor.u32 %v6455_v21, %v4758_v22 }
  0x7e   :  { %2772 = vmatpush.bf16.msrb.mxu0 %v5829_v52  ;;  %v6519_v27 = vld [vmem:[%s10260_s2 + $0x5c4] sm:$0xf]  ;;  %v5142_v30 = vld [vmem:[%s10260_s2 + $0x6d0] sm:$0xf0]  ;;  %v4889_v33 = vor.u32 %v6487_v23, %v4886_v26 }
  0x7f   :  { %2786 = vmatpush.bf16.msrb.mxu1 %v4297_v56  ;;  %v6551_v29 = vld [vmem:[%s10260_s2 + $0x6c4] sm:$0xf]  ;;  %v5017_v34 = vor.u32 %v6519_v27, %v5014_v28  ;;  %v4742_v38 = vld [vmem:[%s10260_s2 + $0x3b0] sm:$0xf0] }
  0x80   :  { %2800 = vmatpush.bf16.msrb.mxu2 %v4425_v57  ;;  %v6451_v37 = vld [vmem:[%s10260_s2 + $0x3a4] sm:$0xf]  ;;  %v5145_v42 = vor.u32 %v6551_v29, %v5142_v30  ;;  %v4870_v45 = vld [vmem:[%s10260_s2 + $0x4b0] sm:$0xf0] }
  0x81   :  { %2814 = vmatpush.bf16.msrb.mxu3 %v4553_v62  ;;  %v6483_v41 = vld [vmem:[%s10260_s2 + $0x4a4] sm:$0xf]  ;;  %v4998_v48 = vld [vmem:[%s10260_s2 + $0x5b0] sm:$0xf0]  ;;  %v4745_v51 = vor.u32 %v6451_v37, %v4742_v38 }
  0x82   :  { %2773 = vmatpush.bf16.msrb.mxu0 %v5813_v6  ;;  %v6515_v46 = vld [vmem:[%s10260_s2 + $0x5a4] sm:$0xf]  ;;  %v5126_v50 = vld [vmem:[%s10260_s2 + $0x6b0] sm:$0xf0]  ;;  %v4873_v52 = vor.u32 %v6483_v41, %v4870_v45 }
  0x83   :  { %2787 = vmatpush.bf16.msrb.mxu1 %v4281_v11  ;;  %v6547_v49 = vld [vmem:[%s10260_s2 + $0x6a4] sm:$0xf]  ;;  %v5001_v53 = vor.u32 %v6515_v46, %v4998_v48  ;;  %v4726_v55 = vld [vmem:[%s10260_s2 + $0x390] sm:$0xf0] }
  0x84   :  { %2801 = vmatpush.bf16.msrb.mxu2 %v4409_v12  ;;  %v6447_v54 = vld [vmem:[%s10260_s2 + $0x384] sm:$0xf]  ;;  %v5129_v57 = vor.u32 %v6547_v49, %v5126_v50  ;;  %v4854_v59 = vld [vmem:[%s10260_s2 + $0x490] sm:$0xf0] }
  0x85   :  { %2815 = vmatpush.bf16.msrb.mxu3 %v4537_v16  ;;  %2774 = vmatmul.bf16.vlgmr.msrb.gmra.mxu0 %v7803_v25  ;;  %v6479_v56 = vld [vmem:[%s10260_s2 + $0x484] sm:$0xf]  ;;  %v4982_v61 = vld [vmem:[%s10260_s2 + $0x590] sm:$0xf0]  ;;  %v4729_v0 = vor.u32 %v6447_v54, %v4726_v55 }
  0x86   :  { %2822 = vmatpush.bf16.msra.mxu0 %v4777_v18  ;;  %2788 = vmatmul.bf16.vlgmr.msrb.gmra.mxu1 %v7143_v58  ;;  %v6511_v60 = vld [vmem:[%s10260_s2 + $0x584] sm:$0xf]  ;;  %v5110_v63 = vld [vmem:[%s10260_s2 + $0x690] sm:$0xf0]  ;;  %v4857_v2 = vor.u32 %v6479_v56, %v4854_v59 }
  0x87   :  { %2836 = vmatpush.bf16.msra.mxu1 %v4905_v19  ;;  %2802 = vmatmul.bf16.vlgmr.msrb.gmra.mxu2 %v7179_v10  ;;  %v6543_v62 = vld [vmem:[%s10260_s2 + $0x684] sm:$0xf]  ;;  %v4985_v3 = vor.u32 %v6511_v60, %v4982_v61  ;;  %v4710_v5 = vld [vmem:[%s10260_s2 + $0x370] sm:$0xf0] }
  0x88   :  { %2850 = vmatpush.bf16.msra.mxu2 %v5033_v20  ;;  %2816 = vmatmul.bf16.vlgmr.msrb.gmra.mxu3 %v7157_v1  ;;  %v6443_v4 = vld [vmem:[%s10260_s2 + $0x364] sm:$0xf]  ;;  %v5113_v7 = vor.u32 %v6543_v62, %v5110_v63  ;;  %v4838_v8 = vld [vmem:[%s10260_s2 + $0x470] sm:$0xf0] }
  0x89   :  { %2864 = vmatpush.bf16.msra.mxu3 %v5161_v24  ;;  %v6475_v6 = vld [vmem:[%s10260_s2 + $0x464] sm:$0xf]  ;;  %v4966_v11 = vld [vmem:[%s10260_s2 + $0x570] sm:$0xf0]  ;;  %v4713_v14 = vor.u32 %v6443_v4, %v4710_v5 }
  0x8a   :  { %2823 = vmatpush.bf16.msra.mxu0 %v4761_v32  ;;  %v6507_v9 = vld [vmem:[%s10260_s2 + $0x564] sm:$0xf]  ;;  %v5094_v13 = vld [vmem:[%s10260_s2 + $0x670] sm:$0xf0]  ;;  %v4841_v15 = vor.u32 %v6475_v6, %v4838_v8 }
  0x8b   :  { %2837 = vmatpush.bf16.msra.mxu1 %v4889_v33  ;;  %v6539_v12 = vld [vmem:[%s10260_s2 + $0x664] sm:$0xf]  ;;  %v4969_v16 = vor.u32 %v6507_v9, %v4966_v11  ;;  %v4694_v19 = vld [vmem:[%s10260_s2 + $0x350] sm:$0xf0] }
  0x8c   :  { %2851 = vmatpush.bf16.msra.mxu2 %v5017_v34  ;;  %v6439_v18 = vld [vmem:[%s10260_s2 + $0x344] sm:$0xf]  ;;  %v5097_v21 = vor.u32 %v6539_v12, %v5094_v13  ;;  %v4822_v22 = vld [vmem:[%s10260_s2 + $0x450] sm:$0xf0] }
  0x8d   :  { %2865 = vmatpush.bf16.msra.mxu3 %v5145_v42  ;;  %v6471_v20 = vld [vmem:[%s10260_s2 + $0x444] sm:$0xf]  ;;  %v4950_v24 = vld [vmem:[%s10260_s2 + $0x550] sm:$0xf0]  ;;  %v4697_v28 = vor.u32 %v6439_v18, %v4694_v19 }
  0x8e   :  { %2824 = vmatpush.bf16.msra.mxu0 %v4745_v51  ;;  %v6503_v23 = vld [vmem:[%s10260_s2 + $0x544] sm:$0xf]  ;;  %v5078_v27 = vld [vmem:[%s10260_s2 + $0x650] sm:$0xf0]  ;;  %v4825_v29 = vor.u32 %v6471_v20, %v4822_v22 }
  0x8f   :  { %2838 = vmatpush.bf16.msra.mxu1 %v4873_v52  ;;  %v6535_v26 = vld [vmem:[%s10260_s2 + $0x644] sm:$0xf]  ;;  %v4953_v30 = vor.u32 %v6503_v23, %v4950_v24  ;;  %v4678_v33 = vld [vmem:[%s10260_s2 + $0x330] sm:$0xf0] }
  0x90   :  { %2852 = vmatpush.bf16.msra.mxu2 %v5001_v53  ;;  %v6435_v32 = vld [vmem:[%s10260_s2 + $0x324] sm:$0xf]  ;;  %v5081_v37 = vor.u32 %v6535_v26, %v5078_v27  ;;  %v4806_v38 = vld [vmem:[%s10260_s2 + $0x430] sm:$0xf0] }
  0x91   :  { %2866 = vmatpush.bf16.msra.mxu3 %v5129_v57  ;;  %v6467_v34 = vld [vmem:[%s10260_s2 + $0x424] sm:$0xf]  ;;  %v4934_v42 = vld [vmem:[%s10260_s2 + $0x530] sm:$0xf0]  ;;  %v4681_v48 = vor.u32 %v6435_v32, %v4678_v33 }
  0x92   :  { %2825 = vmatpush.bf16.msra.mxu0 %v4729_v0  ;;  %v6499_v41 = vld [vmem:[%s10260_s2 + $0x524] sm:$0xf]  ;;  %v5062_v46 = vld [vmem:[%s10260_s2 + $0x630] sm:$0xf0]  ;;  %v4809_v51 = vor.u32 %v6467_v34, %v4806_v38 }
  0x93   :  { %2839 = vmatpush.bf16.msra.mxu1 %v4857_v2  ;;  %v6531_v45 = vld [vmem:[%s10260_s2 + $0x624] sm:$0xf]  ;;  %v4662_v50 = vld [vmem:[%s10260_s2 + $0x310] sm:$0xf0]  ;;  %v4937_v52 = vor.u32 %v6499_v41, %v4934_v42 }
  0x94   :  { %2853 = vmatpush.bf16.msra.mxu2 %v4985_v3  ;;  %v6431_v49 = vld [vmem:[%s10260_s2 + $0x304] sm:$0xf]  ;;  %v4790_v54 = vld [vmem:[%s10260_s2 + $0x410] sm:$0xf0]  ;;  %v5065_v56 = vor.u32 %v6531_v45, %v5062_v46 }
  0x95   :  { %2867 = vmatpush.bf16.msra.mxu3 %v5113_v7  ;;  %v6463_v53 = vld [vmem:[%s10260_s2 + $0x404] sm:$0xf]  ;;  %v4918_v57 = vld [vmem:[%s10260_s2 + $0x510] sm:$0xf0]  ;;  %v4665_v0 = vor.u32 %v6431_v49, %v4662_v50 }
  0x96   :  { %2826 = vmatpush.bf16.msra.mxu0 %v4713_v14  ;;  %v6495_v55 = vld [vmem:[%s10260_s2 + $0x504] sm:$0xf]  ;;  %v5046_v60 = vld [vmem:[%s10260_s2 + $0x610] sm:$0xf0]  ;;  %v4793_v5 = vor.u32 %v6463_v53, %v4790_v54 }
  0x97   :  { %2840 = vmatpush.bf16.msra.mxu1 %v4841_v15  ;;  %v6527_v59 = vld [vmem:[%s10260_s2 + $0x604] sm:$0xf]  ;;  %v5286_v62 = vld [vmem:[%s10260_s2 + $0x7f0] sm:$0xf0]  ;;  %v4921_v6 = vor.u32 %v6495_v55, %v4918_v57 }
  0x98   :  { %2854 = vmatpush.bf16.msra.mxu2 %v4969_v16  ;;  %v6587_v61 = vld [vmem:[%s10260_s2 + $0x7e4] sm:$0xf]  ;;  %v5414_v2 = vld [vmem:[%s10260_s2 + $0x8f0] sm:$0xf0]  ;;  %v5049_v9 = vor.u32 %v6527_v59, %v5046_v60 }
  0x99   :  { %2868 = vmatpush.bf16.msra.mxu3 %v5097_v21  ;;  %v6619_v63 = vld [vmem:[%s10260_s2 + $0x8e4] sm:$0xf]  ;;  %v5542_v4 = vld [vmem:[%s10260_s2 + $0x9f0] sm:$0xf0]  ;;  %v5289_v11 = vor.u32 %v6587_v61, %v5286_v62 }
  0x9a   :  { %2827 = vmatpush.bf16.msra.mxu0 %v4697_v28  ;;  %v6651_v3 = vld [vmem:[%s10260_s2 + $0x9e4] sm:$0xf]  ;;  %v5670_v8 = vld [vmem:[%s10260_s2 + $0xaf0] sm:$0xf0]  ;;  %v5417_v12 = vor.u32 %v6619_v63, %v5414_v2 }
  0x9b   :  { %2841 = vmatpush.bf16.msra.mxu1 %v4825_v29  ;;  %v6683_v7 = vld [vmem:[%s10260_s2 + $0xae4] sm:$0xf]  ;;  %v5545_v13 = vor.u32 %v6651_v3, %v5542_v4  ;;  %v5270_v15 = vld [vmem:[%s10260_s2 + $0x7d0] sm:$0xf0] }
  0x9c   :  { %2855 = vmatpush.bf16.msra.mxu2 %v4953_v30  ;;  %v6583_v14 = vld [vmem:[%s10260_s2 + $0x7c4] sm:$0xf]  ;;  %v5673_v18 = vor.u32 %v6683_v7, %v5670_v8  ;;  %v5398_v19 = vld [vmem:[%s10260_s2 + $0x8d0] sm:$0xf0] }
  0x9d   :  { %2869 = vmatpush.bf16.msra.mxu3 %v5081_v37  ;;  %v6615_v16 = vld [vmem:[%s10260_s2 + $0x8c4] sm:$0xf]  ;;  %v5526_v21 = vld [vmem:[%s10260_s2 + $0x9d0] sm:$0xf0]  ;;  %v5273_v24 = vor.u32 %v6583_v14, %v5270_v15 }
  0x9e   :  { %2828 = vmatpush.bf16.msra.mxu0 %v4681_v48  ;;  %v6647_v20 = vld [vmem:[%s10260_s2 + $0x9c4] sm:$0xf]  ;;  %v5654_v23 = vld [vmem:[%s10260_s2 + $0xad0] sm:$0xf0]  ;;  %v5401_v26 = vor.u32 %v6615_v16, %v5398_v19 }
  0x9f   :  { %2842 = vmatpush.bf16.msra.mxu1 %v4809_v51  ;;  %v6679_v22 = vld [vmem:[%s10260_s2 + $0xac4] sm:$0xf]  ;;  %v5529_v27 = vor.u32 %v6647_v20, %v5526_v21  ;;  %v5254_v29 = vld [vmem:[%s10260_s2 + $0x7b0] sm:$0xf0] }
  0xa0   :  { %2856 = vmatpush.bf16.msra.mxu2 %v4937_v52  ;;  %v6579_v28 = vld [vmem:[%s10260_s2 + $0x7a4] sm:$0xf]  ;;  %v5657_v32 = vor.u32 %v6679_v22, %v5654_v23  ;;  %v5382_v33 = vld [vmem:[%s10260_s2 + $0x8b0] sm:$0xf0] }
  0xa1   :  { %2870 = vmatpush.bf16.msra.mxu3 %v5065_v56  ;;  %v6611_v30 = vld [vmem:[%s10260_s2 + $0x8a4] sm:$0xf]  ;;  %v5510_v37 = vld [vmem:[%s10260_s2 + $0x9b0] sm:$0xf0]  ;;  %v5257_v42 = vor.u32 %v6579_v28, %v5254_v29  ;;  %v2621_v8 = vpop.f32.mrf.mxu1 }
  0xa2   :  { %2829 = vmatpush.bf16.msra.mxu0 %v4665_v0  ;;  %v6643_v34 = vld [vmem:[%s10260_s2 + $0x9a4] sm:$0xf]  ;;  %v5638_v41 = vld [vmem:[%s10260_s2 + $0xab0] sm:$0xf0]  ;;  %v5385_v45 = vor.u32 %v6611_v30, %v5382_v33 }
  0xa3   :  { %2843 = vmatpush.bf16.msra.mxu1 %v4793_v5  ;;  %v6675_v38 = vld [vmem:[%s10260_s2 + $0xaa4] sm:$0xf]  ;;  %v5513_v46 = vor.u32 %v6643_v34, %v5510_v37  ;;  %v5238_v49 = vld [vmem:[%s10260_s2 + $0x790] sm:$0xf0] }
  0xa4   :  { %2857 = vmatpush.bf16.msra.mxu2 %v4921_v6  ;;  %v6575_v48 = vld [vmem:[%s10260_s2 + $0x784] sm:$0xf]  ;;  %v5641_v51 = vor.u32 %v6675_v38, %v5638_v41  ;;  %v5366_v52 = vld [vmem:[%s10260_s2 + $0x890] sm:$0xf0] }
  0xa5   :  { %2871 = vmatpush.bf16.msra.mxu3 %v5049_v9  ;;  %2830 = vmatmul.bf16.vlgmr.msra.gmra.mxu0 %v7193_v17  ;;  %v6607_v50 = vld [vmem:[%s10260_s2 + $0x884] sm:$0xf]  ;;  %v5494_v54 = vld [vmem:[%s10260_s2 + $0x990] sm:$0xf0]  ;;  %v5241_v57 = vor.u32 %v6575_v48, %v5238_v49 }
  0xa6   :  { %2878 = vmatpush.bf16.msrb.mxu0 %v5289_v11  ;;  %2844 = vmatmul.bf16.vlgmr.msra.gmra.mxu1 %v7365_v39  ;;  %v6639_v53 = vld [vmem:[%s10260_s2 + $0x984] sm:$0xf]  ;;  %v5622_v56 = vld [vmem:[%s10260_s2 + $0xa90] sm:$0xf0]  ;;  %v5369_v59 = vor.u32 %v6607_v50, %v5366_v52 }
  0xa7   :  { %2892 = vmatpush.bf16.msrb.mxu1 %v5417_v12  ;;  %2858 = vmatmul.bf16.vlgmr.msra.gmra.mxu2 %v7378_v44  ;;  %v6671_v55 = vld [vmem:[%s10260_s2 + $0xa84] sm:$0xf]  ;;  %v5497_v60 = vor.u32 %v6639_v53, %v5494_v54  ;;  %v5222_v62 = vld [vmem:[%s10260_s2 + $0x770] sm:$0xf0] }
  0xa8   :  { %2906 = vmatpush.bf16.msrb.mxu2 %v5545_v13  ;;  %2872 = vmatmul.bf16.vlgmr.msra.gmra.mxu3 %v7376_v43  ;;  %v6571_v61 = vld [vmem:[%s10260_s2 + $0x764] sm:$0xf]  ;;  %v5625_v0 = vor.u32 %v6671_v55, %v5622_v56  ;;  %v5350_v2 = vld [vmem:[%s10260_s2 + $0x870] sm:$0xf0]  ;;  %v2635_v22 = vpop.f32.mrf.mxu2 }
  0xa9   :  { %2920 = vmatpush.bf16.msrb.mxu3 %v5673_v18  ;;  %v6603_v63 = vld [vmem:[%s10260_s2 + $0x864] sm:$0xf]  ;;  %v5478_v4 = vld [vmem:[%s10260_s2 + $0x970] sm:$0xf0]  ;;  %v2607_v7 = vpop.f32.mrf.mxu0  ;;  %v5225_v9 = vor.u32 %v6571_v61, %v5222_v62 }
  0xaa   :  { %2879 = vmatpush.bf16.msrb.mxu0 %v5273_v24  ;;  %v6635_v3 = vld [vmem:[%s10260_s2 + $0x964] sm:$0xf]  ;;  %v5606_v6 = vld [vmem:[%s10260_s2 + $0xa70] sm:$0xf0]  ;;  %v2622_v11 = vadd.f32 %v2621_v8, %v2607_v7  ;;  %v5353_v12 = vor.u32 %v6603_v63, %v5350_v2  ;;  %v4524_v8 = vld [vmem:[%s10260_s2 + $0x1e8] sm:$0xf] }
  0xab   :  { %2893 = vmatpush.bf16.msrb.mxu1 %v5401_v26  ;;  %v6667_v5 = vld [vmem:[%s10260_s2 + $0xa64] sm:$0xf]  ;;  %v5481_v13 = vor.u32 %v6635_v3, %v5478_v4  ;;  %v5206_v15 = vld [vmem:[%s10260_s2 + $0x750] sm:$0xf0]  ;;  %v4396_v4 = vld [vmem:[%s10260_s2 + $0xe8] sm:$0xf] }
  0xac   :  { %2907 = vmatpush.bf16.msrb.mxu2 %v5529_v27  ;;  %v6567_v14 = vld [vmem:[%s10260_s2 + $0x744] sm:$0xf]  ;;  %v5609_v18 = vor.u32 %v6667_v5, %v5606_v6  ;;  %v5334_v19 = vld [vmem:[%s10260_s2 + $0x850] sm:$0xf0]  ;;  %v2636_v26 = vadd.f32 %v2635_v22, %v2622_v11  ;;  %v6366_v5 = vld [vmem:[%s10260_s2 + $0xf4] sm:$0xf0] }
  0xad   :  { %2921 = vmatpush.bf16.msrb.mxu3 %v5657_v32  ;;  %v6599_v16 = vld [vmem:[%s10260_s2 + $0x844] sm:$0xf]  ;;  %v5462_v21 = vld [vmem:[%s10260_s2 + $0x950] sm:$0xf0]  ;;  %v5209_v27 = vor.u32 %v6567_v14, %v5206_v15  ;;  %v4397_v14 = vor.u32 %v6366_v5, %v4396_v4  ;;  %v4380_v22 = vld [vmem:[%s10260_s2 + $0xc8] sm:$0xf] }
  0xae   :  { %2880 = vmatpush.bf16.msrb.mxu0 %v5257_v42  ;;  %v6631_v20 = vld [vmem:[%s10260_s2 + $0x944] sm:$0xf]  ;;  %v5590_v24 = vld [vmem:[%s10260_s2 + $0xa50] sm:$0xf0]  ;;  %v5337_v28 = vor.u32 %v6599_v16, %v5334_v19 }
  0xaf   :  { %2894 = vmatpush.bf16.msrb.mxu1 %v5385_v45  ;;  %v6663_v23 = vld [vmem:[%s10260_s2 + $0xa44] sm:$0xf]  ;;  %v5465_v29 = vor.u32 %v6631_v20, %v5462_v21  ;;  %v5190_v32 = vld [vmem:[%s10260_s2 + $0x730] sm:$0xf0] }
  0xb0   :  { %2908 = vmatpush.bf16.msrb.mxu2 %v5513_v46  ;;  %v6563_v30 = vld [vmem:[%s10260_s2 + $0x724] sm:$0xf]  ;;  %v5593_v34 = vor.u32 %v6663_v23, %v5590_v24  ;;  %v5318_v37 = vld [vmem:[%s10260_s2 + $0x830] sm:$0xf0]  ;;  %v6362_v23 = vld [vmem:[%s10260_s2 + $0xd4] sm:$0xf0] }
  0xb1   :  { %2922 = vmatpush.bf16.msrb.mxu3 %v5641_v51  ;;  %v6595_v33 = vld [vmem:[%s10260_s2 + $0x824] sm:$0xf]  ;;  %v5446_v41 = vld [vmem:[%s10260_s2 + $0x930] sm:$0xf0]  ;;  %v5193_v49 = vor.u32 %v6563_v30, %v5190_v32  ;;  %v8190_v15 = vpop.f32.mrf.mxu0  ;;  %v4508_v24 = vld [vmem:[%s10260_s2 + $0x1c8] sm:$0xf]  ;;  %v4381_v30 = vor.u32 %v6362_v23, %v4380_v22 }
  0xb2   :  { %2881 = vmatpush.bf16.msrb.mxu0 %v5241_v57  ;;  %v6627_v38 = vld [vmem:[%s10260_s2 + $0x924] sm:$0xf]  ;;  %v5574_v46 = vld [vmem:[%s10260_s2 + $0xa30] sm:$0xf0]  ;;  %v5321_v52 = vor.u32 %v6595_v33, %v5318_v37 }
  0xb3   :  { %2895 = vmatpush.bf16.msrb.mxu1 %v5369_v59  ;;  %v6659_v45 = vld [vmem:[%s10260_s2 + $0xa24] sm:$0xf]  ;;  %v5174_v51 = vld [vmem:[%s10260_s2 + $0x710] sm:$0xf0]  ;;  %v5449_v53 = vor.u32 %v6627_v38, %v5446_v41  ;;  %v4364_v41 = vld [vmem:[%s10260_s2 + $0xa8] sm:$0xf] }
  0xb4   :  { %2909 = vmatpush.bf16.msrb.mxu2 %v5497_v60  ;;  %v2649_v42 = vpop.f32.mrf.mxu3  ;;  %v6559_v50 = vld [vmem:[%s10260_s2 + $0x704] sm:$0xf]  ;;  %v5302_v55 = vld [vmem:[%s10260_s2 + $0x810] sm:$0xf0]  ;;  %v5577_v57 = vor.u32 %v6659_v45, %v5574_v46  ;;  %v4492_v45 = vld [vmem:[%s10260_s2 + $0x1a8] sm:$0xf] }
  0xb5   :  { %2923 = vmatpush.bf16.msrb.mxu3 %v5625_v0  ;;  %v8140_v48 = vadd.f32 %v2649_v42, %v2636_v26  ;;  %v6591_v54 = vld [vmem:[%s10260_s2 + $0x804] sm:$0xf]  ;;  %v5430_v59 = vld [vmem:[%s10260_s2 + $0x910] sm:$0xf0]  ;;  %v5177_v2 = vor.u32 %v6559_v50, %v5174_v51  ;;  %v6394_v26 = vld [vmem:[%s10260_s2 + $0x1d4] sm:$0xf0]  ;;  %v8246_v50 = vpop.f32.mrf.mxu2 }
  0xb6   :  { %2882 = vmatpush.bf16.msrb.mxu0 %v5225_v9  ;;  %v6623_v56 = vld [vmem:[%s10260_s2 + $0x904] sm:$0xf]  ;;  %v5558_v61 = vld [vmem:[%s10260_s2 + $0xa10] sm:$0xf0]  ;;  %v5305_v6 = vor.u32 %v6591_v54, %v5302_v55  ;;  %v6398_v9 = vld [vmem:[%s10260_s2 + $0x1f4] sm:$0xf0]  ;;  %v4509_v37 = vor.u32 %v6394_v26, %v4508_v24 }
  0xb7   :  { %2896 = vmatpush.bf16.msrb.mxu1 %v5353_v12  ;;  %v6655_v60 = vld [vmem:[%s10260_s2 + $0xa04] sm:$0xf]  ;;  %v5798_v63 = vld [vmem:[%s10260_s2 + $0xbf0] sm:$0xf0]  ;;  %v5433_v7 = vor.u32 %v6623_v56, %v5430_v59  ;;  %v4525_v20 = vor.u32 %v6398_v9, %v4524_v8  ;;  %v6358_v42 = vld [vmem:[%s10260_s2 + $0xb4] sm:$0xf0] }
  0xb8   :  { %2910 = vmatpush.bf16.msrb.mxu2 %v5481_v13  ;;  %v6715_v62 = vld [vmem:[%s10260_s2 + $0xbe4] sm:$0xf]  ;;  %v5926_v3 = vld [vmem:[%s10260_s2 + $0xcf0] sm:$0xf0]  ;;  %v5561_v11 = vor.u32 %v6655_v60, %v5558_v61  ;;  %v6390_v46 = vld [vmem:[%s10260_s2 + $0x1b4] sm:$0xf0] }
  0xb9   :  { %2924 = vmatpush.bf16.msrb.mxu3 %v5609_v18  ;;  %v6747_v0 = vld [vmem:[%s10260_s2 + $0xce4] sm:$0xf]  ;;  %v5801_v12 = vor.u32 %v6715_v62, %v5798_v63  ;;  %v5782_v18 = vld [vmem:[%s10260_s2 + $0xbd0] sm:$0xf0]  ;;  %v4493_v56 = vor.u32 %v6390_v46, %v4492_v45  ;;  %v4348_v60 = vld [vmem:[%s10260_s2 + $0x88] sm:$0xf] }
  0xba   :  { %2883 = vmatpush.bf16.msrb.mxu0 %v5209_v27  ;;  %v5929_v13 = vor.u32 %v6747_v0, %v5926_v3  ;;  %v6711_v16 = vld [vmem:[%s10260_s2 + $0xbc4] sm:$0xf]  ;;  %v5910_v21 = vld [vmem:[%s10260_s2 + $0xcd0] sm:$0xf0]  ;;  %v8216_v27 = vpop.f32.mrf.mxu1  ;;  %v6354_v61 = vld [vmem:[%s10260_s2 + $0x94] sm:$0xf0] }
  0xbb   :  { %2897 = vmatpush.bf16.msrb.mxu1 %v5337_v28  ;;  %v6743_v19 = vld [vmem:[%s10260_s2 + $0xcc4] sm:$0xf]  ;;  %v5785_v28 = vor.u32 %v6711_v16, %v5782_v18  ;;  %v5766_v33 = vld [vmem:[%s10260_s2 + $0xbb0] sm:$0xf0]  ;;  %v4476_v63 = vld [vmem:[%s10260_s2 + $0x188] sm:$0xf]  ;;  %v4349_v5 = vor.u32 %v6354_v61, %v4348_v60 }
  0xbc   :  { %2911 = vmatpush.bf16.msrb.mxu2 %v5465_v29  ;;  %v5913_v29 = vor.u32 %v6743_v19, %v5910_v21  ;;  %v6707_v32 = vld [vmem:[%s10260_s2 + $0xba4] sm:$0xf]  ;;  %v5894_v38 = vld [vmem:[%s10260_s2 + $0xcb0] sm:$0xf0]  ;;  %v6386_v0 = vld [vmem:[%s10260_s2 + $0x194] sm:$0xf0] }
  0xbd   :  { %2925 = vmatpush.bf16.msrb.mxu3 %v5593_v34  ;;  %v6739_v34 = vld [vmem:[%s10260_s2 + $0xca4] sm:$0xf]  ;;  %v5750_v54 = vld [vmem:[%s10260_s2 + $0xb90] sm:$0xf0]  ;;  %v4460_v16 = vld [vmem:[%s10260_s2 + $0x168] sm:$0xf] }
  0xbe   :  { %2884 = vmatpush.bf16.msrb.mxu0 %v5193_v49  ;;  %v5769_v49 = vor.u32 %v6707_v32, %v5766_v33  ;;  %v5897_v51 = vor.u32 %v6739_v34, %v5894_v38  ;;  %v6735_v55 = vld [vmem:[%s10260_s2 + $0xc84] sm:$0xf]  ;;  %v5878_v59 = vld [vmem:[%s10260_s2 + $0xc90] sm:$0xf0]  ;;  %v6382_v18 = vld [vmem:[%s10260_s2 + $0x174] sm:$0xf0] }
  0xbf   :  { %2898 = vmatpush.bf16.msrb.mxu1 %v5321_v52  ;;  %v4365_v52 = vor.u32 %v6358_v42, %v4364_v41  ;;  %v5881_v4 = vor.u32 %v6735_v55, %v5878_v59  ;;  %v5734_v8 = vld [vmem:[%s10260_s2 + $0xb70] sm:$0xf0]  ;;  %v6731_v9 = vld [vmem:[%s10260_s2 + $0xc64] sm:$0xf]  ;;  %v4461_v26 = vor.u32 %v6382_v18, %v4460_v16  ;;  %v6346_v32 = vld [vmem:[%s10260_s2 + $0x54] sm:$0xf0] }
  0xc0   :  { %2912 = vmatpush.bf16.msrb.mxu2 %v5449_v53  ;;  %v6703_v53 = vld [vmem:[%s10260_s2 + $0xb84] sm:$0xf]  ;;  %v5718_v23 = vld [vmem:[%s10260_s2 + $0xb50] sm:$0xf0]  ;;  %v4444_v34 = vld [vmem:[%s10260_s2 + $0x148] sm:$0xf] }
  0xc1   :  { %2926 = vmatpush.bf16.msrb.mxu3 %v5577_v57  ;;  %v8257_v57 = vpop.f32.mrf.mxu3  ;;  %v5753_v3 = vor.u32 %v6703_v53, %v5750_v54  ;;  %v6695_v22 = vld [vmem:[%s10260_s2 + $0xb44] sm:$0xf]  ;;  %v5830_v54 = vld [vmem:[%s10260_s2 + $0xc30] sm:$0xf0]  ;;  %v4300_v55 = vld [vmem:[%s10260_s2 + $0x28] sm:$0xf] }
  0xc2   :  { %2885 = vmatpush.bf16.msrb.mxu0 %v5177_v2  ;;  %v6727_v24 = vld [vmem:[%s10260_s2 + $0xc44] sm:$0xf]  ;;  %v5721_v41 = vor.u32 %v6695_v22, %v5718_v23  ;;  %v4428_v59 = vld [vmem:[%s10260_s2 + $0x128] sm:$0xf]  ;;  %v6374_v60 = vld [vmem:[%s10260_s2 + $0x134] sm:$0xf0] }
  0xc3   :  { %2899 = vmatpush.bf16.msrb.mxu1 %v5305_v6  ;;  %v2677_v6 = vpop.f32.mrf.mxu1  ;;  %v4908_v16 = vld [vmem:[%s10260_s2 + $0x4e8] sm:$0xf]  ;;  %v6494_v18 = vld [vmem:[%s10260_s2 + $0x4f4] sm:$0xf0] }
  0xc4   :  { %2913 = vmatpush.bf16.msrb.mxu2 %v5433_v7  ;;  %v6699_v7 = vld [vmem:[%s10260_s2 + $0xb64] sm:$0xf]  ;;  %v6526_v22 = vld [vmem:[%s10260_s2 + $0x5f4] sm:$0xf0] }
  0xc5   :  { %2927 = vmatpush.bf16.msrb.mxu3 %v5561_v11  ;;  %2886 = vmatmul.bf16.vlgmr.msrb.gmra.mxu0 %v7386_v47  ;;  %v2663_v62 = vpop.f32.mrf.mxu0  ;;  %v5737_v19 = vor.u32 %v6699_v7, %v5734_v8  ;;  %v6338_v7 = vld [vmem:[%s10260_s2 + $0x14] sm:$0xf0]  ;;  %v4412_v8 = vld [vmem:[%s10260_s2 + $0x108] sm:$0xf] }
  0xc6   :  { %2934 = vmatpush.bf16.msra.mxu0 %v5801_v12  ;;  %2900 = vmatmul.bf16.vlgmr.msrb.gmra.mxu1 %v7593_v31  ;;  %v2664_v2 = vadd.f32 %v2663_v62, %v8140_v48  ;;  %v4477_v48 = vor.u32 %v6386_v0, %v4476_v63  ;;  %v5862_v12 = vld [vmem:[%s10260_s2 + $0xc70] sm:$0xf0]  ;;  %v6687_v62 = vld [vmem:[%s10260_s2 + $0xb04] sm:$0xf] }
  0xc7   :  { %2948 = vmatpush.bf16.msra.mxu1 %v5929_v13  ;;  %2914 = vmatmul.bf16.vlgmr.msrb.gmra.mxu2 %v7606_v36  ;;  %v4332_v13 = vld [vmem:[%s10260_s2 + $0x68] sm:$0xf]  ;;  %v5686_v63 = vld [vmem:[%s10260_s2 + $0xb10] sm:$0xf0] }
  0xc8   :  { %2962 = vmatpush.bf16.msra.mxu2 %v4397_v14  ;;  %2928 = vmatmul.bf16.vlgmr.msrb.gmra.mxu3 %v7604_v35  ;;  %v2678_v11 = vadd.f32 %v2677_v6, %v2664_v2  ;;  %v6350_v14 = vld [vmem:[%s10260_s2 + $0x74] sm:$0xf0]  ;;  %v4429_v6 = vor.u32 %v6374_v60, %v4428_v59 }
  0xc9   :  { %2976 = vmatpush.bf16.msra.mxu3 %v4525_v20  ;;  %v5865_v20 = vor.u32 %v6731_v9, %v5862_v12  ;;  %v4333_v21 = vor.u32 %v6350_v14, %v4332_v13  ;;  %v6370_v9 = vld [vmem:[%s10260_s2 + $0x114] sm:$0xf0]  ;;  %v4780_v12 = vld [vmem:[%s10260_s2 + $0x3e8] sm:$0xf]  ;;  %v5689_v13 = vor.u32 %v6687_v62, %v5686_v63 }
  0xca   :  { %2935 = vmatpush.bf16.msra.mxu0 %v5785_v28  ;;  %v2691_v28 = vpop.f32.mrf.mxu2  ;;  %v6462_v14 = vld [vmem:[%s10260_s2 + $0x3f4] sm:$0xf0]  ;;  %v4413_v23 = vor.u32 %v6370_v9, %v4412_v8  ;;  %v5004_v63 = vld [vmem:[%s10260_s2 + $0x5a8] sm:$0xf] }
  0xcb   :  { %2949 = vmatpush.bf16.msra.mxu1 %v5913_v29  ;;  %v5846_v29 = vld [vmem:[%s10260_s2 + $0xc50] sm:$0xf0]  ;;  %v2692_v33 = vadd.f32 %v2691_v28, %v2678_v11  ;;  %v6430_v11 = vld [vmem:[%s10260_s2 + $0x2f4] sm:$0xf0]  ;;  %v4909_v28 = vor.u32 %v6494_v18, %v4908_v16  ;;  %v4988_v16 = vld [vmem:[%s10260_s2 + $0x588] sm:$0xf] }
  0xcc   :  { %2963 = vmatpush.bf16.msra.mxu2 %v4381_v30  ;;  %v4316_v30 = vld [vmem:[%s10260_s2 + $0x48] sm:$0xf]  ;;  %v5849_v45 = vor.u32 %v6727_v24, %v5846_v29  ;;  %v6454_v60 = vld [vmem:[%s10260_s2 + $0x3b4] sm:$0xf0] }
  0xcd   :  { %2977 = vmatpush.bf16.msra.mxu3 %v4509_v37  ;;  %v6378_v37 = vld [vmem:[%s10260_s2 + $0x154] sm:$0xf0]  ;;  %v2705_v38 = vpop.f32.mrf.mxu3  ;;  %v4317_v46 = vor.u32 %v6346_v32, %v4316_v30  ;;  %v4636_v29 = vld [vmem:[%s10260_s2 + $0x2c8] sm:$0xf] }
  0xce   :  { %2936 = vmatpush.bf16.msra.mxu0 %v5769_v49  ;;  %v8323_v42 = vadd.f32 %v2705_v38, %v2692_v33  ;;  %v6691_v49 = vld [vmem:[%s10260_s2 + $0xb24] sm:$0xf]  ;;  %v4445_v53 = vor.u32 %v6378_v37, %v4444_v34  ;;  %v6426_v30 = vld [vmem:[%s10260_s2 + $0x2d4] sm:$0xf0]  ;;  %v4764_v32 = vld [vmem:[%s10260_s2 + $0x3c8] sm:$0xf] }
  0xcf   :  { %2950 = vmatpush.bf16.msra.mxu1 %v5897_v51  ;;  %v5702_v51 = vld [vmem:[%s10260_s2 + $0xb30] sm:$0xf0]  ;;  %v6458_v34 = vld [vmem:[%s10260_s2 + $0x3d4] sm:$0xf0]  ;;  %v4892_v37 = vld [vmem:[%s10260_s2 + $0x4c8] sm:$0xf] }
  0xd0   :  { %2964 = vmatpush.bf16.msra.mxu2 %v4365_v52  ;;  %v6723_v52 = vld [vmem:[%s10260_s2 + $0xc24] sm:$0xf]  ;;  %v5705_v61 = vor.u32 %v6691_v49, %v5702_v51  ;;  %v6490_v38 = vld [vmem:[%s10260_s2 + $0x4d4] sm:$0xf0]  ;;  %v8423_v49 = vpop.f32.mrf.mxu1  ;;  %v4637_v51 = vor.u32 %v6426_v30, %v4636_v29 }
  0xd1   :  { %2978 = vmatpush.bf16.msra.mxu3 %v4493_v56  ;;  %v6342_v56 = vld [vmem:[%s10260_s2 + $0x34] sm:$0xf0]  ;;  %v5833_v0 = vor.u32 %v6723_v52, %v5830_v54  ;;  %v4765_v52 = vor.u32 %v6458_v34, %v4764_v32  ;;  %v4620_v54 = vld [vmem:[%s10260_s2 + $0x2a8] sm:$0xf] }
  0xd2   :  { %2937 = vmatpush.bf16.msra.mxu0 %v5753_v3  ;;  %v4301_v2 = vor.u32 %v6342_v56, %v4300_v55  ;;  %v6719_v3 = vld [vmem:[%s10260_s2 + $0xc04] sm:$0xf]  ;;  %v6422_v55 = vld [vmem:[%s10260_s2 + $0x2b4] sm:$0xf0]  ;;  %v4748_v56 = vld [vmem:[%s10260_s2 + $0x3a8] sm:$0xf]  ;;  %v8462_v8 = vpop.f32.mrf.mxu2 }
  0xd3   :  { %2951 = vmatpush.bf16.msra.mxu1 %v5881_v4  ;;  %v5814_v4 = vld [vmem:[%s10260_s2 + $0xc10] sm:$0xf0]  ;;  %v6486_v62 = vld [vmem:[%s10260_s2 + $0x4b4] sm:$0xf0]  ;;  %v4844_v32 = vld [vmem:[%s10260_s2 + $0x468] sm:$0xf] }
  0xd4   :  { %2965 = vmatpush.bf16.msra.mxu2 %v4349_v5  ;;  %v4284_v5 = vld [vmem:[%s10260_s2 + $0x8] sm:$0xf]  ;;  %v6514_v18 = vld [vmem:[%s10260_s2 + $0x594] sm:$0xf0] }
  0xd5   :  { %2979 = vmatpush.bf16.msra.mxu3 %v4477_v48  ;;  %v4652_v48 = vld [vmem:[%s10260_s2 + $0x2e8] sm:$0xf]  ;;  %v6446_v30 = vld [vmem:[%s10260_s2 + $0x374] sm:$0xf0] }
  0xd6   :  { %2938 = vmatpush.bf16.msra.mxu0 %v5737_v19  ;;  %v5817_v19 = vor.u32 %v6719_v3, %v5814_v4  ;;  %v4653_v24 = vor.u32 %v6430_v11, %v4652_v48  ;;  %v4749_v3 = vor.u32 %v6454_v60, %v4748_v56  ;;  %v6450_v48 = vld [vmem:[%s10260_s2 + $0x394] sm:$0xf0]  ;;  %v4860_v11 = vld [vmem:[%s10260_s2 + $0x488] sm:$0xf] }
  0xd7   :  { %2952 = vmatpush.bf16.msra.mxu1 %v5865_v20  ;;  %v4285_v20 = vor.u32 %v6338_v7, %v4284_v5  ;;  %v4604_v5 = vld [vmem:[%s10260_s2 + $0x288] sm:$0xf]  ;;  %v6442_v56 = vld [vmem:[%s10260_s2 + $0x354] sm:$0xf0] }
  0xd8   :  { %2966 = vmatpush.bf16.msra.mxu2 %v4333_v21  ;;  %v5036_v21 = vld [vmem:[%s10260_s2 + $0x5e8] sm:$0xf]  ;;  %v6474_v60 = vld [vmem:[%s10260_s2 + $0x454] sm:$0xf0] }
  0xd9   :  { %2980 = vmatpush.bf16.msra.mxu3 %v4461_v26  ;;  %v4781_v26 = vor.u32 %v6462_v14, %v4780_v12  ;;  %v5037_v33 = vor.u32 %v6526_v22, %v5036_v21  ;;  %v4732_v7 = vld [vmem:[%s10260_s2 + $0x388] sm:$0xf]  ;;  %v6482_v12 = vld [vmem:[%s10260_s2 + $0x494] sm:$0xf0] }
  0xda   :  { %2939 = vmatpush.bf16.msra.mxu0 %v5721_v41  ;;  %v8415_v41 = vpop.f32.mrf.mxu0  ;;  %v4733_v22 = vor.u32 %v6450_v48, %v4732_v7  ;;  %v4972_v34 = vld [vmem:[%s10260_s2 + $0x568] sm:$0xf]  ;;  %v6406_v7 = vld [vmem:[%s10260_s2 + $0x234] sm:$0xf0] }
  0xdb   :  { %2953 = vmatpush.bf16.msra.mxu1 %v5849_v45  ;;  %v5020_v45 = vld [vmem:[%s10260_s2 + $0x5c8] sm:$0xf] }
  0xdc   :  { %2967 = vmatpush.bf16.msra.mxu2 %v4317_v46  ;;  %v6522_v46 = vld [vmem:[%s10260_s2 + $0x5d4] sm:$0xf0] }
  0xdd   :  { %2981 = vmatpush.bf16.msra.mxu3 %v4445_v53  ;;  %v4893_v53 = vor.u32 %v6490_v38, %v4892_v37  ;;  %v5021_v59 = vor.u32 %v6522_v46, %v5020_v45  ;;  %v6510_v37 = vld [vmem:[%s10260_s2 + $0x574] sm:$0xf0] }
  0xde   :  { %2940 = vmatpush.bf16.msra.mxu0 %v5705_v61  ;;  %v4876_v61 = vld [vmem:[%s10260_s2 + $0x4a8] sm:$0xf] }
  0xdf   :  { %2954 = vmatpush.bf16.msra.mxu1 %v5833_v0  ;;  %v6518_v0 = vld [vmem:[%s10260_s2 + $0x5b4] sm:$0xf0]  ;;  %v4877_v4 = vor.u32 %v6486_v62, %v4876_v61 }
  0xe0   :  { %2968 = vmatpush.bf16.msra.mxu2 %v4301_v2  ;;  %v4621_v2 = vor.u32 %v6422_v55, %v4620_v54  ;;  %v5005_v9 = vor.u32 %v6518_v0, %v5004_v63  ;;  %v4973_v54 = vor.u32 %v6510_v37, %v4972_v34  ;;  %v4956_v63 = vld [vmem:[%s10260_s2 + $0x548] sm:$0xf]  ;;  %v6506_v0 = vld [vmem:[%s10260_s2 + $0x554] sm:$0xf0] }
  0xe1   :  { %2982 = vmatpush.bf16.msra.mxu3 %v4429_v6  ;;  %v6418_v6 = vld [vmem:[%s10260_s2 + $0x294] sm:$0xf0]  ;;  %v4957_v48 = vor.u32 %v6506_v0, %v4956_v63  ;;  %v5292_v37 = vld [vmem:[%s10260_s2 + $0x7e8] sm:$0xf] }
  0xe2   :  { %2941 = vmatpush.bf16.msra.mxu0 %v5689_v13  ;;  %v8473_v13 = vpop.f32.mrf.mxu3  ;;  %v6558_v34 = vld [vmem:[%s10260_s2 + $0x6f4] sm:$0xf0]  ;;  %v5276_v0 = vld [vmem:[%s10260_s2 + $0x7c8] sm:$0xf] }
  0xe3   :  { %2955 = vmatpush.bf16.msra.mxu1 %v5817_v19  ;;  %v2733_v21 = vpop.f32.mrf.mxu1  ;;  %v6554_v63 = vld [vmem:[%s10260_s2 + $0x6d4] sm:$0xf0] }
  0xe4   :  { %2969 = vmatpush.bf16.msra.mxu2 %v4285_v20  ;;  %v2719_v14 = vpop.f32.mrf.mxu0  ;;  %v4605_v20 = vor.u32 %v6418_v6, %v4604_v5  ;;  %v4556_v6 = vld [vmem:[%s10260_s2 + $0x228] sm:$0xf] }
  0xe5   :  { %2983 = vmatpush.bf16.msra.mxu3 %v4413_v23  ;;  %2942 = vmatmul.bf16.vlgmr.msra.gmra.mxu0 %v7614_v40  ;;  %v2720_v19 = vadd.f32 %v2719_v14, %v8323_v42  ;;  %v4861_v23 = vor.u32 %v6482_v12, %v4860_v11  ;;  %v4989_v42 = vor.u32 %v6514_v18, %v4988_v16  ;;  %v6438_v11 = vld [vmem:[%s10260_s2 + $0x334] sm:$0xf0]  ;;  %v4812_v12 = vld [vmem:[%s10260_s2 + $0x428] sm:$0xf] }
  0xe6   :  { %2990 = vmatpush.bf16.msrb.mxu0 %v4653_v24  ;;  %2956 = vmatmul.bf16.vlgmr.msra.gmra.mxu1 %v7803_v25  ;;  %v4588_v24 = vld [vmem:[%s10260_s2 + $0x268] sm:$0xf]  ;;  %v6470_v14 = vld [vmem:[%s10260_s2 + $0x434] sm:$0xf0] }
  0xe7   :  { %3004 = vmatpush.bf16.msrb.mxu1 %v4781_v26  ;;  %2970 = vmatmul.bf16.vlgmr.msra.gmra.mxu2 %v7143_v58  ;;  %v6414_v26 = vld [vmem:[%s10260_s2 + $0x274] sm:$0xf0]  ;;  %v2734_v29 = vadd.f32 %v2733_v21, %v2720_v19  ;;  %v4940_v16 = vld [vmem:[%s10260_s2 + $0x528] sm:$0xf]  ;;  %v4557_v19 = vor.u32 %v6406_v7, %v4556_v6 }
  0xe8   :  { %3018 = vmatpush.bf16.msrb.mxu2 %v4909_v28  ;;  %2984 = vmatmul.bf16.vlgmr.msra.gmra.mxu3 %v7179_v10  ;;  %v4716_v28 = vld [vmem:[%s10260_s2 + $0x368] sm:$0xf]  ;;  %v4589_v38 = vor.u32 %v6414_v26, %v4588_v24  ;;  %v6502_v18 = vld [vmem:[%s10260_s2 + $0x534] sm:$0xf0] }
  0xe9   :  { %3032 = vmatpush.bf16.msrb.mxu3 %v5037_v33  ;;  %v6478_v33 = vld [vmem:[%s10260_s2 + $0x474] sm:$0xf0]  ;;  %v4717_v45 = vor.u32 %v6446_v30, %v4716_v28  ;;  %v4668_v24 = vld [vmem:[%s10260_s2 + $0x308] sm:$0xf] }
  0xea   :  { %2991 = vmatpush.bf16.msrb.mxu0 %v4637_v51  ;;  %v4845_v46 = vor.u32 %v6478_v33, %v4844_v32  ;;  %v4572_v51 = vld [vmem:[%s10260_s2 + $0x248] sm:$0xf]  ;;  %v6402_v21 = vld [vmem:[%s10260_s2 + $0x214] sm:$0xf0] }
  0xeb   :  { %3005 = vmatpush.bf16.msrb.mxu1 %v4765_v52  ;;  %v6410_v52 = vld [vmem:[%s10260_s2 + $0x254] sm:$0xf0]  ;;  %v2761_v62 = vpop.f32.mrf.mxu3  ;;  %v4796_v28 = vld [vmem:[%s10260_s2 + $0x408] sm:$0xf] }
  0xec   :  { %3019 = vmatpush.bf16.msrb.mxu2 %v4893_v53  ;;  %v4700_v53 = vld [vmem:[%s10260_s2 + $0x348] sm:$0xf]  ;;  %v2747_v55 = vpop.f32.mrf.mxu2  ;;  %v6434_v26 = vld [vmem:[%s10260_s2 + $0x314] sm:$0xf0]  ;;  %v8622_v7 = vpop.f32.mrf.mxu0 }
  0xed   :  { %3033 = vmatpush.bf16.msrb.mxu3 %v5021_v59  ;;  %v4828_v59 = vld [vmem:[%s10260_s2 + $0x448] sm:$0xf]  ;;  %v2748_v61 = vadd.f32 %v2747_v55, %v2734_v29  ;;  %v6466_v29 = vld [vmem:[%s10260_s2 + $0x414] sm:$0xf0] }
  0xee   :  { %2992 = vmatpush.bf16.msrb.mxu0 %v4621_v2  ;;  %v4573_v2 = vor.u32 %v6410_v52, %v4572_v51  ;;  %v4829_v5 = vor.u32 %v6474_v60, %v4828_v59  ;;  %v4924_v30 = vld [vmem:[%s10260_s2 + $0x508] sm:$0xf]  ;;  %v6498_v32 = vld [vmem:[%s10260_s2 + $0x514] sm:$0xf0]  ;;  %v4669_v52 = vor.u32 %v6434_v26, %v4668_v24 }
  0xef   :  { %3006 = vmatpush.bf16.msrb.mxu1 %v4749_v3  ;;  %v8530_v3 = vadd.f32 %v2761_v62, %v2748_v61  ;;  %v5164_v33 = vld [vmem:[%s10260_s2 + $0x6e8] sm:$0xf]  ;;  %v6622_v51 = vld [vmem:[%s10260_s2 + $0x8f4] sm:$0xf0] }
  0xf0   :  { %3020 = vmatpush.bf16.msrb.mxu2 %v4877_v4  ;;  %v4701_v4 = vor.u32 %v6442_v56, %v4700_v53  ;;  %v4797_v53 = vor.u32 %v6466_v29, %v4796_v28  ;;  %v6654_v55 = vld [vmem:[%s10260_s2 + $0x9f4] sm:$0xf0]  ;;  %v4925_v56 = vor.u32 %v6498_v32, %v4924_v30  ;;  %v5165_v59 = vor.u32 %v6558_v34, %v5164_v33  ;;  %v5148_v62 = vld [vmem:[%s10260_s2 + $0x6c8] sm:$0xf]  ;;  %v8667_v34 = vpop.f32.mrf.mxu1 }
  0xf1   :  { %3034 = vmatpush.bf16.msrb.mxu3 %v5005_v9  ;;  %v4684_v9 = vld [vmem:[%s10260_s2 + $0x328] sm:$0xf]  ;;  %v6618_v6 = vld [vmem:[%s10260_s2 + $0x8d4] sm:$0xf0] }
  0xf2   :  { %2993 = vmatpush.bf16.msrb.mxu0 %v4605_v20  ;;  %v4540_v20 = vld [vmem:[%s10260_s2 + $0x208] sm:$0xf]  ;;  %v6646_v26 = vld [vmem:[%s10260_s2 + $0x9b4] sm:$0xf0] }
  0xf3   :  { %3007 = vmatpush.bf16.msrb.mxu1 %v4733_v22  ;;  %v4685_v22 = vor.u32 %v6438_v11, %v4684_v9  ;;  %v5532_v9 = vld [vmem:[%s10260_s2 + $0x9c8] sm:$0xf]  ;;  %v5149_v11 = vor.u32 %v6554_v63, %v5148_v62  ;;  %v6546_v32 = vld [vmem:[%s10260_s2 + $0x694] sm:$0xf0] }
  0xf4   :  { %3021 = vmatpush.bf16.msrb.mxu2 %v4861_v23  ;;  %v4813_v23 = vor.u32 %v6470_v14, %v4812_v12  ;;  %v5516_v24 = vld [vmem:[%s10260_s2 + $0x9a8] sm:$0xf]  ;;  %v6542_v63 = vld [vmem:[%s10260_s2 + $0x674] sm:$0xf0] }
  0xf5   :  { %3035 = vmatpush.bf16.msrb.mxu3 %v4989_v42  ;;  %v4941_v42 = vor.u32 %v6502_v18, %v4940_v16  ;;  %v5132_v16 = vld [vmem:[%s10260_s2 + $0x6a8] sm:$0xf]  ;;  %v6550_v18 = vld [vmem:[%s10260_s2 + $0x6b4] sm:$0xf0] }
  0xf6   :  { %2994 = vmatpush.bf16.msrb.mxu0 %v4589_v38  ;;  %v4541_v38 = vor.u32 %v6402_v21, %v4540_v20  ;;  %v6582_v21 = vld [vmem:[%s10260_s2 + $0x7b4] sm:$0xf0]  ;;  %v5133_v28 = vor.u32 %v6550_v18, %v5132_v16  ;;  %v5116_v30 = vld [vmem:[%s10260_s2 + $0x688] sm:$0xf] }
  0xf7   :  { %3008 = vmatpush.bf16.msrb.mxu1 %v4717_v45  ;;  %v6590_v45 = vld [vmem:[%s10260_s2 + $0x7f4] sm:$0xf0]  ;;  %v5244_v33 = vld [vmem:[%s10260_s2 + $0x788] sm:$0xf] }
  0xf8   :  { %3022 = vmatpush.bf16.msrb.mxu2 %v4845_v46  ;;  %v5420_v46 = vld [vmem:[%s10260_s2 + $0x8e8] sm:$0xf]  ;;  %v5293_v60 = vor.u32 %v6590_v45, %v5292_v37  ;;  %v8669_v37 = vpop.f32.mrf.mxu2  ;;  %v6578_v45 = vld [vmem:[%s10260_s2 + $0x794] sm:$0xf0] }
  0xf9   :  { %3036 = vmatpush.bf16.msrb.mxu3 %v4973_v54  ;;  %v5548_v54 = vld [vmem:[%s10260_s2 + $0x9e8] sm:$0xf]  ;;  %v5421_v61 = vor.u32 %v6622_v51, %v5420_v46  ;;  %v6610_v51 = vld [vmem:[%s10260_s2 + $0x894] sm:$0xf0] }
  0xfa   :  { %2995 = vmatpush.bf16.msrb.mxu0 %v4573_v2  ;;  %v5549_v2 = vor.u32 %v6654_v55, %v5548_v54  ;;  %v5372_v46 = vld [vmem:[%s10260_s2 + $0x888] sm:$0xf]  ;;  %v6642_v54 = vld [vmem:[%s10260_s2 + $0x994] sm:$0xf0]  ;;  %v8686_v55 = vpop.f32.mrf.mxu3 }
  0xfb   :  { %3009 = vmatpush.bf16.msrb.mxu1 %v4701_v4  ;;  %v6586_v4 = vld [vmem:[%s10260_s2 + $0x7d4] sm:$0xf0]  ;;  %v5100_v62 = vld [vmem:[%s10260_s2 + $0x668] sm:$0xf] }
  0xfc   :  { %3023 = vmatpush.bf16.msrb.mxu2 %v4829_v5  ;;  %v5404_v5 = vld [vmem:[%s10260_s2 + $0x8c8] sm:$0xf]  ;;  %v5277_v12 = vor.u32 %v6586_v4, %v5276_v0  ;;  %v6538_v16 = vld [vmem:[%s10260_s2 + $0x654] sm:$0xf0] }
  0xfd   :  { %3037 = vmatpush.bf16.msrb.mxu3 %v4957_v48  ;;  %v6650_v48 = vld [vmem:[%s10260_s2 + $0x9d4] sm:$0xf0]  ;;  %v5405_v14 = vor.u32 %v6618_v6, %v5404_v5  ;;  %v5228_v0 = vld [vmem:[%s10260_s2 + $0x768] sm:$0xf] }
  0xfe   :  { %2996 = vmatpush.bf16.msrb.mxu0 %v4557_v19  ;;  %v5260_v19 = vld [vmem:[%s10260_s2 + $0x7a8] sm:$0xf]  ;;  %v5533_v20 = vor.u32 %v6650_v48, %v5532_v9  ;;  %v6606_v5 = vld [vmem:[%s10260_s2 + $0x874] sm:$0xf0]  ;;  %v5101_v48 = vor.u32 %v6542_v63, %v5100_v62 }
  0xff   :  { %3010 = vmatpush.bf16.msrb.mxu1 %v4685_v22  ;;  %v5388_v22 = vld [vmem:[%s10260_s2 + $0x8a8] sm:$0xf]  ;;  %v6638_v9 = vld [vmem:[%s10260_s2 + $0x974] sm:$0xf0] }
 0x100   :  { %3024 = vmatpush.bf16.msrb.mxu2 %v4813_v23  ;;  %v6614_v23 = vld [vmem:[%s10260_s2 + $0x8b4] sm:$0xf0]  ;;  %v5356_v4 = vld [vmem:[%s10260_s2 + $0x868] sm:$0xf] }
 0x101   :  { %3038 = vmatpush.bf16.msrb.mxu3 %v4941_v42  ;;  %v5261_v42 = vor.u32 %v6582_v21, %v5260_v19  ;;  %v5389_v29 = vor.u32 %v6614_v23, %v5388_v22  ;;  %v5484_v6 = vld [vmem:[%s10260_s2 + $0x968] sm:$0xf]  ;;  %v6602_v22 = vld [vmem:[%s10260_s2 + $0x854] sm:$0xf0] }
 0x102   :  { %2997 = vmatpush.bf16.msrb.mxu0 %v4541_v38  ;;  %v5517_v38 = vor.u32 %v6646_v26, %v5516_v24  ;;  %v5212_v18 = vld [vmem:[%s10260_s2 + $0x748] sm:$0xf]  ;;  %v5485_v19 = vor.u32 %v6638_v9, %v5484_v6 }
 0x103   :  { %3011 = vmatpush.bf16.msrb.mxu1 %v4669_v52  ;;  %v2775_v52 = vpop.f32.mrf.mxu0  ;;  %v5340_v21 = vld [vmem:[%s10260_s2 + $0x848] sm:$0xf]  ;;  %v2789_v23 = vpop.f32.mrf.mxu1 }
 0x104   :  { %3025 = vmatpush.bf16.msrb.mxu2 %v4797_v53  ;;  %v5500_v53 = vld [vmem:[%s10260_s2 + $0x988] sm:$0xf] }
 0x105   :  { %3039 = vmatpush.bf16.msrb.mxu3 %v4925_v56  ;;  %2998 = vmatmul.bf16.vlgmr.msrb.gmra.mxu0 %v7157_v1  ;;  %v8689_v56 = vadd.f32 %v2775_v52, %v8530_v3  ;;  %v5501_v3 = vor.u32 %v6642_v54, %v5500_v53  ;;  %v5468_v26 = vld [vmem:[%s10260_s2 + $0x948] sm:$0xf]  ;;  %v6566_v53 = vld [vmem:[%s10260_s2 + $0x734] sm:$0xf0] }
 0x106   :  { %3046 = vmatpush.bf16.msra.mxu0 %v5165_v59  ;;  %3012 = vmatmul.bf16.vlgmr.msrb.gmra.mxu1 %v7193_v17  ;;  %v5117_v59 = vor.u32 %v6546_v32, %v5116_v30  ;;  %v5324_v54 = vld [vmem:[%s10260_s2 + $0x828] sm:$0xf] }
 0x107   :  { %3060 = vmatpush.bf16.msra.mxu1 %v5293_v60  ;;  %3026 = vmatmul.bf16.vlgmr.msrb.gmra.mxu2 %v7365_v39  ;;  %v5245_v60 = vor.u32 %v6578_v45, %v5244_v33  ;;  %v5341_v33 = vor.u32 %v6602_v22, %v5340_v21  ;;  %v6534_v45 = vld [vmem:[%s10260_s2 + $0x634] sm:$0xf0]  ;;  %v5052_v63 = vld [vmem:[%s10260_s2 + $0x608] sm:$0xf] }
 0x108   :  { %3074 = vmatpush.bf16.msra.mxu2 %v5421_v61  ;;  %3040 = vmatmul.bf16.vlgmr.msrb.gmra.mxu3 %v7378_v44  ;;  %v5373_v61 = vor.u32 %v6610_v51, %v5372_v46  ;;  %v5196_v46 = vld [vmem:[%s10260_s2 + $0x728] sm:$0xf]  ;;  %v6750_v22 = vld [vmem:[%s10260_s2 + $0xcf4] sm:$0xf0] }
 0x109   :  { %3088 = vmatpush.bf16.msra.mxu3 %v5549_v2  ;;  %v6574_v2 = vld [vmem:[%s10260_s2 + $0x774] sm:$0xf0]  ;;  %v5308_v6 = vld [vmem:[%s10260_s2 + $0x808] sm:$0xf] }
 0x10a   :  { %3047 = vmatpush.bf16.msra.mxu0 %v5149_v11  ;;  %v5229_v11 = vor.u32 %v6574_v2, %v5228_v0  ;;  %v2803_v24 = vpop.f32.mrf.mxu2  ;;  %v6530_v0 = vld [vmem:[%s10260_s2 + $0x614] sm:$0xf0]  ;;  %v5932_v21 = vld [vmem:[%s10260_s2 + $0xce8] sm:$0xf] }
 0x10b   :  { %3061 = vmatpush.bf16.msra.mxu1 %v5277_v12  ;;  %v5357_v12 = vor.u32 %v6606_v5, %v5356_v4  ;;  %v2817_v30 = vpop.f32.mrf.mxu3  ;;  %v5180_v4 = vld [vmem:[%s10260_s2 + $0x708] sm:$0xf]  ;;  %v6562_v5 = vld [vmem:[%s10260_s2 + $0x714] sm:$0xf0] }
 0x10c   :  { %3075 = vmatpush.bf16.msra.mxu2 %v5405_v14  ;;  %v5084_v14 = vld [vmem:[%s10260_s2 + $0x648] sm:$0xf] }
 0x10d   :  { %3089 = vmatpush.bf16.msra.mxu3 %v5533_v20  ;;  %v6570_v20 = vld [vmem:[%s10260_s2 + $0x754] sm:$0xf0] }
 0x10e   :  { %3048 = vmatpush.bf16.msra.mxu0 %v5133_v28  ;;  %v6634_v28 = vld [vmem:[%s10260_s2 + $0x954] sm:$0xf0]  ;;  %v5213_v32 = vor.u32 %v6570_v20, %v5212_v18  ;;  %v5804_v18 = vld [vmem:[%s10260_s2 + $0xbe8] sm:$0xf] }
 0x10f   :  { %3062 = vmatpush.bf16.msra.mxu1 %v5261_v42  ;;  %v2804_v42 = vadd.f32 %v2803_v24, %v2789_v23  ;;  %v5469_v52 = vor.u32 %v6634_v28, %v5468_v26  ;;  %v6718_v20 = vld [vmem:[%s10260_s2 + $0xbf4] sm:$0xf0]  ;;  %v5181_v23 = vor.u32 %v6562_v5, %v5180_v4  ;;  %v6364_v26 = vld [vmem:[%s10260_s2 + $0xec] sm:$0xf]  ;;  %v4398_v28 = vld [vmem:[%s10260_s2 + $0xf8] sm:$0xf0] }
 0x110   :  { %3076 = vmatpush.bf16.msra.mxu2 %v5389_v29  ;;  %v5085_v29 = vor.u32 %v6538_v16, %v5084_v14  ;;  %v5676_v14 = vld [vmem:[%s10260_s2 + $0xae8] sm:$0xf]  ;;  %v6686_v16 = vld [vmem:[%s10260_s2 + $0xaf4] sm:$0xf0] }
 0x111   :  { %3090 = vmatpush.bf16.msra.mxu3 %v5517_v38  ;;  %v5068_v38 = vld [vmem:[%s10260_s2 + $0x628] sm:$0xf]  ;;  %v8748_v51 = vadd.f32 %v2817_v30, %v2804_v42  ;;  %v5805_v30 = vor.u32 %v6718_v20, %v5804_v18  ;;  %v6678_v4 = vld [vmem:[%s10260_s2 + $0xab4] sm:$0xf0] }
 0x112   :  { %3049 = vmatpush.bf16.msra.mxu0 %v5117_v59  ;;  %v6598_v59 = vld [vmem:[%s10260_s2 + $0x834] sm:$0xf0]  ;;  %v5069_v62 = vor.u32 %v6534_v45, %v5068_v38  ;;  %v5788_v45 = vld [vmem:[%s10260_s2 + $0xbc8] sm:$0xf]  ;;  %v2805_v18 = vpop.f32.mrf.mxu2 }
 0x113   :  { %3063 = vmatpush.bf16.msra.mxu1 %v5245_v60  ;;  %v5452_v60 = vld [vmem:[%s10260_s2 + $0x928] sm:$0xf]  ;;  %v5325_v2 = vor.u32 %v6598_v59, %v5324_v54  ;;  %v6682_v38 = vld [vmem:[%s10260_s2 + $0xad4] sm:$0xf0]  ;;  %v2791_v59 = vpop.f32.mrf.mxu1 }
 0x114   :  { %3077 = vmatpush.bf16.msra.mxu2 %v5373_v61  ;;  %v6630_v61 = vld [vmem:[%s10260_s2 + $0x934] sm:$0xf0]  ;;  %v5772_v5 = vld [vmem:[%s10260_s2 + $0xba8] sm:$0xf] }
 0x115   :  { %3091 = vmatpush.bf16.msra.mxu3 %v5501_v3  ;;  %v5197_v3 = vor.u32 %v6566_v53, %v5196_v46  ;;  %v5453_v9 = vor.u32 %v6630_v61, %v5452_v60  ;;  %v4401_v46 = vor.u32 %v6364_v26, %v4398_v28  ;;  %v5916_v53 = vld [vmem:[%s10260_s2 + $0xcc8] sm:$0xf]  ;;  %v6746_v54 = vld [vmem:[%s10260_s2 + $0xcd4] sm:$0xf0]  ;;  %v8831_v60 = vpop.f32.mrf.mxu0  ;;  %v6360_v61 = vld [vmem:[%s10260_s2 + $0xcc] sm:$0xf] }
 0x116   :  { %3050 = vmatpush.bf16.msra.mxu0 %v5101_v48  ;;  %v6594_v48 = vld [vmem:[%s10260_s2 + $0x814] sm:$0xf0] }
 0x117   :  { %3064 = vmatpush.bf16.msra.mxu1 %v5229_v11  ;;  %v5436_v11 = vld [vmem:[%s10260_s2 + $0x908] sm:$0xf]  ;;  %v5309_v24 = vor.u32 %v6594_v48, %v5308_v6  ;;  %v6706_v28 = vld [vmem:[%s10260_s2 + $0xb94] sm:$0xf0] }
 0x118   :  { %3078 = vmatpush.bf16.msra.mxu2 %v5357_v12  ;;  %v6626_v12 = vld [vmem:[%s10260_s2 + $0x914] sm:$0xf0]  ;;  %v5900_v48 = vld [vmem:[%s10260_s2 + $0xca8] sm:$0xf] }
 0x119   :  { %3092 = vmatpush.bf16.msra.mxu3 %v5485_v19  ;;  %v5053_v19 = vor.u32 %v6530_v0, %v5052_v63  ;;  %v5437_v42 = vor.u32 %v6626_v12, %v5436_v11  ;;  %v6742_v11 = vld [vmem:[%s10260_s2 + $0xcb4] sm:$0xf0]  ;;  %v6356_v12 = vld [vmem:[%s10260_s2 + $0xac] sm:$0xf] }
 0x11a   :  { %3051 = vmatpush.bf16.msra.mxu0 %v5085_v29  ;;  %v5677_v29 = vor.u32 %v6686_v16, %v5676_v14  ;;  %v4366_v14 = vld [vmem:[%s10260_s2 + $0xb8] sm:$0xf0]  ;;  %v5901_v20 = vor.u32 %v6742_v11, %v5900_v48  ;;  %v5596_v11 = vld [vmem:[%s10260_s2 + $0xa48] sm:$0xf] }
 0x11b   :  { %3065 = vmatpush.bf16.msra.mxu1 %v5213_v32  ;;  %v5933_v32 = vor.u32 %v6750_v22, %v5932_v21  ;;  %v2819_v21 = vpop.f32.mrf.mxu3  ;;  %v5628_v22 = vld [vmem:[%s10260_s2 + $0xa88] sm:$0xf]  ;;  %v4369_v26 = vor.u32 %v6356_v12, %v4366_v14  ;;  %v6666_v12 = vld [vmem:[%s10260_s2 + $0xa54] sm:$0xf0] }
 0x11c   :  { %3079 = vmatpush.bf16.msra.mxu2 %v5341_v33  ;;  %v5660_v33 = vld [vmem:[%s10260_s2 + $0xac8] sm:$0xf] }
 0x11d   :  { %3093 = vmatpush.bf16.msra.mxu3 %v5469_v52  ;;  %v6714_v52 = vld [vmem:[%s10260_s2 + $0xbd4] sm:$0xf0]  ;;  %v5661_v63 = vor.u32 %v6682_v38, %v5660_v33  ;;  %v4350_v33 = vld [vmem:[%s10260_s2 + $0x98] sm:$0xf0]  ;;  %v5724_v14 = vld [vmem:[%s10260_s2 + $0xb48] sm:$0xf] }
 0x11e   :  { %3052 = vmatpush.bf16.msra.mxu0 %v5069_v62  ;;  %v4382_v62 = vld [vmem:[%s10260_s2 + $0xd8] sm:$0xf0]  ;;  %v5789_v0 = vor.u32 %v6714_v52, %v5788_v45 }
 0x11f   :  { %3066 = vmatpush.bf16.msra.mxu1 %v5197_v3  ;;  %v5917_v3 = vor.u32 %v6746_v54, %v5916_v53  ;;  %v4385_v6 = vor.u32 %v6360_v61, %v4382_v62  ;;  %v5612_v54 = vld [vmem:[%s10260_s2 + $0xa68] sm:$0xf]  ;;  %v6670_v61 = vld [vmem:[%s10260_s2 + $0xa74] sm:$0xf0] }
 0x120   :  { %3080 = vmatpush.bf16.msra.mxu2 %v5325_v2  ;;  %v5644_v2 = vld [vmem:[%s10260_s2 + $0xaa8] sm:$0xf] }
 0x121   :  { %3094 = vmatpush.bf16.msra.mxu3 %v5453_v9  ;;  %v6710_v9 = vld [vmem:[%s10260_s2 + $0xbb4] sm:$0xf0]  ;;  %v5645_v16 = vor.u32 %v6678_v4, %v5644_v2  ;;  %v5740_v62 = vld [vmem:[%s10260_s2 + $0xb68] sm:$0xf] }
 0x122   :  { %3053 = vmatpush.bf16.msra.mxu0 %v5053_v19  ;;  %v5773_v19 = vor.u32 %v6710_v9, %v5772_v5  ;;  %v5868_v2 = vld [vmem:[%s10260_s2 + $0xc68] sm:$0xf]  ;;  %v6734_v4 = vld [vmem:[%s10260_s2 + $0xc74] sm:$0xf0]  ;;  %v6348_v5 = vld [vmem:[%s10260_s2 + $0x6c] sm:$0xf] }
 0x123   :  { %3067 = vmatpush.bf16.msra.mxu1 %v5181_v23  ;;  %v6674_v23 = vld [vmem:[%s10260_s2 + $0xa94] sm:$0xf0]  ;;  %v5869_v48 = vor.u32 %v6734_v4, %v5868_v2  ;;  %v5564_v2 = vld [vmem:[%s10260_s2 + $0xa08] sm:$0xf] }
 0x124   :  { %3081 = vmatpush.bf16.msra.mxu2 %v5309_v24  ;;  %v5756_v24 = vld [vmem:[%s10260_s2 + $0xb88] sm:$0xf]  ;;  %v5629_v45 = vor.u32 %v6674_v23, %v5628_v22  ;;  %v6730_v23 = vld [vmem:[%s10260_s2 + $0xc54] sm:$0xf0] }
 0x125   :  { %3095 = vmatpush.bf16.msra.mxu3 %v5437_v42  ;;  %3054 = vmatmul.bf16.vlgmr.msra.gmra.mxu0 %v7376_v43  ;;  %v5884_v42 = vld [vmem:[%s10260_s2 + $0xc88] sm:$0xf]  ;;  %v5757_v52 = vor.u32 %v6706_v28, %v5756_v24 }
 0x126   :  { %3102 = vmatpush.bf16.msrb.mxu0 %v5677_v29  ;;  %3068 = vmatmul.bf16.vlgmr.msra.gmra.mxu1 %v7386_v47  ;;  %v6738_v29 = vld [vmem:[%s10260_s2 + $0xc94] sm:$0xf0]  ;;  %v5852_v22 = vld [vmem:[%s10260_s2 + $0xc48] sm:$0xf] }
 0x127   :  { %3116 = vmatpush.bf16.msrb.mxu1 %v5805_v30  ;;  %3082 = vmatmul.bf16.vlgmr.msra.gmra.mxu2 %v7593_v31  ;;  %v2831_v30 = vpop.f32.mrf.mxu0  ;;  %v5885_v53 = vor.u32 %v6738_v29, %v5884_v42  ;;  %v4318_v42 = vld [vmem:[%s10260_s2 + $0x58] sm:$0xf0] }
 0x128   :  { %3130 = vmatpush.bf16.msrb.mxu2 %v5933_v32  ;;  %3096 = vmatmul.bf16.vlgmr.msra.gmra.mxu3 %v7606_v36  ;;  %v6352_v32 = vld [vmem:[%s10260_s2 + $0x8c] sm:$0xf]  ;;  %v2832_v38 = vadd.f32 %v2831_v30, %v8748_v51  ;;  %v2806_v51 = vadd.f32 %v2805_v18, %v2791_v59  ;;  %v4334_v59 = vld [vmem:[%s10260_s2 + $0x78] sm:$0xf0]  ;;  %v5597_v30 = vor.u32 %v6666_v12, %v5596_v11  ;;  %v5820_v11 = vld [vmem:[%s10260_s2 + $0xc08] sm:$0xf] }
 0x129   :  { %3144 = vmatpush.bf16.msrb.mxu3 %v4401_v46  ;;  %v2845_v46 = vpop.f32.mrf.mxu1  ;;  %v4337_v18 = vor.u32 %v6348_v5, %v4334_v59  ;;  %v6658_v5 = vld [vmem:[%s10260_s2 + $0xa14] sm:$0xf0]  ;;  %v5692_v59 = vld [vmem:[%s10260_s2 + $0xb08] sm:$0xf] }
 0x12a   :  { %3103 = vmatpush.bf16.msrb.mxu0 %v5661_v63  ;;  %v4353_v63 = vor.u32 %v6352_v32, %v4350_v33  ;;  %v6722_v12 = vld [vmem:[%s10260_s2 + $0xc14] sm:$0xf0] }
 0x12b   :  { %3117 = vmatpush.bf16.msrb.mxu1 %v5789_v0  ;;  %v2846_v0 = vadd.f32 %v2845_v46, %v2832_v38  ;;  %v2873_v28 = vpop.f32.mrf.mxu3  ;;  %v5580_v46 = vld [vmem:[%s10260_s2 + $0xa28] sm:$0xf] }
 0x12c   :  { %3131 = vmatpush.bf16.msrb.mxu2 %v5917_v3  ;;  %v6702_v3 = vld [vmem:[%s10260_s2 + $0xb74] sm:$0xf0] }
 0x12d   :  { %3145 = vmatpush.bf16.msrb.mxu3 %v4385_v6  ;;  %v5613_v6 = vor.u32 %v6670_v61, %v5612_v54  ;;  %v5741_v9 = vor.u32 %v6702_v3, %v5740_v62  ;;  %v6694_v62 = vld [vmem:[%s10260_s2 + $0xb34] sm:$0xf0]  ;;  %v4302_v3 = vld [vmem:[%s10260_s2 + $0x38] sm:$0xf0] }
 0x12e   :  { %3104 = vmatpush.bf16.msrb.mxu0 %v5645_v16  ;;  %v2820_v16 = vadd.f32 %v2819_v21, %v2806_v51  ;;  %v6344_v21 = vld [vmem:[%s10260_s2 + $0x4c] sm:$0xf]  ;;  %v5836_v51 = vld [vmem:[%s10260_s2 + $0xc28] sm:$0xf] }
 0x12f   :  { %3118 = vmatpush.bf16.msrb.mxu1 %v5773_v19  ;;  %v2859_v19 = vpop.f32.mrf.mxu2  ;;  %v4321_v54 = vor.u32 %v6344_v21, %v4318_v42  ;;  %v4654_v21 = vld [vmem:[%s10260_s2 + $0x2f8] sm:$0xf0]  ;;  %v5565_v42 = vor.u32 %v6658_v5, %v5564_v2  ;;  %v6456_v5 = vld [vmem:[%s10260_s2 + $0x3cc] sm:$0xf] }
 0x130   :  { %3132 = vmatpush.bf16.msrb.mxu2 %v5901_v20  ;;  %v6698_v20 = vld [vmem:[%s10260_s2 + $0xb54] sm:$0xf0]  ;;  %v2860_v24 = vadd.f32 %v2859_v19, %v2846_v0  ;;  %v6340_v0 = vld [vmem:[%s10260_s2 + $0x2c] sm:$0xf]  ;;  %v4286_v19 = vld [vmem:[%s10260_s2 + $0x18] sm:$0xf0] }
 0x131   :  { %3146 = vmatpush.bf16.msrb.mxu3 %v4369_v26  ;;  %v2833_v26 = vpop.f32.mrf.mxu0  ;;  %v2847_v32 = vpop.f32.mrf.mxu1  ;;  %v5725_v38 = vor.u32 %v6698_v20, %v5724_v14  ;;  %v4305_v14 = vor.u32 %v6340_v0, %v4302_v3  ;;  %v6396_v20 = vld [vmem:[%s10260_s2 + $0x1ec] sm:$0xf]  ;;  %v4510_v0 = vld [vmem:[%s10260_s2 + $0x1d8] sm:$0xf0] }
 0x132   :  { %3105 = vmatpush.bf16.msrb.mxu0 %v5629_v45  ;;  %v2834_v29 = vadd.f32 %v2833_v26, %v2820_v16  ;;  %v8940_v33 = vadd.f32 %v2873_v28, %v2860_v24  ;;  %v5853_v45 = vor.u32 %v6730_v23, %v5852_v22  ;;  %v6857_v22 = vmov 0   ;;  %v4526_v26 = vld [vmem:[%s10260_s2 + $0x1f8] sm:$0xf0]  ;;  %v6428_v28 = vld [vmem:[%s10260_s2 + $0x2ec] sm:$0xf] }
 0x133   :  { %3119 = vmatpush.bf16.msrb.mxu1 %v5757_v52  ;;  %v6662_v52 = vld [vmem:[%s10260_s2 + $0xa34] sm:$0xf0]  ;;  %6848 = vset.pattern.permute.xlu0 %v6857_v22  ;;  %v2875_v24 = vpop.f32.mrf.mxu3  ;;  %v6424_v3 = vld [vmem:[%s10260_s2 + $0x2cc] sm:$0xf] }
 0x134   :  { %3133 = vmatpush.bf16.msrb.mxu2 %v5885_v53  ;;  %v5708_v53 = vld [vmem:[%s10260_s2 + $0xb28] sm:$0xf]  ;;  %v2848_v61 = vadd.f32 %v2847_v32, %v2834_v29  ;;  %v5581_v4 = vor.u32 %v6662_v52, %v5580_v46  ;;  %v6460_v29 = vld [vmem:[%s10260_s2 + $0x3ec] sm:$0xf]  ;;  %v34_v32 = vld [vmem:[%s10262_s1] sm:$0xff]  ;;  %v5821_v46 = vor.u32 %v6722_v12, %v5820_v11 }
 0x135   :  { %3147 = vmatpush.bf16.msrb.mxu3 %v4353_v63  ;;  %v6726_v63 = vld [vmem:[%s10260_s2 + $0xc34] sm:$0xf0]  ;;  %v6492_v52 = vld [vmem:[%s10260_s2 + $0x4ec] sm:$0xf]  ;;  %3336 = vperm.xlu0 %6848, %v34_v32   ;;  %v4478_v32 = vld [vmem:[%s10260_s2 + $0x198] sm:$0xf0] }
 0x136   :  { %3106 = vmatpush.bf16.msrb.mxu0 %v5613_v6  ;;  %v5709_v6 = vor.u32 %v6694_v62, %v5708_v53  ;;  %v4910_v53 = vld [vmem:[%s10260_s2 + $0x4f8] sm:$0xf0]  ;;  %v4657_v62 = vor.u32 %v6428_v28, %v4654_v21  ;;  %v6452_v22 = vld [vmem:[%s10260_s2 + $0x3ac] sm:$0xf] }
 0x137   :  { %3120 = vmatpush.bf16.msrb.mxu1 %v5741_v9  ;;  %v5837_v9 = vor.u32 %v6726_v63, %v5836_v51  ;;  %v2861_v16 = vpop.f32.mrf.mxu2  ;;  %v6392_v63 = vld [vmem:[%s10260_s2 + $0x1cc] sm:$0xf]  ;;  %v4913_v2 = vor.u32 %v6492_v52, %v4910_v53  ;;  %v4734_v53 = vld [vmem:[%s10260_s2 + $0x398] sm:$0xf0] }
 0x138   :  { %3134 = vmatpush.bf16.msrb.mxu2 %v5869_v48  ;;  %v6690_v48 = vld [vmem:[%s10260_s2 + $0xb14] sm:$0xf0]  ;;  %v2862_v23 = vadd.f32 %v2861_v16, %v2848_v61  ;;  %v4529_v61 = vor.u32 %v6396_v20, %v4526_v26  ;;  %v4494_v16 = vld [vmem:[%s10260_s2 + $0x1b8] sm:$0xf0]  ;;  %v35_v28 = vld [vmem:[%s10262_s1 + $0x8] sm:$0xff] }
 0x139   :  { %3148 = vmatpush.bf16.msrb.mxu3 %v4337_v18  ;;  %v6336_v18 = vld [vmem:[%s10260_s2 + $0xc] sm:$0xf]  ;;  %v4622_v20 = vld [vmem:[%s10260_s2 + $0x2b8] sm:$0xf0] }
 0x13a   :  { %3107 = vmatpush.bf16.msrb.mxu0 %v5597_v30  ;;  %v4782_v30 = vld [vmem:[%s10260_s2 + $0x3f8] sm:$0xf0]  ;;  %v6448_v52 = vld [vmem:[%s10260_s2 + $0x38c] sm:$0xf] }
 0x13b   :  { %3121 = vmatpush.bf16.msrb.mxu1 %v5725_v38  ;;  %v9011_v38 = vadd.f32 %v2875_v24, %v2862_v23  ;;  %v4785_v51 = vor.u32 %v6460_v29, %v4782_v30  ;;  %v4750_v23 = vld [vmem:[%s10260_s2 + $0x3b8] sm:$0xf0]  ;;  %v6484_v24 = vld [vmem:[%s10260_s2 + $0x4ac] sm:$0xf] }
 0x13c   :  { %3135 = vmatpush.bf16.msrb.mxu2 %v5853_v45  ;;  %v5693_v45 = vor.u32 %v6690_v48, %v5692_v59  ;;  %v4766_v59 = vld [vmem:[%s10260_s2 + $0x3d8] sm:$0xf0]  ;;  %v4513_v48 = vor.u32 %v6392_v63, %v4510_v0  ;;  %v4753_v29 = vor.u32 %v6452_v22, %v4750_v23  ;;  %v6384_v30 = vld [vmem:[%s10260_s2 + $0x18c] sm:$0xf] }
 0x13d   :  { %3149 = vmatpush.bf16.msrb.mxu3 %v4321_v54  ;;  %v4289_v54 = vor.u32 %v6336_v18, %v4286_v19  ;;  %v4769_v12 = vor.u32 %v6456_v5, %v4766_v59  ;;  %v6420_v18 = vld [vmem:[%s10260_s2 + $0x2ac] sm:$0xf]  ;;  %v4878_v26 = vld [vmem:[%s10260_s2 + $0x4b8] sm:$0xf0]  ;;  %3341 = vperm.xlu0 %6848, %v35_v28   ;;  %v4481_v63 = vor.u32 %v6384_v30, %v4478_v32 }
 0x13e   :  { %3108 = vmatpush.bf16.msrb.mxu0 %v5581_v4  ;;  %v4638_v4 = vld [vmem:[%s10260_s2 + $0x2d8] sm:$0xf0]  ;;  %v6412_v59 = vld [vmem:[%s10260_s2 + $0x26c] sm:$0xf] }
 0x13f   :  { %3122 = vmatpush.bf16.msrb.mxu1 %v5709_v6  ;;  %v6488_v6 = vld [vmem:[%s10260_s2 + $0x4cc] sm:$0xf]  ;;  %v4641_v11 = vor.u32 %v6424_v3, %v4638_v4  ;;  %v4462_v5 = vld [vmem:[%s10260_s2 + $0x178] sm:$0xf0] }
 0x140   :  { %3136 = vmatpush.bf16.msrb.mxu2 %v5837_v9  ;;  %v4894_v9 = vld [vmem:[%s10260_s2 + $0x4d8] sm:$0xf0]  ;;  %v6380_v4 = vld [vmem:[%s10260_s2 + $0x16c] sm:$0xf] }
 0x141   :  { %3150 = vmatpush.bf16.msrb.mxu3 %v4305_v14  ;;  %v6388_v14 = vld [vmem:[%s10260_s2 + $0x1ac] sm:$0xf]  ;;  %v4897_v19 = vor.u32 %v6488_v6, %v4894_v9  ;;  %v4590_v9 = vld [vmem:[%s10260_s2 + $0x278] sm:$0xf0] }
 0x142   :  { %3109 = vmatpush.bf16.msrb.mxu0 %v5565_v42  ;;  %v4497_v21 = vor.u32 %v6388_v14, %v4494_v16  ;;  %v4625_v42 = vor.u32 %v6420_v18, %v4622_v20  ;;  %v4846_v14 = vld [vmem:[%s10260_s2 + $0x478] sm:$0xf0]  ;;  %v4465_v16 = vor.u32 %v6380_v4, %v4462_v5  ;;  %v4593_v18 = vor.u32 %v6412_v59, %v4590_v9  ;;  %v6376_v20 = vld [vmem:[%s10260_s2 + $0x14c] sm:$0xf] }
 0x143   :  { %3123 = vmatpush.bf16.msrb.mxu1 %v5693_v45  ;;  %v6416_v45 = vld [vmem:[%s10260_s2 + $0x28c] sm:$0xf]  ;;  %v2901_v0 = vpop.f32.mrf.mxu1  ;;  %v4446_v22 = vld [vmem:[%s10260_s2 + $0x158] sm:$0xf0] }
 0x144   :  { %3137 = vmatpush.bf16.msrb.mxu2 %v5821_v46  ;;  %v4881_v46 = vor.u32 %v6484_v24, %v4878_v26  ;;  %v6408_v23 = vld [vmem:[%s10260_s2 + $0x24c] sm:$0xf]  ;;  %v4574_v28 = vld [vmem:[%s10260_s2 + $0x258] sm:$0xf0] }
 0x145   :  { %3151 = vmatpush.bf16.msrb.mxu3 %v4289_v54  ;;  %3110 = vmatmul.bf16.vlgmr.msrb.gmra.mxu0 %v7604_v35  ;;  %v2887_v54 = vpop.f32.mrf.mxu0  ;;  %v6436_v4 = vld [vmem:[%s10260_s2 + $0x32c] sm:$0xf]  ;;  %v4686_v5 = vld [vmem:[%s10260_s2 + $0x338] sm:$0xf0] }
 0x146   :  { %3158 = vmatpush.bf16.msra.mxu0 %v4529_v61  ;;  %3124 = vmatmul.bf16.vlgmr.msrb.gmra.mxu1 %v7614_v40  ;;  %v6480_v61 = vld [vmem:[%s10260_s2 + $0x48c] sm:$0xf] }
 0x147   :  { %3172 = vmatpush.bf16.msra.mxu1 %v4657_v62  ;;  %3138 = vmatmul.bf16.vlgmr.msrb.gmra.mxu2 %v7803_v25  ;;  %v4862_v62 = vld [vmem:[%s10260_s2 + $0x498] sm:$0xf0]  ;;  %v6468_v59 = vld [vmem:[%s10260_s2 + $0x42c] sm:$0xf] }
 0x148   :  { %3186 = vmatpush.bf16.msra.mxu2 %v4785_v51  ;;  %3152 = vmatmul.bf16.vlgmr.msrb.gmra.mxu3 %v7143_v58  ;;  %v4606_v58 = vld [vmem:[%s10260_s2 + $0x298] sm:$0xf0]  ;;  %v2888_v51 = vadd.f32 %v2887_v54, %v8940_v33  ;;  %v4865_v33 = vor.u32 %v6480_v61, %v4862_v62  ;;  %v4577_v61 = vor.u32 %v6408_v23, %v4574_v28  ;;  %v6368_v9 = vld [vmem:[%s10260_s2 + $0x10c] sm:$0xf] }
 0x149   :  { %3200 = vmatpush.bf16.msra.mxu3 %v4913_v2  ;;  %v4609_v3 = vor.u32 %v6416_v45, %v4606_v58  ;;  %v4737_v2 = vor.u32 %v6448_v52, %v4734_v53  ;;  %v6472_v45 = vld [vmem:[%s10260_s2 + $0x44c] sm:$0xf]  ;;  %v4449_v52 = vor.u32 %v6376_v20, %v4446_v22  ;;  %v4670_v22 = vld [vmem:[%s10260_s2 + $0x318] sm:$0xf0] }
 0x14a   :  { %3159 = vmatpush.bf16.msra.mxu0 %v4513_v48  ;;  %v2902_v6 = vadd.f32 %v2901_v0, %v2888_v51  ;;  %v6444_v48 = vld [vmem:[%s10260_s2 + $0x36c] sm:$0xf]  ;;  %v2915_v26 = vpop.f32.mrf.mxu2 }
 0x14b   :  { %3173 = vmatpush.bf16.msra.mxu1 %v4641_v11  ;;  %v4718_v11 = vld [vmem:[%s10260_s2 + $0x378] sm:$0xf0]  ;;  %v2929_v32 = vpop.f32.mrf.mxu3  ;;  %v2903_v53 = vpop.f32.mrf.mxu1  ;;  %v6372_v51 = vld [vmem:[%s10260_s2 + $0x12c] sm:$0xf] }
 0x14c   :  { %3187 = vmatpush.bf16.msra.mxu2 %v4769_v12  ;;  %v6476_v12 = vld [vmem:[%s10260_s2 + $0x46c] sm:$0xf] }
 0x14d   :  { %3201 = vmatpush.bf16.msra.mxu3 %v4897_v19  ;;  %v4721_v19 = vor.u32 %v6444_v48, %v4718_v11  ;;  %v4849_v24 = vor.u32 %v6476_v12, %v4846_v14  ;;  %v2889_v30 = vpop.f32.mrf.mxu0  ;;  %v4414_v48 = vld [vmem:[%s10260_s2 + $0x118] sm:$0xf0]  ;;  %v4689_v12 = vor.u32 %v6436_v4, %v4686_v5  ;;  %v6400_v14 = vld [vmem:[%s10260_s2 + $0x20c] sm:$0xf] }
 0x14e   :  { %3160 = vmatpush.bf16.msra.mxu0 %v4497_v21  ;;  %v6440_v21 = vld [vmem:[%s10260_s2 + $0x34c] sm:$0xf]  ;;  %v2890_v58 = vadd.f32 %v2889_v30, %v9011_v38  ;;  %v4417_v30 = vor.u32 %v6368_v9, %v4414_v48  ;;  %v5406_v48 = vld [vmem:[%s10260_s2 + $0x8d8] sm:$0xf0] }
 0x14f   :  { %3174 = vmatpush.bf16.msra.mxu1 %v4625_v42  ;;  %v4702_v42 = vld [vmem:[%s10260_s2 + $0x358] sm:$0xf0]  ;;  %v6404_v38 = vld [vmem:[%s10260_s2 + $0x22c] sm:$0xf] }
 0x150   :  { %3188 = vmatpush.bf16.msra.mxu2 %v4753_v29  ;;  %v2916_v29 = vadd.f32 %v2915_v26, %v2902_v6  ;;  %v4705_v62 = vor.u32 %v6440_v21, %v4702_v42  ;;  %v6464_v23 = vld [vmem:[%s10260_s2 + $0x40c] sm:$0xf]  ;;  %v5038_v42 = vld [vmem:[%s10260_s2 + $0x5f8] sm:$0xf0] }
 0x151   :  { %3202 = vmatpush.bf16.msra.mxu3 %v4881_v46  ;;  %v4830_v46 = vld [vmem:[%s10260_s2 + $0x458] sm:$0xf0]  ;;  %v6524_v21 = vld [vmem:[%s10260_s2 + $0x5ec] sm:$0xf] }
 0x152   :  { %3161 = vmatpush.bf16.msra.mxu0 %v4481_v63  ;;  %v9148_v54 = vadd.f32 %v2929_v32, %v2916_v29  ;;  %v4430_v63 = vld [vmem:[%s10260_s2 + $0x138] sm:$0xf0]  ;;  %v4833_v0 = vor.u32 %v6472_v45, %v4830_v46  ;;  %v2917_v20 = vpop.f32.mrf.mxu2  ;;  %v6556_v29 = vld [vmem:[%s10260_s2 + $0x6ec] sm:$0xf] }
 0x153   :  { %3175 = vmatpush.bf16.msra.mxu1 %v4609_v3  ;;  %v2904_v3 = vadd.f32 %v2903_v53, %v2890_v58  ;;  %v4433_v6 = vor.u32 %v6372_v51, %v4430_v63  ;;  %v2931_v28 = vpop.f32.mrf.mxu3  ;;  %v5166_v32 = vld [vmem:[%s10260_s2 + $0x6f8] sm:$0xf0]  ;;  %v6588_v45 = vld [vmem:[%s10260_s2 + $0x7ec] sm:$0xf]  ;;  %v5041_v63 = vor.u32 %v6524_v21, %v5038_v42 }
 0x154   :  { %3189 = vmatpush.bf16.msra.mxu2 %v4737_v2  ;;  %v4558_v2 = vld [vmem:[%s10260_s2 + $0x238] sm:$0xf0]  ;;  %v6552_v4 = vld [vmem:[%s10260_s2 + $0x6cc] sm:$0xf] }
 0x155   :  { %3203 = vmatpush.bf16.msra.mxu3 %v4865_v33  ;;  %v4814_v33 = vld [vmem:[%s10260_s2 + $0x438] sm:$0xf0]  ;;  %v4561_v11 = vor.u32 %v6404_v38, %v4558_v2  ;;  %v2918_v26 = vadd.f32 %v2917_v20, %v2904_v3  ;;  %v5169_v38 = vor.u32 %v6556_v29, %v5166_v32  ;;  %v6520_v3 = vld [vmem:[%s10260_s2 + $0x5cc] sm:$0xf] }
 0x156   :  { %3162 = vmatpush.bf16.msra.mxu0 %v4465_v16  ;;  %v4542_v16 = vld [vmem:[%s10260_s2 + $0x218] sm:$0xf0]  ;;  %v6616_v9 = vld [vmem:[%s10260_s2 + $0x8cc] sm:$0xf] }
 0x157   :  { %3176 = vmatpush.bf16.msra.mxu1 %v4593_v18  ;;  %v6432_v18 = vld [vmem:[%s10260_s2 + $0x30c] sm:$0xf]  ;;  %v5294_v46 = vld [vmem:[%s10260_s2 + $0x7f8] sm:$0xf0]  ;;  %v9216_v58 = vadd.f32 %v2931_v28, %v2918_v26  ;;  %v5409_v20 = vor.u32 %v6616_v9, %v5406_v48 }
 0x158   :  { %3190 = vmatpush.bf16.msra.mxu2 %v4721_v19  ;;  %v4817_v19 = vor.u32 %v6468_v59, %v4814_v33  ;;  %v4673_v53 = vor.u32 %v6432_v18, %v4670_v22  ;;  %v5022_v2 = vld [vmem:[%s10260_s2 + $0x5d8] sm:$0xf0]  ;;  %v6584_v33 = vld [vmem:[%s10260_s2 + $0x7cc] sm:$0xf] }
 0x159   :  { %3204 = vmatpush.bf16.msra.mxu3 %v4849_v24  ;;  %v4798_v24 = vld [vmem:[%s10260_s2 + $0x418] sm:$0xf0]  ;;  %v6544_v29 = vld [vmem:[%s10260_s2 + $0x68c] sm:$0xf] }
 0x15a   :  { %3163 = vmatpush.bf16.msra.mxu0 %v4449_v52  ;;  %v4545_v52 = vor.u32 %v6400_v14, %v4542_v16  ;;  %v4801_v51 = vor.u32 %v6464_v23, %v4798_v24  ;;  %v5150_v59 = vld [vmem:[%s10260_s2 + $0x6d8] sm:$0xf0]  ;;  %v6516_v16 = vld [vmem:[%s10260_s2 + $0x5ac] sm:$0xf] }
 0x15b   :  { %3177 = vmatpush.bf16.msra.mxu1 %v4577_v61  ;;  %v6620_v61 = vld [vmem:[%s10260_s2 + $0x8ec] sm:$0xf]  ;;  %v5006_v18 = vld [vmem:[%s10260_s2 + $0x5b8] sm:$0xf0] }
 0x15c   :  { %3191 = vmatpush.bf16.msra.mxu2 %v4705_v62  ;;  %v5422_v62 = vld [vmem:[%s10260_s2 + $0x8f8] sm:$0xf0]  ;;  %v6580_v23 = vld [vmem:[%s10260_s2 + $0x7ac] sm:$0xf]  ;;  %v5009_v28 = vor.u32 %v6516_v16, %v5006_v18 }
 0x15d   :  { %3205 = vmatpush.bf16.msra.mxu3 %v4833_v0  ;;  %v5297_v0 = vor.u32 %v6588_v45, %v5294_v46  ;;  %v5425_v5 = vor.u32 %v6620_v61, %v5422_v62  ;;  %v5134_v22 = vld [vmem:[%s10260_s2 + $0x6b8] sm:$0xf0]  ;;  %v6576_v32 = vld [vmem:[%s10260_s2 + $0x78c] sm:$0xf] }
 0x15e   :  { %3164 = vmatpush.bf16.msra.mxu0 %v4433_v6  ;;  %v5278_v6 = vld [vmem:[%s10260_s2 + $0x7d8] sm:$0xf0]  ;;  %v6536_v18 = vld [vmem:[%s10260_s2 + $0x64c] sm:$0xf] }
 0x15f   :  { %3178 = vmatpush.bf16.msra.mxu1 %v4561_v11  ;;  %v5025_v11 = vor.u32 %v6520_v3, %v5022_v2  ;;  %v5281_v14 = vor.u32 %v6584_v33, %v5278_v6  ;;  %v5262_v24 = vld [vmem:[%s10260_s2 + $0x7b8] sm:$0xf0]  ;;  %v6540_v2 = vld [vmem:[%s10260_s2 + $0x66c] sm:$0xf] }
 0x160   :  { %3192 = vmatpush.bf16.msra.mxu2 %v4689_v12  ;;  %v5153_v12 = vor.u32 %v6552_v4, %v5150_v59  ;;  %v5390_v26 = vld [vmem:[%s10260_s2 + $0x8b8] sm:$0xf0]  ;;  %v5265_v42 = vor.u32 %v6580_v23, %v5262_v24  ;;  %v6572_v59 = vld [vmem:[%s10260_s2 + $0x76c] sm:$0xf] }
 0x161   :  { %3206 = vmatpush.bf16.msra.mxu3 %v4817_v19  ;;  %v6548_v19 = vld [vmem:[%s10260_s2 + $0x6ac] sm:$0xf]  ;;  %v5246_v45 = vld [vmem:[%s10260_s2 + $0x798] sm:$0xf0] }
 0x162   :  { %3165 = vmatpush.bf16.msra.mxu0 %v4417_v30  ;;  %v5137_v21 = vor.u32 %v6548_v19, %v5134_v22  ;;  %v5118_v30 = vld [vmem:[%s10260_s2 + $0x698] sm:$0xf0]  ;;  %v2943_v46 = vpop.f32.mrf.mxu0  ;;  %v6604_v6 = vld [vmem:[%s10260_s2 + $0x86c] sm:$0xf] }
 0x163   :  { %3179 = vmatpush.bf16.msra.mxu1 %v4545_v52  ;;  %v6608_v52 = vld [vmem:[%s10260_s2 + $0x88c] sm:$0xf]  ;;  %v2944_v61 = vadd.f32 %v2943_v46, %v9148_v54  ;;  %v4974_v3 = vld [vmem:[%s10260_s2 + $0x578] sm:$0xf0] }
 0x164   :  { %3193 = vmatpush.bf16.msra.mxu2 %v4673_v53  ;;  %v5374_v53 = vld [vmem:[%s10260_s2 + $0x898] sm:$0xf0]  ;;  %v6568_v22 = vld [vmem:[%s10260_s2 + $0x74c] sm:$0xf] }
 0x165   :  { %3207 = vmatpush.bf16.msra.mxu3 %v4801_v51  ;;  %3166 = vmatmul.bf16.vlgmr.msra.gmra.mxu0 %v7179_v10  ;;  %v6612_v10 = vld [vmem:[%s10260_s2 + $0x8ac] sm:$0xf]  ;;  %v2957_v51 = vpop.f32.mrf.mxu1  ;;  %v5377_v54 = vor.u32 %v6608_v52, %v5374_v53  ;;  %v5230_v33 = vld [vmem:[%s10260_s2 + $0x778] sm:$0xf0] }
 0x166   :  { %3214 = vmatpush.bf16.msrb.mxu0 %v5041_v63  ;;  %3180 = vmatmul.bf16.vlgmr.msra.gmra.mxu1 %v7157_v1  ;;  %v6512_v1 = vld [vmem:[%s10260_s2 + $0x58c] sm:$0xf]  ;;  %v5121_v63 = vor.u32 %v6544_v29, %v5118_v30  ;;  %v9310_v4 = vadd.f32 %v2957_v51, %v2944_v61  ;;  %v5358_v9 = vld [vmem:[%s10260_s2 + $0x878] sm:$0xf0] }
 0x167   :  { %3228 = vmatpush.bf16.msrb.mxu1 %v5169_v38  ;;  %3194 = vmatmul.bf16.vlgmr.msra.gmra.mxu2 %v7193_v17  ;;  %v4990_v17 = vld [vmem:[%s10260_s2 + $0x598] sm:$0xf0]  ;;  %v5249_v38 = vor.u32 %v6576_v32, %v5246_v45  ;;  %v5361_v19 = vor.u32 %v6604_v6, %v5358_v9  ;;  %v6500_v29 = vld [vmem:[%s10260_s2 + $0x52c] sm:$0xf] }
 0x168   :  { %3242 = vmatpush.bf16.msrb.mxu2 %v5297_v0  ;;  %3208 = vmatmul.bf16.vlgmr.msra.gmra.mxu3 %v7365_v39  ;;  %v5393_v39 = vor.u32 %v6612_v10, %v5390_v26  ;;  %v4993_v62 = vor.u32 %v6512_v1, %v4990_v17  ;;  %v6508_v0 = vld [vmem:[%s10260_s2 + $0x56c] sm:$0xf]  ;;  %v4958_v16 = vld [vmem:[%s10260_s2 + $0x558] sm:$0xf0] }
 0x169   :  { %3256 = vmatpush.bf16.msrb.mxu3 %v5425_v5  ;;  %v5102_v5 = vld [vmem:[%s10260_s2 + $0x678] sm:$0xf0]  ;;  %v4977_v48 = vor.u32 %v6508_v0, %v4974_v3  ;;  %v6600_v10 = vld [vmem:[%s10260_s2 + $0x84c] sm:$0xf] }
 0x16a   :  { %3215 = vmatpush.bf16.msrb.mxu0 %v5025_v11  ;;  %v5105_v11 = vor.u32 %v6540_v2, %v5102_v5  ;;  %v5214_v23 = vld [vmem:[%s10260_s2 + $0x758] sm:$0xf0]  ;;  %v2945_v24 = vpop.f32.mrf.mxu0  ;;  %v6532_v30 = vld [vmem:[%s10260_s2 + $0x62c] sm:$0xf] }
 0x16b   :  { %3229 = vmatpush.bf16.msrb.mxu1 %v5153_v12  ;;  %v5233_v12 = vor.u32 %v6572_v59, %v5230_v33  ;;  %v5342_v26 = vld [vmem:[%s10260_s2 + $0x858] sm:$0xf0]  ;;  %v5217_v17 = vor.u32 %v6568_v22, %v5214_v23  ;;  %v6564_v46 = vld [vmem:[%s10260_s2 + $0x72c] sm:$0xf] }
 0x16c   :  { %3243 = vmatpush.bf16.msrb.mxu2 %v5281_v14  ;;  %v6504_v14 = vld [vmem:[%s10260_s2 + $0x54c] sm:$0xf]  ;;  %v5070_v45 = vld [vmem:[%s10260_s2 + $0x638] sm:$0xf0] }
 0x16d   :  { %3257 = vmatpush.bf16.msrb.mxu3 %v5409_v20  ;;  %v5086_v20 = vld [vmem:[%s10260_s2 + $0x658] sm:$0xf0]  ;;  %v6596_v53 = vld [vmem:[%s10260_s2 + $0x82c] sm:$0xf] }
 0x16e   :  { %3216 = vmatpush.bf16.msrb.mxu0 %v5009_v28  ;;  %v2946_v28 = vadd.f32 %v2945_v24, %v9216_v58  ;;  %v5089_v1 = vor.u32 %v6536_v18, %v5086_v20  ;;  %v5345_v58 = vor.u32 %v6600_v10, %v5342_v26  ;;  %v5198_v52 = vld [vmem:[%s10260_s2 + $0x738] sm:$0xf0]  ;;  %v6496_v51 = vld [vmem:[%s10260_s2 + $0x50c] sm:$0xf] }
 0x16f   :  { %3230 = vmatpush.bf16.msrb.mxu1 %v5137_v21  ;;  %v4961_v21 = vor.u32 %v6504_v14, %v4958_v16  ;;  %v5326_v61 = vld [vmem:[%s10260_s2 + $0x838] sm:$0xf0]  ;;  %v5201_v0 = vor.u32 %v6564_v46, %v5198_v52  ;;  %v6528_v3 = vld [vmem:[%s10260_s2 + $0x60c] sm:$0xf] }
 0x170   :  { %3244 = vmatpush.bf16.msrb.mxu2 %v5265_v42  ;;  %v2959_v42 = vpop.f32.mrf.mxu1  ;;  %v5054_v2 = vld [vmem:[%s10260_s2 + $0x618] sm:$0xf0]  ;;  %v5329_v5 = vor.u32 %v6596_v53, %v5326_v61  ;;  %v6592_v33 = vld [vmem:[%s10260_s2 + $0x80c] sm:$0xf] }
 0x171   :  { %3258 = vmatpush.bf16.msrb.mxu3 %v5393_v39  ;;  %v4942_v39 = vld [vmem:[%s10260_s2 + $0x538] sm:$0xf0]  ;;  %v9361_v32 = vadd.f32 %v2959_v42, %v2946_v28  ;;  %v6652_v9 = vld [vmem:[%s10260_s2 + $0x9ec] sm:$0xf] }
 0x172   :  { %3217 = vmatpush.bf16.msrb.mxu0 %v4993_v62  ;;  %v4945_v62 = vor.u32 %v6500_v29, %v4942_v39  ;;  %v5182_v59 = vld [vmem:[%s10260_s2 + $0x718] sm:$0xf0]  ;;  %v6716_v16 = vld [vmem:[%s10260_s2 + $0xbec] sm:$0xf] }
 0x173   :  { %3231 = vmatpush.bf16.msrb.mxu1 %v5121_v63  ;;  %v4926_v63 = vld [vmem:[%s10260_s2 + $0x518] sm:$0xf0]  ;;  %v6748_v22 = vld [vmem:[%s10260_s2 + $0xcec] sm:$0xf] }
 0x174   :  { %3245 = vmatpush.bf16.msrb.mxu2 %v5249_v38  ;;  %v5073_v38 = vor.u32 %v6532_v30, %v5070_v45  ;;  %v5310_v6 = vld [vmem:[%s10260_s2 + $0x818] sm:$0xf0]  ;;  %v6712_v39 = vld [vmem:[%s10260_s2 + $0xbcc] sm:$0xf] }
 0x175   :  { %3259 = vmatpush.bf16.msrb.mxu3 %v5377_v54  ;;  %v6560_v54 = vld [vmem:[%s10260_s2 + $0x70c] sm:$0xf]  ;;  %v5678_v14 = vld [vmem:[%s10260_s2 + $0xaf8] sm:$0xf0]  ;;  %v5313_v24 = vor.u32 %v6592_v33, %v5310_v6 }
 0x176   :  { %3218 = vmatpush.bf16.msrb.mxu0 %v4977_v48  ;;  %v5550_v48 = vld [vmem:[%s10260_s2 + $0x9f8] sm:$0xf0]  ;;  %v5185_v20 = vor.u32 %v6560_v54, %v5182_v59  ;;  %v6644_v61 = vld [vmem:[%s10260_s2 + $0x9ac] sm:$0xf] }
 0x177   :  { %3232 = vmatpush.bf16.msrb.mxu1 %v5105_v11  ;;  %v6684_v11 = vld [vmem:[%s10260_s2 + $0xaec] sm:$0xf]  ;;  %v5806_v18 = vld [vmem:[%s10260_s2 + $0xbf8] sm:$0xf0]  ;;  %v5553_v10 = vor.u32 %v6652_v9, %v5550_v48 }
 0x178   :  { %3246 = vmatpush.bf16.msrb.mxu2 %v5233_v12  ;;  %v4929_v12 = vor.u32 %v6496_v51, %v4926_v63  ;;  %v5934_v23 = vld [vmem:[%s10260_s2 + $0xcf8] sm:$0xf0]  ;;  %v5681_v26 = vor.u32 %v6684_v11, %v5678_v14  ;;  %v5809_v28 = vor.u32 %v6716_v16, %v5806_v18  ;;  %v6676_v51 = vld [vmem:[%s10260_s2 + $0xaac] sm:$0xf] }
 0x179   :  { %3260 = vmatpush.bf16.msrb.mxu3 %v5361_v19  ;;  %v5057_v19 = vor.u32 %v6528_v3, %v5054_v2  ;;  %v5534_v42 = vld [vmem:[%s10260_s2 + $0x9d8] sm:$0xf0]  ;;  %v6672_v33 = vld [vmem:[%s10260_s2 + $0xa8c] sm:$0xf] }
 0x17a   :  { %3219 = vmatpush.bf16.msrb.mxu0 %v4961_v21  ;;  %v6648_v21 = vld [vmem:[%s10260_s2 + $0x9cc] sm:$0xf]  ;;  %v5662_v29 = vld [vmem:[%s10260_s2 + $0xad8] sm:$0xf0] }
 0x17b   :  { %3233 = vmatpush.bf16.msrb.mxu1 %v5089_v1  ;;  %v6680_v1 = vld [vmem:[%s10260_s2 + $0xacc] sm:$0xf]  ;;  %v5790_v30 = vld [vmem:[%s10260_s2 + $0xbd8] sm:$0xf0]  ;;  %v5537_v46 = vor.u32 %v6648_v21, %v5534_v42 }
 0x17c   :  { %3247 = vmatpush.bf16.msrb.mxu2 %v5217_v17  ;;  %v5937_v17 = vor.u32 %v6748_v22, %v5934_v23  ;;  %v5918_v45 = vld [vmem:[%s10260_s2 + $0xcd8] sm:$0xf0]  ;;  %v5665_v52 = vor.u32 %v6680_v1, %v5662_v29  ;;  %v5793_v53 = vor.u32 %v6712_v39, %v5790_v30  ;;  %v6704_v9 = vld [vmem:[%s10260_s2 + $0xb8c] sm:$0xf] }
 0x17d   :  { %3261 = vmatpush.bf16.msrb.mxu3 %v5345_v58  ;;  %v6744_v58 = vld [vmem:[%s10260_s2 + $0xccc] sm:$0xf]  ;;  %v5774_v3 = vld [vmem:[%s10260_s2 + $0xbb8] sm:$0xf0] }
 0x17e   :  { %3220 = vmatpush.bf16.msrb.mxu0 %v4945_v62  ;;  %v5518_v62 = vld [vmem:[%s10260_s2 + $0x9b8] sm:$0xf0]  ;;  %v5921_v63 = vor.u32 %v6744_v58, %v5918_v45  ;;  %v6736_v11 = vld [vmem:[%s10260_s2 + $0xc8c] sm:$0xf] }
 0x17f   :  { %3234 = vmatpush.bf16.msrb.mxu1 %v5073_v38  ;;  %v5646_v38 = vld [vmem:[%s10260_s2 + $0xab8] sm:$0xf0]  ;;  %v5521_v54 = vor.u32 %v6644_v61, %v5518_v62  ;;  %v6668_v22 = vld [vmem:[%s10260_s2 + $0xa6c] sm:$0xf] }
 0x180   :  { %3248 = vmatpush.bf16.msrb.mxu2 %v5201_v0  ;;  %v6708_v0 = vld [vmem:[%s10260_s2 + $0xbac] sm:$0xf]  ;;  %v5902_v2 = vld [vmem:[%s10260_s2 + $0xcb8] sm:$0xf0] }
 0x181   :  { %3262 = vmatpush.bf16.msrb.mxu3 %v5329_v5  ;;  %v5649_v5 = vor.u32 %v6676_v51, %v5646_v38  ;;  %v5777_v59 = vor.u32 %v6708_v0, %v5774_v3  ;;  %v5630_v6 = vld [vmem:[%s10260_s2 + $0xa98] sm:$0xf0]  ;;  %v6632_v29 = vld [vmem:[%s10260_s2 + $0x94c] sm:$0xf] }
 0x182   :  { %3221 = vmatpush.bf16.msrb.mxu0 %v4929_v12  ;;  %v5758_v48 = vld [vmem:[%s10260_s2 + $0xb98] sm:$0xf0]  ;;  %v5633_v16 = vor.u32 %v6672_v33, %v5630_v6  ;;  %v6664_v30 = vld [vmem:[%s10260_s2 + $0xa4c] sm:$0xf] }
 0x183   :  { %3235 = vmatpush.bf16.msrb.mxu1 %v5057_v19  ;;  %v5886_v12 = vld [vmem:[%s10260_s2 + $0xc98] sm:$0xf0]  ;;  %v5761_v18 = vor.u32 %v6704_v9, %v5758_v48  ;;  %v6636_v19 = vld [vmem:[%s10260_s2 + $0x96c] sm:$0xf] }
 0x184   :  { %3249 = vmatpush.bf16.msrb.mxu2 %v5185_v20  ;;  %v5486_v20 = vld [vmem:[%s10260_s2 + $0x978] sm:$0xf0]  ;;  %v5889_v23 = vor.u32 %v6736_v11, %v5886_v12  ;;  %v6628_v38 = vld [vmem:[%s10260_s2 + $0x92c] sm:$0xf] }
 0x185   :  { %3263 = vmatpush.bf16.msrb.mxu3 %v5313_v24  ;;  %3222 = vmatmul.bf16.vlgmr.msrb.gmra.mxu0 %v7378_v44  ;;  %v6740_v44 = vld [vmem:[%s10260_s2 + $0xcac] sm:$0xf]  ;;  %v5614_v24 = vld [vmem:[%s10260_s2 + $0xa78] sm:$0xf0]  ;;  %v5489_v42 = vor.u32 %v6636_v19, %v5486_v20 }
 0x186   :  { %3270 = vmatpush.bf16.msra.mxu0 %v5553_v10  ;;  %3236 = vmatmul.bf16.vlgmr.msrb.gmra.mxu1 %v7376_v43  ;;  %v6640_v43 = vld [vmem:[%s10260_s2 + $0x98c] sm:$0xf]  ;;  %v5870_v21 = vld [vmem:[%s10260_s2 + $0xc78] sm:$0xf0]  ;;  %v5617_v1 = vor.u32 %v6668_v22, %v5614_v24  ;;  %v6052_v22 = vld [vmem:[%s10263_s3 + $0xe0] sm:$0xf]  ;;  %v2985_v24 = vpop.f32.mrf.mxu3 }
 0x187   :  { %3284 = vmatpush.bf16.msra.mxu1 %v5681_v26  ;;  %3250 = vmatmul.bf16.vlgmr.msrb.gmra.mxu2 %v7386_v47  ;;  %v5502_v47 = vld [vmem:[%s10260_s2 + $0x998] sm:$0xf0]  ;;  %v6700_v10 = vld [vmem:[%s10260_s2 + $0xb6c] sm:$0xf] }
 0x188   :  { %3298 = vmatpush.bf16.msra.mxu2 %v5809_v28  ;;  %3264 = vmatmul.bf16.vlgmr.msrb.gmra.mxu3 %v7593_v31  ;;  %v5905_v31 = vor.u32 %v6740_v44, %v5902_v2  ;;  %v5505_v14 = vor.u32 %v6640_v43, %v5502_v47  ;;  %v5742_v26 = vld [vmem:[%s10260_s2 + $0xb78] sm:$0xf0]  ;;  %v6732_v28 = vld [vmem:[%s10260_s2 + $0xc6c] sm:$0xf]  ;;  %v9559_v44 = vpop.f32.mrf.mxu2 }
 0x189   :  { %3312 = vmatpush.bf16.msra.mxu3 %v5937_v17  ;;  %v5745_v17 = vor.u32 %v6700_v10, %v5742_v26  ;;  %v5470_v39 = vld [vmem:[%s10260_s2 + $0x958] sm:$0xf0]  ;;  %v5873_v58 = vor.u32 %v6732_v28, %v5870_v21  ;;  %v6660_v3 = vld [vmem:[%s10260_s2 + $0xa2c] sm:$0xf]  ;;  %v6779_v26 = vld [vmem:[%s10263_s3 + $0xe4] sm:$0xf] }
 0x18a   :  { %3271 = vmatpush.bf16.msra.mxu0 %v5537_v46  ;;  %v5598_v45 = vld [vmem:[%s10260_s2 + $0xa58] sm:$0xf0]  ;;  %v6696_v46 = vld [vmem:[%s10260_s2 + $0xb4c] sm:$0xf]  ;;  %v5473_v62 = vor.u32 %v6632_v29, %v5470_v39  ;;  %v6054_v28 = vld [vmem:[%s10263_s3 + $0xf0] sm:$0xf0] }
 0x18b   :  { %3285 = vmatpush.bf16.msra.mxu1 %v5665_v52  ;;  %v5726_v52 = vld [vmem:[%s10260_s2 + $0xb58] sm:$0xf0]  ;;  %v5601_v51 = vor.u32 %v6664_v30, %v5598_v45  ;;  %v6724_v43 = vld [vmem:[%s10260_s2 + $0xc2c] sm:$0xf]  ;;  %v6057_v29 = vor.u32 %v6779_v26, %v6054_v28  ;;  %v6036_v39 = vld [vmem:[%s10263_s3 + $0xc0] sm:$0xf]  ;;  %v2624_v28 = vadd.f32 %v8216_v27, %v8190_v15 }
 0x18c   :  { %3299 = vmatpush.bf16.msra.mxu2 %v5793_v53  ;;  %v6728_v53 = vld [vmem:[%s10260_s2 + $0xc4c] sm:$0xf]  ;;  %v5854_v61 = vld [vmem:[%s10260_s2 + $0xc58] sm:$0xf0]  ;;  %v6777_v30 = vld [vmem:[%s10263_s3 + $0xcc] sm:$0xf0] }
 0x18d   :  { %3313 = vmatpush.bf16.msra.mxu3 %v5921_v63  ;;  %v5729_v63 = vor.u32 %v6696_v46, %v5726_v52  ;;  %v5454_v0 = vld [vmem:[%s10260_s2 + $0x938] sm:$0xf0]  ;;  %v5857_v2 = vor.u32 %v6728_v53, %v5854_v61  ;;  %v6656_v11 = vld [vmem:[%s10260_s2 + $0xa0c] sm:$0xf]  ;;  %v6775_v45 = vld [vmem:[%s10263_s3 + $0xc4] sm:$0xf]  ;;  %v6037_v52 = vor.u32 %v6777_v30, %v6036_v39  ;;  %v2999_v53 = vpop.f32.mrf.mxu0 }
 0x18e   :  { %3272 = vmatpush.bf16.msra.mxu0 %v5521_v54  ;;  %v5582_v54 = vld [vmem:[%s10260_s2 + $0xa38] sm:$0xf0]  ;;  %v5457_v33 = vor.u32 %v6628_v38, %v5454_v0  ;;  %v6720_v19 = vld [vmem:[%s10260_s2 + $0xc0c] sm:$0xf]  ;;  %v6038_v46 = vld [vmem:[%s10263_s3 + $0xd0] sm:$0xf0]  ;;  %v2987_v0 = vpop.f32.mrf.mxu3 }
 0x18f   :  { %3286 = vmatpush.bf16.msra.mxu1 %v5649_v5  ;;  %v6692_v5 = vld [vmem:[%s10260_s2 + $0xb2c] sm:$0xf]  ;;  %v5838_v47 = vld [vmem:[%s10260_s2 + $0xc38] sm:$0xf0]  ;;  %v5585_v6 = vor.u32 %v6660_v3, %v5582_v54  ;;  %v6041_v61 = vor.u32 %v6775_v45, %v6038_v46  ;;  %v6771_v38 = vld [vmem:[%s10263_s3 + $0xa4] sm:$0xf]  ;;  %v2638_v46 = vadd.f32 %v8246_v50, %v2624_v28 }
 0x190   :  { %3300 = vmatpush.bf16.msra.mxu2 %v5777_v59  ;;  %v5710_v59 = vld [vmem:[%s10260_s2 + $0xb38] sm:$0xf0]  ;;  %v6767_v54 = vld [vmem:[%s10263_s3 + $0x84] sm:$0xf]  ;;  %v5958_v15 = vld [vmem:[%s10263_s3 + $0x30] sm:$0xf0] }
 0x191   :  { %3314 = vmatpush.bf16.msra.mxu3 %v5905_v31  ;;  %v6624_v31 = vld [vmem:[%s10260_s2 + $0x90c] sm:$0xf]  ;;  %v5713_v9 = vor.u32 %v6692_v5, %v5710_v59  ;;  %v5438_v48 = vld [vmem:[%s10260_s2 + $0x918] sm:$0xf0]  ;;  %v5942_v50 = vld [vmem:[%s10263_s3 + $0x10] sm:$0xf0] }
 0x192   :  { %3273 = vmatpush.bf16.msra.mxu0 %v5505_v14  ;;  %v5566_v12 = vld [vmem:[%s10260_s2 + $0xa18] sm:$0xf0]  ;;  %v5841_v14 = vor.u32 %v6724_v43, %v5838_v47  ;;  %v5441_v10 = vor.u32 %v6624_v31, %v5438_v48  ;;  %v2986_v43 = vadd.f32 %v2985_v24, %v9559_v44  ;;  %v6765_v31 = vld [vmem:[%s10263_s3 + $0x6c] sm:$0xf0] }
 0x193   :  { %3287 = vmatpush.bf16.msra.mxu1 %v5633_v16  ;;  %v6688_v16 = vld [vmem:[%s10260_s2 + $0xb0c] sm:$0xf]  ;;  %v5822_v20 = vld [vmem:[%s10260_s2 + $0xc18] sm:$0xf0]  ;;  %v5569_v21 = vor.u32 %v6656_v11, %v5566_v12 }
 0x194   :  { %3301 = vmatpush.bf16.msra.mxu2 %v5761_v18  ;;  %v5694_v18 = vld [vmem:[%s10260_s2 + $0xb18] sm:$0xf0]  ;;  %v3000_v12 = vadd.f32 %v2999_v53, %v2986_v43  ;;  %v5940_v53 = vld [vmem:[%s10263_s3] sm:$0xf]  ;;  %v6044_v43 = vld [vmem:[%s10263_s3 + $0xc8] sm:$0xf] }
 0x195   :  { %3315 = vmatpush.bf16.msra.mxu3 %v5889_v23  ;;  %v6781_v23 = vld [vmem:[%s10263_s3 + $0xec] sm:$0xf0]  ;;  %v3001_v48 = vpop.f32.mrf.mxu0 }
 0x196   :  { %3274 = vmatpush.bf16.msra.mxu0 %v5489_v42  ;;  %v5697_v42 = vor.u32 %v6688_v16, %v5694_v18  ;;  %v3041_v16 = vpop.f32.mrf.mxu3  ;;  %v5972_v18 = vld [vmem:[%s10263_s3 + $0x40] sm:$0xf] }
 0x197   :  { %3288 = vmatpush.bf16.msra.mxu1 %v5617_v1  ;;  %v5825_v1 = vor.u32 %v6720_v19, %v5822_v20  ;;  %v6761_v19 = vld [vmem:[%s10263_s3 + $0x4c] sm:$0xf0]  ;;  %v6759_v20 = vld [vmem:[%s10263_s3 + $0x44] sm:$0xf] }
 0x198   :  { %3302 = vmatpush.bf16.msra.mxu2 %v5745_v17  ;;  %v6053_v17 = vor.u32 %v6781_v23, %v6052_v22  ;;  %v5973_v22 = vor.u32 %v6761_v19, %v5972_v18  ;;  %v5974_v23 = vld [vmem:[%s10263_s3 + $0x50] sm:$0xf0]  ;;  %v6772_v18 = vld [vmem:[%s10263_s3 + $0xac] sm:$0xf] }
 0x199   :  { %3316 = vmatpush.bf16.msra.mxu3 %v5873_v58  ;;  %v9618_v58 = vpop.f32.mrf.mxu2 }
 0x19a   :  { %3275 = vmatpush.bf16.msra.mxu0 %v5473_v62  ;;  %v6020_v62 = vld [vmem:[%s10263_s3 + $0xa0] sm:$0xf]  ;;  %v2988_v27 = vadd.f32 %v2987_v0, %v9618_v58 }
 0x19b   :  { %3289 = vmatpush.bf16.msra.mxu1 %v5601_v51  ;;  %v6773_v51 = vld [vmem:[%s10263_s3 + $0xac] sm:$0xf0] }
 0x19c   :  { %3303 = vmatpush.bf16.msra.mxu2 %v5729_v63  ;;  %v3013_v63 = vpop.f32.mrf.mxu1  ;;  %v6021_v3 = vor.u32 %v6773_v51, %v6020_v62  ;;  %v6751_v62 = vld [vmem:[%s10263_s3 + $0x4] sm:$0xf] }
 0x19d   :  { %3317 = vmatpush.bf16.msra.mxu3 %v5857_v2  ;;  %v3014_v24 = vadd.f32 %v3013_v63, %v3000_v12  ;;  %v6060_v63 = vld [vmem:[%s10263_s3 + $0xe8] sm:$0xf]  ;;  %v5945_v0 = vor.u32 %v6751_v62, %v5942_v50  ;;  %v5998_v62 = vld [vmem:[%s10263_s3 + $0x78] sm:$0xf0] }
 0x19e   :  { %3276 = vmatpush.bf16.msra.mxu0 %v5457_v33  ;;  %v5988_v33 = vld [vmem:[%s10263_s3 + $0x60] sm:$0xf]  ;;  %v3043_v51 = vpop.f32.mrf.mxu3 }
 0x19f   :  { %3290 = vmatpush.bf16.msra.mxu1 %v5585_v6  ;;  %v6763_v6 = vld [vmem:[%s10263_s3 + $0x64] sm:$0xf]  ;;  %v5989_v11 = vor.u32 %v6765_v31, %v5988_v33  ;;  %v6776_v33 = vld [vmem:[%s10263_s3 + $0xcc] sm:$0xf] }
 0x1a0   :  { %3304 = vmatpush.bf16.msra.mxu2 %v5713_v9  ;;  %v5990_v9 = vld [vmem:[%s10263_s3 + $0x70] sm:$0xf0] }
 0x1a1   :  { %3318 = vmatpush.bf16.msra.mxu3 %v5841_v14  ;;  %v3027_v5 = vpop.f32.mrf.mxu2  ;;  %v5993_v14 = vor.u32 %v6763_v6, %v5990_v9 }
 0x1a2   :  { %3277 = vmatpush.bf16.msra.mxu0 %v5441_v10  ;;  %v5977_v10 = vor.u32 %v6759_v20, %v5974_v23  ;;  %v3028_v30 = vadd.f32 %v3027_v5, %v3014_v24  ;;  %v6030_v24 = vld [vmem:[%s10263_s3 + $0xb8] sm:$0xf0] }
 0x1a3   :  { %3291 = vmatpush.bf16.msra.mxu1 %v5569_v21  ;;  %v3055_v21 = vpop.f32.mrf.mxu0 }
 0x1a4   :  { %3305 = vmatpush.bf16.msra.mxu2 %v5697_v42  ;;  %v3015_v44 = vpop.f32.mrf.mxu1  ;;  %v5956_v42 = vld [vmem:[%s10263_s3 + $0x20] sm:$0xf] }
 0x1a5   :  { %3319 = vmatpush.bf16.msra.mxu3 %v5825_v1  ;;  %3278 = vmatmul.bf16.vlgmr.msra.gmra.mxu0 %v7606_v36  ;;  %v6022_v36 = vld [vmem:[%s10263_s3 + $0xb0] sm:$0xf0]  ;;  %v6757_v1 = vld [vmem:[%s10263_s3 + $0x2c] sm:$0xf0] }
 0x1a6   :  { %3782 = vmatpush.bf16.msrb.mxu0 %v6053_v17  ;;  %3292 = vmatmul.bf16.vlgmr.msra.gmra.mxu1 %v7604_v35  ;;  %v6025_v2 = vor.u32 %v6771_v38, %v6022_v36  ;;  %v6004_v35 = vld [vmem:[%s10263_s3 + $0x80] sm:$0xf]  ;;  %v6755_v17 = vld [vmem:[%s10263_s3 + $0x24] sm:$0xf]  ;;  %v5957_v39 = vor.u32 %v6757_v1, %v5956_v42  ;;  %v6782_v38 = vld [vmem:[%s10263_s3 + $0xf4] sm:$0xf0]  ;;  %v3042_v36 = vadd.f32 %v3041_v16, %v3028_v30 }
 0x1a7   :  { %3306 = vmatmul.bf16.vlgmr.msra.gmra.mxu2 %v7614_v40  ;;  %v6769_v40 = vld [vmem:[%s10263_s3 + $0x8c] sm:$0xf0]  ;;  %v5961_v45 = vor.u32 %v6755_v17, %v5958_v15  ;;  %v6028_v16 = vld [vmem:[%s10263_s3 + $0xa8] sm:$0xf]  ;;  %v6768_v1 = vld [vmem:[%s10263_s3 + $0x8c] sm:$0xf] }
 0x1a8   :  { %3810 = vmatpush.bf16.msrb.mxu2 %v6057_v29  ;;  %3320 = vmatmul.bf16.vlgmr.msra.gmra.mxu3 %v7803_v25  ;;  %v6006_v25 = vld [vmem:[%s10263_s3 + $0x90] sm:$0xf0]  ;;  %v6005_v59 = vor.u32 %v6769_v40, %v6004_v35  ;;  %v6062_v35 = vld [vmem:[%s10263_s3 + $0xf8] sm:$0xf0]  ;;  %v6012_v42 = vld [vmem:[%s10263_s3 + $0x88] sm:$0xf] }
 0x1a9   :  { %v6009_v47 = vor.u32 %v6767_v54, %v6006_v25  ;;  %v3029_v26 = vpop.f32.mrf.mxu2  ;;  %v2652_v25 = vadd.f32 %v8257_v57, %v2638_v46 }
 0x1aa   :  { %3783 = vmatpush.bf16.msrb.mxu0 %v6037_v52  ;;  %v3002_v52 = vadd.f32 %v3001_v48, %v2988_v27  ;;  %v6046_v48 = vld [vmem:[%s10263_s3 + $0xd8] sm:$0xf0] }
 0x1ab   :  { %v2666_v31 = vadd.f32 %v8415_v41, %v2652_v25  ;;  %v3057_v9 = vpop.f32.mrf.mxu0  ;;  %v6774_v41 = vld [vmem:[%s10263_s3 + $0xb4] sm:$0xf0] }
 0x1ac   :  { %3811 = vmatpush.bf16.msrb.mxu2 %v6041_v61  ;;  %v3069_v29 = vpop.f32.mrf.mxu1  ;;  %v6753_v61 = vld [vmem:[%s10263_s3 + $0xc] sm:$0xf0]  ;;  %v3016_v5 = vadd.f32 %v3015_v44, %v3002_v52  ;;  %v6029_v23 = vor.u32 %v6774_v41, %v6028_v16  ;;  %v5996_v52 = vld [vmem:[%s10263_s3 + $0x68] sm:$0xf] }
 0x1ad   :  { %v5941_v58 = vor.u32 %v6753_v61, %v5940_v53  ;;  %v2680_v19 = vadd.f32 %v8423_v49, %v2666_v31  ;;  %v6770_v49 = vld [vmem:[%s10263_s3 + $0x94] sm:$0xf0]  ;;  %v6764_v61 = vld [vmem:[%s10263_s3 + $0x6c] sm:$0xf]  ;;  %v5948_v41 = vld [vmem:[%s10263_s3 + $0x8] sm:$0xf] }
 0x1ae   :  { %3784 = vmatpush.bf16.msrb.mxu0 %v6021_v3  ;;  %v6061_v3 = vor.u32 %v6782_v38, %v6060_v63  ;;  %v3030_v6 = vadd.f32 %v3029_v26, %v3016_v5  ;;  %v6766_v53 = vld [vmem:[%s10263_s3 + $0x74] sm:$0xf0]  ;;  %v6001_v63 = vor.u32 %v6764_v61, %v5998_v62  ;;  %v5982_v5 = vld [vmem:[%s10263_s3 + $0x58] sm:$0xf0]  ;;  %v6164_v61 = vld [vmem:[%s10263_s3 + $0x1c0] sm:$0xf] }
 0x1af   :  { %v2694_v26 = vadd.f32 %v8462_v8, %v2680_v19  ;;  %v6014_v8 = vld [vmem:[%s10263_s3 + $0x98] sm:$0xf0]  ;;  %v6752_v19 = vld [vmem:[%s10263_s3 + $0xc] sm:$0xf]  ;;  %v6809_v62 = vld [vmem:[%s10263_s3 + $0x1cc] sm:$0xf0] }
 0x1b0   :  { %3812 = vmatpush.bf16.msrb.mxu2 %v6025_v2  ;;  %v6780_v2 = vld [vmem:[%s10263_s3 + $0xec] sm:$0xf]  ;;  %v3044_v20 = vadd.f32 %v3043_v51, %v3030_v6  ;;  %v6017_v27 = vor.u32 %v6768_v1, %v6014_v8 }
 0x1b1   :  { %v3083_v40 = vpop.f32.mrf.mxu2  ;;  %v6065_v54 = vor.u32 %v6780_v2, %v6062_v35  ;;  %v2708_v30 = vadd.f32 %v8473_v13, %v2694_v26 }
 0x1b2   :  { %3785 = vmatpush.bf16.msrb.mxu0 %v6005_v59  ;;  %v3056_v59 = vadd.f32 %v3055_v21, %v3042_v36  ;;  %v3058_v28 = vadd.f32 %v3057_v9, %v3044_v20  ;;  %v6756_v9 = vld [vmem:[%s10263_s3 + $0x2c] sm:$0xf] }
 0x1b3   :  { %v2722_v13 = vadd.f32 %v8622_v7, %v2708_v30  ;;  %v6760_v7 = vld [vmem:[%s10263_s3 + $0x4c] sm:$0xf]  ;;  %v6180_v30 = vld [vmem:[%s10263_s3 + $0x1e0] sm:$0xf] }
 0x1b4   :  { %3813 = vmatpush.bf16.msrb.mxu2 %v6009_v47  ;;  %v6778_v47 = vld [vmem:[%s10263_s3 + $0xd4] sm:$0xf0]  ;;  %v3071_v44 = vpop.f32.mrf.mxu1  ;;  %v3070_v12 = vadd.f32 %v3069_v29, %v3056_v59  ;;  %v9786_v59 = vpop.permute.xlu0 %3336 }
 0x1b5   :  { %v6045_v57 = vor.u32 %v6778_v47, %v6044_v43  ;;  %v2736_v2 = vadd.f32 %v8667_v34, %v2722_v13  ;;  %v5985_v43 = vor.u32 %v6760_v7, %v5982_v5  ;;  %v5964_v47 = vld [vmem:[%s10263_s3 + $0x28] sm:$0xf]  ;;  %v6758_v34 = vld [vmem:[%s10263_s3 + $0x34] sm:$0xf0]  ;;  %v6150_v7 = vld [vmem:[%s10263_s3 + $0x1b0] sm:$0xf0] }
 0x1b6   :  { %3786 = vmatpush.bf16.msrb.mxu0 %v5989_v11  ;;  %v6049_v11 = vor.u32 %v6776_v33, %v6046_v48  ;;  %v6801_v5 = vld [vmem:[%s10263_s3 + $0x18c] sm:$0xf0] }
 0x1b7   :  { %v2750_v33 = vadd.f32 %v8669_v37, %v2736_v2 }
 0x1b8   :  { %3814 = vmatpush.bf16.msrb.mxu2 %v5993_v14  ;;  %v3097_v14 = vpop.f32.mrf.mxu3 }
 0x1b9   :  { %v3085_v21 = vpop.f32.mrf.mxu2 }
 0x1ba   :  { %3787 = vmatpush.bf16.msrb.mxu0 %v5973_v22  ;;  %v3084_v22 = vadd.f32 %v3083_v40, %v3070_v12 }
 0x1bc   :  { %3815 = vmatpush.bf16.msrb.mxu2 %v5977_v10  ;;  %v6033_v10 = vor.u32 %v6772_v18, %v6030_v24  ;;  %v3098_v17 = vadd.f32 %v3097_v14, %v3084_v22  ;;  %v2764_v14 = vadd.f32 %v8686_v55, %v2750_v33  ;;  %v6754_v18 = vld [vmem:[%s10263_s3 + $0x14] sm:$0xf0]  ;;  %v6134_v33 = vld [vmem:[%s10263_s3 + $0x190] sm:$0xf0] }
 0x1bd   :  { %v5949_v55 = vor.u32 %v6754_v18, %v5948_v41  ;;  %v6793_v41 = vld [vmem:[%s10263_s3 + $0x14c] sm:$0xf0]  ;;  %v6791_v18 = vld [vmem:[%s10263_s3 + $0x144] sm:$0xf] }
 0x1be   :  { %3788 = vmatpush.bf16.msrb.mxu0 %v5957_v39  ;;  %v6013_v39 = vor.u32 %v6770_v49, %v6012_v42  ;;  %v2778_v20 = vadd.f32 %v8831_v60, %v2764_v14 }
 0x1c0   :  { %3816 = vmatpush.bf16.msrb.mxu2 %v5961_v45  ;;  %v3072_v45 = vadd.f32 %v3071_v44, %v3058_v28  ;;  %v3099_v50 = vpop.f32.mrf.mxu3  ;;  %v9817_v28 = vpop.permute.xlu0 %3341 }
 0x1c2   :  { %3789 = vmatpush.bf16.msrb.mxu0 %v5941_v58  ;;  %v3111_v29 = vpop.f32.mrf.mxu0  ;;  %v3086_v51 = vadd.f32 %v3085_v21, %v3072_v45  ;;  %v5997_v58 = vor.u32 %v6766_v53, %v5996_v52  ;;  %v6813_v45 = vld [vmem:[%s10263_s3 + $0x1ec] sm:$0xf0]  ;;  %v6182_v53 = vld [vmem:[%s10263_s3 + $0x1f0] sm:$0xf0] }
 0x1c3   :  { %v3125_v15 = vpop.f32.mrf.mxu1  ;;  %v3112_v46 = vadd.f32 %v3111_v29, %v3098_v17  ;;  %v6181_v52 = vor.u32 %v6813_v45, %v6180_v30  ;;  %v6785_v30 = vld [vmem:[%s10263_s3 + $0x10c] sm:$0xf0]  ;;  %v6783_v45 = vld [vmem:[%s10263_s3 + $0x104] sm:$0xf] }
 0x1c4   :  { %3817 = vmatpush.bf16.msrb.mxu2 %v5945_v0  ;;  %v5980_v0 = vld [vmem:[%s10263_s3 + $0x48] sm:$0xf]  ;;  %v3100_v35 = vadd.f32 %v3099_v50, %v3086_v51  ;;  %v6807_v51 = vld [vmem:[%s10263_s3 + $0x1c4] sm:$0xf]  ;;  %v6165_v50 = vor.u32 %v6809_v62, %v6164_v61  ;;  %v6814_v61 = vld [vmem:[%s10263_s3 + $0x1f4] sm:$0xf0] }
 0x1c5   :  { %v3126_v38 = vadd.f32 %v3125_v15, %v3112_v46  ;;  %v6811_v46 = vld [vmem:[%s10263_s3 + $0x1e4] sm:$0xf]  ;;  %3796 = vmatpush.bf16.msrb.mxu1 %v6181_v52  ;;  %v6070_v52 = vld [vmem:[%s10263_s3 + $0x110] sm:$0xf0] }
 0x1c6   :  { %3838 = vmatpush.bf16.msra.mxu0 %v6061_v3  ;;  %v6762_v3 = vld [vmem:[%s10263_s3 + $0x54] sm:$0xf0]  ;;  %v6185_v13 = vor.u32 %v6811_v46, %v6182_v53  ;;  %v6188_v53 = vld [vmem:[%s10263_s3 + $0x1e8] sm:$0xf] }
 0x1c7   :  { %v5981_v25 = vor.u32 %v6762_v3, %v5980_v0  ;;  %v6803_v3 = vld [vmem:[%s10263_s3 + $0x1a4] sm:$0xf] }
 0x1c8   :  { %3866 = vmatpush.bf16.msra.mxu2 %v6065_v54  ;;  %3824 = vmatpush.bf16.msrb.mxu3 %v6185_v13  ;;  %v6073_v13 = vor.u32 %v6783_v45, %v6070_v52  ;;  %v6110_v52 = vld [vmem:[%s10263_s3 + $0x158] sm:$0xf0] }
 0x1c9   :  { %3797 = vmatpush.bf16.msrb.mxu1 %v6165_v50  ;;  %v6190_v50 = vld [vmem:[%s10263_s3 + $0x1f8] sm:$0xf0] }
 0x1ca   :  { %3839 = vmatpush.bf16.msra.mxu0 %v6045_v57  ;;  %v3139_v36 = vpop.f32.mrf.mxu2  ;;  %v3113_v54 = vpop.f32.mrf.mxu0  ;;  %v5966_v57 = vld [vmem:[%s10263_s3 + $0x38] sm:$0xf0] }
 0x1cb   :  { %v3140_v40 = vadd.f32 %v3139_v36, %v3126_v38  ;;  %v3114_v6 = vadd.f32 %v3113_v54, %v3100_v35  ;;  %v3127_v48 = vpop.f32.mrf.mxu1  ;;  %v5969_v12 = vor.u32 %v6756_v9, %v5966_v57  ;;  %v6805_v38 = vld [vmem:[%s10263_s3 + $0x1ac] sm:$0xf0]  ;;  %v6116_v57 = vld [vmem:[%s10263_s3 + $0x160] sm:$0xf] }
 0x1cc   :  { %3867 = vmatpush.bf16.msra.mxu2 %v6049_v11  ;;  %v5965_v11 = vor.u32 %v6758_v34, %v5964_v47 }
 0x1cd   :  { %v3326_v31 = vmax.f32 %v8689_v56, %v3140_v40  ;;  %v3128_v37 = vadd.f32 %v3127_v48, %v3114_v6  ;;  %v6153_v40 = vor.u32 %v6803_v3, %v6150_v7  ;;  %v6797_v48 = vld [vmem:[%s10263_s3 + $0x16c] sm:$0xf0]  ;;  %v6172_v7 = vld [vmem:[%s10263_s3 + $0x1c8] sm:$0xf] }
 0x1ce   :  { %3840 = vmatpush.bf16.msra.mxu0 %v6029_v23  ;;  %v5950_v23 = vld [vmem:[%s10263_s3 + $0x18] sm:$0xf0] }
 0x1cf   :  { %v3330_v44 = vand.u32 2147483647, %v3326_v31  ;;  %v5953_v24 = vor.u32 %v6752_v19, %v5950_v23 }
 0x1d0   :  { %3868 = vmatpush.bf16.msra.mxu2 %v6033_v10 }
 0x1d1   :  { %v3344_v56 = vmul.f32 %v9786_v59, %v3330_v44  ;;  %v6795_v44 = vld [vmem:[%s10263_s3 + $0x164] sm:$0xf] }
 0x1d2   :  { %3841 = vmatpush.bf16.msra.mxu0 %v6013_v39  ;;  %v3141_v16 = vpop.f32.mrf.mxu2 }
 0x1d3   :  { %v3142_v22 = vadd.f32 %v3141_v16, %v3128_v37  ;;  %v3348_v10 = vadd.f32 1e-06, %v3344_v56  ;;  %v6100_v16 = vld [vmem:[%s10263_s3 + $0x140] sm:$0xf] }
 0x1d4   :  { %3869 = vmatpush.bf16.msra.mxu2 %v6017_v27  ;;  %v3153_v27 = vpop.f32.mrf.mxu3  ;;  %v6101_v19 = vor.u32 %v6793_v41, %v6100_v16  ;;  %v6800_v16 = vld [vmem:[%s10263_s3 + $0x18c] sm:$0xf] }
 0x1d5   :  { %v3328_v26 = vmax.f32 %v2778_v20, %v3142_v22  ;;  %v3352_v42 = vmul.f32 %v3348_v10, %v3326_v31  ;;  %v6102_v20 = vld [vmem:[%s10263_s3 + $0x150] sm:$0xf0] }
 0x1d6   :  { %3842 = vmatpush.bf16.msra.mxu0 %v5997_v58  ;;  %v6166_v58 = vld [vmem:[%s10263_s3 + $0x1d0] sm:$0xf0] }
 0x1d7   :  { %v3332_v21 = vand.u32 2147483647, %v3328_v26  ;;  %v3356_v1 = vmul.f32 25.253813, %v3352_v42  ;;  %v6169_v0 = vor.u32 %v6807_v51, %v6166_v58  ;;  %v6787_v42 = vld [vmem:[%s10263_s3 + $0x124] sm:$0xf]  ;;  %v6189_v51 = vor.u32 %v6814_v61, %v6188_v53 }
 0x1d8   :  { %3870 = vmatpush.bf16.msra.mxu2 %v6001_v63  ;;  %v6148_v63 = vld [vmem:[%s10263_s3 + $0x1a0] sm:$0xf]  ;;  %v6812_v58 = vld [vmem:[%s10263_s3 + $0x1ec] sm:$0xf]  ;;  %v6092_v53 = vld [vmem:[%s10263_s3 + $0x128] sm:$0xf] }
 0x1d9   :  { %v3346_v49 = vmul.f32 %v9817_v28, %v3332_v21  ;;  %v9820_v39 = vmax.f32 %v3356_v1, 0.0  ;;  %v6149_v35 = vor.u32 %v6805_v38, %v6148_v63  ;;  %3825 = vmatpush.bf16.msrb.mxu3 %v6169_v0  ;;  %v6789_v21 = vld [vmem:[%s10263_s3 + $0x12c] sm:$0xf0]  ;;  %v6193_v38 = vor.u32 %v6812_v58, %v6190_v50  ;;  %v6790_v61 = vld [vmem:[%s10263_s3 + $0x134] sm:$0xf0] }
 0x1da   :  { %3843 = vmatpush.bf16.msra.mxu0 %v5981_v25  ;;  %v6132_v25 = vld [vmem:[%s10263_s3 + $0x180] sm:$0xf] }
 0x1db   :  { %v3350_v60 = vadd.f32 1e-06, %v3346_v49  ;;  %3798 = vmatpush.bf16.msrb.mxu1 %v6149_v35  ;;  %v6133_v34 = vor.u32 %v6801_v5, %v6132_v25  ;;  %v6808_v35 = vld [vmem:[%s10263_s3 + $0x1cc] sm:$0xf]  ;;  %v6174_v5 = vld [vmem:[%s10263_s3 + $0x1d8] sm:$0xf0] }
 0x1dc   :  { %3871 = vmatpush.bf16.msra.mxu2 %v5985_v43  ;;  %v3155_v36 = vpop.f32.mrf.mxu3  ;;  %v6799_v43 = vld [vmem:[%s10263_s3 + $0x184] sm:$0xf] }
 0x1dd   :  { %v3354_v17 = vmul.f32 %v3350_v60, %v3328_v26  ;;  %3826 = vmatpush.bf16.msrb.mxu3 %v6153_v40  ;;  %v6137_v6 = vor.u32 %v6799_v43, %v6134_v33  ;;  %v6084_v26 = vld [vmem:[%s10263_s3 + $0x120] sm:$0xf]  ;;  %v6086_v60 = vld [vmem:[%s10263_s3 + $0x130] sm:$0xf0]  ;;  %v6177_v43 = vor.u32 %v6808_v35, %v6174_v5  ;;  %v6156_v33 = vld [vmem:[%s10263_s3 + $0x1a8] sm:$0xf] }
 0x1de   :  { %3844 = vmatpush.bf16.msra.mxu0 %v5965_v11  ;;  %v6117_v11 = vor.u32 %v6797_v48, %v6116_v57  ;;  %v6085_v49 = vor.u32 %v6789_v21, %v6084_v26  ;;  %v6124_v26 = vld [vmem:[%s10263_s3 + $0x168] sm:$0xf]  ;;  %v6798_v21 = vld [vmem:[%s10263_s3 + $0x174] sm:$0xf0] }
 0x1df   :  { %v3358_v29 = vmul.f32 25.253813, %v3354_v17  ;;  %3799 = vmatpush.bf16.msrb.mxu1 %v6133_v34  ;;  %v6089_v17 = vor.u32 %v6787_v42, %v6086_v60  ;;  %v6796_v42 = vld [vmem:[%s10263_s3 + $0x16c] sm:$0xf]  ;;  %v6125_v60 = vor.u32 %v6798_v21, %v6124_v26  ;;  %v6786_v35 = vld [vmem:[%s10263_s3 + $0x114] sm:$0xf0] }
 0x1e0   :  { %3872 = vmatpush.bf16.msra.mxu2 %v5969_v12  ;;  %v6118_v12 = vld [vmem:[%s10263_s3 + $0x170] sm:$0xf0]  ;;  %v6254_v26 = vld [vmem:[%s10264_s4 + $0x78] sm:$0xf0] }
 0x1e1   :  { %v9822_v8 = vmax.f32 %v3358_v29, 0.0  ;;  %3827 = vmatpush.bf16.msrb.mxu3 %v6137_v6  ;;  %v6121_v37 = vor.u32 %v6795_v44, %v6118_v12  ;;  %v6804_v6 = vld [vmem:[%s10263_s3 + $0x1ac] sm:$0xf]  ;;  %v6158_v44 = vld [vmem:[%s10263_s3 + $0x1b8] sm:$0xf0] }
 0x1e2   :  { %3845 = vmatpush.bf16.msra.mxu0 %v5949_v55  ;;  %v3167_v2 = vpop.f32.mrf.mxu0  ;;  %v6105_v55 = vor.u32 %v6791_v18, %v6102_v20 }
 0x1e3   :  { %v3396_v15 = vpack.c.bf16 %v9822_v8, %v9820_v39  ;;  %v3181_v54 = vpop.f32.mrf.mxu1  ;;  %v3168_v14 = vadd.f32 %v3167_v2, %v3153_v27  ;;  %3800 = vmatpush.bf16.msrb.mxu1 %v6117_v11  ;;  %v6068_v27 = vld [vmem:[%s10263_s3 + $0x100] sm:$0xf]  ;;  %v6810_v2 = vld [vmem:[%s10263_s3 + $0x1d4] sm:$0xf0]  ;;  %v6161_v11 = vor.u32 %v6804_v6, %v6158_v44 }
 0x1e4   :  { %3873 = vmatpush.bf16.msra.mxu2 %v5953_v24  ;;  %v6069_v46 = vor.u32 %v6785_v30, %v6068_v27  ;;  %v6173_v25 = vor.u32 %v6810_v2, %v6172_v7  ;;  %v6794_v27 = vld [vmem:[%s10263_s3 + $0x154] sm:$0xf0]  ;;  %v6792_v30 = vld [vmem:[%s10263_s3 + $0x14c] sm:$0xf]  ;;  %v6076_v2 = vld [vmem:[%s10263_s3 + $0x108] sm:$0xf] }
 0x1e5   :  { %3790 = vmatmul.bf16.vlgmr.msrb.gmra.mxu0 %v3396_v15  ;;  %3818 = vmatmul.bf16.vlgmr.msrb.gmra.mxu2 %v3396_v15  ;;  %v3182_v22 = vadd.f32 %v3181_v54, %v3168_v14  ;;  %v6113_v50 = vor.u32 %v6792_v30, %v6110_v52  ;;  %v6846_v30 = vld [vmem:[%s10264_s4 + $0xf4] sm:$0xf0]  ;;  %v6318_v52 = vld [vmem:[%s10264_s4 + $0xf8] sm:$0xf0] }
 0x1e6   :  { %3828 = vmatpush.bf16.msrb.mxu3 %v6121_v37  ;;  %v6140_v37 = vld [vmem:[%s10263_s3 + $0x188] sm:$0xf] }
 0x1e7   :  { %3801 = vmatpush.bf16.msrb.mxu1 %v6101_v19 }
 0x1ea   :  { %v3195_v47 = vpop.f32.mrf.mxu2  ;;  %v3169_v9 = vpop.f32.mrf.mxu0  ;;  %3829 = vmatpush.bf16.msrb.mxu3 %v6105_v55 }
 0x1eb   :  { %v3209_v31 = vpop.f32.mrf.mxu3  ;;  %v3183_v56 = vpop.f32.mrf.mxu1  ;;  %v3196_v1 = vadd.f32 %v3195_v47, %v3182_v22  ;;  %3802 = vmatpush.bf16.msrb.mxu1 %v6085_v49  ;;  %v6142_v22 = vld [vmem:[%s10263_s3 + $0x198] sm:$0xf0] }
 0x1ec   :  { %v6145_v55 = vor.u32 %v6800_v16, %v6142_v22 }
 0x1ed   :  { %v3210_v62 = vadd.f32 %v3209_v31, %v3196_v1  ;;  %v6806_v31 = vld [vmem:[%s10263_s3 + $0x1b4] sm:$0xf0]  ;;  %v6126_v1 = vld [vmem:[%s10263_s3 + $0x178] sm:$0xf0] }
 0x1ee   :  { %3830 = vmatpush.bf16.msrb.mxu3 %v6089_v17  ;;  %v6157_v48 = vor.u32 %v6806_v31, %v6156_v33  ;;  %v6129_v17 = vor.u32 %v6796_v42, %v6126_v1  ;;  %v6244_v42 = vld [vmem:[%s10264_s4 + $0x60] sm:$0xf] }
 0x1ef   :  { %3803 = vmatpush.bf16.msrb.mxu1 %v6069_v46 }
 0x1f2   :  { %v3197_v23 = vpop.f32.mrf.mxu2  ;;  %3831 = vmatpush.bf16.msrb.mxu3 %v6073_v13 }
 0x1f3   :  { %v3211_v24 = vpop.f32.mrf.mxu3  ;;  %3852 = vmatpush.bf16.msra.mxu1 %v6189_v51 }
 0x1f5   :  { %3846 = vmatmul.bf16.vlgmr.msra.gmra.mxu0 %v3396_v15  ;;  %3874 = vmatmul.bf16.vlgmr.msra.gmra.mxu2 %v3396_v15  ;;  %v3170_v15 = vadd.f32 %v3169_v9, %v3155_v36 }
 0x1f6   :  { %3880 = vmatpush.bf16.msra.mxu3 %v6193_v38  ;;  %v6094_v38 = vld [vmem:[%s10263_s3 + $0x138] sm:$0xf0] }
 0x1f7   :  { %v3184_v36 = vadd.f32 %v3183_v56, %v3170_v15  ;;  %3853 = vmatpush.bf16.msra.mxu1 %v6173_v25  ;;  %v6802_v56 = vld [vmem:[%s10263_s3 + $0x194] sm:$0xf0]  ;;  %v6108_v15 = vld [vmem:[%s10263_s3 + $0x148] sm:$0xf]  ;;  %v6078_v25 = vld [vmem:[%s10263_s3 + $0x118] sm:$0xf0] }
 0x1f8   :  { %v6141_v20 = vor.u32 %v6802_v56, %v6140_v37  ;;  %v6109_v46 = vor.u32 %v6794_v27, %v6108_v15  ;;  %v6316_v27 = vld [vmem:[%s10264_s4 + $0xf0] sm:$0xf] }
 0x1f9   :  { %v3198_v40 = vadd.f32 %v3197_v23, %v3184_v36 }
 0x1fa   :  { %3881 = vmatpush.bf16.msra.mxu3 %v6177_v43 }
 0x1fb   :  { %v3212_v9 = vadd.f32 %v3211_v24, %v3198_v40  ;;  %3854 = vmatpush.bf16.msra.mxu1 %v6157_v48 }
 0x1fe   :  { %3882 = vmatpush.bf16.msra.mxu3 %v6161_v11 }
 0x1ff   :  { %3855 = vmatpush.bf16.msra.mxu1 %v6141_v20 }
 0x202   :  { %v3223_v10 = vpop.f32.mrf.mxu0  ;;  %3883 = vmatpush.bf16.msra.mxu3 %v6145_v55 }
 0x203   :  { %v3237_v29 = vpop.f32.mrf.mxu1  ;;  %v3224_v0 = vadd.f32 %v3223_v10, %v3210_v62  ;;  %3856 = vmatpush.bf16.msra.mxu1 %v6125_v60  ;;  %v6827_v60 = vld [vmem:[%s10264_s4 + $0x64] sm:$0xf] }
 0x205   :  { %v3238_v47 = vadd.f32 %v3237_v29, %v3224_v0 }
 0x206   :  { %3884 = vmatpush.bf16.msra.mxu3 %v6129_v17  ;;  %v6246_v17 = vld [vmem:[%s10264_s4 + $0x68] sm:$0xf0] }
 0x207   :  { %3857 = vmatpush.bf16.msra.mxu1 %v6109_v46  ;;  %v6249_v15 = vor.u32 %v6827_v60, %v6246_v17  ;;  %v6317_v46 = vor.u32 %v6846_v30, %v6316_v27  ;;  %v6286_v60 = vld [vmem:[%s10264_s4 + $0xb8] sm:$0xf0]  ;;  %v6817_v27 = vld [vmem:[%s10264_s4 + $0x14] sm:$0xf] }
 0x20a   :  { %v3251_v63 = vpop.f32.mrf.mxu2  ;;  %v3225_v54 = vpop.f32.mrf.mxu0  ;;  %3885 = vmatpush.bf16.msra.mxu3 %v6113_v50 }
 0x20b   :  { %v3265_v3 = vpop.f32.mrf.mxu3  ;;  %v3239_v34 = vpop.f32.mrf.mxu1  ;;  %v3252_v57 = vadd.f32 %v3251_v63, %v3238_v47  ;;  %v3226_v12 = vadd.f32 %v3225_v54, %v3212_v9  ;;  %v6788_v63 = vld [vmem:[%s10263_s3 + $0x12c] sm:$0xf] }
 0x20c   :  { %v6097_v7 = vor.u32 %v6788_v63, %v6094_v38  ;;  %v6784_v54 = vld [vmem:[%s10263_s3 + $0x10c] sm:$0xf]  ;;  %v6308_v63 = vld [vmem:[%s10264_s4 + $0xe0] sm:$0xf]  ;;  %v6844_v38 = vld [vmem:[%s10264_s4 + $0xe4] sm:$0xf0] }
 0x20d   :  { %v3266_v41 = vadd.f32 %v3265_v3, %v3252_v57  ;;  %v3240_v23 = vadd.f32 %v3239_v34, %v3226_v12  ;;  %v6093_v3 = vor.u32 %v6790_v61, %v6092_v53  ;;  %v6077_v34 = vor.u32 %v6786_v35, %v6076_v2  ;;  %v6236_v61 = vld [vmem:[%s10264_s4 + $0x50] sm:$0xf]  ;;  %v6228_v35 = vld [vmem:[%s10264_s4 + $0x40] sm:$0xf] }
 0x20e   :  { %3886 = vmatpush.bf16.msra.mxu3 %v6097_v7  ;;  %v6081_v31 = vor.u32 %v6784_v54, %v6078_v25  ;;  %v6310_v7 = vld [vmem:[%s10264_s4 + $0xe8] sm:$0xf0]  ;;  %v6823_v54 = vld [vmem:[%s10264_s4 + $0x44] sm:$0xf] }
 0x20f   :  { %3858 = vmatpush.bf16.msra.mxu1 %v6093_v3  ;;  %v6309_v3 = vor.u32 %v6844_v38, %v6308_v63  ;;  %v6196_v38 = vld [vmem:[%s10264_s4] sm:$0xf] }
 0x212   :  { %v3253_v14 = vpop.f32.mrf.mxu2  ;;  %3887 = vmatpush.bf16.msra.mxu3 %v6081_v31 }
 0x213   :  { %v3267_v18 = vpop.f32.mrf.mxu3  ;;  %v3254_v49 = vadd.f32 %v3253_v14, %v3240_v23  ;;  %3859 = vmatpush.bf16.msra.mxu1 %v6077_v34  ;;  %v3366_v23 = vmul.f32 %v9822_v8, %v9822_v8  ;;  %v6842_v34 = vld [vmem:[%s10264_s4 + $0xd4] sm:$0xf0] }
 0x215   :  { %v3268_v62 = vadd.f32 %v3267_v18, %v3254_v49  ;;  %v6828_v49 = vld [vmem:[%s10264_s4 + $0x64] sm:$0xf0] }
 0x216   :  { %v6245_v1 = vor.u32 %v6828_v49, %v6244_v42  ;;  %v6837_v49 = vld [vmem:[%s10264_s4 + $0xb4] sm:$0xf] }
 0x217   :  { %v6289_v17 = vor.u32 %v6837_v49, %v6286_v60 }
 0x222   :  { %v3279_v19 = vpop.f32.mrf.mxu0 }
 0x223   :  { %v3280_v24 = vadd.f32 %v3279_v19, %v3266_v41  ;;  %v3293_v10 = vpop.f32.mrf.mxu1  ;;  %v3364_v41 = vmul.f32 %v9820_v39, %v9820_v39  ;;  %v6830_v39 = vld [vmem:[%s10264_s4 + $0x74] sm:$0xf0] }
 0x225   :  { %v3294_v29 = vadd.f32 %v3293_v10, %v3280_v24  ;;  %v6829_v10 = vld [vmem:[%s10264_s4 + $0x74] sm:$0xf] }
 0x226   :  { %v6257_v21 = vor.u32 %v6829_v10, %v6254_v26  ;;  %v6284_v26 = vld [vmem:[%s10264_s4 + $0xb0] sm:$0xf] }
 0x228   :  { %4176 = vmatpush.bf16.msrb.mxu2 %v6257_v21  ;;  %v6838_v21 = vld [vmem:[%s10264_s4 + $0xb4] sm:$0xf0] }
 0x229   :  { %v6285_v42 = vor.u32 %v6838_v21, %v6284_v26 }
 0x22a   :  { %v3307_v45 = vpop.f32.mrf.mxu2  ;;  %v3281_v58 = vpop.f32.mrf.mxu0 }
 0x22b   :  { %v3308_v13 = vadd.f32 %v3307_v45, %v3294_v29  ;;  %v3321_v51 = vpop.f32.mrf.mxu3  ;;  %v3282_v0 = vadd.f32 %v3281_v58, %v3268_v62  ;;  %v3295_v5 = vpop.f32.mrf.mxu1  ;;  %v6845_v45 = vld [vmem:[%s10264_s4 + $0xf4] sm:$0xf]  ;;  %v6826_v62 = vld [vmem:[%s10264_s4 + $0x54] sm:$0xf0]  ;;  %v6238_v58 = vld [vmem:[%s10264_s4 + $0x58] sm:$0xf0] }
 0x22c   :  { %4177 = vmatpush.bf16.msrb.mxu2 %v6249_v15  ;;  %v6321_v53 = vor.u32 %v6845_v45, %v6318_v52  ;;  %v6818_v15 = vld [vmem:[%s10264_s4 + $0x14] sm:$0xf0]  ;;  %v6206_v45 = vld [vmem:[%s10264_s4 + $0x18] sm:$0xf0] }
 0x22d   :  { %v3322_v36 = vadd.f32 %v3321_v51, %v3308_v13  ;;  %v3296_v47 = vadd.f32 %v3295_v5, %v3282_v0  ;;  %v6825_v13 = vld [vmem:[%s10264_s4 + $0x54] sm:$0xf]  ;;  %v6237_v51 = vor.u32 %v6826_v62, %v6236_v61  ;;  %v6230_v5 = vld [vmem:[%s10264_s4 + $0x48] sm:$0xf0]  ;;  %v6209_v52 = vor.u32 %v6817_v27, %v6206_v45  ;;  %v6836_v61 = vld [vmem:[%s10264_s4 + $0xa4] sm:$0xf0] }
 0x22e   :  { %v6241_v50 = vor.u32 %v6825_v13, %v6238_v58  ;;  %v6835_v62 = vld [vmem:[%s10264_s4 + $0xa4] sm:$0xf] }
 0x22f   :  { %v3327_v40 = vmax.f32 %v9310_v4, %v3322_v36  ;;  %v6843_v36 = vld [vmem:[%s10264_s4 + $0xe4] sm:$0xf] }
 0x230   :  { %4178 = vmatpush.bf16.msrb.mxu2 %v6241_v50  ;;  %v6313_v2 = vor.u32 %v6843_v36, %v6310_v7  ;;  %v6816_v36 = vld [vmem:[%s10264_s4 + $0x4] sm:$0xf0] }
 0x231   :  { %v3331_v43 = vand.u32 2147483647, %v3327_v40  ;;  %v6197_v7 = vor.u32 %v6816_v36, %v6196_v38 }
 0x232   :  { %v3309_v33 = vpop.f32.mrf.mxu2 }
 0x233   :  { %v3345_v6 = vmul.f32 %v9786_v59, %v3331_v43  ;;  %v3310_v9 = vadd.f32 %v3309_v33, %v3296_v47  ;;  %v3323_v4 = vpop.f32.mrf.mxu3  ;;  %v6233_v43 = vor.u32 %v6823_v54, %v6230_v5  ;;  %v6300_v47 = vld [vmem:[%s10264_s4 + $0xd0] sm:$0xf]  ;;  %v6841_v33 = vld [vmem:[%s10264_s4 + $0xd4] sm:$0xf]  ;;  %v6834_v5 = vld [vmem:[%s10264_s4 + $0x94] sm:$0xf0] }
 0x234   :  { %v6301_v31 = vor.u32 %v6842_v34, %v6300_v47  ;;  %v6833_v47 = vld [vmem:[%s10264_s4 + $0x94] sm:$0xf]  ;;  %v6270_v34 = vld [vmem:[%s10264_s4 + $0x98] sm:$0xf0] }
 0x235   :  { %v3349_v57 = vadd.f32 1e-06, %v3345_v6  ;;  %v3324_v48 = vadd.f32 %v3323_v4, %v3310_v9  ;;  %v6302_v6 = vld [vmem:[%s10264_s4 + $0xd8] sm:$0xf0]  ;;  %4179 = vmatpush.bf16.msrb.mxu2 %v6233_v43 }
 0x237   :  { %v3353_v44 = vmul.f32 %v3349_v57, %v3327_v40  ;;  %v3329_v11 = vmax.f32 %v9361_v32, %v3324_v48  ;;  %v6824_v40 = vld [vmem:[%s10264_s4 + $0x44] sm:$0xf0]  ;;  %v6305_v57 = vor.u32 %v6841_v33, %v6302_v6  ;;  %v6220_v48 = vld [vmem:[%s10264_s4 + $0x30] sm:$0xf] }
 0x238   :  { %v6229_v25 = vor.u32 %v6824_v40, %v6228_v35  ;;  %v6198_v35 = vld [vmem:[%s10264_s4 + $0x8] sm:$0xf0] }
 0x239   :  { %v3333_v12 = vand.u32 2147483647, %v3329_v11  ;;  %v3357_v14 = vmul.f32 25.253813, %v3353_v44  ;;  %v6822_v44 = vld [vmem:[%s10264_s4 + $0x34] sm:$0xf0] }
 0x23b   :  { %v3347_v37 = vmul.f32 %v9817_v28, %v3333_v12  ;;  %v3361_v56 = vmax.f32 %v3357_v14, 0.0  ;;  %v6252_v28 = vld [vmem:[%s10264_s4 + $0x70] sm:$0xf]  ;;  %v6221_v12 = vor.u32 %v6822_v44, %v6220_v48  ;;  %v6222_v14 = vld [vmem:[%s10264_s4 + $0x38] sm:$0xf0] }
 0x23c   :  { %v6253_v8 = vor.u32 %v6830_v39, %v6252_v28  ;;  %v6214_v28 = vld [vmem:[%s10264_s4 + $0x28] sm:$0xf0]  ;;  %v6832_v48 = vld [vmem:[%s10264_s4 + $0x84] sm:$0xf0]  ;;  %v6831_v44 = vld [vmem:[%s10264_s4 + $0x84] sm:$0xf] }
 0x23d   :  { %v3351_v16 = vadd.f32 1e-06, %v3347_v37  ;;  %v3365_v18 = vmul.f32 %v3361_v56, %v3361_v56 }
 0x23e   :  { %4148 = vmatpush.bf16.msrb.mxu0 %v6253_v8 }
 0x23f   :  { %v3355_v59 = vmul.f32 %v3351_v16, %v3329_v11  ;;  %v3368_v19 = vadd.f32 %v3365_v18, %v3364_v41  ;;  %v6821_v11 = vld [vmem:[%s10264_s4 + $0x34] sm:$0xf]  ;;  %v6840_v16 = vld [vmem:[%s10264_s4 + $0xc4] sm:$0xf0]  ;;  %v6839_v41 = vld [vmem:[%s10264_s4 + $0xc4] sm:$0xf] }
 0x240   :  { %v6225_v37 = vor.u32 %v6821_v11, %v6222_v14 }
 0x241   :  { %v3359_v20 = vmul.f32 25.253813, %v3355_v59  ;;  %3369 = vadd.xlane.f32.xlu1 %v3368_v19  ;;  %v6294_v19 = vld [vmem:[%s10264_s4 + $0xc8] sm:$0xf0] }
 0x242   :  { %4149 = vmatpush.bf16.msrb.mxu0 %v6245_v1  ;;  %4180 = vmatpush.bf16.msrb.mxu2 %v6225_v37 }
 0x243   :  { %v3363_v22 = vmax.f32 %v3359_v20, 0.0  ;;  %v6297_v20 = vor.u32 %v6839_v41, %v6294_v19 }
 0x245   :  { %v3397_v55 = vpack.c.bf16 %v3363_v22, %v3361_v56  ;;  %v3367_v32 = vmul.f32 %v3363_v22, %v3363_v22  ;;  %v6292_v56 = vld [vmem:[%s10264_s4 + $0xc0] sm:$0xf] }
 0x246   :  { %4150 = vmatpush.bf16.msrb.mxu0 %v6237_v51  ;;  %v6293_v59 = vor.u32 %v6840_v16, %v6292_v56  ;;  %v6212_v22 = vld [vmem:[%s10264_s4 + $0x20] sm:$0xf]  ;;  %v6278_v51 = vld [vmem:[%s10264_s4 + $0xa8] sm:$0xf0] }
 0x247   :  { %3804 = vmatmul.bf16.vlgmr.msrb.gmra.mxu1 %v3397_v55  ;;  %3832 = vmatmul.bf16.vlgmr.msrb.gmra.mxu3 %v3397_v55  ;;  %v3371_v24 = vadd.f32 %v3367_v32, %v3366_v23  ;;  %v6281_v63 = vor.u32 %v6835_v62, %v6278_v51 }
 0x248   :  { %4162 = vmatpush.bf16.msrb.mxu1 %v6317_v46  ;;  %4190 = vmatpush.bf16.msrb.mxu3 %v6321_v53  ;;  %v6276_v53 = vld [vmem:[%s10264_s4 + $0xa0] sm:$0xf] }
 0x249   :  { %3372 = vadd.xlane.f32.xlu1 %v3371_v24  ;;  %v6819_v24 = vld [vmem:[%s10264_s4 + $0x24] sm:$0xf]  ;;  %v6277_v13 = vor.u32 %v6836_v61, %v6276_v53 }
 0x24a   :  { %4151 = vmatpush.bf16.msrb.mxu0 %v6229_v25  ;;  %v6217_v8 = vor.u32 %v6819_v24, %v6214_v28  ;;  %v6268_v25 = vld [vmem:[%s10264_s4 + $0x90] sm:$0xf] }
 0x24b   :  { %v6269_v43 = vor.u32 %v6834_v5, %v6268_v25 }
 0x24c   :  { %4163 = vmatpush.bf16.msrb.mxu1 %v6309_v3  ;;  %4191 = vmatpush.bf16.msrb.mxu3 %v6313_v2  ;;  %v6815_v2 = vld [vmem:[%s10264_s4 + $0x4] sm:$0xf] }
 0x24d   :  { %4181 = vmatpush.bf16.msrb.mxu2 %v6217_v8  ;;  %v6201_v54 = vor.u32 %v6815_v2, %v6198_v35 }
 0x24e   :  { %4152 = vmatpush.bf16.msrb.mxu0 %v6221_v12  ;;  %v6262_v12 = vld [vmem:[%s10264_s4 + $0x88] sm:$0xf0] }
 0x24f   :  { %v6265_v41 = vor.u32 %v6831_v44, %v6262_v12 }
 0x250   :  { %4164 = vmatpush.bf16.msrb.mxu1 %v6301_v31  ;;  %4192 = vmatpush.bf16.msrb.mxu3 %v6305_v57  ;;  %v6260_v57 = vld [vmem:[%s10264_s4 + $0x80] sm:$0xf] }
 0x251   :  { %4182 = vmatpush.bf16.msrb.mxu2 %v6209_v52  ;;  %v6261_v11 = vor.u32 %v6832_v48, %v6260_v57 }
 0x254   :  { %4165 = vmatpush.bf16.msrb.mxu1 %v6293_v59  ;;  %4193 = vmatpush.bf16.msrb.mxu3 %v6297_v20 }
 0x255   :  { %4183 = vmatpush.bf16.msrb.mxu2 %v6201_v54 }
 0x257   :  { %3860 = vmatmul.bf16.vlgmr.msra.gmra.mxu1 %v3397_v55  ;;  %3888 = vmatmul.bf16.vlgmr.msra.gmra.mxu3 %v3397_v55  ;;  %v6820_v55 = vld [vmem:[%s10264_s4 + $0x24] sm:$0xf0] }
 0x258   :  { %v6213_v32 = vor.u32 %v6820_v55, %v6212_v22  ;;  %4166 = vmatpush.bf16.msrb.mxu1 %v6285_v42  ;;  %4194 = vmatpush.bf16.msrb.mxu3 %v6289_v17 }
 0x25a   :  { %4153 = vmatpush.bf16.msrb.mxu0 %v6213_v32 }
 0x25c   :  { %4167 = vmatpush.bf16.msrb.mxu1 %v6277_v13  ;;  %4195 = vmatpush.bf16.msrb.mxu3 %v6281_v63 }
 0x260   :  { %4168 = vmatpush.bf16.msrb.mxu1 %v6269_v43 }
 0x262   :  { %v10113_v9 = vpop.f32.mrf.mxu0 }
 0x264   :  { %4169 = vmatpush.bf16.msrb.mxu1 %v6261_v11 }
 0x268   :  { %v10155_v39 = vpop.f32.mrf.mxu2 }
 0x26a   :  { %v10186_v46 = vpop.f32.mrf.mxu0 }
 0x270   :  { %v3821_v33 = vpop.f32.mrf.mxu2 }
 0x272   :  { %v3847_v14 = vpop.f32.mrf.mxu0 }
 0x278   :  { %v3875_v24 = vpop.f32.mrf.mxu2 }
 0x280   :  { %v3877_v52 = vpop.f32.mrf.mxu2 }
 0x2b4   :  { %v3370_v29 = vpop.xlane.xlu1 %3369 }
 0x2b5   :  { %v10083_v0 = vadd.f32 1e-06, %v3370_v29  ;;  %v6204_v29 = vld [vmem:[%s10264_s4 + $0x10] sm:$0xf] }
 0x2b6   :  { %v6205_v30 = vor.u32 %v6818_v15, %v6204_v29 }
 0x2b7   :  { %6849 = vrsqrt.f32 %v10083_v0  ;;  %vm3382_vm1 = vweird.f32 %v10083_v0 }
 0x2b8   :  { %4154 = vmatpush.bf16.msrb.mxu0 %v6205_v30 }
 0x2bc   :  { %v3373_v4 = vpop.xlane.xlu1 %3372  ;;  %4155 = vmatpush.bf16.msrb.mxu0 %v6197_v7 }
 0x2bd   :  { %v10136_v18 = vadd.f32 1e-06, %v3373_v4  ;;  %v10147_v23 = vpop.eup %6849  ;;  %v6273_v4 = vor.u32 %v6833_v47, %v6270_v34 }
 0x2be   :  { %v3377_v1 = vmul.f32 %v10147_v23, %v10083_v0  ;;  %vm3383_vm0 = vweird.f32 %v10147_v23 }
 0x2bf   :  { %6851 = vrsqrt.f32 %v10136_v18  ;;  %4196 = vmatpush.bf16.msrb.mxu3 %v6273_v4  ;;  %vm3384_vm2 = vmor %vm3382_vm1, %vm3383_vm0  ;;  %vm3392_vm4 = vweird.f32 %v10136_v18 }
 0x2c0   :  { %v3378_v58 = vmul.f32 %v10147_v23, %v3377_v1 }
 0x2c2   :  { %v3379_v31 = vmul.f32 0.5, %v3378_v58 }
 0x2c3   :  { %4197 = vmatpush.bf16.msrb.mxu3 %v6265_v41 }
 0x2c4   :  { %v10157_v10 = vpop.f32.mrf.mxu1  ;;  %v3380_v37 = vsub.f32 1.5, %v3379_v31 }
 0x2c5   :  { %v10207_v3 = vpop.eup %6851  ;;  %v3806_v19 = vadd.f32 %v10157_v10, %v10113_v9  ;;  %v3849_v10 = vpop.f32.mrf.mxu0 }
 0x2c6   :  { %v3387_v6 = vmul.f32 %v10207_v3, %v10136_v18  ;;  %v3381_v22 = vmul.f32 %v10147_v23, %v3380_v37  ;;  %vm3393_vm3 = vweird.f32 %v10207_v3 }
 0x2c7   :  { %vm3394_vm5 = vmor %vm3392_vm4, %vm3393_vm3 }
 0x2c8   :  { %v3388_v56 = vmul.f32 %v10207_v3, %v3387_v6  ;;  %v3385_v26 = vsel %vm3384_vm2, %v10147_v23, %v3381_v22 }
 0x2ca   :  { %v3833_v50 = vpop.f32.mrf.mxu3  ;;  %v3389_v55 = vmul.f32 0.5, %v3388_v56 }
 0x2cb   :  { %v3834_v42 = vadd.f32 %v3833_v50, %v10155_v39 }
 0x2cc   :  { %v3807_v40 = vpop.f32.mrf.mxu1  ;;  %v3390_v8 = vsub.f32 1.5, %v3389_v55 }
 0x2cd   :  { %v3808_v1 = vadd.f32 %v3807_v40, %v10186_v46 }
 0x2ce   :  { %v3391_v27 = vmul.f32 %v10207_v3, %v3390_v8 }
 0x2d0   :  { %v3395_v61 = vsel %vm3394_vm5, %v10207_v3, %v3391_v27 }
 0x2d2   :  { %v3835_v16 = vpop.f32.mrf.mxu3 }
 0x2d3   :  { %v3836_v53 = vadd.f32 %v3835_v16, %v3821_v33 }
 0x2d4   :  { %v3861_v59 = vpop.f32.mrf.mxu1 }
 0x2d5   :  { %v3862_v20 = vadd.f32 %v3861_v59, %v3847_v14 }
 0x2d7   :  { %v3894_v32 = vmax.f32 %v3806_v19, %v3862_v20 }
 0x2d9   :  { %v3898_v28 = vand.u32 2147483647, %v3894_v32 }
 0x2da   :  { %v3889_v21 = vpop.f32.mrf.mxu3 }
 0x2db   :  { %v3902_v49 = vmul.f32 %v3898_v28, %v3385_v26  ;;  %v3890_v9 = vadd.f32 %v3889_v21, %v3875_v24 }
 0x2dc   :  { %v3863_v60 = vpop.f32.mrf.mxu1 }
 0x2dd   :  { %v3906_v17 = vadd.f32 1e-06, %v3902_v49  ;;  %v3895_v29 = vmax.f32 %v3834_v42, %v3890_v9  ;;  %v3864_v15 = vadd.f32 %v3863_v60, %v3849_v10 }
 0x2df   :  { %v3910_v0 = vmul.f32 %v3906_v17, %v3894_v32  ;;  %v3899_v30 = vand.u32 2147483647, %v3895_v29  ;;  %v3896_v45 = vmax.f32 %v3808_v1, %v3864_v15 }
 0x2e1   :  { %v3903_v23 = vmul.f32 %v3899_v30, %v3385_v26  ;;  %v3900_v39 = vand.u32 2147483647, %v3896_v45  ;;  %v3914_v58 = vmul.f32 62.5, %v3910_v0 }
 0x2e2   :  { %v3891_v46 = vpop.f32.mrf.mxu3 }
 0x2e3   :  { %v3907_v62 = vadd.f32 1e-06, %v3903_v23  ;;  %v3904_v13 = vmul.f32 %v3900_v39, %v3395_v61  ;;  %v3892_v51 = vadd.f32 %v3891_v46, %v3877_v52  ;;  %v3918_v35 = vmax.f32 %v3914_v58, 0.0 }
 0x2e5   :  { %v3911_v50 = vmul.f32 %v3907_v62, %v3895_v29  ;;  %v3908_v63 = vadd.f32 1e-06, %v3904_v13  ;;  %v3897_v38 = vmax.f32 %v3836_v53, %v3892_v51  ;;  %v3922_v43 = vmul.f32 %v3918_v35, %v3918_v35 }
 0x2e7   :  { %v3912_v36 = vmul.f32 %v3908_v63, %v3896_v45  ;;  %v3901_v7 = vand.u32 2147483647, %v3897_v38  ;;  %v3915_v2 = vmul.f32 62.5, %v3911_v50 }
 0x2e9   :  { %v3916_v18 = vmul.f32 62.5, %v3912_v36  ;;  %v3905_v40 = vmul.f32 %v3901_v7, %v3395_v61  ;;  %v3919_v54 = vmax.f32 %v3915_v2, 0.0 }
 0x2eb   :  { %v3920_v25 = vmax.f32 %v3916_v18, 0.0  ;;  %v3909_v5 = vadd.f32 1e-06, %v3905_v40  ;;  %v3923_v47 = vmul.f32 %v3919_v54, %v3919_v54 }
 0x2ed   :  { %v3913_v3 = vmul.f32 %v3909_v5, %v3897_v38  ;;  %v3926_v34 = vadd.f32 %v3923_v47, %v3922_v43  ;;  %v3954_v33 = vpack.c.bf16 %v3920_v25, %v3918_v35  ;;  %v3924_v57 = vmul.f32 %v3920_v25, %v3920_v25 }
 0x2ef   :  { %v3917_v31 = vmul.f32 62.5, %v3913_v3  ;;  %3927 = vadd.xlane.f32.xlu2 %v3926_v34  ;;  %4156 = vmatmul.bf16.vlgmr.msrb.gmra.mxu0 %v3954_v33 }
 0x2f0   :  { %4184 = vmatmul.bf16.vlgmr.msrb.gmra.mxu2 %v3954_v33 }
 0x2f1   :  { %v3921_v6 = vmax.f32 %v3917_v31, 0.0 }
 0x2f3   :  { %v3955_v4 = vpack.c.bf16 %v3921_v6, %v3919_v54  ;;  %v3925_v48 = vmul.f32 %v3921_v6, %v3921_v6 }
 0x2f5   :  { %4170 = vmatmul.bf16.vlgmr.msrb.gmra.mxu1 %v3955_v4  ;;  %4198 = vmatmul.bf16.vlgmr.msrb.gmra.mxu3 %v3955_v4  ;;  %v3929_v44 = vadd.f32 %v3925_v48, %v3924_v57 }
 0x2f7   :  { %3930 = vadd.xlane.f32.xlu2 %v3929_v44 }
 0x362   :  { %v3928_v11 = vpop.xlane.xlu2 %3927 }
 0x363   :  { %v3932_v12 = vadd.f32 1e-06, %v3928_v11 }
 0x365   :  { %6853 = vrsqrt.f32 %v3932_v12  ;;  %vm3940_vm7 = vweird.f32 %v3932_v12 }
 0x36a   :  { %v3931_v14 = vpop.xlane.xlu2 %3930 }
 0x36b   :  { %v6854_v37 = vpop.eup %6853  ;;  %v3933_v56 = vadd.f32 1e-06, %v3931_v14 }
 0x36c   :  { %v3935_v16 = vmul.f32 %v6854_v37, %v3932_v12  ;;  %v4157_v55 = vpop.f32.mrf.mxu0  ;;  %vm3941_vm6 = vweird.f32 %v6854_v37 }
 0x36d   :  { %6855 = vrsqrt.f32 %v3933_v56  ;;  %vm3942_vm8 = vmor %vm3940_vm7, %vm3941_vm6  ;;  %vm3950_vm10 = vweird.f32 %v3933_v56 }
 0x36e   :  { %v3936_v41 = vmul.f32 %v6854_v37, %v3935_v16 }
 0x370   :  { %v3937_v59 = vmul.f32 0.5, %v3936_v41 }
 0x372   :  { %v4171_v22 = vpop.f32.mrf.mxu1  ;;  %v3938_v32 = vsub.f32 1.5, %v3937_v59 }
 0x373   :  { %v6856_v19 = vpop.eup %6855  ;;  %v4185_v28 = vpop.f32.mrf.mxu2  ;;  %v4172_v26 = vadd.f32 %v4171_v22, %v4157_v55 }
 0x374   :  { %v3945_v20 = vmul.f32 %v6856_v19, %v3933_v56  ;;  %v3939_v42 = vmul.f32 %v6854_v37, %v3938_v32  ;;  %v4159_v29 = vpop.f32.mrf.mxu0  ;;  %vm3951_vm9 = vweird.f32 %v6856_v19 }
 0x375   :  { %vm3952_vm11 = vmor %vm3950_vm10, %vm3951_vm9 }
 0x376   :  { %v3946_v24 = vmul.f32 %v6856_v19, %v3945_v20  ;;  %v3943_v1 = vsel %vm3942_vm8, %v6854_v37, %v3939_v42 }
 0x378   :  { %v4199_v8 = vpop.f32.mrf.mxu3  ;;  %v3947_v49 = vmul.f32 0.5, %v3946_v24 }
 0x379   :  { %v4200_v21 = vadd.f32 %v4199_v8, %v4185_v28 }
 0x37a   :  { %v3948_v60 = vsub.f32 1.5, %v3947_v49  ;;  %v4173_v17 = vpop.f32.mrf.mxu1 }
 0x37b   :  { %v4204_v9 = vmax.f32 %v4172_v26, %v4200_v21  ;;  %v4187_v27 = vpop.f32.mrf.mxu2  ;;  %v4174_v45 = vadd.f32 %v4173_v17, %v4159_v29 }
 0x37c   :  { %v3949_v39 = vmul.f32 %v6856_v19, %v3948_v60 }
 0x37d   :  { %v4206_v10 = vand.u32 2147483647, %v4204_v9 }
 0x37e   :  { %v3953_v62 = vsel %vm3952_vm11, %v6856_v19, %v3949_v39 }
 0x37f   :  { %v4208_v15 = vmul.f32 %v4206_v10, %v3943_v1 }
 0x380   :  { %v4201_v0 = vpop.f32.mrf.mxu3 }
 0x381   :  { %v4210_v30 = vadd.f32 1e-06, %v4208_v15  ;;  %v4202_v23 = vadd.f32 %v4201_v0, %v4187_v27 }
 0x383   :  { %v4212_v52 = vmul.f32 %v4210_v30, %v4204_v9  ;;  %v4205_v53 = vmax.f32 %v4174_v45, %v4202_v23 }
 0x385   :  { %v4214_v61 = vmul.f32 62.5, %v4212_v52  ;;  %v4207_v46 = vand.u32 2147483647, %v4205_v53 }
 0x387   :  { %4216 = vst [vmem:[%s10265_s5] sm:$0xff] %v4214_v61  ;;  %v4209_v13 = vmul.f32 %v4207_v46, %v3953_v62 }
 0x389   :  { %v4211_v51 = vadd.f32 1e-06, %v4209_v13 }
 0x38b   :  { %v4213_v58 = vmul.f32 %v4211_v51, %v4205_v53 }
 0x38d   :  { %v4215_v50 = vmul.f32 62.5, %v4213_v58 }
 0x38f   :  { %4217 = vst [vmem:[%s10265_s5 + $0x8] sm:$0xff] %v4215_v50 }

</bundles_post_ra>
